<compile_context>
chip_gen: v5e
topology: v5e:2x2
jax: 0.10.0
libtpu: 0.0.40
codegen_flags: <defaults>
</compile_context>

<pallas_src>
import functools

import jax
import jax.numpy as jnp
from jax.experimental import pallas as pl
from jax.experimental.pallas import tpu as pltpu


def _round_up(x, m):
    return (x + m - 1) // m * m


def _invariant_spec(block_shape, index_map):
    """BlockSpec for a grid-invariant operand; single-buffered when supported."""
    buffered = getattr(pl, "Buffered", None)
    if buffered is not None:
        try:
            return pl.BlockSpec(block_shape, index_map, pipeline_mode=buffered(1))
        except Exception:  # older jax without pipeline_mode on BlockSpec
            pass
    return pl.BlockSpec(block_shape, index_map)


# --------------------------------------------------------------------------
# Kernel: both ResidualBlocks, fused, for one batch element.
# --------------------------------------------------------------------------
def resblocks_kernel(xp_ref, w1_ref, b1_ref, w2_ref, b2_ref,
                     w3_ref, b3_ref, w4_ref, b4_ref, o_ref, pad_ref,
                     *, H, W, Hp, Wp8, Mp):
    # xp_ref : (Mp, C) f32    zero-padded input, flattened row-major over the
    #                         (Hp, Wp8) padded grid (Wp8 % 8 == 0 -> Mp % 8 == 0).
    # w*_ref : (9, C, C) bf16 tap-major conv weights, tap = dh*3 + dw.
    # b*_ref : (1, C)   f32   biases.
    # o_ref  : (Mp, C)  f32   padded/flattened output (halo discarded by wrapper).
    # pad_ref: (3, Mp + 2*Wp8, C) bf16 scratch; copy dw holds the column-shifted
    #          activation a[j + dw - 1] in rows [Wp8, Wp8 + Mp) with Wp8 zero rows
    #          above/below, so the dh = -1/0/+1 taps are the aligned row windows
    #          starting at 0 / Wp8 / 2*Wp8 (no extra rolls, no OOB reads).
    C = xp_ref.shape[-1]

    # Zero the top/bottom bands of the shift scratch: they act as the conv's
    # out-of-image zero padding for the dh = +/-1 taps.  (Done every grid step
    # so it stays correct when the batch axis is split across TensorCores.)
    zero_band = jnp.zeros((Wp8, C), jnp.bfloat16)
    for dw in range(3):
        pad_ref[dw, pl.ds(0, Wp8), :] = zero_band
        pad_ref[dw, pl.ds(Wp8 + Mp, Wp8), :] = zero_band

    # Interior-pixel mask, rebuilt in-kernel (no HBM input, no VMEM buffer).
    row_id = jax.lax.broadcasted_iota(jnp.int32, (Hp, Wp8, C), 0)
    col_id = jax.lax.broadcasted_iota(jnp.int32, (Hp, Wp8, C), 1)
    interior = (row_id >= 1) & (row_id <= H) & (col_id >= 1) & (col_id <= W)
    mask = interior.astype(jnp.float32).reshape(Mp, C)

    def conv3x3(a_f32, w_ref, b_ref):
        # 3x3 conv (stride 1, zero pad) as 9 bf16 MXU matmuls with f32 acc.
        # Only two XLU rolls (the +/-1 column shifts); the +/-1 row shifts are
        # free, sublane-aligned reads of the zero-banded scratch.
        pad_ref[0, pl.ds(Wp8, Mp), :] = pltpu.roll(a_f32, 1, 0).astype(jnp.bfloat16)
        pad_ref[1, pl.ds(Wp8, Mp), :] = a_f32.astype(jnp.bfloat16)
        pad_ref[2, pl.ds(Wp8, Mp), :] = pltpu.roll(a_f32, Mp - 1, 0).astype(jnp.bfloat16)
        acc = jnp.zeros((Mp, C), jnp.float32)
        for dh in range(3):
            for dw in range(3):
                taps = pad_ref[dw, pl.ds(dh * Wp8, Mp), :]
                acc = acc + jnp.dot(taps, w_ref[dh * 3 + dw],
                                    preferred_element_type=jnp.float32)
        return acc + b_ref[...]

    def resblock(a_f32, w_a, b_a, w_b, b_b, *, last):
        # relu(conv2(relu(conv1(a))) + a); the halo is re-zeroed whenever the
        # result still feeds another conv (it doubles as that conv's padding).
        mid = jnp.maximum(conv3x3(a_f32, w_a, b_a), 0.0) * mask
        out = jnp.maximum(conv3x3(mid, w_b, b_b) + a_f32, 0.0)
        return out if last else out * mask

    x = xp_ref[...]
    y = resblock(x, w1_ref, b1_ref, w2_ref, b2_ref, last=False)
    y = resblock(y, w3_ref, b3_ref, w4_ref, b4_ref, last=True)
    o_ref[...] = y.astype(o_ref.dtype)


# --------------------------------------------------------------------------
# Wrapper: full Residual_Blocks forward.  Input/output in PyTorch NCHW layout.
# --------------------------------------------------------------------------
def residual_blocks_pallas(x_nchw, params):
    assert len(params) == 2, "kernel fuses exactly 2 ResidualBlocks (default)"
    B, C, H, W = x_nchw.shape
    Hp = H + 2
    Wp8 = _round_up(W + 2, 8)     # padded width, multiple of 8 (sublane aligned)
    Mp = Hp * Wp8                 # flattened padded rows, multiple of 8

    (w1, b1, w2, b2), (w3, b3, w4, b4) = params

    # NCHW -> NHWC; zero-pad the conv halo ONCE for the whole fused 4-conv
    # chain (1 row top/bottom, 1 col left, enough cols right to reach Wp8),
    # then flatten the padded grid into the matmul row axis.
    x = jnp.transpose(x_nchw, (0, 2, 3, 1))
    xp = jnp.pad(x, ((0, 0), (1, 1), (1, Wp8 - W - 1), (0, 0))).reshape(B, Mp, C)

    bf16 = lambda w: w.astype(jnp.bfloat16)
    f32b = lambda b: b.reshape(1, C).astype(jnp.float32)
    args = (xp,
            bf16(w1), f32b(b1), bf16(w2), f32b(b2),
            bf16(w3), f32b(b3), bf16(w4), f32b(b4))

    kernel = functools.partial(resblocks_kernel, H=H, W=W, Hp=Hp, Wp8=Wp8, Mp=Mp)

    act_spec = pl.BlockSpec((None, Mp, C), lambda b: (b, 0, 0))
    wspec = _invariant_spec((9, C, C), lambda b: (0, 0, 0))
    bspec = _invariant_spec((1, C), lambda b: (0, 0))

    # VMEM budget derived from actual buffer sizes (weights + biases +
    # double-buffered activation in/out + bf16 shift scratch + f32 temporaries).
    est = (4 * 9 * C * C * 2 + 4 * C * 4          # weights + biases
           + 2 * 2 * Mp * C * 4                   # activation in/out, 2x buffered
           + 3 * (Mp + 2 * Wp8) * C * 2           # bf16 shift scratch
           + 6 * Mp * C * 4)                      # live f32 temporaries headroom
    vmem_limit = int(min(max(est + (8 << 20), 32 << 20), 96 << 20))

    out_p = pl.pallas_call(
        kernel,
        out_shape=jax.ShapeDtypeStruct((B, Mp, C), x_nchw.dtype),
        grid_spec=pltpu.PrefetchScalarGridSpec(
            num_scalar_prefetch=0,
            grid=(B,),
            in_specs=[act_spec,
                      wspec, bspec, wspec, bspec,     # block 1
                      wspec, bspec, wspec, bspec],    # block 2
            out_specs=act_spec,
            scratch_shapes=[pltpu.VMEM((3, Mp + 2 * Wp8, C), jnp.bfloat16)],
        ),
        compiler_params=pltpu.CompilerParams(
            dimension_semantics=("parallel",),
            vmem_limit_bytes=vmem_limit,
        ),
    )(*args)

    # Drop the halo / width padding, back to NCHW.
    out = out_p.reshape(B, Hp, Wp8, C)[:, 1:H + 1, 1:W + 1, :]
    return jnp.transpose(out, (0, 3, 1, 2))


# --------------------------------------------------------------------------
# Pure-JAX reference (same bf16-MXU / f32-epilogue numerics as the kernel).
# --------------------------------------------------------------------------
def conv3x3_ref(x_nhwc, w9, b):
    C = x_nhwc.shape[-1]
    w = w9.reshape(3, 3, C, C).astype(jnp.bfloat16)   # HWIO
    y = jax.lax.conv_general_dilated(
        x_nhwc.astype(jnp.bfloat16), w, window_strides=(1, 1), padding="SAME",
        dimension_numbers=("NHWC", "HWIO", "NHWC"),
        preferred_element_type=jnp.float32)
    return y + b.reshape(1, 1, 1, C)


def residual_blocks_ref(x_nchw, params):
    x = jnp.transpose(x_nchw, (0, 2, 3, 1))
    for (w1, b1, w2, b2) in params:
        out = jax.nn.relu(conv3x3_ref(x, w1, b1))
        out = conv3x3_ref(out, w2, b2)
        x = jax.nn.relu(out + x)
    return jnp.transpose(x, (0, 3, 1, 2))


# --------------------------------------------------------------------------
# Deterministic parameter construction (synthetic init, no checkpoint load).
# --------------------------------------------------------------------------
def make_params(key, channels, num_blocks):
    params = []
    scale = 1.0 / jnp.sqrt(channels * 9.0)
    for _ in range(num_blocks):
        key, k1, k2, k3, k4 = jax.random.split(key, 5)
        # tap-major weights: (9, C_in, C_out); tap = dh*3 + dw
        w1 = jax.random.normal(k1, (9, channels, channels), jnp.float32) * scale
        b1 = jax.random.normal(k2, (channels,), jnp.float32) * scale
        w2 = jax.random.normal(k3, (9, channels, channels), jnp.float32) * scale
        b2 = jax.random.normal(k4, (channels,), jnp.float32) * scale
        params.append((w1, b1, w2, b2))
    return params


if __name__ == "__main__":
    B, C, H, W = 2, 128, 8, 8      # small stand-in for channels=384
    NUM_BLOCKS = 2                 # Residual_Blocks default, stride=1

    key = jax.random.PRNGKey(0)
    key, kx = jax.random.split(key)
    x = jax.random.normal(kx, (B, C, H, W), jnp.float32)  # NCHW, PyTorch layout

    params = make_params(key, C, NUM_BLOCKS)

    out = jax.block_until_ready(jax.jit(residual_blocks_pallas)(x, params))
    ref = jax.block_until_ready(residual_blocks_ref(x, params))

    assert out.shape == (B, C, H, W)
    err = jnp.max(jnp.abs(out - ref))
    assert jnp.allclose(out, ref, atol=1e-2, rtol=1e-2), f"max abs err {err}"

    print("KERNEL_OK")
</pallas_src>

<mosaic_0001>
module attributes {stable_mosaic.version = 11 : i64} {
  func.func @resblocks_kernel(%arg0: i32, %arg1: memref<1x160x128xf32, #tpu.memory_space<vmem>>, %arg2: memref<9x128x128xbf16, #tpu.memory_space<vmem>>, %arg3: memref<1x128xf32, #tpu.memory_space<vmem>>, %arg4: memref<9x128x128xbf16, #tpu.memory_space<vmem>>, %arg5: memref<1x128xf32, #tpu.memory_space<vmem>>, %arg6: memref<9x128x128xbf16, #tpu.memory_space<vmem>>, %arg7: memref<1x128xf32, #tpu.memory_space<vmem>>, %arg8: memref<9x128x128xbf16, #tpu.memory_space<vmem>>, %arg9: memref<1x128xf32, #tpu.memory_space<vmem>>, %arg10: memref<1x160x128xf32, #tpu.memory_space<vmem>>, %arg11: memref<3x192x128xbf16, #tpu.memory_space<vmem>>) attributes {dimension_semantics = [#tpu.dimension_semantics<parallel>], iteration_bounds = array<i64: 2>, scalar_prefetch = 0 : i64, scratch_operands = 1 : i64, tpu.core_type = #tpu.core_type<tc>, window_params = [{transform_indices = @transform_0, window_bounds = array<i64: 1, 160, 128>}, {pipeline_mode = #tpu.pipeline_mode<synchronous>, transform_indices = @transform_1, window_bounds = array<i64: 9, 128, 128>}, {pipeline_mode = #tpu.pipeline_mode<synchronous>, transform_indices = @transform_2, window_bounds = array<i64: 1, 128>}, {pipeline_mode = #tpu.pipeline_mode<synchronous>, transform_indices = @transform_3, window_bounds = array<i64: 9, 128, 128>}, {pipeline_mode = #tpu.pipeline_mode<synchronous>, transform_indices = @transform_4, window_bounds = array<i64: 1, 128>}, {pipeline_mode = #tpu.pipeline_mode<synchronous>, transform_indices = @transform_5, window_bounds = array<i64: 9, 128, 128>}, {pipeline_mode = #tpu.pipeline_mode<synchronous>, transform_indices = @transform_6, window_bounds = array<i64: 1, 128>}, {pipeline_mode = #tpu.pipeline_mode<synchronous>, transform_indices = @transform_7, window_bounds = array<i64: 9, 128, 128>}, {pipeline_mode = #tpu.pipeline_mode<synchronous>, transform_indices = @transform_8, window_bounds = array<i64: 1, 128>}, {transform_indices = @transform_9, window_bounds = array<i64: 1, 160, 128>}]} {
    %cst = arith.constant 0.000000e+00 : bf16
    %0 = vector.broadcast %cst : bf16 to vector<16x128xbf16>
    %c0 = arith.constant 0 : index
    %c0_0 = arith.constant 0 : index
    %c0_1 = arith.constant 0 : index
    %1 = vector.load %arg11[%c0, %c0_0, %c0_1] : memref<3x192x128xbf16, #tpu.memory_space<vmem>>, vector<1x16x128xbf16>
    %2 = vector.shape_cast %1 : vector<1x16x128xbf16> to vector<16x128xbf16>
    %3 = vector.shape_cast %0 : vector<16x128xbf16> to vector<1x16x128xbf16>
    tpu.vector_store %arg11[%c0, %c0_0, %c0_1], %3 {strides = array<i32>} : memref<3x192x128xbf16, #tpu.memory_space<vmem>>, vector<1x16x128xbf16>,
    %c0_2 = arith.constant 0 : index
    %c176 = arith.constant 176 : index
    %c0_3 = arith.constant 0 : index
    %4 = vector.load %arg11[%c0_2, %c176, %c0_3] : memref<3x192x128xbf16, #tpu.memory_space<vmem>>, vector<1x16x128xbf16>
    %5 = vector.shape_cast %4 : vector<1x16x128xbf16> to vector<16x128xbf16>
    %6 = vector.shape_cast %0 : vector<16x128xbf16> to vector<1x16x128xbf16>
    tpu.vector_store %arg11[%c0_2, %c176, %c0_3], %6 {strides = array<i32>} : memref<3x192x128xbf16, #tpu.memory_space<vmem>>, vector<1x16x128xbf16>,
    %c1 = arith.constant 1 : index
    %c0_4 = arith.constant 0 : index
    %c0_5 = arith.constant 0 : index
    %7 = vector.load %arg11[%c1, %c0_4, %c0_5] : memref<3x192x128xbf16, #tpu.memory_space<vmem>>, vector<1x16x128xbf16>
    %8 = vector.shape_cast %7 : vector<1x16x128xbf16> to vector<16x128xbf16>
    %9 = vector.shape_cast %0 : vector<16x128xbf16> to vector<1x16x128xbf16>
    tpu.vector_store %arg11[%c1, %c0_4, %c0_5], %9 {strides = array<i32>} : memref<3x192x128xbf16, #tpu.memory_space<vmem>>, vector<1x16x128xbf16>,
    %c1_6 = arith.constant 1 : index
    %c176_7 = arith.constant 176 : index
    %c0_8 = arith.constant 0 : index
    %10 = vector.load %arg11[%c1_6, %c176_7, %c0_8] : memref<3x192x128xbf16, #tpu.memory_space<vmem>>, vector<1x16x128xbf16>
    %11 = vector.shape_cast %10 : vector<1x16x128xbf16> to vector<16x128xbf16>
    %12 = vector.shape_cast %0 : vector<16x128xbf16> to vector<1x16x128xbf16>
    tpu.vector_store %arg11[%c1_6, %c176_7, %c0_8], %12 {strides = array<i32>} : memref<3x192x128xbf16, #tpu.memory_space<vmem>>, vector<1x16x128xbf16>,
    %c2 = arith.constant 2 : index
    %c0_9 = arith.constant 0 : index
    %c0_10 = arith.constant 0 : index
    %13 = vector.load %arg11[%c2, %c0_9, %c0_10] : memref<3x192x128xbf16, #tpu.memory_space<vmem>>, vector<1x16x128xbf16>
    %14 = vector.shape_cast %13 : vector<1x16x128xbf16> to vector<16x128xbf16>
    %15 = vector.shape_cast %0 : vector<16x128xbf16> to vector<1x16x128xbf16>
    tpu.vector_store %arg11[%c2, %c0_9, %c0_10], %15 {strides = array<i32>} : memref<3x192x128xbf16, #tpu.memory_space<vmem>>, vector<1x16x128xbf16>,
    %c2_11 = arith.constant 2 : index
    %c176_12 = arith.constant 176 : index
    %c0_13 = arith.constant 0 : index
    %16 = vector.load %arg11[%c2_11, %c176_12, %c0_13] : memref<3x192x128xbf16, #tpu.memory_space<vmem>>, vector<1x16x128xbf16>
    %17 = vector.shape_cast %16 : vector<1x16x128xbf16> to vector<16x128xbf16>
    %18 = vector.shape_cast %0 : vector<16x128xbf16> to vector<1x16x128xbf16>
    tpu.vector_store %arg11[%c2_11, %c176_12, %c0_13], %18 {strides = array<i32>} : memref<3x192x128xbf16, #tpu.memory_space<vmem>>, vector<1x16x128xbf16>,
    %19 = tpu.iota {dimensions = array<i32: 0>} : vector<10x16x128xi32>
    %20 = tpu.iota {dimensions = array<i32: 1>} : vector<10x16x128xi32>
    %c1_i32 = arith.constant 1 : i32
    %21 = vector.broadcast %c1_i32 : i32 to vector<10x16x128xi32>
    %22 = arith.cmpi sge, %19, %21 : vector<10x16x128xi32>
    %c8_i32 = arith.constant 8 : i32
    %23 = vector.broadcast %c8_i32 : i32 to vector<10x16x128xi32>
    %24 = arith.cmpi sle, %19, %23 : vector<10x16x128xi32>
    %25 = arith.andi %22, %24 : vector<10x16x128xi1>
    %c1_i32_14 = arith.constant 1 : i32
    %26 = vector.broadcast %c1_i32_14 : i32 to vector<10x16x128xi32>
    %27 = arith.cmpi sge, %20, %26 : vector<10x16x128xi32>
    %28 = arith.andi %25, %27 : vector<10x16x128xi1>
    %c8_i32_15 = arith.constant 8 : i32
    %29 = vector.broadcast %c8_i32_15 : i32 to vector<10x16x128xi32>
    %30 = arith.cmpi sle, %20, %29 : vector<10x16x128xi32>
    %31 = arith.andi %28, %30 : vector<10x16x128xi1>
    %32 = arith.extui %31 : vector<10x16x128xi1> to vector<10x16x128xi32>
    %33 = arith.sitofp %32 : vector<10x16x128xi32> to vector<10x16x128xf32>
    %34 = vector.shape_cast %33 : vector<10x16x128xf32> to vector<160x128xf32>
    %c0_16 = arith.constant 0 : index
    %c0_17 = arith.constant 0 : index
    %c0_18 = arith.constant 0 : index
    %35 = vector.load %arg1[%c0_16, %c0_17, %c0_18] : memref<1x160x128xf32, #tpu.memory_space<vmem>>, vector<1x160x128xf32>
    %36 = vector.shape_cast %35 : vector<1x160x128xf32> to vector<160x128xf32>
    %c1_i32_19 = arith.constant 1 : i32
    %37 = tpu.dynamic_rotate %36 by %c1_i32_19 dim 0 : vector<160x128xf32>, i32 -> vector<160x128xf32>
    %38 = arith.truncf %37 : vector<160x128xf32> to vector<160x128xbf16>
    %c0_20 = arith.constant 0 : index
    %c16 = arith.constant 16 : index
    %c0_21 = arith.constant 0 : index
    %39 = vector.load %arg11[%c0_20, %c16, %c0_21] : memref<3x192x128xbf16, #tpu.memory_space<vmem>>, vector<1x160x128xbf16>
    %40 = vector.shape_cast %39 : vector<1x160x128xbf16> to vector<160x128xbf16>
    %41 = vector.shape_cast %38 : vector<160x128xbf16> to vector<1x160x128xbf16>
    tpu.vector_store %arg11[%c0_20, %c16, %c0_21], %41 {strides = array<i32>} : memref<3x192x128xbf16, #tpu.memory_space<vmem>>, vector<1x160x128xbf16>,
    %42 = arith.truncf %36 : vector<160x128xf32> to vector<160x128xbf16>
    %c1_22 = arith.constant 1 : index
    %c16_23 = arith.constant 16 : index
    %c0_24 = arith.constant 0 : index
    %43 = vector.load %arg11[%c1_22, %c16_23, %c0_24] : memref<3x192x128xbf16, #tpu.memory_space<vmem>>, vector<1x160x128xbf16>
    %44 = vector.shape_cast %43 : vector<1x160x128xbf16> to vector<160x128xbf16>
    %45 = vector.shape_cast %42 : vector<160x128xbf16> to vector<1x160x128xbf16>
    tpu.vector_store %arg11[%c1_22, %c16_23, %c0_24], %45 {strides = array<i32>} : memref<3x192x128xbf16, #tpu.memory_space<vmem>>, vector<1x160x128xbf16>,
    %c159_i32 = arith.constant 159 : i32
    %46 = tpu.dynamic_rotate %36 by %c159_i32 dim 0 : vector<160x128xf32>, i32 -> vector<160x128xf32>
    %47 = arith.truncf %46 : vector<160x128xf32> to vector<160x128xbf16>
    %c2_25 = arith.constant 2 : index
    %c16_26 = arith.constant 16 : index
    %c0_27 = arith.constant 0 : index
    %48 = vector.load %arg11[%c2_25, %c16_26, %c0_27] : memref<3x192x128xbf16, #tpu.memory_space<vmem>>, vector<1x160x128xbf16>
    %49 = vector.shape_cast %48 : vector<1x160x128xbf16> to vector<160x128xbf16>
    %50 = vector.shape_cast %47 : vector<160x128xbf16> to vector<1x160x128xbf16>
    tpu.vector_store %arg11[%c2_25, %c16_26, %c0_27], %50 {strides = array<i32>} : memref<3x192x128xbf16, #tpu.memory_space<vmem>>, vector<1x160x128xbf16>,
    %cst_28 = arith.constant 0.000000e+00 : f32
    %51 = vector.broadcast %cst_28 : f32 to vector<160x128xf32>
    %c0_29 = arith.constant 0 : index
    %c0_30 = arith.constant 0 : index
    %c0_31 = arith.constant 0 : index
    %52 = vector.load %arg11[%c0_29, %c0_30, %c0_31] : memref<3x192x128xbf16, #tpu.memory_space<vmem>>, vector<1x160x128xbf16>
    %53 = vector.shape_cast %52 : vector<1x160x128xbf16> to vector<160x128xbf16>
    %c0_32 = arith.constant 0 : index
    %c0_33 = arith.constant 0 : index
    %c0_34 = arith.constant 0 : index
    %54 = vector.load %arg2[%c0_32, %c0_33, %c0_34] : memref<9x128x128xbf16, #tpu.memory_space<vmem>>, vector<1x128x128xbf16>
    %55 = vector.shape_cast %54 : vector<1x128x128xbf16> to vector<128x128xbf16>
    %cst_35 = arith.constant dense<0.000000e+00> : vector<160x128xf32>
    %56 = tpu.matmul %53, %55, %cst_35 {dimension_numbers = #tpu.dot_dimension_numbers<[1], [0], [0], [1], [0, 0, 1, 1], [], []>} : vector<160x128xbf16>, vector<128x128xbf16>, vector<160x128xf32> -> vector<160x128xf32>
    %57 = arith.addf %51, %56 : vector<160x128xf32>
    %c1_36 = arith.constant 1 : index
    %c0_37 = arith.constant 0 : index
    %c0_38 = arith.constant 0 : index
    %58 = vector.load %arg11[%c1_36, %c0_37, %c0_38] : memref<3x192x128xbf16, #tpu.memory_space<vmem>>, vector<1x160x128xbf16>
    %59 = vector.shape_cast %58 : vector<1x160x128xbf16> to vector<160x128xbf16>
    %c1_39 = arith.constant 1 : index
    %c0_40 = arith.constant 0 : index
    %c0_41 = arith.constant 0 : index
    %60 = vector.load %arg2[%c1_39, %c0_40, %c0_41] : memref<9x128x128xbf16, #tpu.memory_space<vmem>>, vector<1x128x128xbf16>
    %61 = vector.shape_cast %60 : vector<1x128x128xbf16> to vector<128x128xbf16>
    %cst_42 = arith.constant dense<0.000000e+00> : vector<160x128xf32>
    %62 = tpu.matmul %59, %61, %cst_42 {dimension_numbers = #tpu.dot_dimension_numbers<[1], [0], [0], [1], [0, 0, 1, 1], [], []>} : vector<160x128xbf16>, vector<128x128xbf16>, vector<160x128xf32> -> vector<160x128xf32>
    %63 = arith.addf %57, %62 : vector<160x128xf32>
    %c2_43 = arith.constant 2 : index
    %c0_44 = arith.constant 0 : index
    %c0_45 = arith.constant 0 : index
    %64 = vector.load %arg11[%c2_43, %c0_44, %c0_45] : memref<3x192x128xbf16, #tpu.memory_space<vmem>>, vector<1x160x128xbf16>
    %65 = vector.shape_cast %64 : vector<1x160x128xbf16> to vector<160x128xbf16>
    %c2_46 = arith.constant 2 : index
    %c0_47 = arith.constant 0 : index
    %c0_48 = arith.constant 0 : index
    %66 = vector.load %arg2[%c2_46, %c0_47, %c0_48] : memref<9x128x128xbf16, #tpu.memory_space<vmem>>, vector<1x128x128xbf16>
    %67 = vector.shape_cast %66 : vector<1x128x128xbf16> to vector<128x128xbf16>
    %cst_49 = arith.constant dense<0.000000e+00> : vector<160x128xf32>
    %68 = tpu.matmul %65, %67, %cst_49 {dimension_numbers = #tpu.dot_dimension_numbers<[1], [0], [0], [1], [0, 0, 1, 1], [], []>} : vector<160x128xbf16>, vector<128x128xbf16>, vector<160x128xf32> -> vector<160x128xf32>
    %69 = arith.addf %63, %68 : vector<160x128xf32>
    %c0_50 = arith.constant 0 : index
    %c16_51 = arith.constant 16 : index
    %c0_52 = arith.constant 0 : index
    %70 = vector.load %arg11[%c0_50, %c16_51, %c0_52] : memref<3x192x128xbf16, #tpu.memory_space<vmem>>, vector<1x160x128xbf16>
    %71 = vector.shape_cast %70 : vector<1x160x128xbf16> to vector<160x128xbf16>
    %c3 = arith.constant 3 : index
    %c0_53 = arith.constant 0 : index
    %c0_54 = arith.constant 0 : index
    %72 = vector.load %arg2[%c3, %c0_53, %c0_54] : memref<9x128x128xbf16, #tpu.memory_space<vmem>>, vector<1x128x128xbf16>
    %73 = vector.shape_cast %72 : vector<1x128x128xbf16> to vector<128x128xbf16>
    %cst_55 = arith.constant dense<0.000000e+00> : vector<160x128xf32>
    %74 = tpu.matmul %71, %73, %cst_55 {dimension_numbers = #tpu.dot_dimension_numbers<[1], [0], [0], [1], [0, 0, 1, 1], [], []>} : vector<160x128xbf16>, vector<128x128xbf16>, vector<160x128xf32> -> vector<160x128xf32>
    %75 = arith.addf %69, %74 : vector<160x128xf32>
    %c1_56 = arith.constant 1 : index
    %c16_57 = arith.constant 16 : index
    %c0_58 = arith.constant 0 : index
    %76 = vector.load %arg11[%c1_56, %c16_57, %c0_58] : memref<3x192x128xbf16, #tpu.memory_space<vmem>>, vector<1x160x128xbf16>
    %77 = vector.shape_cast %76 : vector<1x160x128xbf16> to vector<160x128xbf16>
    %c4 = arith.constant 4 : index
    %c0_59 = arith.constant 0 : index
    %c0_60 = arith.constant 0 : index
    %78 = vector.load %arg2[%c4, %c0_59, %c0_60] : memref<9x128x128xbf16, #tpu.memory_space<vmem>>, vector<1x128x128xbf16>
    %79 = vector.shape_cast %78 : vector<1x128x128xbf16> to vector<128x128xbf16>
    %cst_61 = arith.constant dense<0.000000e+00> : vector<160x128xf32>
    %80 = tpu.matmul %77, %79, %cst_61 {dimension_numbers = #tpu.dot_dimension_numbers<[1], [0], [0], [1], [0, 0, 1, 1], [], []>} : vector<160x128xbf16>, vector<128x128xbf16>, vector<160x128xf32> -> vector<160x128xf32>
    %81 = arith.addf %75, %80 : vector<160x128xf32>
    %c2_62 = arith.constant 2 : index
    %c16_63 = arith.constant 16 : index
    %c0_64 = arith.constant 0 : index
    %82 = vector.load %arg11[%c2_62, %c16_63, %c0_64] : memref<3x192x128xbf16, #tpu.memory_space<vmem>>, vector<1x160x128xbf16>
    %83 = vector.shape_cast %82 : vector<1x160x128xbf16> to vector<160x128xbf16>
    %c5 = arith.constant 5 : index
    %c0_65 = arith.constant 0 : index
    %c0_66 = arith.constant 0 : index
    %84 = vector.load %arg2[%c5, %c0_65, %c0_66] : memref<9x128x128xbf16, #tpu.memory_space<vmem>>, vector<1x128x128xbf16>
    %85 = vector.shape_cast %84 : vector<1x128x128xbf16> to vector<128x128xbf16>
    %cst_67 = arith.constant dense<0.000000e+00> : vector<160x128xf32>
    %86 = tpu.matmul %83, %85, %cst_67 {dimension_numbers = #tpu.dot_dimension_numbers<[1], [0], [0], [1], [0, 0, 1, 1], [], []>} : vector<160x128xbf16>, vector<128x128xbf16>, vector<160x128xf32> -> vector<160x128xf32>
    %87 = arith.addf %81, %86 : vector<160x128xf32>
    %c0_68 = arith.constant 0 : index
    %c32 = arith.constant 32 : index
    %c0_69 = arith.constant 0 : index
    %88 = vector.load %arg11[%c0_68, %c32, %c0_69] : memref<3x192x128xbf16, #tpu.memory_space<vmem>>, vector<1x160x128xbf16>
    %89 = vector.shape_cast %88 : vector<1x160x128xbf16> to vector<160x128xbf16>
    %c6 = arith.constant 6 : index
    %c0_70 = arith.constant 0 : index
    %c0_71 = arith.constant 0 : index
    %90 = vector.load %arg2[%c6, %c0_70, %c0_71] : memref<9x128x128xbf16, #tpu.memory_space<vmem>>, vector<1x128x128xbf16>
    %91 = vector.shape_cast %90 : vector<1x128x128xbf16> to vector<128x128xbf16>
    %cst_72 = arith.constant dense<0.000000e+00> : vector<160x128xf32>
    %92 = tpu.matmul %89, %91, %cst_72 {dimension_numbers = #tpu.dot_dimension_numbers<[1], [0], [0], [1], [0, 0, 1, 1], [], []>} : vector<160x128xbf16>, vector<128x128xbf16>, vector<160x128xf32> -> vector<160x128xf32>
    %93 = arith.addf %87, %92 : vector<160x128xf32>
    %c1_73 = arith.constant 1 : index
    %c32_74 = arith.constant 32 : index
    %c0_75 = arith.constant 0 : index
    %94 = vector.load %arg11[%c1_73, %c32_74, %c0_75] : memref<3x192x128xbf16, #tpu.memory_space<vmem>>, vector<1x160x128xbf16>
    %95 = vector.shape_cast %94 : vector<1x160x128xbf16> to vector<160x128xbf16>
    %c7 = arith.constant 7 : index
    %c0_76 = arith.constant 0 : index
    %c0_77 = arith.constant 0 : index
    %96 = vector.load %arg2[%c7, %c0_76, %c0_77] : memref<9x128x128xbf16, #tpu.memory_space<vmem>>, vector<1x128x128xbf16>
    %97 = vector.shape_cast %96 : vector<1x128x128xbf16> to vector<128x128xbf16>
    %cst_78 = arith.constant dense<0.000000e+00> : vector<160x128xf32>
    %98 = tpu.matmul %95, %97, %cst_78 {dimension_numbers = #tpu.dot_dimension_numbers<[1], [0], [0], [1], [0, 0, 1, 1], [], []>} : vector<160x128xbf16>, vector<128x128xbf16>, vector<160x128xf32> -> vector<160x128xf32>
    %99 = arith.addf %93, %98 : vector<160x128xf32>
    %c2_79 = arith.constant 2 : index
    %c32_80 = arith.constant 32 : index
    %c0_81 = arith.constant 0 : index
    %100 = vector.load %arg11[%c2_79, %c32_80, %c0_81] : memref<3x192x128xbf16, #tpu.memory_space<vmem>>, vector<1x160x128xbf16>
    %101 = vector.shape_cast %100 : vector<1x160x128xbf16> to vector<160x128xbf16>
    %c8 = arith.constant 8 : index
    %c0_82 = arith.constant 0 : index
    %c0_83 = arith.constant 0 : index
    %102 = vector.load %arg2[%c8, %c0_82, %c0_83] : memref<9x128x128xbf16, #tpu.memory_space<vmem>>, vector<1x128x128xbf16>
    %103 = vector.shape_cast %102 : vector<1x128x128xbf16> to vector<128x128xbf16>
    %cst_84 = arith.constant dense<0.000000e+00> : vector<160x128xf32>
    %104 = tpu.matmul %101, %103, %cst_84 {dimension_numbers = #tpu.dot_dimension_numbers<[1], [0], [0], [1], [0, 0, 1, 1], [], []>} : vector<160x128xbf16>, vector<128x128xbf16>, vector<160x128xf32> -> vector<160x128xf32>
    %105 = arith.addf %99, %104 : vector<160x128xf32>
    %c0_85 = arith.constant 0 : index
    %c0_86 = arith.constant 0 : index
    %106 = vector.load %arg3[%c0_85, %c0_86] : memref<1x128xf32, #tpu.memory_space<vmem>>, vector<1x128xf32>
    %107 = vector.broadcast %106 : vector<1x128xf32> to vector<160x128xf32>
    %108 = arith.addf %105, %107 : vector<160x128xf32>
    %cst_87 = arith.constant 0.000000e+00 : f32
    %109 = vector.broadcast %cst_87 : f32 to vector<160x128xf32>
    %110 = arith.maximumf %108, %109 : vector<160x128xf32>
    %111 = arith.mulf %110, %34 : vector<160x128xf32>
    %c1_i32_88 = arith.constant 1 : i32
    %112 = tpu.dynamic_rotate %111 by %c1_i32_88 dim 0 : vector<160x128xf32>, i32 -> vector<160x128xf32>
    %113 = arith.truncf %112 : vector<160x128xf32> to vector<160x128xbf16>
    %c0_89 = arith.constant 0 : index
    %c16_90 = arith.constant 16 : index
    %c0_91 = arith.constant 0 : index
    %114 = vector.load %arg11[%c0_89, %c16_90, %c0_91] : memref<3x192x128xbf16, #tpu.memory_space<vmem>>, vector<1x160x128xbf16>
    %115 = vector.shape_cast %114 : vector<1x160x128xbf16> to vector<160x128xbf16>
    %116 = vector.shape_cast %113 : vector<160x128xbf16> to vector<1x160x128xbf16>
    tpu.vector_store %arg11[%c0_89, %c16_90, %c0_91], %116 {strides = array<i32>} : memref<3x192x128xbf16, #tpu.memory_space<vmem>>, vector<1x160x128xbf16>,
    %117 = arith.truncf %111 : vector<160x128xf32> to vector<160x128xbf16>
    %c1_92 = arith.constant 1 : index
    %c16_93 = arith.constant 16 : index
    %c0_94 = arith.constant 0 : index
    %118 = vector.load %arg11[%c1_92, %c16_93, %c0_94] : memref<3x192x128xbf16, #tpu.memory_space<vmem>>, vector<1x160x128xbf16>
    %119 = vector.shape_cast %118 : vector<1x160x128xbf16> to vector<160x128xbf16>
    %120 = vector.shape_cast %117 : vector<160x128xbf16> to vector<1x160x128xbf16>
    tpu.vector_store %arg11[%c1_92, %c16_93, %c0_94], %120 {strides = array<i32>} : memref<3x192x128xbf16, #tpu.memory_space<vmem>>, vector<1x160x128xbf16>,
    %c159_i32_95 = arith.constant 159 : i32
    %121 = tpu.dynamic_rotate %111 by %c159_i32_95 dim 0 : vector<160x128xf32>, i32 -> vector<160x128xf32>
    %122 = arith.truncf %121 : vector<160x128xf32> to vector<160x128xbf16>
    %c2_96 = arith.constant 2 : index
    %c16_97 = arith.constant 16 : index
    %c0_98 = arith.constant 0 : index
    %123 = vector.load %arg11[%c2_96, %c16_97, %c0_98] : memref<3x192x128xbf16, #tpu.memory_space<vmem>>, vector<1x160x128xbf16>
    %124 = vector.shape_cast %123 : vector<1x160x128xbf16> to vector<160x128xbf16>
    %125 = vector.shape_cast %122 : vector<160x128xbf16> to vector<1x160x128xbf16>
    tpu.vector_store %arg11[%c2_96, %c16_97, %c0_98], %125 {strides = array<i32>} : memref<3x192x128xbf16, #tpu.memory_space<vmem>>, vector<1x160x128xbf16>,
    %cst_99 = arith.constant 0.000000e+00 : f32
    %126 = vector.broadcast %cst_99 : f32 to vector<160x128xf32>
    %c0_100 = arith.constant 0 : index
    %c0_101 = arith.constant 0 : index
    %c0_102 = arith.constant 0 : index
    %127 = vector.load %arg11[%c0_100, %c0_101, %c0_102] : memref<3x192x128xbf16, #tpu.memory_space<vmem>>, vector<1x160x128xbf16>
    %128 = vector.shape_cast %127 : vector<1x160x128xbf16> to vector<160x128xbf16>
    %c0_103 = arith.constant 0 : index
    %c0_104 = arith.constant 0 : index
    %c0_105 = arith.constant 0 : index
    %129 = vector.load %arg4[%c0_103, %c0_104, %c0_105] : memref<9x128x128xbf16, #tpu.memory_space<vmem>>, vector<1x128x128xbf16>
    %130 = vector.shape_cast %129 : vector<1x128x128xbf16> to vector<128x128xbf16>
    %cst_106 = arith.constant dense<0.000000e+00> : vector<160x128xf32>
    %131 = tpu.matmul %128, %130, %cst_106 {dimension_numbers = #tpu.dot_dimension_numbers<[1], [0], [0], [1], [0, 0, 1, 1], [], []>} : vector<160x128xbf16>, vector<128x128xbf16>, vector<160x128xf32> -> vector<160x128xf32>
    %132 = arith.addf %126, %131 : vector<160x128xf32>
    %c1_107 = arith.constant 1 : index
    %c0_108 = arith.constant 0 : index
    %c0_109 = arith.constant 0 : index
    %133 = vector.load %arg11[%c1_107, %c0_108, %c0_109] : memref<3x192x128xbf16, #tpu.memory_space<vmem>>, vector<1x160x128xbf16>
    %134 = vector.shape_cast %133 : vector<1x160x128xbf16> to vector<160x128xbf16>
    %c1_110 = arith.constant 1 : index
    %c0_111 = arith.constant 0 : index
    %c0_112 = arith.constant 0 : index
    %135 = vector.load %arg4[%c1_110, %c0_111, %c0_112] : memref<9x128x128xbf16, #tpu.memory_space<vmem>>, vector<1x128x128xbf16>
    %136 = vector.shape_cast %135 : vector<1x128x128xbf16> to vector<128x128xbf16>
    %cst_113 = arith.constant dense<0.000000e+00> : vector<160x128xf32>
    %137 = tpu.matmul %134, %136, %cst_113 {dimension_numbers = #tpu.dot_dimension_numbers<[1], [0], [0], [1], [0, 0, 1, 1], [], []>} : vector<160x128xbf16>, vector<128x128xbf16>, vector<160x128xf32> -> vector<160x128xf32>
    %138 = arith.addf %132, %137 : vector<160x128xf32>
    %c2_114 = arith.constant 2 : index
    %c0_115 = arith.constant 0 : index
    %c0_116 = arith.constant 0 : index
    %139 = vector.load %arg11[%c2_114, %c0_115, %c0_116] : memref<3x192x128xbf16, #tpu.memory_space<vmem>>, vector<1x160x128xbf16>
    %140 = vector.shape_cast %139 : vector<1x160x128xbf16> to vector<160x128xbf16>
    %c2_117 = arith.constant 2 : index
    %c0_118 = arith.constant 0 : index
    %c0_119 = arith.constant 0 : index
    %141 = vector.load %arg4[%c2_117, %c0_118, %c0_119] : memref<9x128x128xbf16, #tpu.memory_space<vmem>>, vector<1x128x128xbf16>
    %142 = vector.shape_cast %141 : vector<1x128x128xbf16> to vector<128x128xbf16>
    %cst_120 = arith.constant dense<0.000000e+00> : vector<160x128xf32>
    %143 = tpu.matmul %140, %142, %cst_120 {dimension_numbers = #tpu.dot_dimension_numbers<[1], [0], [0], [1], [0, 0, 1, 1], [], []>} : vector<160x128xbf16>, vector<128x128xbf16>, vector<160x128xf32> -> vector<160x128xf32>
    %144 = arith.addf %138, %143 : vector<160x128xf32>
    %c0_121 = arith.constant 0 : index
    %c16_122 = arith.constant 16 : index
    %c0_123 = arith.constant 0 : index
    %145 = vector.load %arg11[%c0_121, %c16_122, %c0_123] : memref<3x192x128xbf16, #tpu.memory_space<vmem>>, vector<1x160x128xbf16>
    %146 = vector.shape_cast %145 : vector<1x160x128xbf16> to vector<160x128xbf16>
    %c3_124 = arith.constant 3 : index
    %c0_125 = arith.constant 0 : index
    %c0_126 = arith.constant 0 : index
    %147 = vector.load %arg4[%c3_124, %c0_125, %c0_126] : memref<9x128x128xbf16, #tpu.memory_space<vmem>>, vector<1x128x128xbf16>
    %148 = vector.shape_cast %147 : vector<1x128x128xbf16> to vector<128x128xbf16>
    %cst_127 = arith.constant dense<0.000000e+00> : vector<160x128xf32>
    %149 = tpu.matmul %146, %148, %cst_127 {dimension_numbers = #tpu.dot_dimension_numbers<[1], [0], [0], [1], [0, 0, 1, 1], [], []>} : vector<160x128xbf16>, vector<128x128xbf16>, vector<160x128xf32> -> vector<160x128xf32>
    %150 = arith.addf %144, %149 : vector<160x128xf32>
    %c1_128 = arith.constant 1 : index
    %c16_129 = arith.constant 16 : index
    %c0_130 = arith.constant 0 : index
    %151 = vector.load %arg11[%c1_128, %c16_129, %c0_130] : memref<3x192x128xbf16, #tpu.memory_space<vmem>>, vector<1x160x128xbf16>
    %152 = vector.shape_cast %151 : vector<1x160x128xbf16> to vector<160x128xbf16>
    %c4_131 = arith.constant 4 : index
    %c0_132 = arith.constant 0 : index
    %c0_133 = arith.constant 0 : index
    %153 = vector.load %arg4[%c4_131, %c0_132, %c0_133] : memref<9x128x128xbf16, #tpu.memory_space<vmem>>, vector<1x128x128xbf16>
    %154 = vector.shape_cast %153 : vector<1x128x128xbf16> to vector<128x128xbf16>
    %cst_134 = arith.constant dense<0.000000e+00> : vector<160x128xf32>
    %155 = tpu.matmul %152, %154, %cst_134 {dimension_numbers = #tpu.dot_dimension_numbers<[1], [0], [0], [1], [0, 0, 1, 1], [], []>} : vector<160x128xbf16>, vector<128x128xbf16>, vector<160x128xf32> -> vector<160x128xf32>
    %156 = arith.addf %150, %155 : vector<160x128xf32>
    %c2_135 = arith.constant 2 : index
    %c16_136 = arith.constant 16 : index
    %c0_137 = arith.constant 0 : index
    %157 = vector.load %arg11[%c2_135, %c16_136, %c0_137] : memref<3x192x128xbf16, #tpu.memory_space<vmem>>, vector<1x160x128xbf16>
    %158 = vector.shape_cast %157 : vector<1x160x128xbf16> to vector<160x128xbf16>
    %c5_138 = arith.constant 5 : index
    %c0_139 = arith.constant 0 : index
    %c0_140 = arith.constant 0 : index
    %159 = vector.load %arg4[%c5_138, %c0_139, %c0_140] : memref<9x128x128xbf16, #tpu.memory_space<vmem>>, vector<1x128x128xbf16>
    %160 = vector.shape_cast %159 : vector<1x128x128xbf16> to vector<128x128xbf16>
    %cst_141 = arith.constant dense<0.000000e+00> : vector<160x128xf32>
    %161 = tpu.matmul %158, %160, %cst_141 {dimension_numbers = #tpu.dot_dimension_numbers<[1], [0], [0], [1], [0, 0, 1, 1], [], []>} : vector<160x128xbf16>, vector<128x128xbf16>, vector<160x128xf32> -> vector<160x128xf32>
    %162 = arith.addf %156, %161 : vector<160x128xf32>
    %c0_142 = arith.constant 0 : index
    %c32_143 = arith.constant 32 : index
    %c0_144 = arith.constant 0 : index
    %163 = vector.load %arg11[%c0_142, %c32_143, %c0_144] : memref<3x192x128xbf16, #tpu.memory_space<vmem>>, vector<1x160x128xbf16>
    %164 = vector.shape_cast %163 : vector<1x160x128xbf16> to vector<160x128xbf16>
    %c6_145 = arith.constant 6 : index
    %c0_146 = arith.constant 0 : index
    %c0_147 = arith.constant 0 : index
    %165 = vector.load %arg4[%c6_145, %c0_146, %c0_147] : memref<9x128x128xbf16, #tpu.memory_space<vmem>>, vector<1x128x128xbf16>
    %166 = vector.shape_cast %165 : vector<1x128x128xbf16> to vector<128x128xbf16>
    %cst_148 = arith.constant dense<0.000000e+00> : vector<160x128xf32>
    %167 = tpu.matmul %164, %166, %cst_148 {dimension_numbers = #tpu.dot_dimension_numbers<[1], [0], [0], [1], [0, 0, 1, 1], [], []>} : vector<160x128xbf16>, vector<128x128xbf16>, vector<160x128xf32> -> vector<160x128xf32>
    %168 = arith.addf %162, %167 : vector<160x128xf32>
    %c1_149 = arith.constant 1 : index
    %c32_150 = arith.constant 32 : index
    %c0_151 = arith.constant 0 : index
    %169 = vector.load %arg11[%c1_149, %c32_150, %c0_151] : memref<3x192x128xbf16, #tpu.memory_space<vmem>>, vector<1x160x128xbf16>
    %170 = vector.shape_cast %169 : vector<1x160x128xbf16> to vector<160x128xbf16>
    %c7_152 = arith.constant 7 : index
    %c0_153 = arith.constant 0 : index
    %c0_154 = arith.constant 0 : index
    %171 = vector.load %arg4[%c7_152, %c0_153, %c0_154] : memref<9x128x128xbf16, #tpu.memory_space<vmem>>, vector<1x128x128xbf16>
    %172 = vector.shape_cast %171 : vector<1x128x128xbf16> to vector<128x128xbf16>
    %cst_155 = arith.constant dense<0.000000e+00> : vector<160x128xf32>
    %173 = tpu.matmul %170, %172, %cst_155 {dimension_numbers = #tpu.dot_dimension_numbers<[1], [0], [0], [1], [0, 0, 1, 1], [], []>} : vector<160x128xbf16>, vector<128x128xbf16>, vector<160x128xf32> -> vector<160x128xf32>
    %174 = arith.addf %168, %173 : vector<160x128xf32>
    %c2_156 = arith.constant 2 : index
    %c32_157 = arith.constant 32 : index
    %c0_158 = arith.constant 0 : index
    %175 = vector.load %arg11[%c2_156, %c32_157, %c0_158] : memref<3x192x128xbf16, #tpu.memory_space<vmem>>, vector<1x160x128xbf16>
    %176 = vector.shape_cast %175 : vector<1x160x128xbf16> to vector<160x128xbf16>
    %c8_159 = arith.constant 8 : index
    %c0_160 = arith.constant 0 : index
    %c0_161 = arith.constant 0 : index
    %177 = vector.load %arg4[%c8_159, %c0_160, %c0_161] : memref<9x128x128xbf16, #tpu.memory_space<vmem>>, vector<1x128x128xbf16>
    %178 = vector.shape_cast %177 : vector<1x128x128xbf16> to vector<128x128xbf16>
    %cst_162 = arith.constant dense<0.000000e+00> : vector<160x128xf32>
    %179 = tpu.matmul %176, %178, %cst_162 {dimension_numbers = #tpu.dot_dimension_numbers<[1], [0], [0], [1], [0, 0, 1, 1], [], []>} : vector<160x128xbf16>, vector<128x128xbf16>, vector<160x128xf32> -> vector<160x128xf32>
    %180 = arith.addf %174, %179 : vector<160x128xf32>
    %c0_163 = arith.constant 0 : index
    %c0_164 = arith.constant 0 : index
    %181 = vector.load %arg5[%c0_163, %c0_164] : memref<1x128xf32, #tpu.memory_space<vmem>>, vector<1x128xf32>
    %182 = vector.broadcast %181 : vector<1x128xf32> to vector<160x128xf32>
    %183 = arith.addf %180, %182 : vector<160x128xf32>
    %184 = arith.addf %183, %36 : vector<160x128xf32>
    %cst_165 = arith.constant 0.000000e+00 : f32
    %185 = vector.broadcast %cst_165 : f32 to vector<160x128xf32>
    %186 = arith.maximumf %184, %185 : vector<160x128xf32>
    %187 = arith.mulf %186, %34 : vector<160x128xf32>
    %c1_i32_166 = arith.constant 1 : i32
    %188 = tpu.dynamic_rotate %187 by %c1_i32_166 dim 0 : vector<160x128xf32>, i32 -> vector<160x128xf32>
    %189 = arith.truncf %188 : vector<160x128xf32> to vector<160x128xbf16>
    %c0_167 = arith.constant 0 : index
    %c16_168 = arith.constant 16 : index
    %c0_169 = arith.constant 0 : index
    %190 = vector.load %arg11[%c0_167, %c16_168, %c0_169] : memref<3x192x128xbf16, #tpu.memory_space<vmem>>, vector<1x160x128xbf16>
    %191 = vector.shape_cast %190 : vector<1x160x128xbf16> to vector<160x128xbf16>
    %192 = vector.shape_cast %189 : vector<160x128xbf16> to vector<1x160x128xbf16>
    tpu.vector_store %arg11[%c0_167, %c16_168, %c0_169], %192 {strides = array<i32>} : memref<3x192x128xbf16, #tpu.memory_space<vmem>>, vector<1x160x128xbf16>,
    %193 = arith.truncf %187 : vector<160x128xf32> to vector<160x128xbf16>
    %c1_170 = arith.constant 1 : index
    %c16_171 = arith.constant 16 : index
    %c0_172 = arith.constant 0 : index
    %194 = vector.load %arg11[%c1_170, %c16_171, %c0_172] : memref<3x192x128xbf16, #tpu.memory_space<vmem>>, vector<1x160x128xbf16>
    %195 = vector.shape_cast %194 : vector<1x160x128xbf16> to vector<160x128xbf16>
    %196 = vector.shape_cast %193 : vector<160x128xbf16> to vector<1x160x128xbf16>
    tpu.vector_store %arg11[%c1_170, %c16_171, %c0_172], %196 {strides = array<i32>} : memref<3x192x128xbf16, #tpu.memory_space<vmem>>, vector<1x160x128xbf16>,
    %c159_i32_173 = arith.constant 159 : i32
    %197 = tpu.dynamic_rotate %187 by %c159_i32_173 dim 0 : vector<160x128xf32>, i32 -> vector<160x128xf32>
    %198 = arith.truncf %197 : vector<160x128xf32> to vector<160x128xbf16>
    %c2_174 = arith.constant 2 : index
    %c16_175 = arith.constant 16 : index
    %c0_176 = arith.constant 0 : index
    %199 = vector.load %arg11[%c2_174, %c16_175, %c0_176] : memref<3x192x128xbf16, #tpu.memory_space<vmem>>, vector<1x160x128xbf16>
    %200 = vector.shape_cast %199 : vector<1x160x128xbf16> to vector<160x128xbf16>
    %201 = vector.shape_cast %198 : vector<160x128xbf16> to vector<1x160x128xbf16>
    tpu.vector_store %arg11[%c2_174, %c16_175, %c0_176], %201 {strides = array<i32>} : memref<3x192x128xbf16, #tpu.memory_space<vmem>>, vector<1x160x128xbf16>,
    %cst_177 = arith.constant 0.000000e+00 : f32
    %202 = vector.broadcast %cst_177 : f32 to vector<160x128xf32>
    %c0_178 = arith.constant 0 : index
    %c0_179 = arith.constant 0 : index
    %c0_180 = arith.constant 0 : index
    %203 = vector.load %arg11[%c0_178, %c0_179, %c0_180] : memref<3x192x128xbf16, #tpu.memory_space<vmem>>, vector<1x160x128xbf16>
    %204 = vector.shape_cast %203 : vector<1x160x128xbf16> to vector<160x128xbf16>
    %c0_181 = arith.constant 0 : index
    %c0_182 = arith.constant 0 : index
    %c0_183 = arith.constant 0 : index
    %205 = vector.load %arg6[%c0_181, %c0_182, %c0_183] : memref<9x128x128xbf16, #tpu.memory_space<vmem>>, vector<1x128x128xbf16>
    %206 = vector.shape_cast %205 : vector<1x128x128xbf16> to vector<128x128xbf16>
    %cst_184 = arith.constant dense<0.000000e+00> : vector<160x128xf32>
    %207 = tpu.matmul %204, %206, %cst_184 {dimension_numbers = #tpu.dot_dimension_numbers<[1], [0], [0], [1], [0, 0, 1, 1], [], []>} : vector<160x128xbf16>, vector<128x128xbf16>, vector<160x128xf32> -> vector<160x128xf32>
    %208 = arith.addf %202, %207 : vector<160x128xf32>
    %c1_185 = arith.constant 1 : index
    %c0_186 = arith.constant 0 : index
    %c0_187 = arith.constant 0 : index
    %209 = vector.load %arg11[%c1_185, %c0_186, %c0_187] : memref<3x192x128xbf16, #tpu.memory_space<vmem>>, vector<1x160x128xbf16>
    %210 = vector.shape_cast %209 : vector<1x160x128xbf16> to vector<160x128xbf16>
    %c1_188 = arith.constant 1 : index
    %c0_189 = arith.constant 0 : index
    %c0_190 = arith.constant 0 : index
    %211 = vector.load %arg6[%c1_188, %c0_189, %c0_190] : memref<9x128x128xbf16, #tpu.memory_space<vmem>>, vector<1x128x128xbf16>
    %212 = vector.shape_cast %211 : vector<1x128x128xbf16> to vector<128x128xbf16>
    %cst_191 = arith.constant dense<0.000000e+00> : vector<160x128xf32>
    %213 = tpu.matmul %210, %212, %cst_191 {dimension_numbers = #tpu.dot_dimension_numbers<[1], [0], [0], [1], [0, 0, 1, 1], [], []>} : vector<160x128xbf16>, vector<128x128xbf16>, vector<160x128xf32> -> vector<160x128xf32>
    %214 = arith.addf %208, %213 : vector<160x128xf32>
    %c2_192 = arith.constant 2 : index
    %c0_193 = arith.constant 0 : index
    %c0_194 = arith.constant 0 : index
    %215 = vector.load %arg11[%c2_192, %c0_193, %c0_194] : memref<3x192x128xbf16, #tpu.memory_space<vmem>>, vector<1x160x128xbf16>
    %216 = vector.shape_cast %215 : vector<1x160x128xbf16> to vector<160x128xbf16>
    %c2_195 = arith.constant 2 : index
    %c0_196 = arith.constant 0 : index
    %c0_197 = arith.constant 0 : index
    %217 = vector.load %arg6[%c2_195, %c0_196, %c0_197] : memref<9x128x128xbf16, #tpu.memory_space<vmem>>, vector<1x128x128xbf16>
    %218 = vector.shape_cast %217 : vector<1x128x128xbf16> to vector<128x128xbf16>
    %cst_198 = arith.constant dense<0.000000e+00> : vector<160x128xf32>
    %219 = tpu.matmul %216, %218, %cst_198 {dimension_numbers = #tpu.dot_dimension_numbers<[1], [0], [0], [1], [0, 0, 1, 1], [], []>} : vector<160x128xbf16>, vector<128x128xbf16>, vector<160x128xf32> -> vector<160x128xf32>
    %220 = arith.addf %214, %219 : vector<160x128xf32>
    %c0_199 = arith.constant 0 : index
    %c16_200 = arith.constant 16 : index
    %c0_201 = arith.constant 0 : index
    %221 = vector.load %arg11[%c0_199, %c16_200, %c0_201] : memref<3x192x128xbf16, #tpu.memory_space<vmem>>, vector<1x160x128xbf16>
    %222 = vector.shape_cast %221 : vector<1x160x128xbf16> to vector<160x128xbf16>
    %c3_202 = arith.constant 3 : index
    %c0_203 = arith.constant 0 : index
    %c0_204 = arith.constant 0 : index
    %223 = vector.load %arg6[%c3_202, %c0_203, %c0_204] : memref<9x128x128xbf16, #tpu.memory_space<vmem>>, vector<1x128x128xbf16>
    %224 = vector.shape_cast %223 : vector<1x128x128xbf16> to vector<128x128xbf16>
    %cst_205 = arith.constant dense<0.000000e+00> : vector<160x128xf32>
    %225 = tpu.matmul %222, %224, %cst_205 {dimension_numbers = #tpu.dot_dimension_numbers<[1], [0], [0], [1], [0, 0, 1, 1], [], []>} : vector<160x128xbf16>, vector<128x128xbf16>, vector<160x128xf32> -> vector<160x128xf32>
    %226 = arith.addf %220, %225 : vector<160x128xf32>
    %c1_206 = arith.constant 1 : index
    %c16_207 = arith.constant 16 : index
    %c0_208 = arith.constant 0 : index
    %227 = vector.load %arg11[%c1_206, %c16_207, %c0_208] : memref<3x192x128xbf16, #tpu.memory_space<vmem>>, vector<1x160x128xbf16>
    %228 = vector.shape_cast %227 : vector<1x160x128xbf16> to vector<160x128xbf16>
    %c4_209 = arith.constant 4 : index
    %c0_210 = arith.constant 0 : index
    %c0_211 = arith.constant 0 : index
    %229 = vector.load %arg6[%c4_209, %c0_210, %c0_211] : memref<9x128x128xbf16, #tpu.memory_space<vmem>>, vector<1x128x128xbf16>
    %230 = vector.shape_cast %229 : vector<1x128x128xbf16> to vector<128x128xbf16>
    %cst_212 = arith.constant dense<0.000000e+00> : vector<160x128xf32>
    %231 = tpu.matmul %228, %230, %cst_212 {dimension_numbers = #tpu.dot_dimension_numbers<[1], [0], [0], [1], [0, 0, 1, 1], [], []>} : vector<160x128xbf16>, vector<128x128xbf16>, vector<160x128xf32> -> vector<160x128xf32>
    %232 = arith.addf %226, %231 : vector<160x128xf32>
    %c2_213 = arith.constant 2 : index
    %c16_214 = arith.constant 16 : index
    %c0_215 = arith.constant 0 : index
    %233 = vector.load %arg11[%c2_213, %c16_214, %c0_215] : memref<3x192x128xbf16, #tpu.memory_space<vmem>>, vector<1x160x128xbf16>
    %234 = vector.shape_cast %233 : vector<1x160x128xbf16> to vector<160x128xbf16>
    %c5_216 = arith.constant 5 : index
    %c0_217 = arith.constant 0 : index
    %c0_218 = arith.constant 0 : index
    %235 = vector.load %arg6[%c5_216, %c0_217, %c0_218] : memref<9x128x128xbf16, #tpu.memory_space<vmem>>, vector<1x128x128xbf16>
    %236 = vector.shape_cast %235 : vector<1x128x128xbf16> to vector<128x128xbf16>
    %cst_219 = arith.constant dense<0.000000e+00> : vector<160x128xf32>
    %237 = tpu.matmul %234, %236, %cst_219 {dimension_numbers = #tpu.dot_dimension_numbers<[1], [0], [0], [1], [0, 0, 1, 1], [], []>} : vector<160x128xbf16>, vector<128x128xbf16>, vector<160x128xf32> -> vector<160x128xf32>
    %238 = arith.addf %232, %237 : vector<160x128xf32>
    %c0_220 = arith.constant 0 : index
    %c32_221 = arith.constant 32 : index
    %c0_222 = arith.constant 0 : index
    %239 = vector.load %arg11[%c0_220, %c32_221, %c0_222] : memref<3x192x128xbf16, #tpu.memory_space<vmem>>, vector<1x160x128xbf16>
    %240 = vector.shape_cast %239 : vector<1x160x128xbf16> to vector<160x128xbf16>
    %c6_223 = arith.constant 6 : index
    %c0_224 = arith.constant 0 : index
    %c0_225 = arith.constant 0 : index
    %241 = vector.load %arg6[%c6_223, %c0_224, %c0_225] : memref<9x128x128xbf16, #tpu.memory_space<vmem>>, vector<1x128x128xbf16>
    %242 = vector.shape_cast %241 : vector<1x128x128xbf16> to vector<128x128xbf16>
    %cst_226 = arith.constant dense<0.000000e+00> : vector<160x128xf32>
    %243 = tpu.matmul %240, %242, %cst_226 {dimension_numbers = #tpu.dot_dimension_numbers<[1], [0], [0], [1], [0, 0, 1, 1], [], []>} : vector<160x128xbf16>, vector<128x128xbf16>, vector<160x128xf32> -> vector<160x128xf32>
    %244 = arith.addf %238, %243 : vector<160x128xf32>
    %c1_227 = arith.constant 1 : index
    %c32_228 = arith.constant 32 : index
    %c0_229 = arith.constant 0 : index
    %245 = vector.load %arg11[%c1_227, %c32_228, %c0_229] : memref<3x192x128xbf16, #tpu.memory_space<vmem>>, vector<1x160x128xbf16>
    %246 = vector.shape_cast %245 : vector<1x160x128xbf16> to vector<160x128xbf16>
    %c7_230 = arith.constant 7 : index
    %c0_231 = arith.constant 0 : index
    %c0_232 = arith.constant 0 : index
    %247 = vector.load %arg6[%c7_230, %c0_231, %c0_232] : memref<9x128x128xbf16, #tpu.memory_space<vmem>>, vector<1x128x128xbf16>
    %248 = vector.shape_cast %247 : vector<1x128x128xbf16> to vector<128x128xbf16>
    %cst_233 = arith.constant dense<0.000000e+00> : vector<160x128xf32>
    %249 = tpu.matmul %246, %248, %cst_233 {dimension_numbers = #tpu.dot_dimension_numbers<[1], [0], [0], [1], [0, 0, 1, 1], [], []>} : vector<160x128xbf16>, vector<128x128xbf16>, vector<160x128xf32> -> vector<160x128xf32>
    %250 = arith.addf %244, %249 : vector<160x128xf32>
    %c2_234 = arith.constant 2 : index
    %c32_235 = arith.constant 32 : index
    %c0_236 = arith.constant 0 : index
    %251 = vector.load %arg11[%c2_234, %c32_235, %c0_236] : memref<3x192x128xbf16, #tpu.memory_space<vmem>>, vector<1x160x128xbf16>
    %252 = vector.shape_cast %251 : vector<1x160x128xbf16> to vector<160x128xbf16>
    %c8_237 = arith.constant 8 : index
    %c0_238 = arith.constant 0 : index
    %c0_239 = arith.constant 0 : index
    %253 = vector.load %arg6[%c8_237, %c0_238, %c0_239] : memref<9x128x128xbf16, #tpu.memory_space<vmem>>, vector<1x128x128xbf16>
    %254 = vector.shape_cast %253 : vector<1x128x128xbf16> to vector<128x128xbf16>
    %cst_240 = arith.constant dense<0.000000e+00> : vector<160x128xf32>
    %255 = tpu.matmul %252, %254, %cst_240 {dimension_numbers = #tpu.dot_dimension_numbers<[1], [0], [0], [1], [0, 0, 1, 1], [], []>} : vector<160x128xbf16>, vector<128x128xbf16>, vector<160x128xf32> -> vector<160x128xf32>
    %256 = arith.addf %250, %255 : vector<160x128xf32>
    %c0_241 = arith.constant 0 : index
    %c0_242 = arith.constant 0 : index
    %257 = vector.load %arg7[%c0_241, %c0_242] : memref<1x128xf32, #tpu.memory_space<vmem>>, vector<1x128xf32>
    %258 = vector.broadcast %257 : vector<1x128xf32> to vector<160x128xf32>
    %259 = arith.addf %256, %258 : vector<160x128xf32>
    %cst_243 = arith.constant 0.000000e+00 : f32
    %260 = vector.broadcast %cst_243 : f32 to vector<160x128xf32>
    %261 = arith.maximumf %259, %260 : vector<160x128xf32>
    %262 = arith.mulf %261, %34 : vector<160x128xf32>
    %c1_i32_244 = arith.constant 1 : i32
    %263 = tpu.dynamic_rotate %262 by %c1_i32_244 dim 0 : vector<160x128xf32>, i32 -> vector<160x128xf32>
    %264 = arith.truncf %263 : vector<160x128xf32> to vector<160x128xbf16>
    %c0_245 = arith.constant 0 : index
    %c16_246 = arith.constant 16 : index
    %c0_247 = arith.constant 0 : index
    %265 = vector.load %arg11[%c0_245, %c16_246, %c0_247] : memref<3x192x128xbf16, #tpu.memory_space<vmem>>, vector<1x160x128xbf16>
    %266 = vector.shape_cast %265 : vector<1x160x128xbf16> to vector<160x128xbf16>
    %267 = vector.shape_cast %264 : vector<160x128xbf16> to vector<1x160x128xbf16>
    tpu.vector_store %arg11[%c0_245, %c16_246, %c0_247], %267 {strides = array<i32>} : memref<3x192x128xbf16, #tpu.memory_space<vmem>>, vector<1x160x128xbf16>,
    %268 = arith.truncf %262 : vector<160x128xf32> to vector<160x128xbf16>
    %c1_248 = arith.constant 1 : index
    %c16_249 = arith.constant 16 : index
    %c0_250 = arith.constant 0 : index
    %269 = vector.load %arg11[%c1_248, %c16_249, %c0_250] : memref<3x192x128xbf16, #tpu.memory_space<vmem>>, vector<1x160x128xbf16>
    %270 = vector.shape_cast %269 : vector<1x160x128xbf16> to vector<160x128xbf16>
    %271 = vector.shape_cast %268 : vector<160x128xbf16> to vector<1x160x128xbf16>
    tpu.vector_store %arg11[%c1_248, %c16_249, %c0_250], %271 {strides = array<i32>} : memref<3x192x128xbf16, #tpu.memory_space<vmem>>, vector<1x160x128xbf16>,
    %c159_i32_251 = arith.constant 159 : i32
    %272 = tpu.dynamic_rotate %262 by %c159_i32_251 dim 0 : vector<160x128xf32>, i32 -> vector<160x128xf32>
    %273 = arith.truncf %272 : vector<160x128xf32> to vector<160x128xbf16>
    %c2_252 = arith.constant 2 : index
    %c16_253 = arith.constant 16 : index
    %c0_254 = arith.constant 0 : index
    %274 = vector.load %arg11[%c2_252, %c16_253, %c0_254] : memref<3x192x128xbf16, #tpu.memory_space<vmem>>, vector<1x160x128xbf16>
    %275 = vector.shape_cast %274 : vector<1x160x128xbf16> to vector<160x128xbf16>
    %276 = vector.shape_cast %273 : vector<160x128xbf16> to vector<1x160x128xbf16>
    tpu.vector_store %arg11[%c2_252, %c16_253, %c0_254], %276 {strides = array<i32>} : memref<3x192x128xbf16, #tpu.memory_space<vmem>>, vector<1x160x128xbf16>,
    %cst_255 = arith.constant 0.000000e+00 : f32
    %277 = vector.broadcast %cst_255 : f32 to vector<160x128xf32>
    %c0_256 = arith.constant 0 : index
    %c0_257 = arith.constant 0 : index
    %c0_258 = arith.constant 0 : index
    %278 = vector.load %arg11[%c0_256, %c0_257, %c0_258] : memref<3x192x128xbf16, #tpu.memory_space<vmem>>, vector<1x160x128xbf16>
    %279 = vector.shape_cast %278 : vector<1x160x128xbf16> to vector<160x128xbf16>
    %c0_259 = arith.constant 0 : index
    %c0_260 = arith.constant 0 : index
    %c0_261 = arith.constant 0 : index
    %280 = vector.load %arg8[%c0_259, %c0_260, %c0_261] : memref<9x128x128xbf16, #tpu.memory_space<vmem>>, vector<1x128x128xbf16>
    %281 = vector.shape_cast %280 : vector<1x128x128xbf16> to vector<128x128xbf16>
    %cst_262 = arith.constant dense<0.000000e+00> : vector<160x128xf32>
    %282 = tpu.matmul %279, %281, %cst_262 {dimension_numbers = #tpu.dot_dimension_numbers<[1], [0], [0], [1], [0, 0, 1, 1], [], []>} : vector<160x128xbf16>, vector<128x128xbf16>, vector<160x128xf32> -> vector<160x128xf32>
    %283 = arith.addf %277, %282 : vector<160x128xf32>
    %c1_263 = arith.constant 1 : index
    %c0_264 = arith.constant 0 : index
    %c0_265 = arith.constant 0 : index
    %284 = vector.load %arg11[%c1_263, %c0_264, %c0_265] : memref<3x192x128xbf16, #tpu.memory_space<vmem>>, vector<1x160x128xbf16>
    %285 = vector.shape_cast %284 : vector<1x160x128xbf16> to vector<160x128xbf16>
    %c1_266 = arith.constant 1 : index
    %c0_267 = arith.constant 0 : index
    %c0_268 = arith.constant 0 : index
    %286 = vector.load %arg8[%c1_266, %c0_267, %c0_268] : memref<9x128x128xbf16, #tpu.memory_space<vmem>>, vector<1x128x128xbf16>
    %287 = vector.shape_cast %286 : vector<1x128x128xbf16> to vector<128x128xbf16>
    %cst_269 = arith.constant dense<0.000000e+00> : vector<160x128xf32>
    %288 = tpu.matmul %285, %287, %cst_269 {dimension_numbers = #tpu.dot_dimension_numbers<[1], [0], [0], [1], [0, 0, 1, 1], [], []>} : vector<160x128xbf16>, vector<128x128xbf16>, vector<160x128xf32> -> vector<160x128xf32>
    %289 = arith.addf %283, %288 : vector<160x128xf32>
    %c2_270 = arith.constant 2 : index
    %c0_271 = arith.constant 0 : index
    %c0_272 = arith.constant 0 : index
    %290 = vector.load %arg11[%c2_270, %c0_271, %c0_272] : memref<3x192x128xbf16, #tpu.memory_space<vmem>>, vector<1x160x128xbf16>
    %291 = vector.shape_cast %290 : vector<1x160x128xbf16> to vector<160x128xbf16>
    %c2_273 = arith.constant 2 : index
    %c0_274 = arith.constant 0 : index
    %c0_275 = arith.constant 0 : index
    %292 = vector.load %arg8[%c2_273, %c0_274, %c0_275] : memref<9x128x128xbf16, #tpu.memory_space<vmem>>, vector<1x128x128xbf16>
    %293 = vector.shape_cast %292 : vector<1x128x128xbf16> to vector<128x128xbf16>
    %cst_276 = arith.constant dense<0.000000e+00> : vector<160x128xf32>
    %294 = tpu.matmul %291, %293, %cst_276 {dimension_numbers = #tpu.dot_dimension_numbers<[1], [0], [0], [1], [0, 0, 1, 1], [], []>} : vector<160x128xbf16>, vector<128x128xbf16>, vector<160x128xf32> -> vector<160x128xf32>
    %295 = arith.addf %289, %294 : vector<160x128xf32>
    %c0_277 = arith.constant 0 : index
    %c16_278 = arith.constant 16 : index
    %c0_279 = arith.constant 0 : index
    %296 = vector.load %arg11[%c0_277, %c16_278, %c0_279] : memref<3x192x128xbf16, #tpu.memory_space<vmem>>, vector<1x160x128xbf16>
    %297 = vector.shape_cast %296 : vector<1x160x128xbf16> to vector<160x128xbf16>
    %c3_280 = arith.constant 3 : index
    %c0_281 = arith.constant 0 : index
    %c0_282 = arith.constant 0 : index
    %298 = vector.load %arg8[%c3_280, %c0_281, %c0_282] : memref<9x128x128xbf16, #tpu.memory_space<vmem>>, vector<1x128x128xbf16>
    %299 = vector.shape_cast %298 : vector<1x128x128xbf16> to vector<128x128xbf16>
    %cst_283 = arith.constant dense<0.000000e+00> : vector<160x128xf32>
    %300 = tpu.matmul %297, %299, %cst_283 {dimension_numbers = #tpu.dot_dimension_numbers<[1], [0], [0], [1], [0, 0, 1, 1], [], []>} : vector<160x128xbf16>, vector<128x128xbf16>, vector<160x128xf32> -> vector<160x128xf32>
    %301 = arith.addf %295, %300 : vector<160x128xf32>
    %c1_284 = arith.constant 1 : index
    %c16_285 = arith.constant 16 : index
    %c0_286 = arith.constant 0 : index
    %302 = vector.load %arg11[%c1_284, %c16_285, %c0_286] : memref<3x192x128xbf16, #tpu.memory_space<vmem>>, vector<1x160x128xbf16>
    %303 = vector.shape_cast %302 : vector<1x160x128xbf16> to vector<160x128xbf16>
    %c4_287 = arith.constant 4 : index
    %c0_288 = arith.constant 0 : index
    %c0_289 = arith.constant 0 : index
    %304 = vector.load %arg8[%c4_287, %c0_288, %c0_289] : memref<9x128x128xbf16, #tpu.memory_space<vmem>>, vector<1x128x128xbf16>
    %305 = vector.shape_cast %304 : vector<1x128x128xbf16> to vector<128x128xbf16>
    %cst_290 = arith.constant dense<0.000000e+00> : vector<160x128xf32>
    %306 = tpu.matmul %303, %305, %cst_290 {dimension_numbers = #tpu.dot_dimension_numbers<[1], [0], [0], [1], [0, 0, 1, 1], [], []>} : vector<160x128xbf16>, vector<128x128xbf16>, vector<160x128xf32> -> vector<160x128xf32>
    %307 = arith.addf %301, %306 : vector<160x128xf32>
    %c2_291 = arith.constant 2 : index
    %c16_292 = arith.constant 16 : index
    %c0_293 = arith.constant 0 : index
    %308 = vector.load %arg11[%c2_291, %c16_292, %c0_293] : memref<3x192x128xbf16, #tpu.memory_space<vmem>>, vector<1x160x128xbf16>
    %309 = vector.shape_cast %308 : vector<1x160x128xbf16> to vector<160x128xbf16>
    %c5_294 = arith.constant 5 : index
    %c0_295 = arith.constant 0 : index
    %c0_296 = arith.constant 0 : index
    %310 = vector.load %arg8[%c5_294, %c0_295, %c0_296] : memref<9x128x128xbf16, #tpu.memory_space<vmem>>, vector<1x128x128xbf16>
    %311 = vector.shape_cast %310 : vector<1x128x128xbf16> to vector<128x128xbf16>
    %cst_297 = arith.constant dense<0.000000e+00> : vector<160x128xf32>
    %312 = tpu.matmul %309, %311, %cst_297 {dimension_numbers = #tpu.dot_dimension_numbers<[1], [0], [0], [1], [0, 0, 1, 1], [], []>} : vector<160x128xbf16>, vector<128x128xbf16>, vector<160x128xf32> -> vector<160x128xf32>
    %313 = arith.addf %307, %312 : vector<160x128xf32>
    %c0_298 = arith.constant 0 : index
    %c32_299 = arith.constant 32 : index
    %c0_300 = arith.constant 0 : index
    %314 = vector.load %arg11[%c0_298, %c32_299, %c0_300] : memref<3x192x128xbf16, #tpu.memory_space<vmem>>, vector<1x160x128xbf16>
    %315 = vector.shape_cast %314 : vector<1x160x128xbf16> to vector<160x128xbf16>
    %c6_301 = arith.constant 6 : index
    %c0_302 = arith.constant 0 : index
    %c0_303 = arith.constant 0 : index
    %316 = vector.load %arg8[%c6_301, %c0_302, %c0_303] : memref<9x128x128xbf16, #tpu.memory_space<vmem>>, vector<1x128x128xbf16>
    %317 = vector.shape_cast %316 : vector<1x128x128xbf16> to vector<128x128xbf16>
    %cst_304 = arith.constant dense<0.000000e+00> : vector<160x128xf32>
    %318 = tpu.matmul %315, %317, %cst_304 {dimension_numbers = #tpu.dot_dimension_numbers<[1], [0], [0], [1], [0, 0, 1, 1], [], []>} : vector<160x128xbf16>, vector<128x128xbf16>, vector<160x128xf32> -> vector<160x128xf32>
    %319 = arith.addf %313, %318 : vector<160x128xf32>
    %c1_305 = arith.constant 1 : index
    %c32_306 = arith.constant 32 : index
    %c0_307 = arith.constant 0 : index
    %320 = vector.load %arg11[%c1_305, %c32_306, %c0_307] : memref<3x192x128xbf16, #tpu.memory_space<vmem>>, vector<1x160x128xbf16>
    %321 = vector.shape_cast %320 : vector<1x160x128xbf16> to vector<160x128xbf16>
    %c7_308 = arith.constant 7 : index
    %c0_309 = arith.constant 0 : index
    %c0_310 = arith.constant 0 : index
    %322 = vector.load %arg8[%c7_308, %c0_309, %c0_310] : memref<9x128x128xbf16, #tpu.memory_space<vmem>>, vector<1x128x128xbf16>
    %323 = vector.shape_cast %322 : vector<1x128x128xbf16> to vector<128x128xbf16>
    %cst_311 = arith.constant dense<0.000000e+00> : vector<160x128xf32>
    %324 = tpu.matmul %321, %323, %cst_311 {dimension_numbers = #tpu.dot_dimension_numbers<[1], [0], [0], [1], [0, 0, 1, 1], [], []>} : vector<160x128xbf16>, vector<128x128xbf16>, vector<160x128xf32> -> vector<160x128xf32>
    %325 = arith.addf %319, %324 : vector<160x128xf32>
    %c2_312 = arith.constant 2 : index
    %c32_313 = arith.constant 32 : index
    %c0_314 = arith.constant 0 : index
    %326 = vector.load %arg11[%c2_312, %c32_313, %c0_314] : memref<3x192x128xbf16, #tpu.memory_space<vmem>>, vector<1x160x128xbf16>
    %327 = vector.shape_cast %326 : vector<1x160x128xbf16> to vector<160x128xbf16>
    %c8_315 = arith.constant 8 : index
    %c0_316 = arith.constant 0 : index
    %c0_317 = arith.constant 0 : index
    %328 = vector.load %arg8[%c8_315, %c0_316, %c0_317] : memref<9x128x128xbf16, #tpu.memory_space<vmem>>, vector<1x128x128xbf16>
    %329 = vector.shape_cast %328 : vector<1x128x128xbf16> to vector<128x128xbf16>
    %cst_318 = arith.constant dense<0.000000e+00> : vector<160x128xf32>
    %330 = tpu.matmul %327, %329, %cst_318 {dimension_numbers = #tpu.dot_dimension_numbers<[1], [0], [0], [1], [0, 0, 1, 1], [], []>} : vector<160x128xbf16>, vector<128x128xbf16>, vector<160x128xf32> -> vector<160x128xf32>
    %331 = arith.addf %325, %330 : vector<160x128xf32>
    %c0_319 = arith.constant 0 : index
    %c0_320 = arith.constant 0 : index
    %332 = vector.load %arg9[%c0_319, %c0_320] : memref<1x128xf32, #tpu.memory_space<vmem>>, vector<1x128xf32>
    %333 = vector.broadcast %332 : vector<1x128xf32> to vector<160x128xf32>
    %334 = arith.addf %331, %333 : vector<160x128xf32>
    %335 = arith.addf %334, %187 : vector<160x128xf32>
    %cst_321 = arith.constant 0.000000e+00 : f32
    %336 = vector.broadcast %cst_321 : f32 to vector<160x128xf32>
    %337 = arith.maximumf %335, %336 : vector<160x128xf32>
    %c0_322 = arith.constant 0 : index
    %c0_323 = arith.constant 0 : index
    %c0_324 = arith.constant 0 : index
    %338 = vector.load %arg10[%c0_322, %c0_323, %c0_324] : memref<1x160x128xf32, #tpu.memory_space<vmem>>, vector<1x160x128xf32>
    %339 = vector.shape_cast %338 : vector<1x160x128xf32> to vector<160x128xf32>
    %340 = vector.shape_cast %337 : vector<160x128xf32> to vector<1x160x128xf32>
    tpu.vector_store %arg10[%c0_322, %c0_323, %c0_324], %340 {strides = array<i32>} : memref<1x160x128xf32, #tpu.memory_space<vmem>>, vector<1x160x128xf32>,
    return
  }
  func.func @transform_0(%arg0: i32) -> (i32, i32, i32) {
    %c0_i32 = arith.constant 0 : i32
    %c0_i32_0 = arith.constant 0 : i32
    %c0_i32_1 = arith.constant 0 : i32
    return %arg0, %c0_i32, %c0_i32_0 : i32, i32, i32
  }
  func.func @transform_1(%arg0: i32) -> (i32, i32, i32) {
    %c0_i32 = arith.constant 0 : i32
    %c0_i32_0 = arith.constant 0 : i32
    %c0_i32_1 = arith.constant 0 : i32
    %c0_i32_2 = arith.constant 0 : i32
    return %c0_i32, %c0_i32_0, %c0_i32_1 : i32, i32, i32
  }
  func.func @transform_2(%arg0: i32) -> (i32, i32) {
    %c0_i32 = arith.constant 0 : i32
    %c0_i32_0 = arith.constant 0 : i32
    %c0_i32_1 = arith.constant 0 : i32
    return %c0_i32, %c0_i32_0 : i32, i32
  }
  func.func @transform_3(%arg0: i32) -> (i32, i32, i32) {
    %c0_i32 = arith.constant 0 : i32
    %c0_i32_0 = arith.constant 0 : i32
    %c0_i32_1 = arith.constant 0 : i32
    %c0_i32_2 = arith.constant 0 : i32
    return %c0_i32, %c0_i32_0, %c0_i32_1 : i32, i32, i32
  }
  func.func @transform_4(%arg0: i32) -> (i32, i32) {
    %c0_i32 = arith.constant 0 : i32
    %c0_i32_0 = arith.constant 0 : i32
    %c0_i32_1 = arith.constant 0 : i32
    return %c0_i32, %c0_i32_0 : i32, i32
  }
  func.func @transform_5(%arg0: i32) -> (i32, i32, i32) {
    %c0_i32 = arith.constant 0 : i32
    %c0_i32_0 = arith.constant 0 : i32
    %c0_i32_1 = arith.constant 0 : i32
    %c0_i32_2 = arith.constant 0 : i32
    return %c0_i32, %c0_i32_0, %c0_i32_1 : i32, i32, i32
  }
  func.func @transform_6(%arg0: i32) -> (i32, i32) {
    %c0_i32 = arith.constant 0 : i32
    %c0_i32_0 = arith.constant 0 : i32
    %c0_i32_1 = arith.constant 0 : i32
    return %c0_i32, %c0_i32_0 : i32, i32
  }
  func.func @transform_7(%arg0: i32) -> (i32, i32, i32) {
    %c0_i32 = arith.constant 0 : i32
    %c0_i32_0 = arith.constant 0 : i32
    %c0_i32_1 = arith.constant 0 : i32
    %c0_i32_2 = arith.constant 0 : i32
    return %c0_i32, %c0_i32_0, %c0_i32_1 : i32, i32, i32
  }
  func.func @transform_8(%arg0: i32) -> (i32, i32) {
    %c0_i32 = arith.constant 0 : i32
    %c0_i32_0 = arith.constant 0 : i32
    %c0_i32_1 = arith.constant 0 : i32
    return %c0_i32, %c0_i32_0 : i32, i32
  }
  func.func @transform_9(%arg0: i32) -> (i32, i32, i32) {
    %c0_i32 = arith.constant 0 : i32
    %c0_i32_0 = arith.constant 0 : i32
    %c0_i32_1 = arith.constant 0 : i32
    return %arg0, %c0_i32, %c0_i32_0 : i32, i32, i32
  }
}

</mosaic_0001>

<bundles_post_ra>
// kernel: residual_blocks_pallas.1
= control target key start
LH: loop header
LB: loop body
LE: loop exit
PB: predicated region body
PF: predicated region fallthrough
CT: control target
= control target key end

     0   :  { %s14023_s30 = smov 0   ;;  %s16582_s0 = inlined_call_operand.vmem [shape: f32[2,160,128], index: 0, kind: input, shape index: {}]   ;;  %s16583_s1 = inlined_call_operand.vmem [shape: bf16[9,128,128], index: 1, kind: input, shape index: {}]   ;;  %s16584_s2 = inlined_call_operand.vmem [shape: f32[1,128], index: 2, kind: input, shape index: {}]   ;;  %s16585_s3 = inlined_call_operand.vmem [shape: bf16[9,128,128], index: 3, kind: input, shape index: {}]   ;;  %s16586_s4 = inlined_call_operand.vmem [shape: f32[1,128], index: 4, kind: input, shape index: {}]   ;;  %s16587_s5 = inlined_call_operand.vmem [shape: bf16[9,128,128], index: 5, kind: input, shape index: {}]   ;;  %s16588_s6 = inlined_call_operand.vmem [shape: f32[1,128], index: 6, kind: input, shape index: {}]   ;;  %s16589_s7 = inlined_call_operand.vmem [shape: bf16[9,128,128], index: 7, kind: input, shape index: {}]   ;;  %s16590_s8 = inlined_call_operand.vmem [shape: f32[1,128], index: 8, kind: input, shape index: {}]   ;;  %s16591_s9 = inlined_call_operand.vmem [shape: f32[2,160,128], index: 9, kind: output, shape index: {}]  }
   0x1 LB: > { %s9444_s10 = sadd.s32 4294967295, %s13969_s30   ;;  %p9448_p0 = scmp.ge.s32.totalorder %s13969_s30, 1  ;;  %s13969_s30 = sphi %s14023_s30, %s19_s30  }
   0x2   : > { %p287_p1 = scmp.lt.s32.totalorder %s13969_s30, 3 }
   0x4   : > { %p288_p2 = pnand %p9448_p0, %p287_p1 }
   0x6   : > { %291 = sbr.rel (%p288_p2) target bundleno = 2047 (0x7ff), region = 56 }
   0xb   : > { %v12594_v0 = vld [vmem:[%s16583_s1 + $0x78] sm:$0xff]  ;;  %p323_p3 = scmp.lt.s32.totalorder %s9444_s10, 1  ;;  %v13971_v4 = vmov 0   ;;  %v12593_v5 = vld [vmem:[%s16583_s1 + $0x70] sm:$0xff]  ;;  %v348_v9 = vlaneseq  ;;  %v12592_v10 = vld [vmem:[%s16583_s1 + $0x68] sm:$0xff] }
   0xc   : > { %v12576_v1 = vld [vmem:[%s16583_s1 + $0x38] sm:$0xff]  ;;  %339 = vst [vmem:[#allocation2 + $0x60] sm:$0xf] %v13971_v4  ;;  %774 = vmatpush.bf16.msra.mxu0 %v12594_v0  ;;  %v12575_v6 = vld [vmem:[%s16583_s1 + $0x30] sm:$0xff]  ;;  %v12574_v11 = vld [vmem:[%s16583_s1 + $0x28] sm:$0xff] }
   0xd   : > { %v12612_v2 = vld [vmem:[%s16583_s1 + $0xb8] sm:$0xff]  ;;  %941 = vmatpush.bf16.msra.mxu1 %v12576_v1  ;;  %340 = vst [vmem:[#allocation2 + $0x64] sm:$0xf] %v13971_v4  ;;  %s16646_s10 = smov (!%p323_p3, %s9444_s10), 1  ;;  %v12611_v7 = vld [vmem:[%s16583_s1 + $0xb0] sm:$0xff]  ;;  %v12610_v12 = vld [vmem:[%s16583_s1 + $0xa8] sm:$0xff] }
   0xe   : > { %v12630_v3 = vld [vmem:[%s16583_s1 + $0xf8] sm:$0xff]  ;;  %1145 = vmatpush.bf16.msra.mxu2 %v12612_v2  ;;  %v12629_v8 = vld [vmem:[%s16583_s1 + $0xf0] sm:$0xff]  ;;  %334 = vst [vmem:[#allocation2] sm:$0xf] %v13971_v4  ;;  %s13927_s27 = smul.u32 160, %s16646_s10  ;;  %v12628_v13 = vld [vmem:[%s16583_s1 + $0xe8] sm:$0xff] }
   0xf   : > { %1369 = vmatpush.bf16.msra.mxu3 %v12630_v3  ;;  %335 = vst [vmem:[#allocation2 + $0x4] sm:$0xf] %v13971_v4  ;;  %v14070_v14 = vshrl.u32 %v348_v9, 7  ;;  %v12591_v15 = vld [vmem:[%s16583_s1 + $0x60] sm:$0xff]  ;;  %v12590_v20 = vld [vmem:[%s16583_s1 + $0x58] sm:$0xff]  ;;  %v12589_v45 = vld [vmem:[%s16583_s1 + $0x50] sm:$0xff] }
  0x10   : > { %336 = vst [vmem:[#allocation2 + $0x58] sm:$0xf] %v13971_v4  ;;  %775 = vmatpush.bf16.msra.mxu0 %v12593_v5  ;;  %s14077_s19 = scalar_lea.vmem %s16582_s0, %s13927_s27  ;;  %v12573_v16 = vld [vmem:[%s16583_s1 + $0x20] sm:$0xff]  ;;  %v12572_v21 = vld [vmem:[%s16583_s1 + $0x18] sm:$0xff]  ;;  %v12571_v46 = vld [vmem:[%s16583_s1 + $0x10] sm:$0xff]  ;;  %s16501_s28 = scalar_lea.vmem %s16591_s9, %s13927_s27 }
  0x11   : > { %942 = vmatpush.bf16.msra.mxu1 %v12575_v6  ;;  %337 = vst [vmem:[#allocation2 + $0x5c] sm:$0xf] %v13971_v4  ;;  %v12609_v17 = vld [vmem:[%s16583_s1 + $0xa0] sm:$0xff]  ;;  %vm411_vm0 = vcmp.lt.s32.totalorder %v14070_v14, 1  ;;  %vm532_vm1 = vcmp.lt.s32.totalorder %v14070_v14, 7  ;;  %v372_v22 = vld [vmem:[%s14077_s19 + $0x8] sm:$0xff] }
  0x12   : > { %1146 = vmatpush.bf16.msra.mxu2 %v12611_v7  ;;  %341 = vst [vmem:[#allocation2 + $0xb8] sm:$0xf] %v13971_v4  ;;  %v12627_v18 = vld [vmem:[%s16583_s1 + $0xe0] sm:$0xff]  ;;  %v14104_v23 = vld [vmem:[%s14077_s19 + $0x98] sm:$0xff]  ;;  %v373_v25 = vld [vmem:[%s14077_s19 + $0x10] sm:$0xff]  ;;  %v392_v27 = vrot.slane %v372_v22, 7 }
  0x13   : > { %1370 = vmatpush.bf16.msra.mxu3 %v12629_v8  ;;  %342 = vst [vmem:[#allocation2 + $0xbc] sm:$0xf] %v13971_v4  ;;  %v14092_v19 = vld [vmem:[%s14077_s19] sm:$0xff]  ;;  %v12608_v26 = vld [vmem:[%s16583_s1 + $0x98] sm:$0xff]  ;;  %v410_v28 = vrot.slane %v14104_v23, 7  ;;  %v513_v32 = vrot.slane %v372_v22, 1 }
  0x14   : > { %344 = vst [vmem:[#allocation2 + $0xc0] sm:$0xf] %v13971_v4  ;;  %776 = vmatpush.bf16.msra.mxu0 %v12592_v10  ;;  %v391_v24 = vrot.slane %v14092_v19, 7  ;;  %v13260_v29 = vpack.c.bf16 %v372_v22, %v14092_v19  ;;  %v512_v30 = vrot.slane %v14092_v19, 1  ;;  %v374_v31 = vld [vmem:[%s14077_s19 + $0x18] sm:$0xff]  ;;  %v514_v33 = vrot.slane %v373_v25, 1 }
  0x15   : > { %943 = vmatpush.bf16.msra.mxu1 %v12574_v11  ;;  %345 = vst [vmem:[#allocation2 + $0xc4] sm:$0xf] %v13971_v4  ;;  %v393_v34 = vrot.slane %v373_v25, 7  ;;  %v394_v35 = vrot.slane %v374_v31, 7  ;;  %v12626_v36 = vld [vmem:[%s16583_s1 + $0xd8] sm:$0xff]  ;;  %v13265_v48 = vpack.c.bf16 %v374_v31, %v373_v25  ;;  %v12607_v49 = vld [vmem:[%s16583_s1 + $0x90] sm:$0xff] }
  0x16   : > { %1147 = vmatpush.bf16.msra.mxu2 %v12610_v12  ;;  %346 = vst [vmem:[#allocation2 + $0x118] sm:$0xf] %v13971_v4  ;;  %v430_v37 = vsel %vm411_vm0, %v391_v24, %v392_v27  ;;  %v431_v38 = vsel %vm411_vm0, %v410_v28, %v391_v24  ;;  %v550_v40 = vsel %vm532_vm1, %v513_v32, %v514_v33  ;;  %v12625_v50 = vld [vmem:[%s16583_s1 + $0xd0] sm:$0xff]  ;;  %v375_v51 = vld [vmem:[%s14077_s19 + $0x20] sm:$0xff]  ;;  %v515_v52 = vrot.slane %v374_v31, 1  ;;  %v376_v54 = vld [vmem:[%s14077_s19 + $0x28] sm:$0xff] }
  0x17   : > { %1371 = vmatpush.bf16.msra.mxu3 %v12628_v13  ;;  %347 = vst [vmem:[#allocation2 + $0x11c] sm:$0xf] %v13971_v4  ;;  %v13210_v39 = vpack.c.bf16 %v430_v37, %v431_v38  ;;  %v551_v41 = vsel %vm532_vm1, %v512_v30, %v513_v32  ;;  %v428_v42 = vsel %vm411_vm0, %v393_v34, %v394_v35  ;;  %v516_v53 = vrot.slane %v375_v51, 1  ;;  %v12588_v55 = vld [vmem:[%s16583_s1 + $0x48] sm:$0xff]  ;;  %v12587_v3 = vld [vmem:[%s16583_s1 + $0x40] sm:$0xff]  ;;  %v12648_v7 = vld [vmem:[%s16583_s1 + $0x138] sm:$0xff] }
  0x18   : > { %777 = vmatpush.bf16.msra.mxu0 %v12591_v15  ;;  %13817 = vst [vmem:[#allocation2 + $0x68] sm:$0xff] %v13260_v29   ;;  %v13310_v43 = vpack.c.bf16 %v550_v40, %v551_v41  ;;  %v429_v44 = vsel %vm411_vm0, %v392_v27, %v393_v34  ;;  %v12570_v56 = vld [vmem:[%s16583_s1 + $0x8] sm:$0xff]  ;;  %v549_v58 = vsel %vm532_vm1, %v514_v33, %v515_v52  ;;  %v395_v59 = vrot.slane %v375_v51, 7  ;;  %v12569_v4 = vld [vmem:[%s16583_s1] sm:$0xff]  ;;  %v12647_v12 = vld [vmem:[%s16583_s1 + $0x130] sm:$0xff] }
  0x19   : > { %944 = vmatpush.bf16.msra.mxu1 %v12573_v16  ;;  %13807 = vst [vmem:[#allocation2 + $0x8] sm:$0xff] %v13210_v39   ;;  %v13215_v47 = vpack.c.bf16 %v428_v42, %v429_v44  ;;  %v548_v57 = vsel %vm532_vm1, %v515_v52, %v516_v53  ;;  %v396_v60 = vrot.slane %v376_v54, 7  ;;  %v12606_v61 = vld [vmem:[%s16583_s1 + $0x88] sm:$0xff]  ;;  %v12605_v5 = vld [vmem:[%s16583_s1 + $0x80] sm:$0xff]  ;;  %v13270_v13 = vpack.c.bf16 %v376_v54, %v375_v51  ;;  %v377_v15 = vld [vmem:[%s14077_s19 + $0x30] sm:$0xff] }
  0x1a   : > { %1148 = vmatpush.bf16.msra.mxu2 %v12609_v17  ;;  %13827 = vst [vmem:[#allocation2 + $0xc8] sm:$0xff] %v13310_v43   ;;  %v12624_v62 = vld [vmem:[%s16583_s1 + $0xc8] sm:$0xff]  ;;  %v13315_v63 = vpack.c.bf16 %v548_v57, %v549_v58  ;;  %v427_v1 = vsel %vm411_vm0, %v394_v35, %v395_v59  ;;  %v12623_v6 = vld [vmem:[%s16583_s1 + $0xc0] sm:$0xff]  ;;  %v517_v17 = vrot.slane %v376_v54, 1  ;;  %v397_v24 = vrot.slane %v377_v15, 7  ;;  %v382_v58 = vld [vmem:[%s14077_s19 + $0x58] sm:$0xff] }
  0x1b   : > { %1372 = vmatpush.bf16.msra.mxu3 %v12627_v18  ;;  %13808 = vst [vmem:[#allocation2 + $0x10] sm:$0xff] %v13215_v47   ;;  %v426_v0 = vsel %vm411_vm0, %v395_v59, %v396_v60  ;;  %v12577_v8 = vld [vmem:[#allocation2 + $0x60] sm:$0xff]  ;;  %v12646_v16 = vld [vmem:[%s16583_s1 + $0x128] sm:$0xff]  ;;  %v518_v18 = vrot.slane %v377_v15, 1  ;;  %vm351_vm2 = vcmp.ge.s32.totalorder %v14070_v14, 1 }
  0x1c   : > { %778 = vmatpush.bf16.msra.mxu0 %v12590_v20  ;;  %13818 = vst [vmem:[#allocation2 + $0x70] sm:$0xff] %v13265_v48   ;;  %v13220_v2 = vpack.c.bf16 %v426_v0, %v427_v1  ;;  %v12559_v9 = vld [vmem:[#allocation2] sm:$0xff]  ;;  %v378_v20 = vld [vmem:[%s14077_s19 + $0x38] sm:$0xff]  ;;  %v547_v22 = vsel %vm532_vm1, %v516_v53, %v517_v17  ;;  %v425_v29 = vsel %vm411_vm0, %v396_v60, %v397_v24  ;;  %v380_v41 = vld [vmem:[%s14077_s19 + $0x48] sm:$0xff] }
  0x1d   : > { %945 = vmatpush.bf16.msra.mxu1 %v12572_v21  ;;  %13828 = vst [vmem:[#allocation2 + $0xd0] sm:$0xff] %v13315_v63   ;;  %v12595_v10 = vld [vmem:[#allocation2 + $0xc0] sm:$0xff]  ;;  %v546_v21 = vsel %vm532_vm1, %v517_v17, %v518_v18  ;;  %v398_v25 = vrot.slane %v378_v20, 7  ;;  %v13275_v37 = vpack.c.bf16 %v378_v20, %v377_v15  ;;  %v519_v39 = vrot.slane %v378_v20, 1 }
  0x1e   : > { %1149 = vmatpush.bf16.msra.mxu2 %v12608_v26  ;;  %13809 = vst [vmem:[#allocation2 + $0x18] sm:$0xff] %v13220_v2   ;;  %v13320_v26 = vpack.c.bf16 %v546_v21, %v547_v22  ;;  %v379_v38 = vld [vmem:[%s14077_s19 + $0x40] sm:$0xff] }
  0x1f   : > { %1373 = vmatpush.bf16.msra.mxu3 %v12626_v36  ;;  %13819 = vst [vmem:[#allocation2 + $0x78] sm:$0xff] %v13270_v13   ;;  %v424_v27 = vsel %vm411_vm0, %v397_v24, %v398_v25  ;;  %v12578_v32 = vld [vmem:[#allocation2 + $0x68] sm:$0xff]  ;;  %v12645_v36 = vld [vmem:[%s16583_s1 + $0x120] sm:$0xff]  ;;  %v520_v40 = vrot.slane %v379_v38, 1  ;;  %v545_v43 = vsel %vm532_vm1, %v518_v18, %v519_v39  ;;  %v399_v44 = vrot.slane %v379_v38, 7 }
  0x20   : > { %779 = vmatpush.bf16.msra.mxu0 %v12589_v45  ;;  %v12613_v11 = vld [vmem:[#allocation2 + $0x8] sm:$0xff]  ;;  %13829 = vst [vmem:[#allocation2 + $0xd8] sm:$0xff] %v13320_v26   ;;  %v13225_v31 = vpack.c.bf16 %v424_v27, %v425_v29  ;;  %v400_v45 = vrot.slane %v380_v41, 7  ;;  %v13280_v54 = vpack.c.bf16 %v380_v41, %v379_v38  ;;  %v12643_v29 = vld [vmem:[%s16583_s1 + $0x110] sm:$0xff] }
  0x21   : > { %946 = vmatpush.bf16.msra.mxu1 %v12571_v46  ;;  %v12560_v33 = vld [vmem:[#allocation2 + $0x8] sm:$0xff]  ;;  %13820 = vst [vmem:[#allocation2 + $0x80] sm:$0xff] %v13275_v37   ;;  %v544_v42 = vsel %vm532_vm1, %v519_v39, %v520_v40  ;;  %v423_v48 = vsel %vm411_vm0, %v398_v25, %v399_v44 }
  0x22   : > { %1150 = vmatpush.bf16.msra.mxu2 %v12607_v49  ;;  %13810 = vst [vmem:[#allocation2 + $0x20] sm:$0xff] %v13225_v31   ;;  %v12596_v34 = vld [vmem:[#allocation2 + $0xc8] sm:$0xff]  ;;  %v12614_v35 = vld [vmem:[#allocation2 + $0x10] sm:$0xff]  ;;  %v13325_v46 = vpack.c.bf16 %v544_v42, %v545_v43  ;;  %v422_v47 = vsel %vm411_vm0, %v399_v44, %v400_v45 }
  0x23   : > { %1374 = vmatpush.bf16.msra.mxu3 %v12625_v50  ;;  %v13230_v49 = vpack.c.bf16 %v422_v47, %v423_v48  ;;  %v12579_v50 = vld [vmem:[#allocation2 + $0x70] sm:$0xff]  ;;  %13821 = vst [vmem:[#allocation2 + $0x88] sm:$0xff] %v13280_v54   ;;  %v12642_v48 = vld [vmem:[%s16583_s1 + $0x108] sm:$0xff] }
  0x24   : > { %780 = vmatpush.bf16.msra.mxu0 %v12588_v55  ;;  %13830 = vst [vmem:[#allocation2 + $0xe0] sm:$0xff] %v13325_v46   ;;  %v12561_v51 = vld [vmem:[#allocation2 + $0x10] sm:$0xff] }
  0x25   : > { %947 = vmatpush.bf16.msra.mxu1 %v12570_v56  ;;  %13811 = vst [vmem:[#allocation2 + $0x28] sm:$0xff] %v13230_v49   ;;  %v12597_v52 = vld [vmem:[#allocation2 + $0xd0] sm:$0xff]  ;;  %v12615_v53 = vld [vmem:[#allocation2 + $0x18] sm:$0xff]  ;;  %v521_v56 = vrot.slane %v380_v41, 1  ;;  %v387_v49 = vld [vmem:[%s14077_s19 + $0x80] sm:$0xff] }
  0x26   : > { %1151 = vmatpush.bf16.msra.mxu2 %v12606_v61  ;;  %v381_v55 = vld [vmem:[%s14077_s19 + $0x50] sm:$0xff] }
  0x27   : > { %1375 = vmatpush.bf16.msra.mxu3 %v12624_v62  ;;  %v522_v57 = vrot.slane %v381_v55, 1  ;;  %v543_v60 = vsel %vm532_vm1, %v520_v40, %v521_v56  ;;  %v401_v61 = vrot.slane %v381_v55, 7  ;;  %v402_v62 = vrot.slane %v382_v58, 7 }
  0x28   : > { %781 = vmatpush.bf16.msra.mxu0 %v12587_v3  ;;  %v12580_v3 = vld [vmem:[#allocation2 + $0x78] sm:$0xff]  ;;  %v12581_v24 = vld [vmem:[#allocation2 + $0x80] sm:$0xff] }
  0x29   : > { %948 = vmatpush.bf16.msra.mxu1 %v12569_v4  ;;  %v542_v59 = vsel %vm532_vm1, %v521_v56, %v522_v57  ;;  %v420_v0 = vsel %vm411_vm0, %v401_v61, %v402_v62  ;;  %v421_v1 = vsel %vm411_vm0, %v400_v45, %v401_v61  ;;  %v12562_v4 = vld [vmem:[#allocation2 + $0x18] sm:$0xff]  ;;  %v12563_v25 = vld [vmem:[#allocation2 + $0x20] sm:$0xff] }
  0x2a   : > { %1152 = vmatpush.bf16.msra.mxu2 %v12605_v5  ;;  %v13330_v63 = vpack.c.bf16 %v542_v59, %v543_v60  ;;  %v13235_v2 = vpack.c.bf16 %v420_v0, %v421_v1  ;;  %v12598_v5 = vld [vmem:[#allocation2 + $0xd8] sm:$0xff]  ;;  %v12582_v44 = vld [vmem:[#allocation2 + $0x88] sm:$0xff] }
  0x2b   : > { %1376 = vmatpush.bf16.msra.mxu3 %v12623_v6  ;;  %782 = vmatmul.bf16.vlgmr.msra.gmra.mxu0 %v12577_v8  ;;  %v12616_v6 = vld [vmem:[#allocation2 + $0x20] sm:$0xff]  ;;  %v13285_v8 = vpack.c.bf16 %v382_v58, %v381_v55  ;;  %v407_v55 = vrot.slane %v387_v49, 7 }
  0x2c   : > { %1593 = vmatpush.bf16.msrb.mxu0 %v12648_v7  ;;  %949 = vmatmul.bf16.vlgmr.msra.gmra.mxu1 %v12559_v9  ;;  %13831 = vst [vmem:[#allocation2 + $0xe8] sm:$0xff] %v13330_v63   ;;  %v12644_v7 = vld [vmem:[%s16583_s1 + $0x118] sm:$0xff]  ;;  %v383_v9 = vld [vmem:[%s14077_s19 + $0x60] sm:$0xff]  ;;  %v12617_v27 = vld [vmem:[#allocation2 + $0x28] sm:$0xff] }
  0x2d   : > { %1153 = vmatmul.bf16.vlgmr.msra.gmra.mxu2 %v12595_v10  ;;  %13812 = vst [vmem:[#allocation2 + $0x30] sm:$0xff] %v13235_v2   ;;  %v523_v10 = vrot.slane %v382_v58, 1  ;;  %v12599_v26 = vld [vmem:[#allocation2 + $0xe0] sm:$0xff]  ;;  %v12564_v45 = vld [vmem:[#allocation2 + $0x28] sm:$0xff]  ;;  %v12684_v2 = vld [vmem:[%s16583_s1 + $0x1b8] sm:$0xff] }
  0x2e   : > { %1377 = vmatmul.bf16.vlgmr.msra.gmra.mxu3 %v12613_v11  ;;  %13822 = vst [vmem:[#allocation2 + $0x90] sm:$0xff] %v13285_v8   ;;  %v524_v11 = vrot.slane %v383_v9, 1  ;;  %2041 = vmatpush.bf16.msrb.mxu2 %v12684_v2  ;;  %v12683_v8 = vld [vmem:[%s16583_s1 + $0x1b0] sm:$0xff] }
  0x2f   : > { %v541_v15 = vsel %vm532_vm1, %v522_v57, %v523_v10 }
  0x30   : > { %1594 = vmatpush.bf16.msrb.mxu0 %v12647_v12  ;;  %v384_v12 = vld [vmem:[%s14077_s19 + $0x68] sm:$0xff]  ;;  %v540_v13 = vsel %vm532_vm1, %v523_v10, %v524_v11 }
  0x31   : > { %v404_v17 = vrot.slane %v384_v12, 7  ;;  %v13335_v18 = vpack.c.bf16 %v540_v13, %v541_v15  ;;  %v13290_v31 = vpack.c.bf16 %v384_v12, %v383_v9  ;;  %v12701_v13 = vld [vmem:[%s16583_s1 + $0x1f0] sm:$0xff] }
  0x32   : > { %2042 = vmatpush.bf16.msrb.mxu2 %v12683_v8 }
  0x33   : > { %13832 = vst [vmem:[#allocation2 + $0xf0] sm:$0xff] %v13335_v18   ;;  %v12600_v46 = vld [vmem:[#allocation2 + $0xe8] sm:$0xff] }
  0x34   : > { %1595 = vmatpush.bf16.msrb.mxu0 %v12646_v16  ;;  %v403_v16 = vrot.slane %v383_v9, 7  ;;  %13823 = vst [vmem:[#allocation2 + $0x98] sm:$0xff] %v13290_v31   ;;  %v12618_v47 = vld [vmem:[#allocation2 + $0x30] sm:$0xff]  ;;  %v12641_v31 = vld [vmem:[%s16583_s1 + $0x100] sm:$0xff] }
  0x35   : > { %v12565_v63 = vld [vmem:[#allocation2 + $0x30] sm:$0xff] }
  0x36   : > { %v418_v20 = vsel %vm411_vm0, %v403_v16, %v404_v17  ;;  %v419_v21 = vsel %vm411_vm0, %v402_v62, %v403_v16  ;;  %v12583_v62 = vld [vmem:[#allocation2 + $0x90] sm:$0xff] }
  0x37   : > { %v13240_v22 = vpack.c.bf16 %v418_v20, %v419_v21 }
  0x38   : > { %1596 = vmatpush.bf16.msrb.mxu0 %v12645_v36 }
  0x39   : > { %13813 = vst [vmem:[#allocation2 + $0x38] sm:$0xff] %v13240_v22   ;;  %v12664_v22 = vld [vmem:[%s16583_s1 + $0x168] sm:$0xff] }
  0x3a   : > { %v12601_v0 = vld [vmem:[#allocation2 + $0xf0] sm:$0xff] }
  0x3b   : > { %787 = vmatmul.bf16.gmra.mxu0 %v12578_v32  ;;  %v385_v32 = vld [vmem:[%s14077_s19 + $0x70] sm:$0xff] }
  0x3c   : > { %954 = vmatmul.bf16.gmra.mxu1 %v12560_v33  ;;  %1597 = vmatpush.bf16.msrb.mxu0 %v12644_v7  ;;  %v525_v33 = vrot.slane %v384_v12, 1  ;;  %v405_v38 = vrot.slane %v385_v32, 7  ;;  %v12665_v12 = vld [vmem:[%s16583_s1 + $0x170] sm:$0xff] }
  0x3d   : > { %1158 = vmatmul.bf16.gmra.mxu2 %v12596_v34  ;;  %v526_v34 = vrot.slane %v385_v32, 1 }
  0x3e   : > { %1382 = vmatmul.bf16.gmra.mxu3 %v12614_v35  ;;  %v386_v35 = vld [vmem:[%s14077_s19 + $0x78] sm:$0xff]  ;;  %v539_v37 = vsel %vm532_vm1, %v524_v11, %v525_v33  ;;  %v417_v42 = vsel %vm411_vm0, %v404_v17, %v405_v38  ;;  %v12682_v17 = vld [vmem:[%s16583_s1 + $0x1a8] sm:$0xff] }
  0x3f   : > { %v538_v36 = vsel %vm532_vm1, %v525_v33, %v526_v34  ;;  %v406_v39 = vrot.slane %v386_v35, 7  ;;  %v13295_v57 = vpack.c.bf16 %v386_v35, %v385_v32  ;;  %2043 = vmatpush.bf16.msrb.mxu2 %v12682_v17  ;;  %v12663_v32 = vld [vmem:[%s16583_s1 + $0x160] sm:$0xff] }
  0x40   : > { %1598 = vmatpush.bf16.msrb.mxu0 %v12643_v29  ;;  %v13340_v40 = vpack.c.bf16 %v538_v36, %v539_v37  ;;  %v12619_v1 = vld [vmem:[#allocation2 + $0x38] sm:$0xff]  ;;  %v12699_v33 = vld [vmem:[%s16583_s1 + $0x1e0] sm:$0xff]  ;;  %v12679_v37 = vld [vmem:[%s16583_s1 + $0x190] sm:$0xff] }
  0x41   : > { %v416_v41 = vsel %vm411_vm0, %v405_v38, %v406_v39  ;;  %v415_v60 = vsel %vm411_vm0, %v406_v39, %v407_v55  ;;  %13824 = vst [vmem:[#allocation2 + $0xa0] sm:$0xff] %v13295_v57   ;;  %v12698_v36 = vld [vmem:[%s16583_s1 + $0x1d8] sm:$0xff]  ;;  %v12661_v38 = vld [vmem:[%s16583_s1 + $0x150] sm:$0xff] }
  0x42   : > { %13833 = vst [vmem:[#allocation2 + $0xf8] sm:$0xff] %v13340_v40   ;;  %v13245_v43 = vpack.c.bf16 %v416_v41, %v417_v42  ;;  %v12697_v39 = vld [vmem:[%s16583_s1 + $0x1d0] sm:$0xff]  ;;  %v12678_v40 = vld [vmem:[%s16583_s1 + $0x188] sm:$0xff] }
  0x43   : > { %v12660_v41 = vld [vmem:[%s16583_s1 + $0x148] sm:$0xff] }
  0x44   : > { %13814 = vst [vmem:[#allocation2 + $0x40] sm:$0xff] %v13245_v43   ;;  %1599 = vmatpush.bf16.msrb.mxu0 %v12642_v48  ;;  %v12696_v42 = vld [vmem:[%s16583_s1 + $0x1c8] sm:$0xff] }
  0x48   : > { %1600 = vmatpush.bf16.msrb.mxu0 %v12641_v31  ;;  %v12585_v43 = vld [vmem:[#allocation2 + $0xa0] sm:$0xff] }
  0x4b   : > { %792 = vmatmul.bf16.gmra.mxu0 %v12579_v50  ;;  %v527_v50 = vrot.slane %v386_v35, 1  ;;  %v12620_v29 = vld [vmem:[#allocation2 + $0x40] sm:$0xff]  ;;  %v12662_v35 = vld [vmem:[%s16583_s1 + $0x158] sm:$0xff] }
  0x4c   : > { %959 = vmatmul.bf16.gmra.mxu1 %v12561_v51  ;;  %v528_v51 = vrot.slane %v387_v49, 1 }
  0x4d   : > { %1163 = vmatmul.bf16.gmra.mxu2 %v12597_v52  ;;  %v388_v52 = vld [vmem:[%s14077_s19 + $0x88] sm:$0xff]  ;;  %v537_v54 = vsel %vm532_vm1, %v526_v34, %v527_v50  ;;  %v12680_v34 = vld [vmem:[%s16583_s1 + $0x198] sm:$0xff] }
  0x4e   : > { %1387 = vmatmul.bf16.gmra.mxu3 %v12615_v53  ;;  %v536_v53 = vsel %vm532_vm1, %v527_v50, %v528_v51  ;;  %v408_v56 = vrot.slane %v388_v52, 7  ;;  %v13300_v15 = vpack.c.bf16 %v388_v52, %v387_v49 }
  0x4f   : > { %v13345_v58 = vpack.c.bf16 %v536_v53, %v537_v54  ;;  %v12720_v53 = vld [vmem:[%s16583_s1 + $0x238] sm:$0xff] }
  0x50   : > { %v414_v59 = vsel %vm411_vm0, %v407_v55, %v408_v56  ;;  %13825 = vst [vmem:[#allocation2 + $0xa8] sm:$0xff] %v13300_v15   ;;  %2489 = vmatpush.bf16.msra.mxu0 %v12720_v53 }
  0x51   : > { %v13250_v61 = vpack.c.bf16 %v414_v59, %v415_v60  ;;  %13834 = vst [vmem:[#allocation2 + $0x100] sm:$0xff] %v13345_v58  }
  0x53   : > { %13815 = vst [vmem:[#allocation2 + $0x48] sm:$0xff] %v13250_v61  }
  0x58   : > { %v12603_v48 = vld [vmem:[#allocation2 + $0x100] sm:$0xff] }
  0x5a   : > { %v12621_v49 = vld [vmem:[#allocation2 + $0x48] sm:$0xff] }
  0x5b   : > { %797 = vmatmul.bf16.gmra.mxu0 %v12580_v3  ;;  %v12666_v3 = vld [vmem:[%s16583_s1 + $0x178] sm:$0xff] }
  0x5c   : > { %964 = vmatmul.bf16.gmra.mxu1 %v12562_v4  ;;  %v12702_v4 = vld [vmem:[%s16583_s1 + $0x1f8] sm:$0xff] }
  0x5d   : > { %1168 = vmatmul.bf16.gmra.mxu2 %v12598_v5  ;;  %v14271_v5 = vld [vmem:[%s14077_s19 + $0x90] sm:$0xff]  ;;  %1817 = vmatpush.bf16.msrb.mxu1 %v12666_v3 }
  0x5e   : > { %1392 = vmatmul.bf16.gmra.mxu3 %v12616_v6  ;;  %v529_v6 = vrot.slane %v388_v52, 1  ;;  %v530_v7 = vrot.slane %v14271_v5, 1  ;;  %v409_v11 = vrot.slane %v14271_v5, 7  ;;  %v12695_v52 = vld [vmem:[%s16583_s1 + $0x1c0] sm:$0xff] }
  0x5f   : > { %2265 = vmatpush.bf16.msrb.mxu3 %v12702_v4 }
  0x60   : > { %v534_v9 = vsel %vm532_vm1, %v529_v6, %v530_v7  ;;  %v535_v10 = vsel %vm532_vm1, %v528_v51, %v529_v6  ;;  %v412_v18 = vsel %vm411_vm0, %v409_v11, %v410_v28  ;;  %v413_v20 = vsel %vm411_vm0, %v408_v56, %v409_v11  ;;  %v12566_v28 = vld [vmem:[#allocation2 + $0x38] sm:$0xff]  ;;  %v12659_v51 = vld [vmem:[%s16583_s1 + $0x140] sm:$0xff] }
  0x61   : > { %v13350_v16 = vpack.c.bf16 %v534_v9, %v535_v10  ;;  %1818 = vmatpush.bf16.msrb.mxu1 %v12665_v12  ;;  %v13255_v21 = vpack.c.bf16 %v412_v18, %v413_v20 }
  0x63   : > { %2266 = vmatpush.bf16.msrb.mxu3 %v12701_v13  ;;  %13835 = vst [vmem:[#allocation2 + $0x108] sm:$0xff] %v13350_v16   ;;  %v12719_v16 = vld [vmem:[%s16583_s1 + $0x230] sm:$0xff] }
  0x64   : > { %13816 = vst [vmem:[#allocation2 + $0x50] sm:$0xff] %v13255_v21   ;;  %2490 = vmatpush.bf16.msra.mxu0 %v12719_v16 }
  0x65   : > { %1819 = vmatpush.bf16.msrb.mxu1 %v12664_v22  ;;  %v12631_v22 = vld [vmem:[#allocation2 + $0x68] sm:$0xff] }
  0x69   : > { %1820 = vmatpush.bf16.msrb.mxu1 %v12663_v32 }
  0x6a   : > { %v12604_v4 = vld [vmem:[#allocation2 + $0x108] sm:$0xff] }
  0x6b   : > { %802 = vmatmul.bf16.gmra.mxu0 %v12581_v24  ;;  %v12700_v24 = vld [vmem:[%s16583_s1 + $0x1e8] sm:$0xff]  ;;  %v12622_v6 = vld [vmem:[#allocation2 + $0x50] sm:$0xff] }
  0x6c   : > { %969 = vmatmul.bf16.gmra.mxu1 %v12563_v25  ;;  %v12584_v25 = vld [vmem:[#allocation2 + $0x98] sm:$0xff]  ;;  %2267 = vmatpush.bf16.msrb.mxu3 %v12700_v24  ;;  %v12649_v24 = vld [vmem:[#allocation2 + $0xc8] sm:$0xff] }
  0x6d   : > { %1173 = vmatmul.bf16.gmra.mxu2 %v12599_v26  ;;  %v12681_v26 = vld [vmem:[%s16583_s1 + $0x1a0] sm:$0xff]  ;;  %1821 = vmatpush.bf16.msrb.mxu1 %v12662_v35 }
  0x6e   : > { %1397 = vmatmul.bf16.gmra.mxu3 %v12617_v27  ;;  %v12602_v27 = vld [vmem:[#allocation2 + $0xf8] sm:$0xff]  ;;  %2044 = vmatpush.bf16.msrb.mxu2 %v12681_v26 }
  0x70   : > { %2268 = vmatpush.bf16.msrb.mxu3 %v12699_v33 }
  0x71   : > { %1822 = vmatpush.bf16.msrb.mxu1 %v12661_v38 }
  0x72   : > { %2045 = vmatpush.bf16.msrb.mxu2 %v12680_v34 }
  0x74   : > { %2269 = vmatpush.bf16.msrb.mxu3 %v12698_v36 }
  0x75   : > { %1823 = vmatpush.bf16.msrb.mxu1 %v12660_v41 }
  0x76   : > { %2046 = vmatpush.bf16.msrb.mxu2 %v12679_v37 }
  0x78   : > { %2270 = vmatpush.bf16.msrb.mxu3 %v12697_v39 }
  0x79   : > { %1824 = vmatpush.bf16.msrb.mxu1 %v12659_v51 }
  0x7a   : > { %2047 = vmatpush.bf16.msrb.mxu2 %v12678_v40  ;;  %v12718_v40 = vld [vmem:[%s16583_s1 + $0x228] sm:$0xff] }
  0x7b   : > { %807 = vmatmul.bf16.gmra.mxu0 %v12582_v44  ;;  %v12567_v44 = vld [vmem:[#allocation2 + $0x40] sm:$0xff] }
  0x7c   : > { %974 = vmatmul.bf16.gmra.mxu1 %v12564_v45  ;;  %v12677_v45 = vld [vmem:[%s16583_s1 + $0x180] sm:$0xff]  ;;  %2271 = vmatpush.bf16.msrb.mxu3 %v12696_v42 }
  0x7d   : > { %1178 = vmatmul.bf16.gmra.mxu2 %v12600_v46  ;;  %2491 = vmatpush.bf16.msra.mxu0 %v12718_v40 }
  0x7e   : > { %1402 = vmatmul.bf16.gmra.mxu3 %v12618_v47  ;;  %2048 = vmatpush.bf16.msrb.mxu2 %v12677_v45 }
  0x80   : > { %2272 = vmatpush.bf16.msrb.mxu3 %v12695_v52 }
  0x8b   : > { %812 = vmatmul.bf16.gmra.mxu0 %v12583_v62 }
  0x8c   : > { %979 = vmatmul.bf16.gmra.mxu1 %v12565_v63  ;;  %v12586_v63 = vld [vmem:[#allocation2 + $0xa8] sm:$0xff] }
  0x8d   : > { %1183 = vmatmul.bf16.gmra.mxu2 %v12601_v0  ;;  %v12568_v0 = vld [vmem:[#allocation2 + $0x48] sm:$0xff] }
  0x8e   : > { %1407 = vmatmul.bf16.gmra.mxu3 %v12619_v1 }
  0x9b   : > { %817 = vmatmul.bf16.gmra.mxu0 %v12584_v25 }
  0x9c   : > { %984 = vmatmul.bf16.gmra.mxu1 %v12566_v28 }
  0x9d   : > { %1188 = vmatmul.bf16.gmra.mxu2 %v12602_v27  ;;  %v12667_v27 = vld [vmem:[#allocation2 + $0x10] sm:$0xff] }
  0x9e   : > { %1412 = vmatmul.bf16.gmra.mxu3 %v12620_v29  ;;  %v12685_v29 = vld [vmem:[#allocation2 + $0x70] sm:$0xff] }
  0xa8   : > { %v783_v46 = vpop.f32.mrf.mxu0 }
  0xa9   : > { %v950_v47 = vpop.f32.mrf.mxu1 }
  0xaa   : > { %v951_v50 = vadd.f32 %v950_v47, %v783_v46 }
  0xab   : > { %822 = vmatmul.bf16.gmra.mxu0 %v12585_v43  ;;  %v12632_v43 = vld [vmem:[#allocation2 + $0x70] sm:$0xff] }
  0xac   : > { %989 = vmatmul.bf16.gmra.mxu1 %v12567_v44  ;;  %v12650_v44 = vld [vmem:[#allocation2 + $0xd0] sm:$0xff] }
  0xad   : > { %1193 = vmatmul.bf16.gmra.mxu2 %v12603_v48  ;;  %v12668_v48 = vld [vmem:[#allocation2 + $0x18] sm:$0xff] }
  0xae   : > { %1417 = vmatmul.bf16.gmra.mxu3 %v12621_v49  ;;  %v12686_v49 = vld [vmem:[#allocation2 + $0x78] sm:$0xff] }
  0xb0   : > { %v1154_v54 = vpop.f32.mrf.mxu2  ;;  %v785_v57 = vpop.f32.mrf.mxu0 }
  0xb1   : > { %v1378_v55 = vpop.f32.mrf.mxu3  ;;  %v1204_v56 = vadd.f32 %v1154_v54, %v951_v50  ;;  %v952_v58 = vpop.f32.mrf.mxu1 }
  0xb2   : > { %v953_v59 = vadd.f32 %v952_v58, %v785_v57 }
  0xb3   : > { %v14356_v60 = vadd.f32 %v1378_v55, %v1204_v56 }
  0xb8   : > { %v1156_v61 = vpop.f32.mrf.mxu2  ;;  %v788_v2 = vpop.f32.mrf.mxu0 }
  0xb9   : > { %v1380_v62 = vpop.f32.mrf.mxu3  ;;  %v1205_v1 = vadd.f32 %v1156_v61, %v953_v59  ;;  %v955_v3 = vpop.f32.mrf.mxu1 }
  0xba   : > { %v956_v8 = vadd.f32 %v955_v3, %v788_v2  ;;  %v12669_v3 = vld [vmem:[#allocation2 + $0x20] sm:$0xff] }
  0xbb   : > { %v14358_v9 = vadd.f32 %v1380_v62, %v1205_v1  ;;  %827 = vmatmul.bf16.gmra.mxu0 %v12586_v63  ;;  %v12633_v62 = vld [vmem:[#allocation2 + $0x78] sm:$0xff] }
  0xbc   : > { %994 = vmatmul.bf16.gmra.mxu1 %v12568_v0  ;;  %v12651_v63 = vld [vmem:[#allocation2 + $0xd8] sm:$0xff] }
  0xbd   : > { %1198 = vmatmul.bf16.gmra.mxu2 %v12604_v4  ;;  %v12687_v4 = vld [vmem:[#allocation2 + $0x80] sm:$0xff] }
  0xbe   : > { %1422 = vmatmul.bf16.gmra.mxu3 %v12622_v6  ;;  %v12717_v6 = vld [vmem:[%s16583_s1 + $0x220] sm:$0xff] }
  0xbf   : > { %2492 = vmatpush.bf16.msra.mxu0 %v12717_v6  ;;  %v12654_v6 = vld [vmem:[#allocation2 + $0xf0] sm:$0xff] }
  0xc0   : > { %v1159_v10 = vpop.f32.mrf.mxu2  ;;  %v790_v13 = vpop.f32.mrf.mxu0 }
  0xc1   : > { %v1383_v11 = vpop.f32.mrf.mxu3  ;;  %v1206_v12 = vadd.f32 %v1159_v10, %v956_v8  ;;  %v957_v15 = vpop.f32.mrf.mxu1 }
  0xc2   : > { %v958_v17 = vadd.f32 %v957_v15, %v790_v13 }
  0xc3   : > { %v14363_v18 = vadd.f32 %v1383_v11, %v1206_v12 }
  0xc8   : > { %v1161_v20 = vpop.f32.mrf.mxu2  ;;  %v793_v28 = vpop.f32.mrf.mxu0 }
  0xc9   : > { %v1385_v21 = vpop.f32.mrf.mxu3  ;;  %v1207_v25 = vadd.f32 %v1161_v20, %v958_v17  ;;  %v960_v26 = vpop.f32.mrf.mxu1 }
  0xca   : > { %v961_v31 = vadd.f32 %v960_v26, %v793_v28 }
  0xcb   : > { %v14365_v32 = vadd.f32 %v1385_v21, %v1207_v25  ;;  %1601 = vmatmul.bf16.vlgmr.msrb.gmra.mxu0 %v12631_v22  ;;  %v12652_v25 = vld [vmem:[#allocation2 + $0xe0] sm:$0xff] }
  0xcc   : > { %1825 = vmatmul.bf16.vlgmr.msrb.gmra.mxu1 %v12649_v24  ;;  %v12634_v24 = vld [vmem:[#allocation2 + $0x80] sm:$0xff] }
  0xcd   : > { %2049 = vmatmul.bf16.vlgmr.msrb.gmra.mxu2 %v12667_v27 }
  0xce   : > { %2273 = vmatmul.bf16.vlgmr.msrb.gmra.mxu3 %v12685_v29  ;;  %v12670_v29 = vld [vmem:[#allocation2 + $0x28] sm:$0xff] }
  0xd0   : > { %v1164_v33 = vpop.f32.mrf.mxu2  ;;  %v795_v36 = vpop.f32.mrf.mxu0 }
  0xd1   : > { %v1388_v34 = vpop.f32.mrf.mxu3  ;;  %v1208_v35 = vadd.f32 %v1164_v33, %v961_v31  ;;  %v962_v37 = vpop.f32.mrf.mxu1  ;;  %v12688_v31 = vld [vmem:[#allocation2 + $0x88] sm:$0xff] }
  0xd2   : > { %v963_v38 = vadd.f32 %v962_v37, %v795_v36 }
  0xd3   : > { %v14367_v39 = vadd.f32 %v1388_v34, %v1208_v35  ;;  %v12716_v35 = vld [vmem:[%s16583_s1 + $0x218] sm:$0xff] }
  0xd4   : > { %2493 = vmatpush.bf16.msra.mxu0 %v12716_v35 }
  0xd8   : > { %v1166_v41 = vpop.f32.mrf.mxu2  ;;  %v798_v46 = vpop.f32.mrf.mxu0 }
  0xd9   : > { %v1390_v42 = vpop.f32.mrf.mxu3  ;;  %v1209_v45 = vadd.f32 %v1166_v41, %v963_v38  ;;  %v965_v47 = vpop.f32.mrf.mxu1 }
  0xda   : > { %v966_v50 = vadd.f32 %v965_v47, %v798_v46  ;;  %v12635_v46 = vld [vmem:[#allocation2 + $0x88] sm:$0xff] }
  0xdb   : > { %v14372_v51 = vadd.f32 %v1390_v42, %v1209_v45  ;;  %1606 = vmatmul.bf16.gmra.mxu0 %v12632_v43  ;;  %v12653_v47 = vld [vmem:[#allocation2 + $0xe8] sm:$0xff] }
  0xdc   : > { %1830 = vmatmul.bf16.gmra.mxu1 %v12650_v44 }
  0xdd   : > { %2054 = vmatmul.bf16.gmra.mxu2 %v12668_v48 }
  0xde   : > { %2278 = vmatmul.bf16.gmra.mxu3 %v12686_v49 }
  0xe0   : > { %v1169_v52 = vpop.f32.mrf.mxu2  ;;  %v800_v55 = vpop.f32.mrf.mxu0 }
  0xe1   : > { %v1393_v53 = vpop.f32.mrf.mxu3  ;;  %v1210_v54 = vadd.f32 %v1169_v52, %v966_v50  ;;  %v967_v56 = vpop.f32.mrf.mxu1  ;;  %v12671_v52 = vld [vmem:[#allocation2 + $0x30] sm:$0xff] }
  0xe2   : > { %v968_v57 = vadd.f32 %v967_v56, %v800_v55 }
  0xe3   : > { %v14374_v58 = vadd.f32 %v1393_v53, %v1210_v54  ;;  %v12689_v53 = vld [vmem:[#allocation2 + $0x90] sm:$0xff] }
  0xe8   : > { %v1171_v59 = vpop.f32.mrf.mxu2  ;;  %v803_v1 = vpop.f32.mrf.mxu0 }
  0xe9   : > { %v1395_v61 = vpop.f32.mrf.mxu3  ;;  %v1211_v0 = vadd.f32 %v1171_v59, %v968_v57  ;;  %v970_v2 = vpop.f32.mrf.mxu1 }
  0xea   : > { %v971_v8 = vadd.f32 %v970_v2, %v803_v1 }
  0xeb   : > { %v14379_v10 = vadd.f32 %v1395_v61, %v1211_v0  ;;  %1611 = vmatmul.bf16.gmra.mxu0 %v12633_v62 }
  0xec   : > { %1835 = vmatmul.bf16.gmra.mxu1 %v12651_v63  ;;  %v12715_v63 = vld [vmem:[%s16583_s1 + $0x210] sm:$0xff] }
  0xed   : > { %2059 = vmatmul.bf16.gmra.mxu2 %v12669_v3  ;;  %2494 = vmatpush.bf16.msra.mxu0 %v12715_v63  ;;  %v12638_v63 = vld [vmem:[#allocation2 + $0xa0] sm:$0xff] }
  0xee   : > { %2283 = vmatmul.bf16.gmra.mxu3 %v12687_v4  ;;  %v12636_v4 = vld [vmem:[#allocation2 + $0x90] sm:$0xff] }
  0xf0   : > { %v1174_v11 = vpop.f32.mrf.mxu2  ;;  %v805_v15 = vpop.f32.mrf.mxu0 }
  0xf1   : > { %v1398_v12 = vpop.f32.mrf.mxu3  ;;  %v1212_v13 = vadd.f32 %v1174_v11, %v971_v8  ;;  %v972_v16 = vpop.f32.mrf.mxu1 }
  0xf2   : > { %v973_v17 = vadd.f32 %v972_v16, %v805_v15  ;;  %v12690_v15 = vld [vmem:[#allocation2 + $0x98] sm:$0xff] }
  0xf3   : > { %v14381_v20 = vadd.f32 %v1398_v12, %v1212_v13  ;;  %v12672_v13 = vld [vmem:[#allocation2 + $0x38] sm:$0xff] }
  0xf8   : > { %v1176_v21 = vpop.f32.mrf.mxu2  ;;  %v808_v26 = vpop.f32.mrf.mxu0 }
  0xf9   : > { %v1400_v22 = vpop.f32.mrf.mxu3  ;;  %v1213_v28 = vadd.f32 %v1176_v21, %v973_v17  ;;  %v975_v27 = vpop.f32.mrf.mxu1 }
  0xfa   : > { %v976_v33 = vadd.f32 %v975_v27, %v808_v26 }
  0xfb   : > { %v14383_v34 = vadd.f32 %v1400_v22, %v1213_v28  ;;  %1616 = vmatmul.bf16.gmra.mxu0 %v12634_v24 }
  0xfc   : > { %1840 = vmatmul.bf16.gmra.mxu1 %v12652_v25 }
  0xfd   : > { %2064 = vmatmul.bf16.gmra.mxu2 %v12670_v29  ;;  %v12714_v29 = vld [vmem:[%s16583_s1 + $0x208] sm:$0xff] }
  0xfe   : > { %2288 = vmatmul.bf16.gmra.mxu3 %v12688_v31  ;;  %v13305_v31 = vpack.c.bf16 %v14104_v23, %v14271_v5  ;;  %2495 = vmatpush.bf16.msra.mxu0 %v12714_v29  ;;  %v12692_v5 = vld [vmem:[#allocation2 + $0xa8] sm:$0xff]  ;;  %v12755_v29 = vld [vmem:[%s16585_s3 + $0x70] sm:$0xff] }
 0x100   : > { %v1179_v36 = vpop.f32.mrf.mxu2  ;;  %v810_v40 = vpop.f32.mrf.mxu0  ;;  %13826 = vst [vmem:[#allocation2 + $0xb0] sm:$0xff] %v13305_v31  }
 0x101   : > { %v1403_v37 = vpop.f32.mrf.mxu3  ;;  %v1214_v38 = vadd.f32 %v1179_v36, %v976_v33  ;;  %v977_v41 = vpop.f32.mrf.mxu1  ;;  %v12637_v36 = vld [vmem:[#allocation2 + $0x98] sm:$0xff] }
 0x102   : > { %v978_v42 = vadd.f32 %v977_v41, %v810_v40 }
 0x103   : > { %v14388_v43 = vadd.f32 %v1403_v37, %v1214_v38  ;;  %v12655_v37 = vld [vmem:[#allocation2 + $0xf8] sm:$0xff] }
 0x107   : > { %v12640_v31 = vld [vmem:[#allocation2 + $0xb0] sm:$0xff] }
 0x108   : > { %v1181_v44 = vpop.f32.mrf.mxu2  ;;  %v813_v49 = vpop.f32.mrf.mxu0 }
 0x109   : > { %v1405_v45 = vpop.f32.mrf.mxu3  ;;  %v1215_v48 = vadd.f32 %v1181_v44, %v978_v42  ;;  %v980_v50 = vpop.f32.mrf.mxu1  ;;  %v12673_v42 = vld [vmem:[#allocation2 + $0x40] sm:$0xff] }
 0x10a   : > { %v981_v54 = vadd.f32 %v980_v50, %v813_v49  ;;  %v12691_v44 = vld [vmem:[#allocation2 + $0xa0] sm:$0xff] }
 0x10b   : > { %v14390_v55 = vadd.f32 %v1405_v45, %v1215_v48  ;;  %1621 = vmatmul.bf16.gmra.mxu0 %v12635_v46 }
 0x10c   : > { %1845 = vmatmul.bf16.gmra.mxu1 %v12653_v47 }
 0x10d   : > { %2069 = vmatmul.bf16.gmra.mxu2 %v12671_v52  ;;  %v13942_v52 = vld [vmem:[%s14077_s19 + $0x98] sm:$0xff] }
 0x10e   : > { %2293 = vmatmul.bf16.gmra.mxu3 %v12689_v53  ;;  %v531_v53 = vrot.slane %v13942_v52, 1 }
 0x110   : > { %v1184_v56 = vpop.f32.mrf.mxu2  ;;  %v815_v61 = vpop.f32.mrf.mxu0 }
 0x111   : > { %v1408_v57 = vpop.f32.mrf.mxu3  ;;  %v1216_v59 = vadd.f32 %v1184_v56, %v981_v54  ;;  %v982_v62 = vpop.f32.mrf.mxu1  ;;  %v533_v56 = vsel %vm532_vm1, %v530_v7, %v531_v53  ;;  %v12713_v7 = vld [vmem:[%s16583_s1 + $0x200] sm:$0xff] }
 0x112   : > { %v983_v0 = vadd.f32 %v982_v62, %v815_v61  ;;  %2496 = vmatpush.bf16.msra.mxu0 %v12713_v7 }
 0x113   : > { %v14395_v1 = vadd.f32 %v1408_v57, %v1216_v59  ;;  %v552_v57 = vsel %vm532_vm1, %v531_v53, %v512_v30  ;;  %v12756_v30 = vld [vmem:[%s16585_s3 + $0x78] sm:$0xff]  ;;  %v12705_v53 = vld [vmem:[#allocation2 + $0xe0] sm:$0xff] }
 0x114   : > { %v13355_v59 = vpack.c.bf16 %v552_v57, %v533_v56  ;;  %3013 = vmatpush.bf16.msra.mxu1 %v12756_v30 }
 0x116   : > { %13836 = vst [vmem:[#allocation2 + $0x110] sm:$0xff] %v13355_v59  }
 0x118   : > { %v1186_v2 = vpop.f32.mrf.mxu2  ;;  %v818_v11 = vpop.f32.mrf.mxu0  ;;  %3014 = vmatpush.bf16.msra.mxu1 %v12755_v29  ;;  %v12774_v29 = vld [vmem:[%s16585_s3 + $0xb8] sm:$0xff] }
 0x119   : > { %v1410_v3 = vpop.f32.mrf.mxu3  ;;  %v1217_v8 = vadd.f32 %v1186_v2, %v983_v0  ;;  %v985_v12 = vpop.f32.mrf.mxu1  ;;  %v12656_v0 = vld [vmem:[#allocation2 + $0x100] sm:$0xff]  ;;  %3384 = vmatpush.bf16.msra.mxu3 %v12774_v29 }
 0x11a   : > { %v986_v16 = vadd.f32 %v985_v12, %v818_v11 }
 0x11b   : > { %v14397_v17 = vadd.f32 %v1410_v3, %v1217_v8  ;;  %1626 = vmatmul.bf16.gmra.mxu0 %v12636_v4  ;;  %v12674_v4 = vld [vmem:[#allocation2 + $0x48] sm:$0xff] }
 0x11c   : > { %1850 = vmatmul.bf16.gmra.mxu1 %v12654_v6 }
 0x11d   : > { %2074 = vmatmul.bf16.gmra.mxu2 %v12672_v13 }
 0x11e   : > { %2298 = vmatmul.bf16.gmra.mxu3 %v12690_v15  ;;  %v12639_v15 = vld [vmem:[#allocation2 + $0xa8] sm:$0xff] }
 0x120   : > { %v1189_v21 = vpop.f32.mrf.mxu2  ;;  %v820_v25 = vpop.f32.mrf.mxu0 }
 0x121   : > { %v1413_v22 = vpop.f32.mrf.mxu3  ;;  %v1218_v24 = vadd.f32 %v1189_v21, %v986_v16  ;;  %v987_v28 = vpop.f32.mrf.mxu1  ;;  %v12657_v16 = vld [vmem:[#allocation2 + $0x108] sm:$0xff] }
 0x122   : > { %v988_v26 = vadd.f32 %v987_v28, %v820_v25 }
 0x123   : > { %v14399_v27 = vadd.f32 %v1413_v22, %v1218_v24  ;;  %v12675_v22 = vld [vmem:[#allocation2 + $0x50] sm:$0xff] }
 0x124   : > { %v12693_v24 = vld [vmem:[#allocation2 + $0xb0] sm:$0xff] }
 0x128   : > { %v1191_v33 = vpop.f32.mrf.mxu2  ;;  %v823_v40 = vpop.f32.mrf.mxu0 }
 0x129   : > { %v1415_v35 = vpop.f32.mrf.mxu3  ;;  %v1219_v38 = vadd.f32 %v1191_v33, %v988_v26  ;;  %v990_v41 = vpop.f32.mrf.mxu1  ;;  %v12658_v33 = vld [vmem:[#allocation2 + $0x110] sm:$0xff] }
 0x12a   : > { %v991_v45 = vadd.f32 %v990_v41, %v823_v40  ;;  %v12754_v40 = vld [vmem:[%s16585_s3 + $0x68] sm:$0xff]  ;;  %v12703_v41 = vld [vmem:[#allocation2 + $0xd0] sm:$0xff] }
 0x12b   : > { %v14406_v46 = vadd.f32 %v1415_v35, %v1219_v38  ;;  %1631 = vmatmul.bf16.gmra.mxu0 %v12637_v36  ;;  %v12676_v36 = vld [vmem:[#allocation2 + $0x58] sm:$0xff]  ;;  %3015 = vmatpush.bf16.msra.mxu1 %v12754_v40 }
 0x12c   : > { %1855 = vmatmul.bf16.gmra.mxu1 %v12655_v37  ;;  %v12694_v37 = vld [vmem:[#allocation2 + $0xb8] sm:$0xff] }
 0x12d   : > { %2079 = vmatmul.bf16.gmra.mxu2 %v12673_v42  ;;  %v12708_v40 = vld [vmem:[#allocation2 + $0xf8] sm:$0xff] }
 0x12e   : > { %2303 = vmatmul.bf16.gmra.mxu3 %v12691_v44 }
 0x130   : > { %v1194_v23 = vpop.f32.mrf.mxu2  ;;  %v14408_v49 = vpop.f32.mrf.mxu0 }
 0x131   : > { %v1418_v47 = vpop.f32.mrf.mxu3  ;;  %v1220_v48 = vadd.f32 %v1194_v23, %v991_v45  ;;  %v14410_v50 = vpop.f32.mrf.mxu1  ;;  %v12704_v23 = vld [vmem:[#allocation2 + $0xd8] sm:$0xff] }
 0x133   : > { %v14413_v54 = vadd.f32 %v1418_v47, %v1220_v48  ;;  %v12753_v48 = vld [vmem:[%s16585_s3 + $0x60] sm:$0xff] }
 0x134   : > { %3016 = vmatpush.bf16.msra.mxu1 %v12753_v48  ;;  %v12771_v48 = vld [vmem:[%s16585_s3 + $0xa0] sm:$0xff] }
 0x138   : > { %v14423_v61 = vpop.f32.mrf.mxu2  ;;  %v828_v2 = vpop.f32.mrf.mxu0 }
 0x139   : > { %v14425_v62 = vpop.f32.mrf.mxu3  ;;  %v995_v3 = vpop.f32.mrf.mxu1 }
 0x13a   : > { %v996_v19 = vadd.f32 %v995_v3, %v828_v2 }
 0x13b   : > { %1636 = vmatmul.bf16.gmra.mxu0 %v12638_v63 }
 0x13c   : > { %1860 = vmatmul.bf16.gmra.mxu1 %v12656_v0 }
 0x13d   : > { %2084 = vmatmul.bf16.gmra.mxu2 %v12674_v4  ;;  %v12706_v4 = vld [vmem:[#allocation2 + $0xe8] sm:$0xff] }
 0x13e   : > { %2308 = vmatmul.bf16.gmra.mxu3 %v12692_v5 }
 0x140   : > { %v1199_v6 = vpop.f32.mrf.mxu2  ;;  %v14433_v12 = vpop.f32.mrf.mxu0 }
 0x141   : > { %v1423_v8 = vpop.f32.mrf.mxu3  ;;  %v1222_v11 = vadd.f32 %v1199_v6, %v996_v19  ;;  %16607 = vst [vmem:[#allocation3_spill] sm:$0xff] %v14433_v12  ;;  %v14475_v59 = vpop.f32.mrf.mxu1 }
 0x142   : > { %16609 = vst [vmem:[#allocation5_spill] sm:$0xff] %v14475_v59 }
 0x143   : > { %v14435_v13 = vadd.f32 %v1423_v8, %v1222_v11  ;;  %v12751_v11 = vld [vmem:[%s16585_s3 + $0x50] sm:$0xff] }
 0x148   : > { %v1602_v21 = vpop.f32.mrf.mxu0  ;;  %v14473_v57 = vpop.f32.mrf.mxu2 }
 0x149   : > { %v14438_v25 = vadd.f32 %v1602_v21, %v14356_v60  ;;  %16608 = vst [vmem:[#allocation4_spill] sm:$0xff] %v14473_v57  ;;  %v14480_v63 = vpop.f32.mrf.mxu3  ;;  %v14485_v2 = vpop.f32.mrf.mxu1 }
 0x14a   : > { %16610 = vst [vmem:[#allocation6_spill] sm:$0xff] %v14480_v63 }
 0x14b   : > { %1641 = vmatmul.bf16.gmra.mxu0 %v12639_v15 }
 0x14c   : > { %1865 = vmatmul.bf16.gmra.mxu1 %v12657_v16 }
 0x14d   : > { %2089 = vmatmul.bf16.gmra.mxu2 %v12675_v22 }
 0x14e   : > { %2313 = vmatmul.bf16.gmra.mxu3 %v12693_v24 }
 0x150   : > { %v1604_v28 = vpop.f32.mrf.mxu0 }
 0x151   : > { %v14441_v26 = vadd.f32 %v1604_v28, %v14358_v9  ;;  %v14489_v3 = vpop.f32.mrf.mxu3  ;;  %v14494_v19 = vpop.f32.mrf.mxu1 }
 0x158   : > { %v1607_v35 = vpop.f32.mrf.mxu0 }
 0x159   : > { %v14447_v60 = vadd.f32 %v1607_v35, %v14363_v18  ;;  %v14498_v6 = vpop.f32.mrf.mxu3  ;;  %v14506_v15 = vpop.f32.mrf.mxu1  ;;  %v12737_v35 = vld [vmem:[%s16585_s3 + $0x30] sm:$0xff] }
 0x15b   : > { %1646 = vmatmul.bf16.gmra.mxu0 %v12640_v31 }
 0x15c   : > { %1870 = vmatmul.bf16.gmra.mxu1 %v12658_v33 }
 0x15d   : > { %2094 = vmatmul.bf16.gmra.mxu2 %v12676_v36  ;;  %v12750_v36 = vld [vmem:[%s16585_s3 + $0x48] sm:$0xff] }
 0x15e   : > { %2318 = vmatmul.bf16.gmra.mxu3 %v12694_v37  ;;  %v12773_v37 = vld [vmem:[%s16585_s3 + $0xb0] sm:$0xff] }
 0x15f   : > { %3385 = vmatpush.bf16.msra.mxu3 %v12773_v37  ;;  %v12721_v37 = vld [vmem:[#allocation2] sm:$0xff] }
 0x160   : > { %v1609_v38 = vpop.f32.mrf.mxu0 }
 0x161   : > { %v14450_v9 = vadd.f32 %v1609_v38, %v14365_v32  ;;  %v14513_v24 = vpop.f32.mrf.mxu3  ;;  %v14521_v31 = vpop.f32.mrf.mxu1 }
 0x168   : > { %v1612_v42 = vpop.f32.mrf.mxu0 }
 0x169   : > { %v14456_v44 = vadd.f32 %v1612_v42, %v14367_v39  ;;  %v14537_v38 = vpop.f32.mrf.mxu3  ;;  %v12772_v42 = vld [vmem:[%s16585_s3 + $0xa8] sm:$0xff] }
 0x16a   : > { %3386 = vmatpush.bf16.msra.mxu3 %v12772_v42  ;;  %v12749_v42 = vld [vmem:[%s16585_s3 + $0x40] sm:$0xff] }
 0x16b   : > { %2497 = vmatmul.bf16.vlgmr.msra.gmra.mxu0 %v12703_v41 }
 0x16e   : > { %3387 = vmatpush.bf16.msra.mxu3 %v12771_v48  ;;  %v12739_v48 = vld [vmem:[#allocation2 + $0x60] sm:$0xff] }
 0x170   : > { %v1614_v18 = vpop.f32.mrf.mxu0 }
 0x171   : > { %v14459_v45 = vadd.f32 %v1614_v18, %v14372_v51 }
 0x178   : > { %v1617_v47 = vpop.f32.mrf.mxu0 }
 0x179   : > { %v14462_v32 = vadd.f32 %v1617_v47, %v14374_v58  ;;  %v12752_v58 = vld [vmem:[%s16585_s3 + $0x58] sm:$0xff]  ;;  %v14551_v47 = vpop.f32.mrf.mxu1 }
 0x17a   : > { %3017 = vmatpush.bf16.msra.mxu1 %v12752_v58  ;;  %v12770_v58 = vld [vmem:[%s16585_s3 + $0x98] sm:$0xff] }
 0x17b   : > { %2502 = vmatmul.bf16.gmra.mxu0 %v12704_v23  ;;  %v12735_v23 = vld [vmem:[%s16585_s3 + $0x20] sm:$0xff]  ;;  %3388 = vmatpush.bf16.msra.mxu3 %v12770_v58 }
 0x17e   : > { %3018 = vmatpush.bf16.msra.mxu1 %v12751_v11 }
 0x180   : > { %v1619_v52 = vpop.f32.mrf.mxu0 }
 0x181   : > { %v14468_v39 = vadd.f32 %v1619_v52, %v14379_v10 }
 0x182   : > { %3019 = vmatpush.bf16.msra.mxu1 %v12750_v36  ;;  %v12767_v36 = vld [vmem:[%s16585_s3 + $0x80] sm:$0xff] }
 0x186   : > { %3020 = vmatpush.bf16.msra.mxu1 %v12749_v42 }
 0x188   : > { %v1622_v56 = vpop.f32.mrf.mxu0 }
 0x189   : > { %v14471_v51 = vadd.f32 %v1622_v56, %v14381_v20  ;;  %v14487_v20 = vpop.f32.mrf.mxu2  ;;  %3021 = vmatmul.bf16.vlgmr.msra.gmra.mxu1 %v12739_v48  ;;  %v12711_v48 = vld [vmem:[#allocation2 + $0x110] sm:$0xff] }
 0x18b   : > { %2507 = vmatmul.bf16.gmra.mxu0 %v12705_v53  ;;  %v14558_v53 = vpop.f32.mrf.mxu3 }
 0x190   : > { %v1624_v0 = vpop.f32.mrf.mxu0 }
 0x191   : > { %v14483_v10 = vadd.f32 %v1624_v0, %v14383_v34  ;;  %v14496_v30 = vpop.f32.mrf.mxu2 }
 0x198   : > { %v1627_v5 = vpop.f32.mrf.mxu0 }
 0x199   : > { %v14492_v7 = vadd.f32 %v1627_v5, %v14388_v43  ;;  %v12707_v43 = vld [vmem:[#allocation2 + $0xf0] sm:$0xff]  ;;  %v14508_v16 = vpop.f32.mrf.mxu2 }
 0x19a   : > { %v12769_v5 = vld [vmem:[%s16585_s3 + $0x90] sm:$0xff] }
 0x19b   : > { %2512 = vmatmul.bf16.gmra.mxu0 %v12706_v4  ;;  %v12733_v4 = vld [vmem:[%s16585_s3 + $0x10] sm:$0xff]  ;;  %3389 = vmatpush.bf16.msra.mxu3 %v12769_v5 }
 0x1a0   : > { %v1629_v34 = vpop.f32.mrf.mxu0 }
 0x1a1   : > { %v14501_v8 = vadd.f32 %v1629_v34, %v14390_v55  ;;  %v12738_v55 = vld [vmem:[%s16585_s3 + $0x38] sm:$0xff]  ;;  %v14575_v34 = vpop.f32.mrf.mxu1 }
 0x1a2   : > { %3180 = vmatpush.bf16.msra.mxu2 %v12738_v55 }
 0x1a6   : > { %3181 = vmatpush.bf16.msra.mxu2 %v12737_v35  ;;  %v12731_v35 = vld [vmem:[%s16585_s3] sm:$0xff] }
 0x1a8   : > { %v1632_v21 = vpop.f32.mrf.mxu0 }
 0x1a9   : > { %v14511_v22 = vadd.f32 %v1632_v21, %v14395_v1  ;;  %v14526_v1 = vpop.f32.mrf.mxu2  ;;  %v14582_v21 = vpop.f32.mrf.mxu3 }
 0x1ab   : > { %2517 = vmatmul.bf16.gmra.mxu0 %v12707_v43  ;;  %v12709_v43 = vld [vmem:[#allocation2 + $0x100] sm:$0xff] }
 0x1b0   : > { %v1634_v28 = vpop.f32.mrf.mxu0 }
 0x1b1   : > { %v14524_v33 = vadd.f32 %v1634_v28, %v14397_v17  ;;  %v12736_v17 = vld [vmem:[%s16585_s3 + $0x28] sm:$0xff]  ;;  %v14556_v52 = vpop.f32.mrf.mxu2 }
 0x1b2   : > { %3182 = vmatpush.bf16.msra.mxu2 %v12736_v17  ;;  %v12768_v28 = vld [vmem:[%s16585_s3 + $0x88] sm:$0xff]  ;;  %v14596_v17 = vpop.f32.mrf.mxu1 }
 0x1b3   : > { %3390 = vmatpush.bf16.msra.mxu3 %v12768_v28 }
 0x1b6   : > { %3183 = vmatpush.bf16.msra.mxu2 %v12735_v23  ;;  %v14605_v23 = vpop.f32.mrf.mxu3 }
 0x1b7   : > { %3391 = vmatpush.bf16.msra.mxu3 %v12767_v36 }
 0x1b8   : > { %v1637_v41 = vpop.f32.mrf.mxu0 }
 0x1b9   : > { %v14546_v18 = vadd.f32 %v1637_v41, %v14399_v27  ;;  %v12734_v27 = vld [vmem:[%s16585_s3 + $0x18] sm:$0xff]  ;;  %v14577_v11 = vpop.f32.mrf.mxu2 }
 0x1ba   : > { %3184 = vmatpush.bf16.msra.mxu2 %v12734_v27  ;;  %v12710_v27 = vld [vmem:[#allocation2 + $0x108] sm:$0xff]  ;;  %v14607_v58 = vpop.f32.mrf.mxu1 }
 0x1bb   : > { %2522 = vmatmul.bf16.gmra.mxu0 %v12708_v40  ;;  %v12757_v40 = vld [vmem:[#allocation2 + $0xc0] sm:$0xff] }
 0x1bc   : > { %3392 = vmatmul.bf16.vlgmr.msra.gmra.mxu3 %v12757_v40  ;;  %v12810_v40 = vld [vmem:[%s16585_s3 + $0x138] sm:$0xff] }
 0x1bd   : > { %3832 = vmatpush.bf16.msrb.mxu1 %v12810_v40 }
 0x1be   : > { %3185 = vmatpush.bf16.msra.mxu2 %v12733_v4 }
 0x1c0   : > { %v1639_v56 = vpop.f32.mrf.mxu0 }
 0x1c1   : > { %v14567_v0 = vadd.f32 %v1639_v56, %v14406_v46  ;;  %v12732_v46 = vld [vmem:[%s16585_s3 + $0x8] sm:$0xff]  ;;  %v14598_v41 = vpop.f32.mrf.mxu2 }
 0x1c2   : > { %3186 = vmatpush.bf16.msra.mxu2 %v12732_v46  ;;  %v14614_v46 = vpop.f32.mrf.mxu3 }
 0x1c6   : > { %3187 = vmatpush.bf16.msra.mxu2 %v12731_v35  ;;  %v14621_v35 = vpop.f32.mrf.mxu1 }
 0x1c8   : > { %v1642_v55 = vpop.f32.mrf.mxu0 }
 0x1c9   : > { %v14588_v29 = vadd.f32 %v1642_v55, %v14413_v54  ;;  %3188 = vmatmul.bf16.vlgmr.msra.gmra.mxu2 %v12721_v37  ;;  %v14612_v5 = vpop.f32.mrf.mxu2  ;;  %v1876_v55 = vadd.f32 %v14485_v2, %v14438_v25  ;;  %v1877_v2 = vadd.f32 %v14494_v19, %v14441_v26  ;;  %v1878_v19 = vadd.f32 %v14506_v15, %v14447_v60 }
 0x1ca   : > { %v14625_v37 = vpop.f32.mrf.mxu3  ;;  %v1879_v60 = vadd.f32 %v14521_v31, %v14450_v9 }
 0x1cb   : > { %2527 = vmatmul.bf16.gmra.mxu0 %v12709_v43  ;;  %v2100_v28 = vadd.f32 %v14487_v20, %v1876_v55 }
 0x1cd   : > { %v2324_v42 = vadd.f32 %v14489_v3, %v2100_v28 }
 0x1ce   : > { %v14642_v55 = vpop.f32.mrf.mxu1 }
 0x1d0   : > { %v14600_v54 = vpop.f32.mrf.mxu0 }
 0x1d1   : > { %v14623_v36 = vpop.f32.mrf.mxu2 }
 0x1d2   : > { %v14648_v40 = vpop.f32.mrf.mxu3 }
 0x1d8   : > { %v1647_v56 = vpop.f32.mrf.mxu0 }
 0x1d9   : > { %v14610_v4 = vadd.f32 %v1647_v56, %v14435_v13  ;;  %v12792_v13 = vld [vmem:[%s16585_s3 + $0xf8] sm:$0xff]  ;;  %v2101_v56 = vadd.f32 %v14496_v30, %v1877_v2  ;;  %v14645_v28 = vpop.f32.mrf.mxu2 }
 0x1da   : > { %3608 = vmatpush.bf16.msrb.mxu0 %v12792_v13 }
 0x1db   : > { %16611 = vst [vmem:[#allocation7_spill] sm:$0xff] %v14610_v4  ;;  %2532 = vmatmul.bf16.gmra.mxu0 %v12710_v27  ;;  %v14639_v27 = vld [vmem:[%s16584_s2] ss:$0 sm:$0xff]  ;;  %v2325_v13 = vadd.f32 %v14498_v6, %v2101_v56  ;;  %v14660_v56 = vpop.f32.mrf.mxu1  ;;  %v12712_v4 = vld [vmem:[#allocation2 + $0x118] sm:$0xff] }
 0x1e0   : > { %v14616_v43 = vpop.f32.mrf.mxu0 }
 0x1e1   : > { %16612 = vst [vmem:[#allocation8_spill] sm:$0xff] %v14616_v43  ;;  %v2102_v43 = vadd.f32 %v14508_v16, %v1878_v19  ;;  %v14664_v15 = vpop.f32.mrf.mxu2 }
 0x1e3   : > { %v2326_v6 = vadd.f32 %v14513_v24, %v2102_v43  ;;  %v14669_v24 = vpop.f32.mrf.mxu3  ;;  %v2103_v43 = vadd.f32 %v14526_v1, %v1879_v60  ;;  %v12809_v1 = vld [vmem:[%s16585_s3 + $0x130] sm:$0xff] }
 0x1e4   : > { %3833 = vmatpush.bf16.msrb.mxu1 %v12809_v1 }
 0x1e8   : > { %v2498_v25 = vpop.f32.mrf.mxu0 }
 0x1e9   : > { %v2548_v20 = vadd.f32 %v2498_v25, %v2324_v42  ;;  %v14693_v59 = vpop.f32.mrf.mxu2 }
 0x1eb   : > { %2537 = vmatmul.bf16.gmra.mxu0 %v12711_v48  ;;  %v2572_v3 = vadd.f32 %v14639_v27, %v2548_v20  ;;  %v12791_v20 = vld [vmem:[%s16585_s3 + $0xf0] sm:$0xff] }
 0x1ec   : > { %3609 = vmatpush.bf16.msrb.mxu0 %v12791_v20  ;;  %v2327_v20 = vadd.f32 %v14537_v38, %v2103_v43 }
 0x1ed   : > { %v2592_v42 = vmax.f32 %v2572_v3, 0.0 }
 0x1ef   : > { %v14654_v48 = vmul.f32 0.0, %v2592_v42  ;;  %v13972_v42 = vmov 0.0  }
 0x1f0   : > { %v2500_v26 = vpop.f32.mrf.mxu0 }
 0x1f1   : > { %v2549_v25 = vadd.f32 %v2500_v26, %v2325_v13  ;;  %16613 = vst [vmem:[#allocation9_spill] sm:$0xff] %v14654_v48  ;;  %v16592_v3 = vrot.slane %v14654_v48, 7 }
 0x1f3   : > { %v2573_v30 = vadd.f32 %v14639_v27, %v2549_v25  ;;  %v14679_v25 = vsel %vm351_vm2, 1.0, %v13972_v42 }
 0x1f5   : > { %v2593_v2 = vmax.f32 %v2573_v30, 0.0  ;;  %v350_v30 = vadd.s32 8, %v14070_v14 }
 0x1f7   : > { %v2613_v63 = vmul.f32 0.0, %v2593_v2  ;;  %vm358_vm3 = vcmp.le.s32.totalorder %v350_v30, 8 }
 0x1f8   : > { %v2503_v16 = vpop.f32.mrf.mxu0 }
 0x1f9   : > { %v2633_v13 = vrot.slane %v2613_v63, 7  ;;  %v13410_v26 = vpack.c.bf16 %v2613_v63, %v14654_v48  ;;  %v2550_v19 = vadd.f32 %v2503_v16, %v2326_v6  ;;  %v2753_v6 = vrot.slane %v2613_v63, 1 }
 0x1fa   : > { %v1880_v16 = vadd.f32 %v14551_v47, %v14456_v44 }
 0x1fb   : > { %v14676_v9 = vsel %vm411_vm0, %v16592_v3, %v2633_v13  ;;  %13847 = vst [vmem:[#allocation2 + $0x68] sm:$0xff] %v13410_v26   ;;  %v2574_v31 = vadd.f32 %v14639_v27, %v2550_v19  ;;  %2542 = vmatmul.bf16.gmra.mxu0 %v12712_v4  ;;  %v14689_v26 = vpop.f32.mrf.mxu1  ;;  %v16593_v19 = vrot.slane %v14654_v48, 1 }
 0x1fc   : > { %16614 = vst [vmem:[#allocation10_spill] sm:$0xff] %v14676_v9  ;;  %v2104_v57 = vadd.f32 %v14556_v52, %v1880_v16  ;;  %v14707_v52 = vsel %vm358_vm3, 1.0, %v13972_v42 }
 0x1fd   : > { %v2594_v2 = vmax.f32 %v2574_v31, 0.0  ;;  %v2790_v44 = vsel %vm532_vm1, %v16593_v19, %v2753_v6 }
 0x1fe   : > { %v2328_v16 = vadd.f32 %v14558_v53, %v2104_v57 }
 0x1ff   : > { %v2614_v60 = vmul.f32 %v14679_v25, %v2594_v2  ;;  %v14704_v2 = vpop.f32.mrf.mxu3 }
 0x200   : > { %v2505_v4 = vpop.f32.mrf.mxu0 }
 0x201   : > { %v2634_v31 = vrot.slane %v2614_v60, 7  ;;  %v2754_v3 = vrot.slane %v2614_v60, 1  ;;  %v2551_v9 = vadd.f32 %v2505_v4, %v2327_v20 }
 0x202   : > { %v12740_v63 = vld [vmem:[#allocation2 + $0x68] sm:$0xff] }
 0x203   : > { %v2669_v38 = vsel %vm411_vm0, %v2633_v13, %v2634_v31  ;;  %v2789_v47 = vsel %vm532_vm1, %v2753_v6, %v2754_v3  ;;  %v2575_v43 = vadd.f32 %v14639_v27, %v2551_v9  ;;  %3026 = vmatmul.bf16.gmra.mxu1 %v12740_v63  ;;  %v1881_v13 = vadd.f32 %v14575_v34, %v14459_v45  ;;  %v14714_v30 = vpop.f32.mrf.mxu1  ;;  %v14721_v63 = vpop.f32.mrf.mxu2 }
 0x204   : > { %v13460_v1 = vpack.c.bf16 %v2789_v47, %v2790_v44 }
 0x205   : > { %v2595_v20 = vmax.f32 %v2575_v43, 0.0  ;;  %v2105_v44 = vadd.f32 %v14577_v11, %v1881_v13  ;;  %v12790_v11 = vld [vmem:[%s16585_s3 + $0xe8] sm:$0xff] }
 0x206   : > { %13857 = vst [vmem:[#allocation2 + $0xc8] sm:$0xff] %v13460_v1   ;;  %3610 = vmatpush.bf16.msrb.mxu0 %v12790_v11 }
 0x207   : > { %v2615_v4 = vmul.f32 %v14707_v52, %v2595_v20  ;;  %v14723_v47 = vpop.f32.mrf.mxu3 }
 0x208   : > { %v2508_v19 = vpop.f32.mrf.mxu0 }
 0x209   : > { %v2635_v6 = vrot.slane %v2615_v4, 7  ;;  %v13415_v48 = vpack.c.bf16 %v2615_v4, %v2614_v60  ;;  %v2755_v9 = vrot.slane %v2615_v4, 1  ;;  %v2552_v12 = vadd.f32 %v2508_v19, %v2328_v16  ;;  %v12808_v19 = vld [vmem:[%s16585_s3 + $0x128] sm:$0xff] }
 0x20a   : > { %3834 = vmatpush.bf16.msrb.mxu1 %v12808_v19 }
 0x20b   : > { %v2668_v42 = vsel %vm411_vm0, %v2634_v31, %v2635_v6  ;;  %v2788_v57 = vsel %vm532_vm1, %v2754_v3, %v2755_v9  ;;  %13848 = vst [vmem:[#allocation2 + $0x70] sm:$0xff] %v13415_v48   ;;  %v2576_v53 = vadd.f32 %v14639_v27, %v2552_v12  ;;  %v2329_v48 = vadd.f32 %v14582_v21, %v2105_v44 }
 0x20c   : > { %v13365_v45 = vpack.c.bf16 %v2668_v42, %v2669_v38  ;;  %v1882_v31 = vadd.f32 %v14596_v17, %v14462_v32  ;;  %v14741_v42 = vpop.f32.mrf.mxu1  ;;  %v14743_v32 = vpop.f32.mrf.mxu2 }
 0x20d   : > { %v2596_v34 = vmax.f32 %v2576_v53, 0.0  ;;  %v12758_v60 = vld [vmem:[#allocation2 + $0xc8] sm:$0xff] }
 0x20e   : > { %13838 = vst [vmem:[#allocation2 + $0x10] sm:$0xff] %v13365_v45   ;;  %3397 = vmatmul.bf16.gmra.mxu3 %v12758_v60  ;;  %v2106_v16 = vadd.f32 %v14598_v41, %v1882_v31 }
 0x20f   : > { %v2616_v12 = vmul.f32 %v14679_v25, %v2596_v34  ;;  %v14749_v45 = vpop.f32.mrf.mxu3 }
 0x210   : > { %v2510_v3 = vpop.f32.mrf.mxu0  ;;  %v2330_v17 = vadd.f32 %v14605_v23, %v2106_v16  ;;  %v1884_v16 = vadd.f32 %v14621_v35, %v14471_v51  ;;  %v12807_v51 = vld [vmem:[%s16585_s3 + $0x120] sm:$0xff] }
 0x211   : > { %v2636_v38 = vrot.slane %v2616_v12, 7  ;;  %v2756_v43 = vrot.slane %v2616_v12, 1  ;;  %v2553_v1 = vadd.f32 %v2510_v3, %v2329_v48  ;;  %3835 = vmatpush.bf16.msrb.mxu1 %v12807_v51 }
 0x212   : > { %v12741_v20 = vld [vmem:[#allocation2 + $0x70] sm:$0xff] }
 0x213   : > { %v2667_v4 = vsel %vm411_vm0, %v2635_v6, %v2636_v38  ;;  %v2787_v21 = vsel %vm532_vm1, %v2755_v9, %v2756_v43  ;;  %v2577_v13 = vadd.f32 %v14639_v27, %v2553_v1  ;;  %3031 = vmatmul.bf16.gmra.mxu1 %v12741_v20  ;;  %v1883_v6 = vadd.f32 %v14607_v58, %v14468_v39 }
 0x214   : > { %v13465_v44 = vpack.c.bf16 %v2787_v21, %v2788_v57  ;;  %v14764_v20 = vpop.f32.mrf.mxu2 }
 0x215   : > { %v2597_v53 = vmax.f32 %v2577_v13, 0.0  ;;  %v2107_v19 = vadd.f32 %v14612_v5, %v1883_v6  ;;  %v14761_v5 = vpop.f32.mrf.mxu1 }
 0x216   : > { %13858 = vst [vmem:[#allocation2 + $0xd0] sm:$0xff] %v13465_v44  }
 0x217   : > { %v2617_v41 = vmul.f32 %v14707_v52, %v2597_v53  ;;  %v2331_v1 = vadd.f32 %v14614_v46, %v2107_v19  ;;  %v14768_v44 = vpop.f32.mrf.mxu3  ;;  %v2108_v46 = vadd.f32 %v14623_v36, %v1884_v16 }
 0x218   : > { %v2513_v9 = vpop.f32.mrf.mxu0 }
 0x219   : > { %v2637_v34 = vrot.slane %v2617_v41, 7  ;;  %v13420_v60 = vpack.c.bf16 %v2617_v41, %v2616_v12  ;;  %v2757_v57 = vrot.slane %v2617_v41, 1  ;;  %v2554_v11 = vadd.f32 %v2513_v9, %v2330_v17  ;;  %v12789_v12 = vld [vmem:[%s16585_s3 + $0xe0] sm:$0xff] }
 0x21a   : > { %3611 = vmatpush.bf16.msrb.mxu0 %v12789_v12  ;;  %v2332_v35 = vadd.f32 %v14625_v37, %v2108_v46 }
 0x21b   : > { %v2666_v48 = vsel %vm411_vm0, %v2636_v38, %v2637_v34  ;;  %v2786_v23 = vsel %vm532_vm1, %v2756_v43, %v2757_v57  ;;  %13849 = vst [vmem:[#allocation2 + $0x78] sm:$0xff] %v13420_v60   ;;  %v2578_v3 = vadd.f32 %v14639_v27, %v2554_v11 }
 0x21c   : > { %v13370_v31 = vpack.c.bf16 %v2666_v48, %v2667_v4 }
 0x21d   : > { %v2598_v39 = vmax.f32 %v2578_v3, 0.0  ;;  %v12759_v58 = vld [vmem:[#allocation2 + $0xd0] sm:$0xff] }
 0x21e   : > { %13839 = vst [vmem:[#allocation2 + $0x18] sm:$0xff] %v13370_v31   ;;  %3402 = vmatmul.bf16.gmra.mxu3 %v12759_v58  ;;  %v14785_v31 = vpop.f32.mrf.mxu2 }
 0x21f   : > { %v2618_v38 = vmul.f32 %v14679_v25, %v2598_v39 }
 0x220   : > { %v2515_v43 = vpop.f32.mrf.mxu0 }
 0x221   : > { %v2638_v4 = vrot.slane %v2618_v38, 7  ;;  %v2758_v21 = vrot.slane %v2618_v38, 1  ;;  %v2555_v13 = vadd.f32 %v2515_v43, %v2331_v1 }
 0x222   : > { %v12742_v53 = vld [vmem:[#allocation2 + $0x78] sm:$0xff] }
 0x223   : > { %v2665_v17 = vsel %vm411_vm0, %v2637_v34, %v2638_v4  ;;  %v2785_v41 = vsel %vm532_vm1, %v2757_v57, %v2758_v21  ;;  %v2579_v6 = vadd.f32 %v14639_v27, %v2555_v13  ;;  %3036 = vmatmul.bf16.gmra.mxu1 %v12742_v53  ;;  %v1885_v34 = vadd.f32 %v14642_v55, %v14483_v10  ;;  %v14783_v57 = vpop.f32.mrf.mxu1  ;;  %v14793_v55 = vpop.f32.mrf.mxu3 }
 0x224   : > { %v13470_v9 = vpack.c.bf16 %v2785_v41, %v2786_v23 }
 0x225   : > { %v2599_v60 = vmax.f32 %v2579_v6, 0.0  ;;  %v2109_v39 = vadd.f32 %v14645_v28, %v1885_v34 }
 0x226   : > { %13859 = vst [vmem:[#allocation2 + $0xd8] sm:$0xff] %v13470_v9  }
 0x227   : > { %v2619_v36 = vmul.f32 %v14707_v52, %v2599_v60  ;;  %v2333_v43 = vadd.f32 %v14648_v40, %v2109_v39  ;;  %v14807_v60 = vpop.f32.mrf.mxu2 }
 0x228   : > { %v2518_v11 = vpop.f32.mrf.mxu0 }
 0x229   : > { %v2639_v19 = vrot.slane %v2619_v36, 7  ;;  %v13425_v48 = vpack.c.bf16 %v2619_v36, %v2618_v38  ;;  %v2759_v23 = vrot.slane %v2619_v36, 1  ;;  %v2556_v3 = vadd.f32 %v2518_v11, %v2332_v35  ;;  %v12806_v35 = vld [vmem:[%s16585_s3 + $0x118] sm:$0xff] }
 0x22a   : > { %v1887_v11 = vadd.f32 %v14689_v26, %v14501_v8  ;;  %3836 = vmatpush.bf16.msrb.mxu1 %v12806_v35 }
 0x22b   : > { %v2664_v37 = vsel %vm411_vm0, %v2638_v4, %v2639_v19  ;;  %v2784_v58 = vsel %vm532_vm1, %v2758_v21, %v2759_v23  ;;  %13850 = vst [vmem:[#allocation2 + $0x80] sm:$0xff] %v13425_v48   ;;  %v2580_v10 = vadd.f32 %v14639_v27, %v2556_v3  ;;  %v1886_v4 = vadd.f32 %v14660_v56, %v14492_v7  ;;  %v14800_v6 = vpop.f32.mrf.mxu1  ;;  %v14809_v56 = vpop.f32.mrf.mxu3 }
 0x22c   : > { %v13375_v12 = vpack.c.bf16 %v2664_v37, %v2665_v17  ;;  %v2111_v37 = vadd.f32 %v14693_v59, %v1887_v11 }
 0x22d   : > { %v2600_v1 = vmax.f32 %v2580_v10, 0.0  ;;  %v12760_v38 = vld [vmem:[#allocation2 + $0xd8] sm:$0xff]  ;;  %v2110_v41 = vadd.f32 %v14664_v15, %v1886_v4  ;;  %v1888_v4 = vadd.f32 %v14714_v30, %v14511_v22  ;;  %v12787_v22 = vld [vmem:[%s16585_s3 + $0xd0] sm:$0xff] }
 0x22e   : > { %13840 = vst [vmem:[#allocation2 + $0x20] sm:$0xff] %v13375_v12   ;;  %3407 = vmatmul.bf16.gmra.mxu3 %v12760_v38  ;;  %v12788_v15 = vld [vmem:[%s16585_s3 + $0xd8] sm:$0xff] }
 0x22f   : > { %v2620_v16 = vmul.f32 %v14679_v25, %v2600_v1  ;;  %v2334_v36 = vadd.f32 %v14669_v24, %v2110_v41  ;;  %3612 = vmatpush.bf16.msrb.mxu0 %v12788_v15  ;;  %v14829_v38 = vpop.f32.mrf.mxu2  ;;  %v2112_v41 = vadd.f32 %v14721_v63, %v1888_v4  ;;  %v1889_v15 = vadd.f32 %v14741_v42, %v14524_v33 }
 0x230   : > { %v2520_v28 = vpop.f32.mrf.mxu0 }
 0x231   : > { %v2640_v13 = vrot.slane %v2620_v16, 7  ;;  %v2760_v21 = vrot.slane %v2620_v16, 1  ;;  %v2557_v53 = vadd.f32 %v2520_v28, %v2333_v43  ;;  %v2335_v43 = vadd.f32 %v14704_v2, %v2111_v37 }
 0x232   : > { %v12743_v46 = vld [vmem:[#allocation2 + $0x80] sm:$0xff]  ;;  %v2336_v30 = vadd.f32 %v14723_v47, %v2112_v41 }
 0x233   : > { %v2663_v17 = vsel %vm411_vm0, %v2639_v19, %v2640_v13  ;;  %v2783_v40 = vsel %vm532_vm1, %v2759_v23, %v2760_v21  ;;  %v2581_v9 = vadd.f32 %v14639_v27, %v2557_v53  ;;  %3041 = vmatmul.bf16.gmra.mxu1 %v12743_v46  ;;  %v14827_v8 = vpop.f32.mrf.mxu1  ;;  %3613 = vmatpush.bf16.msrb.mxu0 %v12787_v22 }
 0x234   : > { %v13475_v51 = vpack.c.bf16 %v2783_v40, %v2784_v58 }
 0x235   : > { %v2601_v7 = vmax.f32 %v2581_v9, 0.0 }
 0x236   : > { %13860 = vst [vmem:[#allocation2 + $0xe0] sm:$0xff] %v13475_v51  }
 0x237   : > { %v2621_v34 = vmul.f32 %v14707_v52, %v2601_v7  ;;  %v14852_v35 = vpop.f32.mrf.mxu2 }
 0x238   : > { %v2523_v19 = vpop.f32.mrf.mxu0 }
 0x239   : > { %v2641_v48 = vrot.slane %v2621_v34, 7  ;;  %v13430_v23 = vpack.c.bf16 %v2621_v34, %v2620_v16  ;;  %v2761_v3 = vrot.slane %v2621_v34, 1  ;;  %v2558_v39 = vadd.f32 %v2523_v19, %v2334_v36  ;;  %v14833_v16 = vpop.f32.mrf.mxu3 }
 0x23b   : > { %v2662_v58 = vsel %vm411_vm0, %v2640_v13, %v2641_v48  ;;  %v2782_v24 = vsel %vm532_vm1, %v2760_v21, %v2761_v3  ;;  %13851 = vst [vmem:[#allocation2 + $0x88] sm:$0xff] %v13430_v23   ;;  %v2582_v10 = vadd.f32 %v14639_v27, %v2558_v39  ;;  %v14847_v7 = vpop.f32.mrf.mxu1 }
 0x23c   : > { %v13380_v12 = vpack.c.bf16 %v2662_v58, %v2663_v17 }
 0x23d   : > { %v2602_v26 = vmax.f32 %v2582_v10, 0.0  ;;  %v12761_v1 = vld [vmem:[#allocation2 + $0xe0] sm:$0xff] }
 0x23e   : > { %13841 = vst [vmem:[#allocation2 + $0x28] sm:$0xff] %v13380_v12   ;;  %3412 = vmatmul.bf16.gmra.mxu3 %v12761_v1 }
 0x23f   : > { %v2622_v59 = vmul.f32 %v14679_v25, %v2602_v26  ;;  %v1890_v26 = vadd.f32 %v14761_v5, %v14546_v18  ;;  %v14871_v4 = vpop.f32.mrf.mxu2 }
 0x240   : > { %v2525_v28 = vpop.f32.mrf.mxu0 }
 0x241   : > { %v2642_v13 = vrot.slane %v2622_v59, 7  ;;  %v2762_v21 = vrot.slane %v2622_v59, 1  ;;  %v2559_v53 = vadd.f32 %v2525_v28, %v2335_v43  ;;  %v14854_v23 = vpop.f32.mrf.mxu3 }
 0x242   : > { %v12744_v46 = vld [vmem:[#allocation2 + $0x88] sm:$0xff] }
 0x243   : > { %v2661_v17 = vsel %vm411_vm0, %v2641_v48, %v2642_v13  ;;  %v2781_v2 = vsel %vm532_vm1, %v2761_v3, %v2762_v21  ;;  %v2583_v40 = vadd.f32 %v14639_v27, %v2559_v53  ;;  %3046 = vmatmul.bf16.gmra.mxu1 %v12744_v46  ;;  %v2113_v3 = vadd.f32 %v14743_v32, %v1889_v15  ;;  %v14869_v28 = vpop.f32.mrf.mxu1 }
 0x244   : > { %v13480_v9 = vpack.c.bf16 %v2781_v2, %v2782_v24  ;;  %v12805_v24 = vld [vmem:[%s16585_s3 + $0x110] sm:$0xff] }
 0x245   : > { %v2603_v51 = vmax.f32 %v2583_v40, 0.0  ;;  %v2337_v10 = vadd.f32 %v14749_v45, %v2113_v3  ;;  %3837 = vmatpush.bf16.msrb.mxu1 %v12805_v24 }
 0x246   : > { %13861 = vst [vmem:[#allocation2 + $0xe8] sm:$0xff] %v13480_v9  }
 0x247   : > { %v2623_v63 = vmul.f32 %v14707_v52, %v2603_v51 }
 0x248   : > { %v2528_v36 = vpop.f32.mrf.mxu0 }
 0x249   : > { %v2643_v34 = vrot.slane %v2623_v63, 7  ;;  %v13435_v11 = vpack.c.bf16 %v2623_v63, %v2622_v59  ;;  %v2763_v19 = vrot.slane %v2623_v63, 1  ;;  %v2560_v48 = vadd.f32 %v2528_v36, %v2336_v30  ;;  %v14879_v41 = vpop.f32.mrf.mxu3 }
 0x24b   : > { %v2660_v47 = vsel %vm411_vm0, %v2642_v13, %v2643_v34  ;;  %v2780_v39 = vsel %vm532_vm1, %v2762_v21, %v2763_v19  ;;  %13852 = vst [vmem:[#allocation2 + $0x90] sm:$0xff] %v13435_v11   ;;  %v2584_v33 = vadd.f32 %v14639_v27, %v2560_v48  ;;  %v2114_v21 = vadd.f32 %v14764_v20, %v1890_v26  ;;  %v3022_v15 = vpop.f32.mrf.mxu1 }
 0x24c   : > { %v13385_v42 = vpack.c.bf16 %v2660_v47, %v2661_v17  ;;  %v1891_v20 = vadd.f32 %v14783_v57, %v14567_v0  ;;  %v3189_v36 = vpop.f32.mrf.mxu2  ;;  %v993_v0 = vadd.f32 %v14410_v50, %v14408_v49 }
 0x24d   : > { %v2604_v37 = vmax.f32 %v2584_v33, 0.0  ;;  %v12762_v58 = vld [vmem:[#allocation2 + $0xe8] sm:$0xff]  ;;  %v2338_v17 = vadd.f32 %v14768_v44, %v2114_v21 }
 0x24e   : > { %13842 = vst [vmem:[#allocation2 + $0x30] sm:$0xff] %v13385_v42   ;;  %3417 = vmatmul.bf16.gmra.mxu3 %v12762_v58  ;;  %v2115_v63 = vadd.f32 %v14785_v31, %v1891_v20  ;;  %v12786_v33 = vld [vmem:[%s16585_s3 + $0xc8] sm:$0xff]  ;;  %v1892_v58 = vadd.f32 %v14800_v6, %v14588_v29 }
 0x24f   : > { %v2624_v32 = vmul.f32 %v14679_v25, %v2604_v37  ;;  %v12804_v42 = vld [vmem:[%s16585_s3 + $0x108] sm:$0xff]  ;;  %3614 = vmatpush.bf16.msrb.mxu0 %v12786_v33  ;;  %v16619_v33 = vld [vmem:[#allocation6_spill] sm:$0xff] }
 0x250   : > { %v2530_v12 = vpop.f32.mrf.mxu0  ;;  %v2339_v37 = vadd.f32 %v14793_v55, %v2115_v63  ;;  %3838 = vmatpush.bf16.msrb.mxu1 %v12804_v42  ;;  %v2116_v55 = vadd.f32 %v14807_v60, %v1892_v58 }
 0x251   : > { %v2644_v1 = vrot.slane %v2624_v32, 7  ;;  %v2764_v43 = vrot.slane %v2624_v32, 1  ;;  %v2561_v59 = vadd.f32 %v2530_v12, %v2337_v10  ;;  %v3393_v48 = vpop.f32.mrf.mxu3 }
 0x252   : > { %v12745_v13 = vld [vmem:[#allocation2 + $0x90] sm:$0xff]  ;;  %v2340_v60 = vadd.f32 %v14809_v56, %v2116_v55 }
 0x253   : > { %v2659_v45 = vsel %vm411_vm0, %v2643_v34, %v2644_v1  ;;  %v2779_v53 = vsel %vm532_vm1, %v2763_v19, %v2764_v43  ;;  %v2585_v46 = vadd.f32 %v14639_v27, %v2561_v59  ;;  %3051 = vmatmul.bf16.gmra.mxu1 %v12745_v13  ;;  %v3190_v19 = vadd.f32 %v3189_v36, %v3022_v15 }
 0x254   : > { %v13485_v18 = vpack.c.bf16 %v2779_v53, %v2780_v39  ;;  %v1221_v39 = vadd.f32 %v14423_v61, %v993_v0  ;;  %v12846_v61 = vld [vmem:[%s16585_s3 + $0x1b8] sm:$0xff] }
 0x255   : > { %v2605_v5 = vmax.f32 %v2585_v46, 0.0  ;;  %v14893_v31 = vadd.f32 %v3393_v48, %v3190_v19  ;;  %4280 = vmatpush.bf16.msrb.mxu3 %v12846_v61  ;;  %v12803_v48 = vld [vmem:[%s16585_s3 + $0x100] sm:$0xff] }
 0x256   : > { %13862 = vst [vmem:[#allocation2 + $0xf0] sm:$0xff] %v13485_v18   ;;  %v1445_v12 = vadd.f32 %v14425_v62, %v1221_v39  ;;  %v12845_v62 = vld [vmem:[%s16585_s3 + $0x1b0] sm:$0xff]  ;;  %3839 = vmatpush.bf16.msrb.mxu1 %v12803_v48 }
 0x257   : > { %v2625_v2 = vmul.f32 %v14707_v52, %v2605_v5  ;;  %v16621_v48 = vld [vmem:[#allocation9_spill] sm:$0xff] }
 0x258   : > { %v2533_v40 = vpop.f32.mrf.mxu0  ;;  %v1669_v13 = vadd.f32 %v14600_v54, %v1445_v12  ;;  %v12844_v54 = vld [vmem:[%s16585_s3 + $0x1a8] sm:$0xff] }
 0x259   : > { %v2645_v9 = vrot.slane %v2625_v2, 7  ;;  %v13440_v51 = vpack.c.bf16 %v2625_v2, %v2624_v32  ;;  %v2765_v22 = vrot.slane %v2625_v2, 1  ;;  %v2562_v30 = vadd.f32 %v2533_v40, %v2338_v17  ;;  %4281 = vmatpush.bf16.msrb.mxu3 %v12845_v62  ;;  %v16615_v40 = vld [vmem:[#allocation3_spill] sm:$0xff] }
 0x25b   : > { %v2658_v34 = vsel %vm411_vm0, %v2644_v1, %v2645_v9  ;;  %v2778_v44 = vsel %vm532_vm1, %v2764_v43, %v2765_v22  ;;  %13853 = vst [vmem:[#allocation2 + $0x98] sm:$0xff] %v13440_v51   ;;  %v2586_v11 = vadd.f32 %v14639_v27, %v2562_v30  ;;  %v12843_v30 = vld [vmem:[%s16585_s3 + $0x1a0] sm:$0xff] }
 0x25c   : > { %v13390_v57 = vpack.c.bf16 %v2658_v34, %v2659_v45  ;;  %v1893_v45 = vadd.f32 %v14827_v8, %v1669_v13 }
 0x25d   : > { %v2606_v3 = vmax.f32 %v2586_v11, 0.0  ;;  %v12763_v47 = vld [vmem:[#allocation2 + $0xf0] sm:$0xff]  ;;  %4282 = vmatpush.bf16.msrb.mxu3 %v12844_v54  ;;  %v16618_v11 = vld [vmem:[#allocation7_spill] sm:$0xff] }
 0x25e   : > { %13843 = vst [vmem:[#allocation2 + $0x38] sm:$0xff] %v13390_v57   ;;  %3422 = vmatmul.bf16.gmra.mxu3 %v12763_v47  ;;  %v2117_v2 = vadd.f32 %v14829_v38, %v1893_v45  ;;  %v16617_v38 = vld [vmem:[#allocation4_spill] sm:$0xff]  ;;  %v1894_v19 = vadd.f32 %v14847_v7, %v16618_v11  ;;  %v12785_v57 = vld [vmem:[%s16585_s3 + $0xc0] sm:$0xff]  ;;  %v12842_v7 = vld [vmem:[%s16585_s3 + $0x198] sm:$0xff] }
 0x25f   : > { %v2626_v49 = vmul.f32 %v14679_v25, %v2606_v3  ;;  %v12828_v3 = vld [vmem:[%s16585_s3 + $0x178] sm:$0xff]  ;;  %3615 = vmatpush.bf16.msrb.mxu0 %v12785_v57  ;;  %v12827_v45 = vld [vmem:[%s16585_s3 + $0x170] sm:$0xff]  ;;  %v12826_v57 = vld [vmem:[%s16585_s3 + $0x168] sm:$0xff] }
 0x260   : > { %v2535_v50 = vpop.f32.mrf.mxu0  ;;  %v2341_v34 = vadd.f32 %v14833_v16, %v2117_v2  ;;  %4056 = vmatpush.bf16.msrb.mxu2 %v12828_v3  ;;  %v16622_v3 = vrot.slane %v16621_v48, 7 }
 0x261   : > { %v2646_v24 = vrot.slane %v2626_v49, 7  ;;  %v2766_v10 = vrot.slane %v2626_v49, 1  ;;  %v2563_v32 = vadd.f32 %v2535_v50, %v2339_v37  ;;  %4283 = vmatpush.bf16.msrb.mxu3 %v12843_v30  ;;  %v2118_v37 = vadd.f32 %v14852_v35, %v1894_v19  ;;  %v12841_v35 = vld [vmem:[%s16585_s3 + $0x190] sm:$0xff] }
 0x262   : > { %v12746_v26 = vld [vmem:[#allocation2 + $0x98] sm:$0xff] }
 0x263   : > { %v2657_v1 = vsel %vm411_vm0, %v2645_v9, %v2646_v24  ;;  %v2777_v43 = vsel %vm532_vm1, %v2765_v22, %v2766_v10  ;;  %v2587_v59 = vadd.f32 %v14639_v27, %v2563_v32  ;;  %3056 = vmatmul.bf16.gmra.mxu1 %v12746_v26  ;;  %v16616_v9 = vld [vmem:[#allocation5_spill] sm:$0xff]  ;;  %v2342_v26 = vadd.f32 %v14854_v23, %v2118_v37  ;;  %v12864_v23 = vld [vmem:[%s16585_s3 + $0x1f8] sm:$0xff] }
 0x264   : > { %v13490_v29 = vpack.c.bf16 %v2777_v43, %v2778_v44  ;;  %v998_v51 = vadd.f32 %v16616_v9, %v16615_v40  ;;  %v12840_v43 = vld [vmem:[%s16585_s3 + $0x188] sm:$0xff]  ;;  %4504 = vmatpush.bf16.msra.mxu0 %v12864_v23  ;;  %4057 = vmatpush.bf16.msrb.mxu2 %v12827_v45  ;;  %v12830_v23 = vld [vmem:[#allocation2 + $0x18] sm:$0xff] }
 0x265   : > { %v2607_v6 = vmax.f32 %v2587_v59, 0.0  ;;  %4284 = vmatpush.bf16.msrb.mxu3 %v12842_v7 }
 0x266   : > { %13863 = vst [vmem:[#allocation2 + $0xf8] sm:$0xff] %v13490_v29   ;;  %v1223_v36 = vadd.f32 %v16617_v38, %v998_v51 }
 0x267   : > { %v2627_v21 = vmul.f32 %v14707_v52, %v2607_v6 }
 0x268   : > { %v2538_v53 = vpop.f32.mrf.mxu0  ;;  %v1447_v42 = vadd.f32 %v16619_v33, %v1223_v36  ;;  %v16624_v33 = vld [vmem:[#allocation10_spill] sm:$0xff]  ;;  %4058 = vmatpush.bf16.msrb.mxu2 %v12826_v57 }
 0x269   : > { %v2647_v46 = vrot.slane %v2627_v21, 7  ;;  %v13445_v18 = vpack.c.bf16 %v2627_v21, %v2626_v49  ;;  %v2767_v5 = vrot.slane %v2627_v21, 1  ;;  %v2564_v17 = vadd.f32 %v2538_v53, %v2340_v60  ;;  %4285 = vmatpush.bf16.msrb.mxu3 %v12841_v35  ;;  %v12882_v53 = vld [vmem:[%s16585_s3 + $0x238] sm:$0xff] }
 0x26a   : > { %4728 = vmatpush.bf16.msra.mxu1 %v12882_v53  ;;  %v12795_v53 = vld [vmem:[#allocation2 + $0x78] sm:$0xff] }
 0x26b   : > { %v2656_v20 = vsel %vm411_vm0, %v2646_v24, %v2647_v46  ;;  %v2776_v56 = vsel %vm532_vm1, %v2766_v10, %v2767_v5  ;;  %13854 = vst [vmem:[#allocation2 + $0xa0] sm:$0xff] %v13445_v18   ;;  %v2588_v8 = vadd.f32 %v14639_v27, %v2564_v17  ;;  %v16620_v24 = vld [vmem:[#allocation8_spill] sm:$0xff]  ;;  %v12839_v18 = vld [vmem:[%s16585_s3 + $0x180] sm:$0xff] }
 0x26c   : > { %v13395_v22 = vpack.c.bf16 %v2656_v20, %v2657_v1  ;;  %v1671_v10 = vadd.f32 %v16620_v24, %v1447_v42  ;;  %v14967_v1 = vpop.f32.mrf.mxu1  ;;  %v12793_v24 = vld [vmem:[#allocation2 + $0x68] sm:$0xff] }
 0x26d   : > { %v2608_v63 = vmax.f32 %v2588_v8, 0.0  ;;  %v12764_v15 = vld [vmem:[#allocation2 + $0xf8] sm:$0xff]  ;;  %4286 = vmatpush.bf16.msrb.mxu3 %v12840_v43  ;;  %v12794_v43 = vld [vmem:[#allocation2 + $0x70] sm:$0xff] }
 0x26e   : > { %13844 = vst [vmem:[#allocation2 + $0x40] sm:$0xff] %v13395_v22   ;;  %3427 = vmatmul.bf16.gmra.mxu3 %v12764_v15  ;;  %v1895_v59 = vadd.f32 %v14869_v28, %v1671_v10 }
 0x26f   : > { %v2628_v44 = vmul.f32 %v14679_v25, %v2608_v63 }
 0x270   : > { %v2540_v0 = vpop.f32.mrf.mxu0  ;;  %v2119_v21 = vadd.f32 %v14871_v4, %v1895_v59  ;;  %v12825_v59 = vld [vmem:[%s16585_s3 + $0x160] sm:$0xff] }
 0x271   : > { %v2648_v16 = vrot.slane %v2628_v44, 7  ;;  %v2768_v47 = vrot.slane %v2628_v44, 1  ;;  %v2565_v39 = vadd.f32 %v2540_v0, %v2341_v34  ;;  %4287 = vmatpush.bf16.msrb.mxu3 %v12839_v18  ;;  %v12863_v0 = vld [vmem:[%s16585_s3 + $0x1f0] sm:$0xff]  ;;  %4059 = vmatpush.bf16.msrb.mxu2 %v12825_v59  ;;  %v12879_v18 = vld [vmem:[%s16585_s3 + $0x220] sm:$0xff] }
 0x272   : > { %v12747_v49 = vld [vmem:[#allocation2 + $0xa0] sm:$0xff]  ;;  %v2343_v2 = vadd.f32 %v14879_v41, %v2119_v21  ;;  %4505 = vmatpush.bf16.msra.mxu0 %v12863_v0 }
 0x273   : > { %v2655_v50 = vsel %vm411_vm0, %v2647_v46, %v2648_v16  ;;  %v2775_v61 = vsel %vm532_vm1, %v2767_v5, %v2768_v47  ;;  %v2589_v58 = vadd.f32 %v14639_v27, %v2565_v39  ;;  %3061 = vmatmul.bf16.gmra.mxu1 %v12747_v49  ;;  %v16623_v39 = vrot.slane %v16621_v48, 1  ;;  %v12822_v48 = vld [vmem:[%s16585_s3 + $0x148] sm:$0xff] }
 0x274   : > { %v13495_v32 = vpack.c.bf16 %v2775_v61, %v2776_v56  ;;  %v12881_v61 = vld [vmem:[%s16585_s3 + $0x230] sm:$0xff] }
 0x275   : > { %v2609_v12 = vmax.f32 %v2589_v58, 0.0  ;;  %4729 = vmatpush.bf16.msra.mxu1 %v12881_v61 }
 0x276   : > { %13864 = vst [vmem:[#allocation2 + $0x100] sm:$0xff] %v13495_v32  }
 0x277   : > { %v2629_v55 = vmul.f32 %v14707_v52, %v2609_v12  ;;  %v12829_v12 = vld [vmem:[#allocation2 + $0x10] sm:$0xff] }
 0x278   : > { %v2543_v13 = vpop.f32.mrf.mxu0 }
 0x279   : > { %v2649_v29 = vrot.slane %v2629_v55, 7  ;;  %v13450_v62 = vpack.c.bf16 %v2629_v55, %v2628_v44  ;;  %v2769_v6 = vrot.slane %v2629_v55, 1  ;;  %v2566_v60 = vadd.f32 %v2543_v13, %v2342_v26  ;;  %v12862_v55 = vld [vmem:[%s16585_s3 + $0x1e8] sm:$0xff] }
 0x27a   : > { %v12880_v13 = vld [vmem:[%s16585_s3 + $0x228] sm:$0xff]  ;;  %4506 = vmatpush.bf16.msra.mxu0 %v12862_v55  ;;  %v12728_v55 = vld [vmem:[#allocation2 + $0x38] sm:$0xff] }
 0x27b   : > { %v2654_v28 = vsel %vm411_vm0, %v2648_v16, %v2649_v29  ;;  %13855 = vst [vmem:[#allocation2 + $0xa8] sm:$0xff] %v13450_v62   ;;  %v2590_v54 = vadd.f32 %v14639_v27, %v2566_v60  ;;  %v2774_v46 = vsel %vm532_vm1, %v2768_v47, %v2769_v6  ;;  %v12776_v62 = vld [vmem:[#allocation2 + $0x10] sm:$0xff]  ;;  %4730 = vmatpush.bf16.msra.mxu1 %v12880_v13 }
 0x27c   : > { %v13400_v4 = vpack.c.bf16 %v2654_v28, %v2655_v50  ;;  %v12861_v28 = vld [vmem:[%s16585_s3 + $0x1e0] sm:$0xff] }
 0x27d   : > { %v2610_v5 = vmax.f32 %v2590_v54, 0.0  ;;  %v12765_v17 = vld [vmem:[#allocation2 + $0x100] sm:$0xff]  ;;  %v12724_v54 = vld [vmem:[#allocation2 + $0x18] sm:$0xff] }
 0x27e   : > { %13845 = vst [vmem:[#allocation2 + $0x48] sm:$0xff] %v13400_v4   ;;  %3432 = vmatmul.bf16.gmra.mxu3 %v12765_v17  ;;  %4507 = vmatpush.bf16.msra.mxu0 %v12861_v28  ;;  %v12824_v4 = vld [vmem:[%s16585_s3 + $0x158] sm:$0xff]  ;;  %v12729_v28 = vld [vmem:[#allocation2 + $0x40] sm:$0xff] }
 0x27f   : > { %v2630_v20 = vmul.f32 0.0, %v2610_v5  ;;  %4060 = vmatpush.bf16.msrb.mxu2 %v12824_v4  ;;  %4731 = vmatpush.bf16.msra.mxu1 %v12879_v18  ;;  %v12875_v4 = vld [vmem:[%s16585_s3 + $0x200] sm:$0xff]  ;;  %v12918_v18 = vld [vmem:[%s16587_s5 + $0x78] sm:$0xff] }
 0x280   : > { %v2545_v56 = vpop.f32.mrf.mxu0  ;;  %v14992_v51 = vpop.f32.mrf.mxu1 }
 0x281   : > { %v2650_v8 = vrot.slane %v2630_v20, 7  ;;  %v2770_v40 = vrot.slane %v2630_v20, 1  ;;  %v2567_v9 = vadd.f32 %v2545_v56, %v2343_v2  ;;  %v12831_v2 = vld [vmem:[#allocation2 + $0x20] sm:$0xff] }
 0x282   : > { %v12748_v22 = vld [vmem:[#allocation2 + $0xa8] sm:$0xff]  ;;  %v12796_v56 = vld [vmem:[#allocation2 + $0x80] sm:$0xff] }
 0x283   : > { %v2653_v30 = vsel %vm411_vm0, %v2649_v29, %v2650_v8  ;;  %v2773_v63 = vsel %vm532_vm1, %v2769_v6, %v2770_v40  ;;  %v2591_v15 = vadd.f32 %v14639_v27, %v2567_v9  ;;  %3066 = vmatmul.bf16.gmra.mxu1 %v12748_v22  ;;  %v12723_v29 = vld [vmem:[#allocation2 + $0x10] sm:$0xff]  ;;  %v15038_v6 = vpop.f32.mrf.mxu3  ;;  %v12778_v9 = vld [vmem:[#allocation2 + $0x20] sm:$0xff] }
 0x284   : > { %v13500_v38 = vpack.c.bf16 %v2773_v63, %v2774_v46  ;;  %v12777_v46 = vld [vmem:[#allocation2 + $0x18] sm:$0xff]  ;;  %v12823_v63 = vld [vmem:[%s16585_s3 + $0x150] sm:$0xff] }
 0x285   : > { %v2611_v41 = vmax.f32 %v2591_v15, 0.0  ;;  %v12878_v15 = vld [vmem:[%s16585_s3 + $0x218] sm:$0xff]  ;;  %4061 = vmatpush.bf16.msrb.mxu2 %v12823_v63  ;;  %v12801_v63 = vld [vmem:[#allocation2 + $0xa8] sm:$0xff] }
 0x286   : > { %13865 = vst [vmem:[#allocation2 + $0x108] sm:$0xff] %v13500_v38   ;;  %4732 = vmatpush.bf16.msra.mxu1 %v12878_v15  ;;  %v12832_v38 = vld [vmem:[#allocation2 + $0x28] sm:$0xff] }
 0x287   : > { %v2631_v36 = vmul.f32 0.0, %v2611_v41 }
 0x288   : > { %v14999_v19 = vpop.f32.mrf.mxu1 }
 0x289   : > { %v2651_v34 = vrot.slane %v2631_v36, 7  ;;  %v13455_v44 = vpack.c.bf16 %v2631_v36, %v2630_v20  ;;  %v2771_v11 = vrot.slane %v2631_v36, 1  ;;  %4062 = vmatpush.bf16.msrb.mxu2 %v12822_v48 }
 0x28b   : > { %v2652_v27 = vsel %vm411_vm0, %v2650_v8, %v2651_v34  ;;  %v2671_v16 = vsel %vm411_vm0, %v2651_v34, %v16622_v3  ;;  %13856 = vst [vmem:[#allocation2 + $0xb0] sm:$0xff] %v13455_v44   ;;  %v2772_v47 = vsel %vm532_vm1, %v2770_v40, %v2771_v11  ;;  %v2791_v7 = vsel %vm532_vm1, %v2771_v11, %v16623_v39  ;;  %v12725_v40 = vld [vmem:[#allocation2 + $0x20] sm:$0xff]  ;;  %v12797_v34 = vld [vmem:[#allocation2 + $0x88] sm:$0xff]  ;;  %v12833_v3 = vld [vmem:[#allocation2 + $0x30] sm:$0xff] }
 0x28c   : > { %v13360_v42 = vpack.c.bf16 %v16624_v33, %v2671_v16  ;;  %v13405_v37 = vpack.c.bf16 %v2652_v27, %v2653_v30  ;;  %v13505_v49 = vpack.c.bf16 %v2791_v7, %v2772_v47  ;;  %v12860_v30 = vld [vmem:[%s16585_s3 + $0x1d8] sm:$0xff]  ;;  %v12726_v44 = vld [vmem:[#allocation2 + $0x28] sm:$0xff]  ;;  %v12859_v27 = vld [vmem:[%s16585_s3 + $0x1d0] sm:$0xff] }
 0x28d   : > { %v12766_v50 = vld [vmem:[#allocation2 + $0x108] sm:$0xff]  ;;  %4508 = vmatpush.bf16.msra.mxu0 %v12860_v30  ;;  %v12877_v16 = vld [vmem:[%s16585_s3 + $0x210] sm:$0xff]  ;;  %v3191_v30 = vpop.f32.mrf.mxu2 }
 0x28e   : > { %13837 = vst [vmem:[#allocation2 + $0x8] sm:$0xff] %v13360_v42   ;;  %3437 = vmatmul.bf16.gmra.mxu3 %v12766_v50  ;;  %v12779_v11 = vld [vmem:[#allocation2 + $0x28] sm:$0xff]  ;;  %4733 = vmatpush.bf16.msra.mxu1 %v12877_v16  ;;  %v12798_v39 = vld [vmem:[#allocation2 + $0x90] sm:$0xff]  ;;  %v12834_v50 = vld [vmem:[#allocation2 + $0x38] sm:$0xff] }
 0x28f   : > { %13846 = vst [vmem:[#allocation2 + $0x50] sm:$0xff] %v13405_v37   ;;  %v12727_v33 = vld [vmem:[#allocation2 + $0x30] sm:$0xff] }
 0x290   : > { %13866 = vst [vmem:[#allocation2 + $0x110] sm:$0xff] %v13505_v49   ;;  %v15023_v58 = vpop.f32.mrf.mxu1  ;;  %v12780_v42 = vld [vmem:[#allocation2 + $0x30] sm:$0xff] }
 0x291   : > { %v15042_v21 = vpop.f32.mrf.mxu3  ;;  %4509 = vmatpush.bf16.msra.mxu0 %v12859_v27  ;;  %v3192_v27 = vadd.f32 %v3191_v30, %v14967_v1 }
 0x293   : > { %3840 = vmatmul.bf16.vlgmr.msrb.gmra.mxu1 %v12793_v24  ;;  %v12858_v24 = vld [vmem:[%s16585_s3 + $0x1c8] sm:$0xff] }
 0x295   : > { %v12722_v10 = vld [vmem:[#allocation2 + $0x8] sm:$0xff]  ;;  %4510 = vmatpush.bf16.msra.mxu0 %v12858_v24 }
 0x296   : > { %v12775_v32 = vld [vmem:[#allocation2 + $0x8] sm:$0xff]  ;;  %3193 = vmatmul.bf16.gmra.mxu2 %v12722_v10  ;;  %v12799_v10 = vld [vmem:[#allocation2 + $0x98] sm:$0xff]  ;;  %v12837_v24 = vld [vmem:[#allocation2 + $0x50] sm:$0xff] }
 0x297   : > { %3616 = vmatmul.bf16.vlgmr.msrb.gmra.mxu0 %v12775_v32  ;;  %v12821_v32 = vld [vmem:[%s16585_s3 + $0x140] sm:$0xff] }
 0x298   : > { %v15025_v35 = vpop.f32.mrf.mxu1  ;;  %4063 = vmatpush.bf16.msrb.mxu2 %v12821_v32 }
 0x299   : > { %v15057_v17 = vpop.f32.mrf.mxu3 }
 0x29c   : > { %5272 = vmatpush.bf16.msra.mxu2 %v12918_v18 }
 0x29e   : > { %4288 = vmatmul.bf16.vlgmr.msrb.gmra.mxu3 %v12829_v12  ;;  %v12876_v12 = vld [vmem:[%s16585_s3 + $0x208] sm:$0xff] }
 0x29f   : > { %4734 = vmatpush.bf16.msra.mxu1 %v12876_v12 }
 0x2a0   : > { %v15027_v26 = vpop.f32.mrf.mxu1 }
 0x2a1   : > { %v15061_v8 = vpop.f32.mrf.mxu3 }
 0x2a3   : > { %3845 = vmatmul.bf16.gmra.mxu1 %v12794_v43  ;;  %v12781_v43 = vld [vmem:[#allocation2 + $0x38] sm:$0xff] }
 0x2a4   : > { %4735 = vmatpush.bf16.msra.mxu1 %v12875_v4 }
 0x2a6   : > { %3198 = vmatmul.bf16.gmra.mxu2 %v12723_v29  ;;  %v12835_v29 = vld [vmem:[#allocation2 + $0x40] sm:$0xff] }
 0x2a7   : > { %3621 = vmatmul.bf16.gmra.mxu0 %v12776_v62 }
 0x2a8   : > { %v15040_v60 = vpop.f32.mrf.mxu1 }
 0x2a9   : > { %v15074_v41 = vpop.f32.mrf.mxu3 }
 0x2ae   : > { %4293 = vmatmul.bf16.gmra.mxu3 %v12830_v23 }
 0x2b0   : > { %v15044_v45 = vpop.f32.mrf.mxu1 }
 0x2b1   : > { %v15078_v0 = vpop.f32.mrf.mxu3 }
 0x2b3   : > { %3850 = vmatmul.bf16.gmra.mxu1 %v12795_v53  ;;  %v12800_v53 = vld [vmem:[#allocation2 + $0xa0] sm:$0xff] }
 0x2b6   : > { %3203 = vmatmul.bf16.gmra.mxu2 %v12724_v54  ;;  %v12782_v54 = vld [vmem:[#allocation2 + $0x40] sm:$0xff] }
 0x2b7   : > { %3626 = vmatmul.bf16.gmra.mxu0 %v12777_v46  ;;  %v12857_v46 = vld [vmem:[%s16585_s3 + $0x1c0] sm:$0xff] }
 0x2b8   : > { %v15055_v5 = vpop.f32.mrf.mxu1  ;;  %4511 = vmatpush.bf16.msra.mxu0 %v12857_v46 }
 0x2b9   : > { %v15093_v7 = vpop.f32.mrf.mxu3 }
 0x2be   : > { %4298 = vmatmul.bf16.gmra.mxu3 %v12831_v2 }
 0x2c0   : > { %v15059_v20 = vpop.f32.mrf.mxu1 }
 0x2c1   : > { %v15097_v49 = vpop.f32.mrf.mxu3 }
 0x2c3   : > { %3855 = vmatmul.bf16.gmra.mxu1 %v12796_v56 }
 0x2c6   : > { %3208 = vmatmul.bf16.gmra.mxu2 %v12725_v40  ;;  %v12836_v40 = vld [vmem:[#allocation2 + $0x48] sm:$0xff] }
 0x2c7   : > { %3631 = vmatmul.bf16.gmra.mxu0 %v12778_v9 }
 0x2c8   : > { %v15063_v22 = vpop.f32.mrf.mxu1 }
 0x2c9   : > { %v15110_v59 = vpop.f32.mrf.mxu3 }
 0x2ce   : > { %4303 = vmatmul.bf16.gmra.mxu3 %v12832_v38 }
 0x2d0   : > { %v15076_v36 = vpop.f32.mrf.mxu1 }
 0x2d1   : > { %v15114_v62 = vpop.f32.mrf.mxu3 }
 0x2d3   : > { %3860 = vmatmul.bf16.gmra.mxu1 %v12797_v34 }
 0x2d6   : > { %3213 = vmatmul.bf16.gmra.mxu2 %v12726_v44  ;;  %v12730_v44 = vld [vmem:[#allocation2 + $0x48] sm:$0xff] }
 0x2d7   : > { %3636 = vmatmul.bf16.gmra.mxu0 %v12779_v11  ;;  %v12783_v11 = vld [vmem:[#allocation2 + $0x48] sm:$0xff] }
 0x2d8   : > { %v15080_v57 = vpop.f32.mrf.mxu1 }
 0x2d9   : > { %v15129_v56 = vpop.f32.mrf.mxu3 }
 0x2de   : > { %4308 = vmatmul.bf16.gmra.mxu3 %v12833_v3 }
 0x2e0   : > { %v15091_v47 = vpop.f32.mrf.mxu1 }
 0x2e1   : > { %v15131_v38 = vpop.f32.mrf.mxu3 }
 0x2e3   : > { %3865 = vmatmul.bf16.gmra.mxu1 %v12798_v39  ;;  %v3444_v39 = vadd.f32 %v15038_v6, %v3192_v27 }
 0x2e6   : > { %3218 = vmatmul.bf16.gmra.mxu2 %v12727_v33  ;;  %v12917_v33 = vld [vmem:[%s16587_s5 + $0x70] sm:$0xff] }
 0x2e7   : > { %3641 = vmatmul.bf16.gmra.mxu0 %v12780_v42  ;;  %5273 = vmatpush.bf16.msra.mxu2 %v12917_v33 }
 0x2e8   : > { %v15095_v37 = vpop.f32.mrf.mxu1 }
 0x2ee   : > { %4313 = vmatmul.bf16.gmra.mxu3 %v12834_v50 }
 0x2f0   : > { %v15099_v61 = vpop.f32.mrf.mxu1 }
 0x2f3   : > { %3870 = vmatmul.bf16.gmra.mxu1 %v12799_v10 }
 0x2f6   : > { %3223 = vmatmul.bf16.gmra.mxu2 %v12728_v55  ;;  %v12802_v55 = vld [vmem:[#allocation2 + $0xb0] sm:$0xff] }
 0x2f7   : > { %3646 = vmatmul.bf16.gmra.mxu0 %v12781_v43 }
 0x2f8   : > { %v15112_v13 = vpop.f32.mrf.mxu1 }
 0x2fe   : > { %4318 = vmatmul.bf16.gmra.mxu3 %v12835_v29 }
 0x300   : > { %v15116_v23 = vpop.f32.mrf.mxu1 }
 0x303   : > { %3875 = vmatmul.bf16.gmra.mxu1 %v12800_v53  ;;  %v12784_v53 = vld [vmem:[#allocation2 + $0x50] sm:$0xff] }
 0x306   : > { %3228 = vmatmul.bf16.gmra.mxu2 %v12729_v28  ;;  %v12811_v28 = vld [vmem:[#allocation2 + $0xc8] sm:$0xff] }
 0x307   : > { %3651 = vmatmul.bf16.gmra.mxu0 %v12782_v54 }
 0x308   : > { %v15127_v2 = vpop.f32.mrf.mxu1 }
 0x30e   : > { %4323 = vmatmul.bf16.gmra.mxu3 %v12836_v40 }
 0x310   : > { %v3841_v9 = vpop.f32.mrf.mxu1 }
 0x313   : > { %3880 = vmatmul.bf16.gmra.mxu1 %v12801_v63 }
 0x314   : > { %v3617_v15 = vpop.f32.mrf.mxu0 }
 0x315   : > { %v3667_v34 = vadd.f32 %v3617_v15, %v14893_v31  ;;  %v15141_v31 = vpop.f32.mrf.mxu3 }
 0x316   : > { %3233 = vmatmul.bf16.gmra.mxu2 %v12730_v44 }
 0x317   : > { %3656 = vmatmul.bf16.gmra.mxu0 %v12783_v11  ;;  %v15135_v48 = vadd.f32 %v3841_v9, %v3667_v34  ;;  %v12865_v34 = vld [vmem:[#allocation2 + $0xd0] sm:$0xff] }
 0x318   : > { %v3843_v3 = vpop.f32.mrf.mxu1 }
 0x319   : > { %v3194_v16 = vpop.f32.mrf.mxu2 }
 0x31a   : > { %v3195_v1 = vadd.f32 %v3194_v16, %v14992_v51 }
 0x31c   : > { %v3619_v42 = vpop.f32.mrf.mxu0  ;;  %v3445_v6 = vadd.f32 %v15042_v21, %v3195_v1  ;;  %v12916_v21 = vld [vmem:[%s16587_s5 + $0x68] sm:$0xff] }
 0x31d   : > { %v3668_v50 = vadd.f32 %v3619_v42, %v3444_v39  ;;  %5274 = vmatpush.bf16.msra.mxu2 %v12916_v21 }
 0x31e   : > { %4328 = vmatmul.bf16.gmra.mxu3 %v12837_v24 }
 0x31f   : > { %v15144_v10 = vadd.f32 %v3843_v3, %v3668_v50  ;;  %v12847_v3 = vld [vmem:[#allocation2 + $0x70] sm:$0xff] }
 0x320   : > { %v3846_v32 = vpop.f32.mrf.mxu1 }
 0x321   : > { %v3196_v12 = vpop.f32.mrf.mxu2 }
 0x322   : > { %v3197_v54 = vadd.f32 %v3196_v12, %v14999_v19 }
 0x323   : > { %3885 = vmatmul.bf16.gmra.mxu1 %v12802_v55  ;;  %v12866_v55 = vld [vmem:[#allocation2 + $0xd8] sm:$0xff] }
 0x324   : > { %v3622_v43 = vpop.f32.mrf.mxu0  ;;  %v3446_v18 = vadd.f32 %v15057_v17, %v3197_v54  ;;  %v12812_v17 = vld [vmem:[#allocation2 + $0xd0] sm:$0xff] }
 0x325   : > { %v3669_v29 = vadd.f32 %v3622_v43, %v3445_v6 }
 0x326   : > { %4064 = vmatmul.bf16.vlgmr.msrb.gmra.mxu2 %v12811_v28  ;;  %v15169_v28 = vpop.f32.mrf.mxu3 }
 0x327   : > { %3661 = vmatmul.bf16.gmra.mxu0 %v12784_v53  ;;  %v15148_v46 = vadd.f32 %v3846_v32, %v3669_v29  ;;  %v12813_v53 = vld [vmem:[#allocation2 + $0xd8] sm:$0xff] }
 0x328   : > { %v3848_v51 = vpop.f32.mrf.mxu1 }
 0x329   : > { %v3199_v4 = vpop.f32.mrf.mxu2 }
 0x32a   : > { %v3200_v30 = vadd.f32 %v3199_v4, %v15023_v58 }
 0x32c   : > { %v3624_v40 = vpop.f32.mrf.mxu0  ;;  %v3447_v44 = vadd.f32 %v15061_v8, %v3200_v30 }
 0x32d   : > { %v3670_v9 = vadd.f32 %v3624_v40, %v3446_v18 }
 0x32e   : > { %v15178_v30 = vpop.f32.mrf.mxu3 }
 0x32f   : > { %v15155_v63 = vadd.f32 %v3848_v51, %v3670_v9 }
 0x330   : > { %v3851_v19 = vpop.f32.mrf.mxu1 }
 0x331   : > { %v3201_v15 = vpop.f32.mrf.mxu2 }
 0x332   : > { %v3202_v16 = vadd.f32 %v3201_v15, %v15025_v35  ;;  %v12915_v35 = vld [vmem:[%s16587_s5 + $0x60] sm:$0xff] }
 0x333   : > { %4736 = vmatmul.bf16.vlgmr.msra.gmra.mxu1 %v12865_v34  ;;  %5275 = vmatpush.bf16.msra.mxu2 %v12915_v35  ;;  %v12867_v34 = vld [vmem:[#allocation2 + $0xe0] sm:$0xff] }
 0x334   : > { %v3627_v11 = vpop.f32.mrf.mxu0  ;;  %v3448_v42 = vadd.f32 %v15074_v41, %v3202_v16  ;;  %v12848_v41 = vld [vmem:[#allocation2 + $0x78] sm:$0xff] }
 0x335   : > { %v3671_v27 = vadd.f32 %v3627_v11, %v3447_v44 }
 0x336   : > { %4069 = vmatmul.bf16.gmra.mxu2 %v12812_v17  ;;  %v12849_v17 = vld [vmem:[#allocation2 + $0x80] sm:$0xff] }
 0x337   : > { %4512 = vmatmul.bf16.vlgmr.msra.gmra.mxu0 %v12847_v3  ;;  %v15159_v39 = vadd.f32 %v3851_v19, %v3671_v27  ;;  %v12814_v27 = vld [vmem:[#allocation2 + $0xe0] sm:$0xff] }
 0x338   : > { %v3853_v58 = vpop.f32.mrf.mxu1 }
 0x339   : > { %v3204_v33 = vpop.f32.mrf.mxu2 }
 0x33a   : > { %v3205_v1 = vadd.f32 %v3204_v33, %v15027_v26 }
 0x33c   : > { %v3629_v50 = vpop.f32.mrf.mxu0  ;;  %v3449_v6 = vadd.f32 %v15078_v0, %v3205_v1 }
 0x33d   : > { %v3672_v24 = vadd.f32 %v3629_v50, %v3448_v42 }
 0x33f   : > { %v15163_v8 = vadd.f32 %v3853_v58, %v3672_v24  ;;  %v15187_v58 = vpop.f32.mrf.mxu3 }
 0x340   : > { %v3856_v32 = vpop.f32.mrf.mxu1 }
 0x341   : > { %v3206_v12 = vpop.f32.mrf.mxu2 }
 0x342   : > { %v3207_v26 = vadd.f32 %v3206_v12, %v15040_v60  ;;  %v12868_v12 = vld [vmem:[#allocation2 + $0xe8] sm:$0xff] }
 0x343   : > { %4741 = vmatmul.bf16.gmra.mxu1 %v12866_v55 }
 0x344   : > { %v3632_v43 = vpop.f32.mrf.mxu0  ;;  %v3450_v4 = vadd.f32 %v15093_v7, %v3207_v26 }
 0x345   : > { %v3673_v29 = vadd.f32 %v3632_v43, %v3449_v6 }
 0x346   : > { %4074 = vmatmul.bf16.gmra.mxu2 %v12813_v53  ;;  %v12850_v53 = vld [vmem:[#allocation2 + $0x88] sm:$0xff] }
 0x347   : > { %4517 = vmatmul.bf16.gmra.mxu0 %v12848_v41  ;;  %v15172_v54 = vadd.f32 %v3856_v32, %v3673_v29  ;;  %v15194_v6 = vpop.f32.mrf.mxu3  ;;  %v12815_v29 = vld [vmem:[#allocation2 + $0xe8] sm:$0xff] }
 0x348   : > { %v3858_v51 = vpop.f32.mrf.mxu1 }
 0x349   : > { %v3209_v0 = vpop.f32.mrf.mxu2 }
 0x34a   : > { %v3210_v9 = vadd.f32 %v3209_v0, %v15044_v45  ;;  %v12914_v45 = vld [vmem:[%s16587_s5 + $0x58] sm:$0xff] }
 0x34b   : > { %5276 = vmatpush.bf16.msra.mxu2 %v12914_v45 }
 0x34c   : > { %v3634_v18 = vpop.f32.mrf.mxu0  ;;  %v3451_v60 = vadd.f32 %v15097_v49, %v3210_v9 }
 0x34d   : > { %v3674_v40 = vadd.f32 %v3634_v18, %v3450_v4 }
 0x34f   : > { %v15176_v21 = vadd.f32 %v3858_v51, %v3674_v40  ;;  %v15203_v18 = vpop.f32.mrf.mxu3 }
 0x350   : > { %v3861_v19 = vpop.f32.mrf.mxu1 }
 0x351   : > { %v3211_v15 = vpop.f32.mrf.mxu2 }
 0x352   : > { %v3212_v7 = vadd.f32 %v3211_v15, %v15055_v5  ;;  %v12869_v15 = vld [vmem:[#allocation2 + $0xf0] sm:$0xff] }
 0x353   : > { %4746 = vmatmul.bf16.gmra.mxu1 %v12867_v34 }
 0x354   : > { %v3637_v44 = vpop.f32.mrf.mxu0  ;;  %v3452_v33 = vadd.f32 %v15110_v59, %v3212_v7 }
 0x355   : > { %v3675_v11 = vadd.f32 %v3637_v44, %v3451_v60  ;;  %v12816_v44 = vld [vmem:[#allocation2 + $0xf0] sm:$0xff] }
 0x356   : > { %4079 = vmatmul.bf16.gmra.mxu2 %v12814_v27 }
 0x357   : > { %4522 = vmatmul.bf16.gmra.mxu0 %v12849_v17  ;;  %v15185_v3 = vadd.f32 %v3861_v19, %v3675_v11  ;;  %v12851_v11 = vld [vmem:[#allocation2 + $0x90] sm:$0xff]  ;;  %v15212_v7 = vpop.f32.mrf.mxu3 }
 0x358   : > { %v3863_v16 = vpop.f32.mrf.mxu1 }
 0x359   : > { %v3214_v49 = vpop.f32.mrf.mxu2 }
 0x35a   : > { %v3215_v24 = vadd.f32 %v3214_v49, %v15059_v20 }
 0x35c   : > { %v3639_v42 = vpop.f32.mrf.mxu0  ;;  %v3453_v55 = vadd.f32 %v15114_v62, %v3215_v24  ;;  %v12913_v62 = vld [vmem:[%s16587_s5 + $0x50] sm:$0xff] }
 0x35d   : > { %v3676_v50 = vadd.f32 %v3639_v42, %v3452_v33  ;;  %5277 = vmatpush.bf16.msra.mxu2 %v12913_v62 }
 0x35f   : > { %v15191_v5 = vadd.f32 %v3863_v16, %v3676_v50  ;;  %v15221_v24 = vpop.f32.mrf.mxu3 }
 0x360   : > { %v3866_v1 = vpop.f32.mrf.mxu1 }
 0x361   : > { %v3216_v32 = vpop.f32.mrf.mxu2 }
 0x362   : > { %v3217_v59 = vadd.f32 %v3216_v32, %v15063_v22  ;;  %v12870_v32 = vld [vmem:[#allocation2 + $0xf8] sm:$0xff] }
 0x363   : > { %4751 = vmatmul.bf16.gmra.mxu1 %v12868_v12 }
 0x364   : > { %v3642_v35 = vpop.f32.mrf.mxu0  ;;  %v3454_v51 = vadd.f32 %v15129_v56, %v3217_v59 }
 0x365   : > { %v3677_v43 = vadd.f32 %v3642_v35, %v3453_v55  ;;  %v12817_v35 = vld [vmem:[#allocation2 + $0xf8] sm:$0xff] }
 0x366   : > { %4084 = vmatmul.bf16.gmra.mxu2 %v12815_v29 }
 0x367   : > { %4527 = vmatmul.bf16.gmra.mxu0 %v12850_v53  ;;  %v15197_v41 = vadd.f32 %v3866_v1, %v3677_v43  ;;  %v12852_v43 = vld [vmem:[#allocation2 + $0x98] sm:$0xff] }
 0x368   : > { %v3868_v20 = vpop.f32.mrf.mxu1 }
 0x369   : > { %v3219_v26 = vpop.f32.mrf.mxu2 }
 0x36a   : > { %v3220_v40 = vadd.f32 %v3219_v26, %v15076_v36  ;;  %v15231_v26 = vpop.f32.mrf.mxu3 }
 0x36c   : > { %v3644_v0 = vpop.f32.mrf.mxu0  ;;  %v3455_v34 = vadd.f32 %v15131_v38, %v3220_v40  ;;  %v12912_v38 = vld [vmem:[%s16587_s5 + $0x48] sm:$0xff] }
 0x36d   : > { %v3678_v4 = vadd.f32 %v3644_v0, %v3454_v51  ;;  %5278 = vmatpush.bf16.msra.mxu2 %v12912_v38  ;;  %v12898_v0 = vld [vmem:[%s16587_s5 + $0x28] sm:$0xff] }
 0x36f   : > { %v15206_v22 = vadd.f32 %v3868_v20, %v3678_v4 }
 0x370   : > { %v3871_v9 = vpop.f32.mrf.mxu1 }
 0x371   : > { %v3221_v19 = vpop.f32.mrf.mxu2 }
 0x372   : > { %v3222_v27 = vadd.f32 %v3221_v19, %v15080_v57 }
 0x373   : > { %4756 = vmatmul.bf16.gmra.mxu1 %v12869_v15 }
 0x374   : > { %v3647_v60 = vpop.f32.mrf.mxu0  ;;  %v3456_v16 = vadd.f32 %v15141_v31, %v3222_v27  ;;  %v15249_v27 = vpop.f32.mrf.mxu3 }
 0x375   : > { %v3679_v56 = vadd.f32 %v3647_v60, %v3455_v34  ;;  %v12911_v34 = vld [vmem:[%s16587_s5 + $0x40] sm:$0xff] }
 0x376   : > { %4089 = vmatmul.bf16.gmra.mxu2 %v12816_v44 }
 0x377   : > { %4532 = vmatmul.bf16.gmra.mxu0 %v12851_v11  ;;  %v15210_v17 = vadd.f32 %v3871_v9, %v3679_v56  ;;  %v12897_v56 = vld [vmem:[%s16587_s5 + $0x20] sm:$0xff]  ;;  %5279 = vmatpush.bf16.msra.mxu2 %v12911_v34 }
 0x378   : > { %v3873_v36 = vpop.f32.mrf.mxu1  ;;  %v12853_v11 = vld [vmem:[#allocation2 + $0xa0] sm:$0xff] }
 0x379   : > { %v3224_v45 = vpop.f32.mrf.mxu2 }
 0x37a   : > { %v3225_v42 = vadd.f32 %v3224_v45, %v15091_v47  ;;  %v12900_v47 = vld [vmem:[%s16587_s5 + $0x38] sm:$0xff] }
 0x37b   : > { %5439 = vmatpush.bf16.msra.mxu3 %v12900_v47 }
 0x37c   : > { %v3649_v49 = vpop.f32.mrf.mxu0  ;;  %v3457_v12 = vadd.f32 %v15169_v28, %v3225_v42 }
 0x37d   : > { %v3680_v33 = vadd.f32 %v3649_v49, %v3456_v16  ;;  %v12896_v16 = vld [vmem:[%s16587_s5 + $0x18] sm:$0xff] }
 0x37e   : > { %v12936_v49 = vld [vmem:[%s16587_s5 + $0xb8] sm:$0xff] }
 0x37f   : > { %v15219_v57 = vadd.f32 %v3873_v36, %v3680_v33  ;;  %5643 = vmatpush.bf16.msrb.mxu0 %v12936_v49  ;;  %v12929_v49 = vld [vmem:[%s16587_s5 + $0x80] sm:$0xff] }
 0x380   : > { %v3876_v50 = vpop.f32.mrf.mxu1 }
 0x381   : > { %v3226_v1 = vpop.f32.mrf.mxu2 }
 0x382   : > { %v3227_v29 = vadd.f32 %v3226_v1, %v15095_v37  ;;  %v12899_v37 = vld [vmem:[%s16587_s5 + $0x30] sm:$0xff] }
 0x383   : > { %4761 = vmatmul.bf16.gmra.mxu1 %v12870_v32  ;;  %5440 = vmatpush.bf16.msra.mxu3 %v12899_v37  ;;  %v12935_v1 = vld [vmem:[%s16587_s5 + $0xb0] sm:$0xff]  ;;  %v12854_v37 = vld [vmem:[#allocation2 + $0xa8] sm:$0xff] }
 0x384   : > { %v3652_v55 = vpop.f32.mrf.mxu0  ;;  %v3458_v28 = vadd.f32 %v15178_v30, %v3227_v29  ;;  %v12871_v30 = vld [vmem:[#allocation2 + $0x100] sm:$0xff]  ;;  %5644 = vmatpush.bf16.msrb.mxu0 %v12935_v1  ;;  %v12872_v29 = vld [vmem:[#allocation2 + $0x108] sm:$0xff] }
 0x385   : > { %v3681_v31 = vadd.f32 %v3652_v55, %v3457_v12  ;;  %v15272_v55 = vpop.f32.mrf.mxu3 }
 0x386   : > { %4094 = vmatmul.bf16.gmra.mxu2 %v12817_v35 }
 0x387   : > { %4537 = vmatmul.bf16.gmra.mxu0 %v12852_v43  ;;  %v15228_v53 = vadd.f32 %v3876_v50, %v3681_v31  ;;  %5441 = vmatpush.bf16.msra.mxu3 %v12898_v0  ;;  %v12895_v50 = vld [vmem:[%s16587_s5 + $0x10] sm:$0xff]  ;;  %v12934_v31 = vld [vmem:[%s16587_s5 + $0xa8] sm:$0xff] }
 0x388   : > { %v3878_v59 = vpop.f32.mrf.mxu1  ;;  %5645 = vmatpush.bf16.msrb.mxu0 %v12934_v31 }
 0x389   : > { %v3229_v20 = vpop.f32.mrf.mxu2 }
 0x38a   : > { %v3230_v4 = vadd.f32 %v3229_v20, %v15099_v61  ;;  %v12818_v61 = vld [vmem:[#allocation2 + $0x100] sm:$0xff] }
 0x38b   : > { %5442 = vmatpush.bf16.msra.mxu3 %v12897_v56  ;;  %v12933_v20 = vld [vmem:[%s16587_s5 + $0xa0] sm:$0xff] }
 0x38c   : > { %v3654_v51 = vpop.f32.mrf.mxu0  ;;  %v3459_v15 = vadd.f32 %v15187_v58, %v3230_v4  ;;  %v12838_v58 = vld [vmem:[#allocation2 + $0x58] sm:$0xff]  ;;  %5646 = vmatpush.bf16.msrb.mxu0 %v12933_v20 }
 0x38d   : > { %v3682_v62 = vadd.f32 %v3654_v51, %v3458_v28  ;;  %4333 = vmatmul.bf16.gmra.mxu3 %v12838_v58  ;;  %v12819_v51 = vld [vmem:[#allocation2 + $0x108] sm:$0xff]  ;;  %v12932_v4 = vld [vmem:[%s16587_s5 + $0x98] sm:$0xff] }
 0x38f   : > { %v15240_v40 = vadd.f32 %v3878_v59, %v3682_v62  ;;  %5443 = vmatpush.bf16.msra.mxu3 %v12896_v16 }
 0x390   : > { %v3881_v9 = vpop.f32.mrf.mxu1  ;;  %5647 = vmatpush.bf16.msrb.mxu0 %v12932_v4 }
 0x391   : > { %v3231_v19 = vpop.f32.mrf.mxu2 }
 0x392   : > { %v3232_v36 = vadd.f32 %v3231_v19, %v15112_v13  ;;  %v15295_v19 = vpop.f32.mrf.mxu3 }
 0x393   : > { %4766 = vmatmul.bf16.gmra.mxu1 %v12871_v30  ;;  %5444 = vmatpush.bf16.msra.mxu3 %v12895_v50  ;;  %v12954_v50 = vld [vmem:[%s16587_s5 + $0xf8] sm:$0xff] }
 0x394   : > { %v3657_v60 = vpop.f32.mrf.mxu0  ;;  %v3460_v13 = vadd.f32 %v15194_v6, %v3232_v36  ;;  %v12894_v6 = vld [vmem:[%s16587_s5 + $0x8] sm:$0xff]  ;;  %v12873_v36 = vld [vmem:[#allocation2 + $0x110] sm:$0xff]  ;;  %5867 = vmatpush.bf16.msrb.mxu1 %v12954_v50 }
 0x395   : > { %v3683_v44 = vadd.f32 %v3657_v60, %v3459_v15 }
 0x396   : > { %4099 = vmatmul.bf16.gmra.mxu2 %v12818_v61 }
 0x397   : > { %4542 = vmatmul.bf16.gmra.mxu0 %v12853_v11  ;;  %v15252_v45 = vadd.f32 %v3881_v9, %v3683_v44  ;;  %5445 = vmatpush.bf16.msra.mxu3 %v12894_v6  ;;  %v12930_v44 = vld [vmem:[%s16587_s5 + $0x88] sm:$0xff] }
 0x398   : > { %v15260_v33 = vpop.f32.mrf.mxu1 }
 0x399   : > { %v3234_v38 = vpop.f32.mrf.mxu2 }
 0x39a   : > { %v3235_v12 = vadd.f32 %v3234_v38, %v15116_v23  ;;  %v12893_v23 = vld [vmem:[%s16587_s5] sm:$0xff]  ;;  %v15308_v58 = vpop.f32.mrf.mxu3 }
 0x39b   : > { %5446 = vmatpush.bf16.msra.mxu3 %v12893_v23 }
 0x39c   : > { %v3659_v42 = vpop.f32.mrf.mxu0  ;;  %v3461_v47 = vadd.f32 %v15203_v18, %v3235_v12  ;;  %v12883_v18 = vld [vmem:[#allocation2] sm:$0xff] }
 0x39d   : > { %v15269_v32 = vadd.f32 %v3659_v42, %v3460_v13  ;;  %v12855_v13 = vld [vmem:[#allocation2 + $0xb0] sm:$0xff]  ;;  %v12972_v42 = vld [vmem:[%s16587_s5 + $0x138] sm:$0xff]  ;;  %v15323_v12 = vld [vmem:[%s16586_s4] ss:$0 sm:$0xff] }
 0x39e   : > { %5447 = vmatmul.bf16.vlgmr.msra.gmra.mxu3 %v12883_v18  ;;  %6091 = vmatpush.bf16.msrb.mxu2 %v12972_v42  ;;  %v13945_v42 = vld [vmem:[%s14077_s19 + $0x10] sm:$0xff] }
 0x3a0   : > { %v3886_v35 = vpop.f32.mrf.mxu1 }
 0x3a1   : > { %v3236_v43 = vpop.f32.mrf.mxu2 }
 0x3a2   : > { %v3237_v62 = vadd.f32 %v3236_v43, %v15127_v2  ;;  %v12931_v2 = vld [vmem:[%s16587_s5 + $0x90] sm:$0xff] }
 0x3a3   : > { %4771 = vmatmul.bf16.gmra.mxu1 %v12872_v29  ;;  %5648 = vmatpush.bf16.msrb.mxu0 %v12931_v2  ;;  %v12901_v2 = vld [vmem:[#allocation2 + $0x60] sm:$0xff] }
 0x3a4   : > { %v3662_v59 = vpop.f32.mrf.mxu0  ;;  %v3462_v15 = vadd.f32 %v15212_v7, %v3237_v62 }
 0x3a5   : > { %v3685_v28 = vadd.f32 %v3662_v59, %v3461_v47  ;;  %v13943_v59 = vld [vmem:[%s14077_s19] sm:$0xff] }
 0x3a6   : > { %4104 = vmatmul.bf16.gmra.mxu2 %v12819_v51  ;;  %v12874_v51 = vld [vmem:[#allocation2 + $0x118] sm:$0xff] }
 0x3a7   : > { %4547 = vmatmul.bf16.gmra.mxu0 %v12854_v37  ;;  %v15288_v0 = vadd.f32 %v3886_v35, %v3685_v28 }
 0x3a8   : > { %v15293_v9 = vpop.f32.mrf.mxu1  ;;  %5649 = vmatpush.bf16.msrb.mxu0 %v12930_v44 }
 0x3a9   : > { %v4065_v30 = vpop.f32.mrf.mxu2 }
 0x3aa   : > { %v4115_v56 = vadd.f32 %v4065_v30, %v15135_v48  ;;  %v12820_v48 = vld [vmem:[#allocation2 + $0x110] sm:$0xff]  ;;  %v13944_v30 = vld [vmem:[%s14077_s19 + $0x8] sm:$0xff] }
 0x3ac   : > { %v3664_v34 = vpop.f32.mrf.mxu0  ;;  %v4339_v7 = vadd.f32 %v15221_v24, %v4115_v56  ;;  %5650 = vmatpush.bf16.msrb.mxu0 %v12929_v49 }
 0x3ad   : > { %v15301_v60 = vadd.f32 %v3664_v34, %v3462_v15 }
 0x3b0   : > { %v4737_v61 = vpop.f32.mrf.mxu1 }
 0x3b1   : > { %v4067_v11 = vpop.f32.mrf.mxu2 }
 0x3b2   : > { %v4116_v24 = vadd.f32 %v4067_v11, %v15144_v10  ;;  %v15327_v10 = vpop.f32.mrf.mxu3 }
 0x3b3   : > { %4776 = vmatmul.bf16.gmra.mxu1 %v12873_v36 }
 0x3b4   : > { %v4513_v16 = vpop.f32.mrf.mxu0  ;;  %v4340_v43 = vadd.f32 %v15231_v26, %v4116_v24  ;;  %v12856_v26 = vld [vmem:[#allocation2 + $0xb8] sm:$0xff] }
 0x3b5   : > { %v4563_v38 = vadd.f32 %v4513_v16, %v4339_v7 }
 0x3b6   : > { %4109 = vmatmul.bf16.gmra.mxu2 %v12820_v48 }
 0x3b7   : > { %v4787_v1 = vadd.f32 %v4737_v61, %v4563_v38  ;;  %4552 = vmatmul.bf16.gmra.mxu0 %v12855_v13 }
 0x3b8   : > { %v4739_v6 = vpop.f32.mrf.mxu1 }
 0x3b9   : > { %v4070_v31 = vpop.f32.mrf.mxu2  ;;  %v4811_v35 = vadd.f32 %v15323_v12, %v4787_v1 }
 0x3ba   : > { %v4117_v20 = vadd.f32 %v4070_v31, %v15148_v46  ;;  %v12971_v46 = vld [vmem:[%s16587_s5 + $0x130] sm:$0xff] }
 0x3bb   : > { %v4831_v23 = vadd.f32 %v13943_v59, %v4811_v35  ;;  %6092 = vmatpush.bf16.msrb.mxu2 %v12971_v46  ;;  %v12953_v31 = vld [vmem:[%s16587_s5 + $0xf0] sm:$0xff] }
 0x3bc   : > { %v4515_v29 = vpop.f32.mrf.mxu0  ;;  %v4341_v34 = vadd.f32 %v15249_v27, %v4117_v20  ;;  %v15342_v27 = vpop.f32.mrf.mxu3  ;;  %5868 = vmatpush.bf16.msrb.mxu1 %v12953_v31 }
 0x3bd   : > { %v4564_v47 = vadd.f32 %v4515_v29, %v4340_v43  ;;  %v4851_v4 = vmax.f32 %v4831_v23, 0.0 }
 0x3bf   : > { %v4788_v28 = vadd.f32 %v4739_v6, %v4564_v47  ;;  %v15337_v11 = vmul.f32 0.0, %v4851_v4 }
 0x3c0   : > { %v4742_v62 = vpop.f32.mrf.mxu1 }
 0x3c1   : > { %v4812_v37 = vadd.f32 %v15323_v12, %v4788_v28  ;;  %v4072_v18 = vpop.f32.mrf.mxu2  ;;  %v5011_v59 = vrot.slane %v15337_v11, 1 }
 0x3c2   : > { %v4118_v7 = vadd.f32 %v4072_v18, %v15155_v63 }
 0x3c3   : > { %v4832_v15 = vadd.f32 %v13944_v30, %v4812_v37  ;;  %4781 = vmatmul.bf16.gmra.mxu1 %v12874_v51  ;;  %v12919_v30 = vld [vmem:[#allocation2 + $0xc0] sm:$0xff] }
 0x3c4   : > { %v4518_v56 = vpop.f32.mrf.mxu0  ;;  %v4342_v24 = vadd.f32 %v15272_v55, %v4118_v7  ;;  %v15360_v28 = vpop.f32.mrf.mxu3 }
 0x3c5   : > { %v4852_v44 = vmax.f32 %v4832_v15, 0.0  ;;  %v4565_v61 = vadd.f32 %v4518_v56, %v4341_v34 }
 0x3c6   : > { %5280 = vmatmul.bf16.vlgmr.msra.gmra.mxu2 %v12901_v2 }
 0x3c7   : > { %v15339_v36 = vmul.f32 0.0, %v4852_v44  ;;  %v4789_v16 = vadd.f32 %v4742_v62, %v4565_v61  ;;  %4557 = vmatmul.bf16.gmra.mxu0 %v12856_v26  ;;  %v13946_v62 = vld [vmem:[%s14077_s19 + $0x18] sm:$0xff] }
 0x3c8   : > { %v4744_v48 = vpop.f32.mrf.mxu1 }
 0x3c9   : > { %v13560_v49 = vpack.c.bf16 %v15339_v36, %v15337_v11  ;;  %v4813_v38 = vadd.f32 %v15323_v12, %v4789_v16  ;;  %v4075_v13 = vpop.f32.mrf.mxu2  ;;  %v5012_v35 = vrot.slane %v15339_v36, 1 }
 0x3ca   : > { %v4119_v29 = vadd.f32 %v4075_v13, %v15159_v39 }
 0x3cb   : > { %13877 = vst [vmem:[#allocation2 + $0x68] sm:$0xff] %v13560_v49   ;;  %v4833_v50 = vadd.f32 %v13945_v42, %v4813_v38  ;;  %v5049_v37 = vsel %vm532_vm1, %v5011_v59, %v5012_v35 }
 0x3cc   : > { %v4520_v1 = vpop.f32.mrf.mxu0  ;;  %v4343_v4 = vadd.f32 %v15295_v19, %v4119_v29  ;;  %v4892_v19 = vrot.slane %v15339_v36, 7 }
 0x3cd   : > { %v4853_v63 = vmax.f32 %v4833_v50, 0.0  ;;  %v4566_v6 = vadd.f32 %v4520_v1, %v4342_v24  ;;  %v13947_v50 = vld [vmem:[%s14077_s19 + $0x20] sm:$0xff] }
 0x3cf   : > { %v15354_v43 = vmul.f32 %v14679_v25, %v4853_v63  ;;  %v4790_v47 = vadd.f32 %v4744_v48, %v4566_v6  ;;  %v15388_v63 = vpop.f32.mrf.mxu3 }
 0x3d0   : > { %v4747_v20 = vpop.f32.mrf.mxu1 }
 0x3d1   : > { %v5013_v55 = vrot.slane %v15354_v43, 1  ;;  %v4814_v23 = vadd.f32 %v15323_v12, %v4790_v47  ;;  %v4077_v51 = vpop.f32.mrf.mxu2  ;;  %v4893_v44 = vrot.slane %v15354_v43, 7  ;;  %v12970_v47 = vld [vmem:[%s16587_s5 + $0x128] sm:$0xff] }
 0x3d2   : > { %v12902_v56 = vld [vmem:[#allocation2 + $0x68] sm:$0xff]  ;;  %v4120_v46 = vadd.f32 %v4077_v51, %v15163_v8  ;;  %6093 = vmatpush.bf16.msrb.mxu2 %v12970_v47 }
 0x3d3   : > { %v5048_v39 = vsel %vm532_vm1, %v5012_v35, %v5013_v55  ;;  %v4834_v18 = vadd.f32 %v13946_v62, %v4814_v23  ;;  %v4928_v42 = vsel %vm411_vm0, %v4892_v19, %v4893_v44  ;;  %v12952_v23 = vld [vmem:[%s16587_s5 + $0xe8] sm:$0xff] }
 0x3d4   : > { %v13610_v15 = vpack.c.bf16 %v5048_v39, %v5049_v37  ;;  %v4523_v34 = vpop.f32.mrf.mxu0  ;;  %v4344_v1 = vadd.f32 %v15308_v58, %v4120_v46  ;;  %5869 = vmatpush.bf16.msrb.mxu1 %v12952_v23 }
 0x3d5   : > { %v4854_v26 = vmax.f32 %v4834_v18, 0.0  ;;  %v4567_v2 = vadd.f32 %v4523_v34, %v4343_v4  ;;  %v13948_v34 = vld [vmem:[%s14077_s19 + $0x28] sm:$0xff] }
 0x3d6   : > { %13887 = vst [vmem:[#allocation2 + $0xc8] sm:$0xff] %v13610_v15   ;;  %5285 = vmatmul.bf16.gmra.mxu2 %v12902_v56 }
 0x3d7   : > { %v15372_v61 = vmul.f32 %v14707_v52, %v4854_v26  ;;  %v4791_v7 = vadd.f32 %v4747_v20, %v4567_v2  ;;  %5651 = vmatmul.bf16.vlgmr.msrb.gmra.mxu0 %v12919_v30 }
 0x3d8   : > { %v4749_v48 = vpop.f32.mrf.mxu1 }
 0x3d9   : > { %v4894_v16 = vrot.slane %v15372_v61, 7  ;;  %v13565_v49 = vpack.c.bf16 %v15372_v61, %v15354_v43  ;;  %v4815_v38 = vadd.f32 %v15323_v12, %v4791_v7  ;;  %v4080_v13 = vpop.f32.mrf.mxu2  ;;  %v5014_v20 = vrot.slane %v15372_v61, 1 }
 0x3da   : > { %v4121_v51 = vadd.f32 %v4080_v13, %v15172_v54 }
 0x3db   : > { %v4927_v8 = vsel %vm411_vm0, %v4893_v44, %v4894_v16  ;;  %13878 = vst [vmem:[#allocation2 + $0x70] sm:$0xff] %v13565_v49   ;;  %v4835_v24 = vadd.f32 %v13947_v50, %v4815_v38  ;;  %v5047_v30 = vsel %vm532_vm1, %v5013_v55, %v5014_v20  ;;  %v15409_v38 = vpop.f32.mrf.mxu3 }
 0x3dc   : > { %v13515_v6 = vpack.c.bf16 %v4927_v8, %v4928_v42  ;;  %v4525_v31 = vpop.f32.mrf.mxu0  ;;  %v4345_v2 = vadd.f32 %v15327_v10, %v4121_v51 }
 0x3dd   : > { %v4855_v35 = vmax.f32 %v4835_v24, 0.0  ;;  %v4568_v29 = vadd.f32 %v4525_v31, %v4344_v1  ;;  %v12920_v49 = vld [vmem:[#allocation2 + $0xc8] sm:$0xff] }
 0x3de   : > { %13868 = vst [vmem:[#allocation2 + $0x10] sm:$0xff] %v13515_v6  }
 0x3df   : > { %v15398_v58 = vmul.f32 %v14679_v25, %v4855_v35  ;;  %v4792_v37 = vadd.f32 %v4749_v48, %v4568_v29 }
 0x3e0   : > { %v4752_v18 = vpop.f32.mrf.mxu1 }
 0x3e1   : > { %v5015_v39 = vrot.slane %v15398_v58, 1  ;;  %v4816_v62 = vadd.f32 %v15323_v12, %v4792_v37  ;;  %v4082_v4 = vpop.f32.mrf.mxu2  ;;  %v4895_v48 = vrot.slane %v15398_v58, 7  ;;  %v12969_v37 = vld [vmem:[%s16587_s5 + $0x120] sm:$0xff] }
 0x3e2   : > { %v12903_v7 = vld [vmem:[#allocation2 + $0x70] sm:$0xff]  ;;  %v4122_v13 = vadd.f32 %v4082_v4, %v15176_v21  ;;  %6094 = vmatpush.bf16.msrb.mxu2 %v12969_v37 }
 0x3e3   : > { %v5046_v15 = vsel %vm532_vm1, %v5014_v20, %v5015_v39  ;;  %v4836_v26 = vadd.f32 %v13948_v34, %v4816_v62  ;;  %v4926_v6 = vsel %vm411_vm0, %v4894_v16, %v4895_v48  ;;  %v13949_v21 = vld [vmem:[%s14077_s19 + $0x30] sm:$0xff] }
 0x3e4   : > { %v13615_v54 = vpack.c.bf16 %v5046_v15, %v5047_v30  ;;  %v4528_v56 = vpop.f32.mrf.mxu0  ;;  %v4346_v29 = vadd.f32 %v15342_v27, %v4122_v13  ;;  %v15434_v30 = vpop.f32.mrf.mxu3 }
 0x3e5   : > { %v4856_v44 = vmax.f32 %v4836_v26, 0.0  ;;  %v4569_v46 = vadd.f32 %v4528_v56, %v4345_v2  ;;  %v13950_v56 = vld [vmem:[%s14077_s19 + $0x38] sm:$0xff] }
 0x3e6   : > { %13888 = vst [vmem:[#allocation2 + $0xd0] sm:$0xff] %v13615_v54   ;;  %5290 = vmatmul.bf16.gmra.mxu2 %v12903_v7 }
 0x3e7   : > { %v15413_v55 = vmul.f32 %v14707_v52, %v4856_v44  ;;  %v4793_v42 = vadd.f32 %v4752_v18, %v4569_v46  ;;  %5656 = vmatmul.bf16.gmra.mxu0 %v12920_v49 }
 0x3e8   : > { %v4754_v24 = vpop.f32.mrf.mxu1 }
 0x3e9   : > { %v4896_v10 = vrot.slane %v15413_v55, 7  ;;  %v13570_v8 = vpack.c.bf16 %v15413_v55, %v15398_v58  ;;  %v4817_v50 = vadd.f32 %v15323_v12, %v4793_v42  ;;  %v4085_v1 = vpop.f32.mrf.mxu2  ;;  %v5016_v16 = vrot.slane %v15413_v55, 1 }
 0x3ea   : > { %v4123_v18 = vadd.f32 %v4085_v1, %v15185_v3 }
 0x3eb   : > { %v4925_v31 = vsel %vm411_vm0, %v4895_v48, %v4896_v10  ;;  %13879 = vst [vmem:[#allocation2 + $0x78] sm:$0xff] %v13570_v8   ;;  %v4837_v35 = vadd.f32 %v13949_v21, %v4817_v50  ;;  %v5045_v2 = vsel %vm532_vm1, %v5015_v39, %v5016_v16  ;;  %v12951_v8 = vld [vmem:[%s16587_s5 + $0xe0] sm:$0xff] }
 0x3ec   : > { %v13520_v47 = vpack.c.bf16 %v4925_v31, %v4926_v6  ;;  %v4530_v23 = vpop.f32.mrf.mxu0  ;;  %v4347_v3 = vadd.f32 %v15360_v28, %v4123_v18  ;;  %5870 = vmatpush.bf16.msrb.mxu1 %v12951_v8 }
 0x3ed   : > { %v4857_v20 = vmax.f32 %v4837_v35, 0.0  ;;  %v4570_v51 = vadd.f32 %v4530_v23, %v4346_v29  ;;  %v12921_v42 = vld [vmem:[#allocation2 + $0xd0] sm:$0xff]  ;;  %v15456_v35 = vpop.f32.mrf.mxu3  ;;  %v13951_v23 = vld [vmem:[%s14077_s19 + $0x40] sm:$0xff] }
 0x3ee   : > { %13869 = vst [vmem:[#allocation2 + $0x18] sm:$0xff] %v13520_v47  }
 0x3ef   : > { %v15431_v62 = vmul.f32 %v14679_v25, %v4857_v20  ;;  %v4794_v4 = vadd.f32 %v4754_v24, %v4570_v51 }
 0x3f0   : > { %v4757_v34 = vpop.f32.mrf.mxu1 }
 0x3f1   : > { %v5017_v27 = vrot.slane %v15431_v62, 1  ;;  %v4818_v15 = vadd.f32 %v15323_v12, %v4794_v4  ;;  %v4087_v26 = vpop.f32.mrf.mxu2  ;;  %v4897_v39 = vrot.slane %v15431_v62, 7 }
 0x3f2   : > { %v12904_v13 = vld [vmem:[#allocation2 + $0x78] sm:$0xff]  ;;  %v4124_v24 = vadd.f32 %v4087_v26, %v15191_v5 }
 0x3f3   : > { %v5044_v54 = vsel %vm532_vm1, %v5016_v16, %v5017_v27  ;;  %v4838_v44 = vadd.f32 %v13950_v56, %v4818_v15  ;;  %v4924_v47 = vsel %vm411_vm0, %v4896_v10, %v4897_v39 }
 0x3f4   : > { %v13620_v46 = vpack.c.bf16 %v5044_v54, %v5045_v2  ;;  %v4533_v7 = vpop.f32.mrf.mxu0  ;;  %v4348_v51 = vadd.f32 %v15388_v63, %v4124_v24 }
 0x3f5   : > { %v4858_v49 = vmax.f32 %v4838_v44, 0.0  ;;  %v4571_v48 = vadd.f32 %v4533_v7, %v4347_v3 }
 0x3f6   : > { %13889 = vst [vmem:[#allocation2 + $0xd8] sm:$0xff] %v13620_v46   ;;  %5295 = vmatmul.bf16.gmra.mxu2 %v12904_v13  ;;  %v13952_v46 = vld [vmem:[%s14077_s19 + $0x48] sm:$0xff] }
 0x3f7   : > { %v15449_v50 = vmul.f32 %v14707_v52, %v4858_v49  ;;  %v4795_v28 = vadd.f32 %v4757_v34, %v4571_v48  ;;  %5661 = vmatmul.bf16.gmra.mxu0 %v12921_v42  ;;  %v15477_v48 = vpop.f32.mrf.mxu3 }
 0x3f8   : > { %v4759_v21 = vpop.f32.mrf.mxu1 }
 0x3f9   : > { %v4898_v1 = vrot.slane %v15449_v50, 7  ;;  %v13575_v6 = vpack.c.bf16 %v15449_v50, %v15431_v62  ;;  %v4819_v31 = vadd.f32 %v15323_v12, %v4795_v28  ;;  %v4090_v29 = vpop.f32.mrf.mxu2  ;;  %v5018_v15 = vrot.slane %v15449_v50, 1  ;;  %v12950_v28 = vld [vmem:[%s16587_s5 + $0xd8] sm:$0xff] }
 0x3fa   : > { %v4125_v10 = vadd.f32 %v4090_v29, %v15197_v41  ;;  %5871 = vmatpush.bf16.msrb.mxu1 %v12950_v28 }
 0x3fb   : > { %v4923_v5 = vsel %vm411_vm0, %v4897_v39, %v4898_v1  ;;  %13880 = vst [vmem:[#allocation2 + $0x80] sm:$0xff] %v13575_v6   ;;  %v4839_v20 = vadd.f32 %v13951_v23, %v4819_v31  ;;  %v5043_v44 = vsel %vm532_vm1, %v5017_v27, %v5018_v15  ;;  %v12968_v27 = vld [vmem:[%s16587_s5 + $0x118] sm:$0xff] }
 0x3fc   : > { %v13525_v37 = vpack.c.bf16 %v4923_v5, %v4924_v47  ;;  %v4535_v16 = vpop.f32.mrf.mxu0  ;;  %v4349_v49 = vadd.f32 %v15409_v38, %v4125_v10  ;;  %6095 = vmatpush.bf16.msrb.mxu2 %v12968_v27 }
 0x3fd   : > { %v4859_v18 = vmax.f32 %v4839_v20, 0.0  ;;  %v4572_v4 = vadd.f32 %v4535_v16, %v4348_v51  ;;  %v12922_v24 = vld [vmem:[#allocation2 + $0xd8] sm:$0xff] }
 0x3fe   : > { %13870 = vst [vmem:[#allocation2 + $0x20] sm:$0xff] %v13525_v37   ;;  %v13953_v37 = vld [vmem:[%s14077_s19 + $0x50] sm:$0xff] }
 0x3ff   : > { %v15466_v34 = vmul.f32 %v14679_v25, %v4859_v18  ;;  %v4796_v26 = vadd.f32 %v4759_v21, %v4572_v4 }
 0x400   : > { %v4762_v56 = vpop.f32.mrf.mxu1 }
 0x401   : > { %v5019_v2 = vrot.slane %v15466_v34, 1  ;;  %v4820_v54 = vadd.f32 %v15323_v12, %v4796_v26  ;;  %v4092_v63 = vpop.f32.mrf.mxu2  ;;  %v4899_v6 = vrot.slane %v15466_v34, 7 }
 0x402   : > { %v12905_v39 = vld [vmem:[#allocation2 + $0x80] sm:$0xff]  ;;  %v4126_v31 = vadd.f32 %v4092_v63, %v15206_v22 }
 0x403   : > { %v5042_v3 = vsel %vm532_vm1, %v5018_v15, %v5019_v2  ;;  %v4840_v7 = vadd.f32 %v13952_v46, %v4820_v54  ;;  %v4922_v51 = vsel %vm411_vm0, %v4898_v1, %v4899_v6  ;;  %v4324_v54 = vpop.f32.mrf.mxu3 }
 0x404   : > { %v13625_v41 = vpack.c.bf16 %v5042_v3, %v5043_v44  ;;  %v4538_v13 = vpop.f32.mrf.mxu0  ;;  %v4350_v18 = vadd.f32 %v15434_v30, %v4126_v31  ;;  %v12967_v31 = vld [vmem:[%s16587_s5 + $0x110] sm:$0xff] }
 0x405   : > { %v4860_v42 = vmax.f32 %v4840_v7, 0.0  ;;  %v4573_v8 = vadd.f32 %v4538_v13, %v4349_v49  ;;  %v13954_v13 = vld [vmem:[%s14077_s19 + $0x58] sm:$0xff]  ;;  %6096 = vmatpush.bf16.msrb.mxu2 %v12967_v31 }
 0x406   : > { %13890 = vst [vmem:[#allocation2 + $0xe0] sm:$0xff] %v13625_v41   ;;  %5300 = vmatmul.bf16.gmra.mxu2 %v12905_v39 }
 0x407   : > { %v15487_v38 = vmul.f32 %v14707_v52, %v4860_v42  ;;  %v4797_v21 = vadd.f32 %v4762_v56, %v4573_v8  ;;  %5666 = vmatmul.bf16.gmra.mxu0 %v12922_v24 }
 0x408   : > { %v4764_v23 = vpop.f32.mrf.mxu1 }
 0x409   : > { %v4900_v29 = vrot.slane %v15487_v38, 7  ;;  %v13580_v47 = vpack.c.bf16 %v15487_v38, %v15466_v34  ;;  %v4821_v5 = vadd.f32 %v15323_v12, %v4797_v21  ;;  %v4095_v20 = vpop.f32.mrf.mxu2  ;;  %v5020_v56 = vrot.slane %v15487_v38, 1 }
 0x40a   : > { %v4127_v1 = vadd.f32 %v4095_v20, %v15210_v17 }
 0x40b   : > { %v4921_v22 = vsel %vm411_vm0, %v4899_v6, %v4900_v29  ;;  %13881 = vst [vmem:[#allocation2 + $0x88] sm:$0xff] %v13580_v47   ;;  %v4841_v16 = vadd.f32 %v13953_v37, %v4821_v5  ;;  %v5041_v49 = vsel %vm532_vm1, %v5019_v2, %v5020_v56  ;;  %v4326_v5 = vpop.f32.mrf.mxu3 }
 0x40c   : > { %v13530_v4 = vpack.c.bf16 %v4921_v22, %v4922_v51  ;;  %v4540_v15 = vpop.f32.mrf.mxu0  ;;  %v4351_v8 = vadd.f32 %v15456_v35, %v4127_v1 }
 0x40d   : > { %v4861_v10 = vmax.f32 %v4841_v16, 0.0  ;;  %v4574_v26 = vadd.f32 %v4540_v15, %v4350_v18  ;;  %v12923_v6 = vld [vmem:[#allocation2 + $0xe0] sm:$0xff] }
 0x40e   : > { %13871 = vst [vmem:[#allocation2 + $0x28] sm:$0xff] %v13530_v4   ;;  %v13955_v18 = vld [vmem:[%s14077_s19 + $0x60] sm:$0xff] }
 0x40f   : > { %v15502_v63 = vmul.f32 %v14679_v25, %v4861_v10  ;;  %v4798_v44 = vadd.f32 %v4764_v23, %v4574_v26 }
 0x410   : > { %v4767_v30 = vpop.f32.mrf.mxu1 }
 0x411   : > { %v5021_v3 = vrot.slane %v15502_v63, 1  ;;  %v4822_v46 = vadd.f32 %v15323_v12, %v4798_v44  ;;  %v4097_v7 = vpop.f32.mrf.mxu2  ;;  %v4901_v2 = vrot.slane %v15502_v63, 7  ;;  %v12949_v44 = vld [vmem:[%s16587_s5 + $0xd0] sm:$0xff] }
 0x412   : > { %v12906_v28 = vld [vmem:[#allocation2 + $0x88] sm:$0xff]  ;;  %v4128_v47 = vadd.f32 %v4097_v7, %v15219_v57  ;;  %5872 = vmatpush.bf16.msrb.mxu1 %v12949_v44 }
 0x413   : > { %v5040_v41 = vsel %vm532_vm1, %v5020_v56, %v5021_v3  ;;  %v4842_v42 = vadd.f32 %v13954_v13, %v4822_v46  ;;  %v4920_v16 = vsel %vm411_vm0, %v4900_v29, %v4901_v2  ;;  %v4329_v13 = vpop.f32.mrf.mxu3 }
 0x414   : > { %v13630_v39 = vpack.c.bf16 %v5040_v41, %v5041_v49  ;;  %v4543_v24 = vpop.f32.mrf.mxu0  ;;  %v4352_v15 = vadd.f32 %v15477_v48, %v4128_v47 }
 0x415   : > { %v4862_v17 = vmax.f32 %v4842_v42, 0.0  ;;  %v4575_v27 = vadd.f32 %v4543_v24, %v4351_v8  ;;  %v13956_v24 = vld [vmem:[%s14077_s19 + $0x68] sm:$0xff] }
 0x416   : > { %13891 = vst [vmem:[#allocation2 + $0xe8] sm:$0xff] %v13630_v39   ;;  %5305 = vmatmul.bf16.gmra.mxu2 %v12906_v28 }
 0x417   : > { %v15518_v21 = vmul.f32 %v14707_v52, %v4862_v17  ;;  %v4799_v35 = vadd.f32 %v4767_v30, %v4575_v27  ;;  %5671 = vmatmul.bf16.gmra.mxu0 %v12923_v6 }
 0x418   : > { %v4769_v22 = vpop.f32.mrf.mxu1 }
 0x419   : > { %16625 = vst [vmem:[#allocation3_spill] sm:$0xff] %v15518_v21  ;;  %v4902_v23 = vrot.slane %v15518_v21, 7  ;;  %v13585_v20 = vpack.c.bf16 %v15518_v21, %v15502_v63  ;;  %v4823_v51 = vadd.f32 %v15323_v12, %v4799_v35  ;;  %v4100_v37 = vpop.f32.mrf.mxu2  ;;  %v5022_v29 = vrot.slane %v15518_v21, 1 }
 0x41a   : > { %v4129_v30 = vadd.f32 %v4100_v37, %v15228_v53 }
 0x41b   : > { %v4919_v57 = vsel %vm411_vm0, %v4901_v2, %v4902_v23  ;;  %13882 = vst [vmem:[#allocation2 + $0x90] sm:$0xff] %v13585_v20   ;;  %v4843_v4 = vadd.f32 %v13955_v18, %v4823_v51  ;;  %v5039_v8 = vsel %vm532_vm1, %v5021_v3, %v5022_v29 }
 0x41c   : > { %v13535_v10 = vpack.c.bf16 %v4919_v57, %v4920_v16  ;;  %v4545_v26 = vpop.f32.mrf.mxu0  ;;  %v4353_v27 = vadd.f32 %v4324_v54, %v4129_v30  ;;  %v12966_v30 = vld [vmem:[%s16587_s5 + $0x108] sm:$0xff] }
 0x41d   : > { %v4863_v56 = vmax.f32 %v4843_v4, 0.0  ;;  %v4576_v1 = vadd.f32 %v4545_v26, %v4352_v15  ;;  %v12924_v47 = vld [vmem:[#allocation2 + $0xe8] sm:$0xff]  ;;  %v4331_v26 = vpop.f32.mrf.mxu3  ;;  %6097 = vmatpush.bf16.msrb.mxu2 %v12966_v30 }
 0x41e   : > { %13872 = vst [vmem:[#allocation2 + $0x30] sm:$0xff] %v13535_v10  }
 0x41f   : > { %v15536_v46 = vmul.f32 %v14679_v25, %v4863_v56  ;;  %v4800_v7 = vadd.f32 %v4769_v22, %v4576_v1 }
 0x420   : > { %v4772_v41 = vpop.f32.mrf.mxu1 }
 0x421   : > { %16626 = vst [vmem:[#allocation5_spill] sm:$0xff] %v15536_v46  ;;  %v5023_v48 = vrot.slane %v15536_v46, 1  ;;  %v4824_v49 = vadd.f32 %v15323_v12, %v4800_v7  ;;  %v4102_v42 = vpop.f32.mrf.mxu2  ;;  %v4903_v35 = vrot.slane %v15536_v46, 7 }
 0x422   : > { %v12907_v2 = vld [vmem:[#allocation2 + $0x90] sm:$0xff]  ;;  %v4130_v3 = vadd.f32 %v4102_v42, %v15240_v40 }
 0x423   : > { %v5038_v39 = vsel %vm532_vm1, %v5022_v29, %v5023_v48  ;;  %v4844_v17 = vadd.f32 %v13956_v24, %v4824_v49  ;;  %v4918_v18 = vsel %vm411_vm0, %v4902_v23, %v4903_v35  ;;  %v13957_v40 = vld [vmem:[%s14077_s19 + $0x70] sm:$0xff]  ;;  %v12948_v23 = vld [vmem:[%s16587_s5 + $0xc8] sm:$0xff] }
 0x424   : > { %v13635_v28 = vpack.c.bf16 %v5038_v39, %v5039_v8  ;;  %v4548_v53 = vpop.f32.mrf.mxu0  ;;  %v4354_v10 = vadd.f32 %v4326_v5, %v4130_v3  ;;  %5873 = vmatpush.bf16.msrb.mxu1 %v12948_v23  ;;  %v13007_v23 = vld [vmem:[%s16587_s5 + $0x1b0] sm:$0xff] }
 0x425   : > { %v4864_v6 = vmax.f32 %v4844_v17, 0.0  ;;  %v4577_v31 = vadd.f32 %v4548_v53, %v4353_v27 }
 0x426   : > { %13892 = vst [vmem:[#allocation2 + $0xf0] sm:$0xff] %v13635_v28   ;;  %5310 = vmatmul.bf16.gmra.mxu2 %v12907_v2  ;;  %v13958_v28 = vld [vmem:[%s14077_s19 + $0x78] sm:$0xff]  ;;  %v4334_v2 = vpop.f32.mrf.mxu3 }
 0x427   : > { %v15548_v20 = vmul.f32 %v14707_v52, %v4864_v6  ;;  %v4801_v51 = vadd.f32 %v4772_v41, %v4577_v31  ;;  %5676 = vmatmul.bf16.gmra.mxu0 %v12924_v47 }
 0x428   : > { %v4774_v16 = vpop.f32.mrf.mxu1 }
 0x429   : > { %16627 = vst [vmem:[#allocation4_spill] sm:$0xff] %v15548_v20  ;;  %v4904_v54 = vrot.slane %v15548_v20, 7  ;;  %v13590_v22 = vpack.c.bf16 %v15548_v20, %v15536_v46  ;;  %v4825_v37 = vadd.f32 %v15323_v12, %v4801_v51  ;;  %v4105_v57 = vpop.f32.mrf.mxu2  ;;  %v5024_v7 = vrot.slane %v15548_v20, 1 }
 0x42a   : > { %v4131_v5 = vadd.f32 %v4105_v57, %v15252_v45 }
 0x42b   : > { %v4917_v4 = vsel %vm411_vm0, %v4903_v35, %v4904_v54  ;;  %13883 = vst [vmem:[#allocation2 + $0x98] sm:$0xff] %v13590_v22   ;;  %v4845_v15 = vadd.f32 %v13957_v40, %v4825_v37  ;;  %v5037_v17 = vsel %vm532_vm1, %v5023_v48, %v5024_v7  ;;  %v3908_v35 = vadd.f32 %v15260_v33, %v15269_v32 }
 0x42c   : > { %v13540_v56 = vpack.c.bf16 %v4917_v4, %v4918_v18  ;;  %v4550_v1 = vpop.f32.mrf.mxu0  ;;  %v4355_v6 = vadd.f32 %v4329_v13, %v4131_v5  ;;  %v13008_v13 = vld [vmem:[%s16587_s5 + $0x1b8] sm:$0xff] }
 0x42d   : > { %v4865_v44 = vmax.f32 %v4845_v15, 0.0  ;;  %v4578_v29 = vadd.f32 %v4550_v1, %v4354_v10  ;;  %v12925_v22 = vld [vmem:[#allocation2 + $0xf0] sm:$0xff]  ;;  %6539 = vmatpush.bf16.msra.mxu0 %v13008_v13 }
 0x42e   : > { %13873 = vst [vmem:[#allocation2 + $0x38] sm:$0xff] %v13540_v56   ;;  %v13959_v56 = vld [vmem:[%s14077_s19 + $0x80] sm:$0xff] }
 0x42f   : > { %v15568_v49 = vmul.f32 %v14679_v25, %v4865_v44  ;;  %v4802_v41 = vadd.f32 %v4774_v16, %v4578_v29 }
 0x430   : > { %v4777_v39 = vpop.f32.mrf.mxu1 }
 0x431   : > { %16628 = vst [vmem:[#allocation7_spill] sm:$0xff] %v15568_v49  ;;  %v5025_v42 = vrot.slane %v15568_v49, 1  ;;  %v4826_v8 = vadd.f32 %v15323_v12, %v4802_v41  ;;  %v4107_v24 = vpop.f32.mrf.mxu2  ;;  %v4905_v37 = vrot.slane %v15568_v49, 7  ;;  %v4336_v41 = vpop.f32.mrf.mxu3  ;;  %6540 = vmatpush.bf16.msra.mxu0 %v13007_v23  ;;  %v13026_v23 = vld [vmem:[%s16587_s5 + $0x1f8] sm:$0xff] }
 0x432   : > { %v12908_v51 = vld [vmem:[#allocation2 + $0x98] sm:$0xff]  ;;  %v4132_v16 = vadd.f32 %v4107_v24, %v3908_v35  ;;  %v12965_v24 = vld [vmem:[%s16587_s5 + $0x100] sm:$0xff]  ;;  %v13960_v35 = vld [vmem:[%s14077_s19 + $0x88] sm:$0xff] }
 0x433   : > { %v5036_v27 = vsel %vm532_vm1, %v5024_v7, %v5025_v42  ;;  %v4846_v53 = vadd.f32 %v13958_v28, %v4826_v8  ;;  %v4916_v15 = vsel %vm411_vm0, %v4904_v54, %v4905_v37  ;;  %6098 = vmatpush.bf16.msrb.mxu2 %v12965_v24 }
 0x434   : > { %v13640_v31 = vpack.c.bf16 %v5036_v27, %v5037_v17  ;;  %v4553_v45 = vpop.f32.mrf.mxu0  ;;  %v4356_v44 = vadd.f32 %v4331_v26, %v4132_v16  ;;  %v12947_v17 = vld [vmem:[%s16587_s5 + $0xc0] sm:$0xff]  ;;  %v12990_v27 = vld [vmem:[%s16587_s5 + $0x178] sm:$0xff] }
 0x435   : > { %v4866_v47 = vmax.f32 %v4846_v53, 0.0  ;;  %v4579_v3 = vadd.f32 %v4553_v45, %v4355_v6  ;;  %5874 = vmatpush.bf16.msrb.mxu1 %v12947_v17  ;;  %6315 = vmatpush.bf16.msrb.mxu3 %v12990_v27  ;;  %v13005_v16 = vld [vmem:[%s16587_s5 + $0x1a0] sm:$0xff]  ;;  %v12989_v27 = vld [vmem:[%s16587_s5 + $0x170] sm:$0xff] }
 0x436   : > { %13893 = vst [vmem:[#allocation2 + $0xf8] sm:$0xff] %v13640_v31   ;;  %5315 = vmatmul.bf16.gmra.mxu2 %v12908_v51 }
 0x437   : > { %v15582_v48 = vmul.f32 %v14707_v52, %v4866_v47  ;;  %v4803_v57 = vadd.f32 %v4777_v39, %v4579_v3  ;;  %5681 = vmatmul.bf16.gmra.mxu0 %v12925_v22 }
 0x438   : > { %v4779_v4 = vpop.f32.mrf.mxu1 }
 0x439   : > { %16629 = vst [vmem:[#allocation6_spill] sm:$0xff] %v15582_v48  ;;  %v4906_v33 = vrot.slane %v15582_v48, 7  ;;  %v13595_v32 = vpack.c.bf16 %v15582_v48, %v15568_v49  ;;  %v4827_v18 = vadd.f32 %v15323_v12, %v4803_v57  ;;  %v4110_v40 = vpop.f32.mrf.mxu2  ;;  %v5026_v54 = vrot.slane %v15582_v48, 1  ;;  %6763 = vmatpush.bf16.msra.mxu1 %v13026_v23  ;;  %6316 = vmatpush.bf16.msrb.mxu3 %v12989_v27  ;;  %v13025_v27 = vld [vmem:[%s16587_s5 + $0x1f0] sm:$0xff]  ;;  %v12973_v48 = vld [vmem:[#allocation2 + $0xc8] sm:$0xff] }
 0x43a   : > { %v4133_v39 = vadd.f32 %v4110_v40, %v15288_v0  ;;  %v13006_v0 = vld [vmem:[%s16587_s5 + $0x1a8] sm:$0xff] }
 0x43b   : > { %v4915_v10 = vsel %vm411_vm0, %v4905_v37, %v4906_v33  ;;  %13884 = vst [vmem:[#allocation2 + $0xa0] sm:$0xff] %v13595_v32   ;;  %v4847_v1 = vadd.f32 %v13959_v56, %v4827_v18  ;;  %v5035_v31 = vsel %vm532_vm1, %v5025_v42, %v5026_v54  ;;  %6541 = vmatpush.bf16.msra.mxu0 %v13006_v0  ;;  %v5448_v56 = vpop.f32.mrf.mxu3 }
 0x43c   : > { %v13545_v29 = vpack.c.bf16 %v4915_v10, %v4916_v15  ;;  %v4555_v30 = vpop.f32.mrf.mxu0  ;;  %v4357_v47 = vadd.f32 %v4334_v2, %v4133_v39  ;;  %v3910_v42 = vadd.f32 %v15293_v9, %v15301_v60  ;;  %v13044_v10 = vld [vmem:[%s16587_s5 + $0x238] sm:$0xff] }
 0x43d   : > { %v4867_v7 = vmax.f32 %v4847_v1, 0.0  ;;  %v4580_v5 = vadd.f32 %v4555_v30, %v4356_v44  ;;  %v12926_v18 = vld [vmem:[#allocation2 + $0xf8] sm:$0xff]  ;;  %6987 = vmatpush.bf16.msra.mxu2 %v13044_v10  ;;  %6764 = vmatpush.bf16.msra.mxu1 %v13025_v27 }
 0x43e   : > { %13874 = vst [vmem:[#allocation2 + $0x40] sm:$0xff] %v13545_v29   ;;  %v13004_v9 = vld [vmem:[%s16587_s5 + $0x198] sm:$0xff] }
 0x43f   : > { %v15603_v8 = vmul.f32 %v14679_v25, %v4867_v7  ;;  %v4804_v26 = vadd.f32 %v4779_v4, %v4580_v5  ;;  %6542 = vmatpush.bf16.msra.mxu0 %v13005_v16  ;;  %v13962_v16 = vld [vmem:[%s14077_s19 + $0x98] sm:$0xff] }
 0x440   : > { %v4782_v22 = vpop.f32.mrf.mxu1 }
 0x441   : > { %16630 = vst [vmem:[#allocation8_spill] sm:$0xff] %v15603_v8  ;;  %v5027_v28 = vrot.slane %v15603_v8, 1  ;;  %v4828_v53 = vadd.f32 %v15323_v12, %v4804_v26  ;;  %v4112_v6 = vpop.f32.mrf.mxu2  ;;  %v4907_v2 = vrot.slane %v15603_v8, 7 }
 0x442   : > { %v12909_v32 = vld [vmem:[#allocation2 + $0xa0] sm:$0xff]  ;;  %v4134_v40 = vadd.f32 %v4112_v6, %v3910_v42 }
 0x443   : > { %v5034_v45 = vsel %vm532_vm1, %v5026_v54, %v5027_v28  ;;  %v4848_v3 = vadd.f32 %v13960_v35, %v4828_v53  ;;  %v4914_v29 = vsel %vm411_vm0, %v4906_v33, %v4907_v2  ;;  %v13961_v54 = vld [vmem:[%s14077_s19 + $0x90] sm:$0xff]  ;;  %6543 = vmatpush.bf16.msra.mxu0 %v13004_v9 }
 0x444   : > { %v13645_v51 = vpack.c.bf16 %v5034_v45, %v5035_v31  ;;  %v4558_v37 = vpop.f32.mrf.mxu0  ;;  %v4358_v5 = vadd.f32 %v4336_v41, %v4134_v40  ;;  %v13003_v33 = vld [vmem:[%s16587_s5 + $0x190] sm:$0xff] }
 0x445   : > { %v4868_v57 = vmax.f32 %v4848_v3, 0.0  ;;  %v4581_v13 = vadd.f32 %v4558_v37, %v4357_v47  ;;  %v13002_v47 = vld [vmem:[%s16587_s5 + $0x188] sm:$0xff] }
 0x446   : > { %13894 = vst [vmem:[#allocation2 + $0x100] sm:$0xff] %v13645_v51   ;;  %5320 = vmatmul.bf16.gmra.mxu2 %v12909_v32  ;;  %v13001_v32 = vld [vmem:[%s16587_s5 + $0x180] sm:$0xff] }
 0x447   : > { %v15634_v4 = vmul.f32 %v14707_v52, %v4868_v57  ;;  %v4805_v15 = vadd.f32 %v4782_v22, %v4581_v13  ;;  %5686 = vmatmul.bf16.gmra.mxu0 %v12926_v18 }
 0x448   : > { %v4784_v41 = vpop.f32.mrf.mxu1  ;;  %6544 = vmatpush.bf16.msra.mxu0 %v13003_v33 }
 0x449   : > { %16631 = vst [vmem:[#allocation9_spill] sm:$0xff] %v15634_v4  ;;  %v4908_v60 = vrot.slane %v15634_v4, 7  ;;  %v13600_v1 = vpack.c.bf16 %v15634_v4, %v15603_v8  ;;  %v4829_v44 = vadd.f32 %v15323_v12, %v4805_v15  ;;  %v5281_v30 = vpop.f32.mrf.mxu2  ;;  %v5028_v6 = vrot.slane %v15634_v4, 1 }
 0x44a   : > { %v5449_v26 = vadd.f32 %v5448_v56, %v5281_v30  ;;  %v4891_v56 = vrot.slane %v15337_v11, 7 }
 0x44b   : > { %v4913_v7 = vsel %vm411_vm0, %v4907_v2, %v4908_v60  ;;  %13885 = vst [vmem:[#allocation2 + $0xa8] sm:$0xff] %v13600_v1   ;;  %v4849_v39 = vadd.f32 %v13961_v54, %v4829_v44  ;;  %v5033_v37 = vsel %vm532_vm1, %v5027_v28, %v5028_v6  ;;  %v5450_v28 = vpop.f32.mrf.mxu3 }
 0x44c   : > { %v13550_v24 = vpack.c.bf16 %v4913_v7, %v4914_v29  ;;  %v4560_v17 = vpop.f32.mrf.mxu0  ;;  %6545 = vmatpush.bf16.msra.mxu0 %v13002_v47  ;;  %v4929_v29 = vsel %vm411_vm0, %v4891_v56, %v4892_v19 }
 0x44d   : > { %v4869_v53 = vmax.f32 %v4849_v39, 0.0  ;;  %v4582_v0 = vadd.f32 %v4560_v17, %v4358_v5  ;;  %v12927_v40 = vld [vmem:[#allocation2 + $0x100] sm:$0xff]  ;;  %v13043_v5 = vld [vmem:[%s16587_s5 + $0x230] sm:$0xff] }
 0x44e   : > { %13875 = vst [vmem:[#allocation2 + $0x48] sm:$0xff] %v13550_v24   ;;  %6988 = vmatpush.bf16.msra.mxu2 %v13043_v5  ;;  %v12958_v5 = vld [vmem:[#allocation2 + $0x80] sm:$0xff] }
 0x44f   : > { %v15663_v31 = vmul.f32 0.0, %v4869_v53  ;;  %v4806_v45 = vadd.f32 %v4784_v41, %v4582_v0  ;;  %v12955_v41 = vld [vmem:[#allocation2 + $0x68] sm:$0xff] }
 0x450   : > { %6546 = vmatpush.bf16.msra.mxu0 %v13001_v32 }
 0x451   : > { %16632 = vst [vmem:[#allocation10_spill] sm:$0xff] %v15663_v31  ;;  %v5029_v35 = vrot.slane %v15663_v31, 1  ;;  %v4830_v3 = vadd.f32 %v15323_v12, %v4806_v45  ;;  %v5283_v51 = vpop.f32.mrf.mxu2  ;;  %v4909_v15 = vrot.slane %v15663_v31, 7 }
 0x452   : > { %v12910_v2 = vld [vmem:[#allocation2 + $0xa8] sm:$0xff]  ;;  %v5451_v23 = vadd.f32 %v5450_v28, %v5283_v51  ;;  %v12886_v28 = vld [vmem:[#allocation2 + $0x18] sm:$0xff] }
 0x453   : > { %v5032_v22 = vsel %vm532_vm1, %v5028_v6, %v5029_v35  ;;  %v4850_v57 = vadd.f32 %v13962_v16, %v4830_v3  ;;  %v4912_v30 = vsel %vm411_vm0, %v4908_v60, %v4909_v15  ;;  %v13042_v3 = vld [vmem:[%s16587_s5 + $0x228] sm:$0xff]  ;;  %v12991_v16 = vld [vmem:[#allocation2 + $0x10] sm:$0xff] }
 0x454   : > { %v13650_v42 = vpack.c.bf16 %v5032_v22, %v5033_v37  ;;  %v5652_v13 = vpop.f32.mrf.mxu0  ;;  %6989 = vmatpush.bf16.msra.mxu2 %v13042_v3  ;;  %v13024_v22 = vld [vmem:[%s16587_s5 + $0x1e8] sm:$0xff]  ;;  %v12956_v37 = vld [vmem:[#allocation2 + $0x70] sm:$0xff] }
 0x455   : > { %v4870_v18 = vmax.f32 %v4850_v57, 0.0  ;;  %v15680_v12 = vadd.f32 %v5652_v13, %v5449_v26  ;;  %6765 = vmatpush.bf16.msra.mxu1 %v13024_v22  ;;  %v12885_v57 = vld [vmem:[#allocation2 + $0x10] sm:$0xff]  ;;  %v12987_v13 = vld [vmem:[%s16587_s5 + $0x160] sm:$0xff] }
 0x456   : > { %13895 = vst [vmem:[#allocation2 + $0x108] sm:$0xff] %v13650_v42   ;;  %5325 = vmatmul.bf16.gmra.mxu2 %v12910_v2  ;;  %v12938_v42 = vld [vmem:[#allocation2 + $0x10] sm:$0xff]  ;;  %v13041_v2 = vld [vmem:[%s16587_s5 + $0x220] sm:$0xff] }
 0x457   : > { %v15683_v10 = vmul.f32 0.0, %v4870_v18  ;;  %5691 = vmatmul.bf16.gmra.mxu0 %v12927_v40  ;;  %v12957_v40 = vld [vmem:[#allocation2 + $0x78] sm:$0xff]  ;;  %v13039_v22 = vld [vmem:[%s16587_s5 + $0x210] sm:$0xff] }
 0x458   : > { %6990 = vmatpush.bf16.msra.mxu2 %v13041_v2  ;;  %v12995_v2 = vld [vmem:[#allocation2 + $0x30] sm:$0xff] }
 0x459   : > { %16633 = vst [vmem:[#allocation11_spill] sm:$0xff] %v15683_v10  ;;  %v4910_v9 = vrot.slane %v15683_v10, 7  ;;  %v13605_v1 = vpack.c.bf16 %v15683_v10, %v15663_v31  ;;  %v5030_v44 = vrot.slane %v15683_v10, 1  ;;  %v15696_v7 = vpop.f32.mrf.mxu2  ;;  %v13079_v31 = vld [vmem:[%s16589_s7 + $0x70] sm:$0xff] }
 0x45b   : > { %v4911_v54 = vsel %vm411_vm0, %v4909_v15, %v4910_v9  ;;  %v4930_v39 = vsel %vm411_vm0, %v4910_v9, %v4891_v56  ;;  %v5031_v26 = vsel %vm532_vm1, %v5029_v35, %v5030_v44  ;;  %v5050_v19 = vsel %vm532_vm1, %v5030_v44, %v5011_v59  ;;  %13886 = vst [vmem:[#allocation2 + $0xb0] sm:$0xff] %v13605_v1   ;;  %v12988_v59 = vld [vmem:[%s16587_s5 + $0x168] sm:$0xff]  ;;  %v12992_v15 = vld [vmem:[#allocation2 + $0x18] sm:$0xff]  ;;  %v13023_v9 = vld [vmem:[%s16587_s5 + $0x1e0] sm:$0xff] }
 0x45c   : > { %v13510_v60 = vpack.c.bf16 %v4929_v29, %v4930_v39  ;;  %v13555_v24 = vpack.c.bf16 %v4911_v54, %v4912_v30  ;;  %v13655_v17 = vpack.c.bf16 %v5050_v19, %v5031_v26  ;;  %v5654_v33 = vpop.f32.mrf.mxu0  ;;  %6317 = vmatpush.bf16.msrb.mxu3 %v12988_v59  ;;  %v12939_v56 = vld [vmem:[#allocation2 + $0x18] sm:$0xff]  ;;  %6766 = vmatpush.bf16.msra.mxu1 %v13023_v9  ;;  %v12993_v54 = vld [vmem:[#allocation2 + $0x20] sm:$0xff]  ;;  %v12994_v59 = vld [vmem:[#allocation2 + $0x28] sm:$0xff] }
 0x45d   : > { %v15714_v53 = vadd.f32 %v5654_v33, %v5451_v23  ;;  %v12928_v6 = vld [vmem:[#allocation2 + $0x108] sm:$0xff]  ;;  %v12986_v29 = vld [vmem:[%s16587_s5 + $0x158] sm:$0xff]  ;;  %v12887_v39 = vld [vmem:[#allocation2 + $0x20] sm:$0xff] }
 0x45e   : > { %13867 = vst [vmem:[#allocation2 + $0x8] sm:$0xff] %v13510_v60   ;;  %v12940_v26 = vld [vmem:[#allocation2 + $0x20] sm:$0xff]  ;;  %v13040_v19 = vld [vmem:[%s16587_s5 + $0x218] sm:$0xff]  ;;  %v13038_v9 = vld [vmem:[%s16587_s5 + $0x208] sm:$0xff] }
 0x45f   : > { %13876 = vst [vmem:[#allocation2 + $0x50] sm:$0xff] %v13555_v24   ;;  %6991 = vmatpush.bf16.msra.mxu2 %v13040_v19  ;;  %v13022_v24 = vld [vmem:[%s16587_s5 + $0x1d8] sm:$0xff] }
 0x460   : > { %13896 = vst [vmem:[#allocation2 + $0x110] sm:$0xff] %v13655_v17   ;;  %6318 = vmatpush.bf16.msrb.mxu3 %v12987_v13  ;;  %6767 = vmatpush.bf16.msra.mxu1 %v13022_v24  ;;  %v12985_v17 = vld [vmem:[%s16587_s5 + $0x150] sm:$0xff]  ;;  %v12890_v19 = vld [vmem:[#allocation2 + $0x38] sm:$0xff] }
 0x461   : > { %v15716_v0 = vpop.f32.mrf.mxu2  ;;  %v12960_v13 = vld [vmem:[#allocation2 + $0x90] sm:$0xff]  ;;  %v12943_v24 = vld [vmem:[#allocation2 + $0x38] sm:$0xff] }
 0x463   : > { %6992 = vmatpush.bf16.msra.mxu2 %v13039_v22  ;;  %v12962_v22 = vld [vmem:[#allocation2 + $0xa0] sm:$0xff] }
 0x464   : > { %v15744_v1 = vpop.f32.mrf.mxu0  ;;  %6319 = vmatpush.bf16.msrb.mxu3 %v12986_v29 }
 0x465   : > { %v12884_v45 = vld [vmem:[#allocation2 + $0x8] sm:$0xff] }
 0x466   : > { %v12937_v47 = vld [vmem:[#allocation2 + $0x8] sm:$0xff]  ;;  %6099 = vmatmul.bf16.vlgmr.msrb.gmra.mxu2 %v12955_v41  ;;  %5452 = vmatmul.bf16.gmra.mxu3 %v12884_v45  ;;  %v12946_v8 = vld [vmem:[#allocation2 + $0x50] sm:$0xff] }
 0x467   : > { %5696 = vmatmul.bf16.gmra.mxu0 %v12928_v6  ;;  %5875 = vmatmul.bf16.vlgmr.msrb.gmra.mxu1 %v12937_v47  ;;  %v12959_v41 = vld [vmem:[#allocation2 + $0x88] sm:$0xff] }
 0x468   : > { %6320 = vmatpush.bf16.msrb.mxu3 %v12985_v17  ;;  %v12888_v6 = vld [vmem:[#allocation2 + $0x28] sm:$0xff]  ;;  %6993 = vmatpush.bf16.msra.mxu2 %v13038_v9  ;;  %v12983_v17 = vld [vmem:[%s16587_s5 + $0x140] sm:$0xff]  ;;  %v13080_v9 = vld [vmem:[%s16589_s7 + $0x78] sm:$0xff] }
 0x469   : > { %v15721_v35 = vpop.f32.mrf.mxu2  ;;  %v12941_v45 = vld [vmem:[#allocation2 + $0x28] sm:$0xff] }
 0x46c   : > { %v15753_v23 = vpop.f32.mrf.mxu0 }
 0x471   : > { %v15726_v51 = vpop.f32.mrf.mxu2 }
 0x474   : > { %v15766_v33 = vpop.f32.mrf.mxu0 }
 0x476   : > { %6104 = vmatmul.bf16.gmra.mxu2 %v12956_v37  ;;  %5457 = vmatmul.bf16.gmra.mxu3 %v12885_v57  ;;  %v13021_v37 = vld [vmem:[%s16587_s5 + $0x1d0] sm:$0xff] }
 0x477   : > { %6547 = vmatmul.bf16.vlgmr.msra.gmra.mxu0 %v12991_v16  ;;  %5880 = vmatmul.bf16.gmra.mxu1 %v12938_v42  ;;  %v12984_v42 = vld [vmem:[%s16587_s5 + $0x148] sm:$0xff] }
 0x478   : > { %6768 = vmatpush.bf16.msra.mxu1 %v13021_v37  ;;  %6321 = vmatpush.bf16.msrb.mxu3 %v12984_v42  ;;  %v12997_v37 = vld [vmem:[#allocation2 + $0x40] sm:$0xff] }
 0x479   : > { %v15734_v32 = vpop.f32.mrf.mxu2  ;;  %v12891_v42 = vld [vmem:[#allocation2 + $0x40] sm:$0xff] }
 0x47c   : > { %v15770_v47 = vpop.f32.mrf.mxu0  ;;  %6322 = vmatpush.bf16.msrb.mxu3 %v12983_v17 }
 0x480   : > { %7511 = vmatpush.bf16.msra.mxu3 %v13080_v9 }
 0x481   : > { %v15736_v18 = vpop.f32.mrf.mxu2 }
 0x484   : > { %v15780_v16 = vpop.f32.mrf.mxu0  ;;  %7512 = vmatpush.bf16.msra.mxu3 %v13079_v31 }
 0x486   : > { %6109 = vmatmul.bf16.gmra.mxu2 %v12957_v40  ;;  %5462 = vmatmul.bf16.gmra.mxu3 %v12886_v28  ;;  %v12889_v40 = vld [vmem:[#allocation2 + $0x30] sm:$0xff] }
 0x487   : > { %6552 = vmatmul.bf16.gmra.mxu0 %v12992_v15  ;;  %5885 = vmatmul.bf16.gmra.mxu1 %v12939_v56  ;;  %v12942_v15 = vld [vmem:[#allocation2 + $0x30] sm:$0xff] }
 0x489   : > { %v15746_v44 = vpop.f32.mrf.mxu2 }
 0x48c   : > { %v15789_v56 = vpop.f32.mrf.mxu0 }
 0x491   : > { %v15751_v30 = vpop.f32.mrf.mxu2 }
 0x496   : > { %6114 = vmatmul.bf16.gmra.mxu2 %v12958_v5  ;;  %5467 = vmatmul.bf16.gmra.mxu3 %v12887_v39  ;;  %v13020_v5 = vld [vmem:[%s16587_s5 + $0x1c8] sm:$0xff]  ;;  %v12961_v39 = vld [vmem:[#allocation2 + $0x98] sm:$0xff] }
 0x497   : > { %6557 = vmatmul.bf16.gmra.mxu0 %v12993_v54  ;;  %5890 = vmatmul.bf16.gmra.mxu1 %v12940_v26  ;;  %v15799_v54 = vpop.f32.mrf.mxu0  ;;  %v12996_v26 = vld [vmem:[#allocation2 + $0x38] sm:$0xff] }
 0x498   : > { %6769 = vmatpush.bf16.msra.mxu1 %v13020_v5 }
 0x499   : > { %v15758_v60 = vpop.f32.mrf.mxu2 }
 0x4a1   : > { %v15768_v27 = vpop.f32.mrf.mxu2 }
 0x4a6   : > { %6119 = vmatmul.bf16.gmra.mxu2 %v12959_v41  ;;  %5472 = vmatmul.bf16.gmra.mxu3 %v12888_v6 }
 0x4a7   : > { %6562 = vmatmul.bf16.gmra.mxu0 %v12994_v59  ;;  %5895 = vmatmul.bf16.gmra.mxu1 %v12941_v45  ;;  %v15806_v59 = vpop.f32.mrf.mxu0  ;;  %v13037_v45 = vld [vmem:[%s16587_s5 + $0x200] sm:$0xff] }
 0x4a8   : > { %6994 = vmatpush.bf16.msra.mxu2 %v13037_v45  ;;  %v12892_v45 = vld [vmem:[#allocation2 + $0x48] sm:$0xff] }
 0x4a9   : > { %v15772_v3 = vpop.f32.mrf.mxu2 }
 0x4b1   : > { %v15782_v57 = vpop.f32.mrf.mxu2 }
 0x4b6   : > { %6124 = vmatmul.bf16.gmra.mxu2 %v12960_v13  ;;  %5477 = vmatmul.bf16.gmra.mxu3 %v12889_v40  ;;  %v12944_v13 = vld [vmem:[#allocation2 + $0x40] sm:$0xff]  ;;  %v15816_v40 = vpop.f32.mrf.mxu0 }
 0x4b7   : > { %6567 = vmatmul.bf16.gmra.mxu0 %v12995_v2  ;;  %5900 = vmatmul.bf16.gmra.mxu1 %v12942_v15  ;;  %v13019_v2 = vld [vmem:[%s16587_s5 + $0x1c0] sm:$0xff] }
 0x4b8   : > { %6770 = vmatpush.bf16.msra.mxu1 %v13019_v2 }
 0x4b9   : > { %v15787_v28 = vpop.f32.mrf.mxu2 }
 0x4c1   : > { %v15794_v29 = vpop.f32.mrf.mxu2 }
 0x4c6   : > { %6129 = vmatmul.bf16.gmra.mxu2 %v12961_v39  ;;  %5482 = vmatmul.bf16.gmra.mxu3 %v12890_v19  ;;  %v15825_v39 = vpop.f32.mrf.mxu0  ;;  %v12963_v19 = vld [vmem:[#allocation2 + $0xa8] sm:$0xff] }
 0x4c7   : > { %6572 = vmatmul.bf16.gmra.mxu0 %v12996_v26  ;;  %5905 = vmatmul.bf16.gmra.mxu1 %v12943_v24  ;;  %v12998_v24 = vld [vmem:[#allocation2 + $0x48] sm:$0xff] }
 0x4c9   : > { %v15804_v41 = vpop.f32.mrf.mxu2 }
 0x4ce   : > { %v15830_v2 = vpop.f32.mrf.mxu0 }
 0x4d1   : > { %v15808_v6 = vpop.f32.mrf.mxu2 }
 0x4d6   : > { %6134 = vmatmul.bf16.gmra.mxu2 %v12962_v22  ;;  %5487 = vmatmul.bf16.gmra.mxu3 %v12891_v42  ;;  %v12945_v22 = vld [vmem:[#allocation2 + $0x48] sm:$0xff] }
 0x4d7   : > { %6577 = vmatmul.bf16.gmra.mxu0 %v12997_v37  ;;  %5910 = vmatmul.bf16.gmra.mxu1 %v12944_v13 }
 0x4d9   : > { %v15818_v15 = vpop.f32.mrf.mxu2 }
 0x4e1   : > { %v15823_v5 = vpop.f32.mrf.mxu2 }
 0x4e4   : > { %v5876_v26 = vpop.f32.mrf.mxu1 }
 0x4e5   : > { %v5926_v17 = vadd.f32 %v5876_v26, %v15680_v12 }
 0x4e6   : > { %6139 = vmatmul.bf16.gmra.mxu2 %v12963_v19  ;;  %5492 = vmatmul.bf16.gmra.mxu3 %v12892_v45 }
 0x4e7   : > { %6582 = vmatmul.bf16.gmra.mxu0 %v12998_v24  ;;  %5915 = vmatmul.bf16.gmra.mxu1 %v12945_v22  ;;  %v12964_v22 = vld [vmem:[#allocation2 + $0xb0] sm:$0xff] }
 0x4e9   : > { %v6100_v37 = vpop.f32.mrf.mxu2  ;;  %v5453_v13 = vpop.f32.mrf.mxu3 }
 0x4ea   : > { %v15828_v42 = vadd.f32 %v6100_v37, %v5926_v17  ;;  %v5454_v12 = vadd.f32 %v5453_v13, %v15696_v7  ;;  %v12999_v37 = vld [vmem:[#allocation2 + $0x50] sm:$0xff] }
 0x4ec   : > { %v5878_v9 = vpop.f32.mrf.mxu1  ;;  %v5704_v17 = vadd.f32 %v15744_v1, %v5454_v12 }
 0x4ed   : > { %v5927_v10 = vadd.f32 %v5878_v9, %v15714_v53  ;;  %v15840_v53 = vpop.f32.mrf.mxu0 }
 0x4f1   : > { %v6102_v26 = vpop.f32.mrf.mxu2  ;;  %v5455_v24 = vpop.f32.mrf.mxu3 }
 0x4f2   : > { %v15837_v19 = vadd.f32 %v6102_v26, %v5927_v10  ;;  %v5456_v9 = vadd.f32 %v5455_v24, %v15716_v0  ;;  %v12974_v24 = vld [vmem:[#allocation2 + $0xd0] sm:$0xff] }
 0x4f4   : > { %v5881_v45 = vpop.f32.mrf.mxu1  ;;  %v5705_v1 = vadd.f32 %v15753_v23, %v5456_v9 }
 0x4f5   : > { %v5928_v4 = vadd.f32 %v5881_v45, %v5704_v17 }
 0x4f6   : > { %6144 = vmatmul.bf16.gmra.mxu2 %v12964_v22  ;;  %6323 = vmatmul.bf16.vlgmr.msrb.gmra.mxu3 %v12973_v48  ;;  %v13078_v48 = vld [vmem:[%s16589_s7 + $0x68] sm:$0xff] }
 0x4f7   : > { %6587 = vmatmul.bf16.gmra.mxu0 %v12999_v37  ;;  %5920 = vmatmul.bf16.gmra.mxu1 %v12946_v8  ;;  %v13009_v37 = vld [vmem:[#allocation2 + $0x70] sm:$0xff] }
 0x4f8   : > { %7513 = vmatpush.bf16.msra.mxu3 %v13078_v48 }
 0x4f9   : > { %v6105_v31 = vpop.f32.mrf.mxu2  ;;  %v5458_v7 = vpop.f32.mrf.mxu3 }
 0x4fa   : > { %v15843_v10 = vadd.f32 %v6105_v31, %v5928_v4  ;;  %v5459_v26 = vadd.f32 %v5458_v7, %v15721_v35  ;;  %v13027_v4 = vld [vmem:[#allocation2 + $0xd0] sm:$0xff] }
 0x4fc   : > { %v5883_v13 = vpop.f32.mrf.mxu1  ;;  %v5706_v22 = vadd.f32 %v15766_v33, %v5459_v26 }
 0x4fd   : > { %v5929_v12 = vadd.f32 %v5883_v13, %v5705_v1 }
 0x501   : > { %v6107_v17 = vpop.f32.mrf.mxu2  ;;  %v5460_v49 = vpop.f32.mrf.mxu3 }
 0x502   : > { %v15847_v45 = vadd.f32 %v6107_v17, %v5929_v12  ;;  %v5461_v23 = vadd.f32 %v5460_v49, %v15726_v51  ;;  %v13028_v49 = vld [vmem:[#allocation2 + $0xd8] sm:$0xff] }
 0x504   : > { %v5886_v8 = vpop.f32.mrf.mxu1  ;;  %v5707_v33 = vadd.f32 %v15770_v47, %v5461_v23  ;;  %v15865_v47 = vpop.f32.mrf.mxu0 }
 0x505   : > { %v5930_v0 = vadd.f32 %v5886_v8, %v5706_v22  ;;  %v12975_v8 = vld [vmem:[#allocation2 + $0xd8] sm:$0xff] }
 0x506   : > { %6995 = vmatmul.bf16.vlgmr.msra.gmra.mxu2 %v13027_v4  ;;  %6328 = vmatmul.bf16.gmra.mxu3 %v12974_v24  ;;  %v13010_v4 = vld [vmem:[#allocation2 + $0x78] sm:$0xff] }
 0x507   : > { %6771 = vmatmul.bf16.vlgmr.msra.gmra.mxu1 %v13009_v37 }
 0x509   : > { %v6110_v35 = vpop.f32.mrf.mxu2  ;;  %v5463_v31 = vpop.f32.mrf.mxu3 }
 0x50a   : > { %v15854_v9 = vadd.f32 %v6110_v35, %v5930_v0  ;;  %v5464_v13 = vadd.f32 %v5463_v31, %v15734_v32  ;;  %v13077_v32 = vld [vmem:[%s16589_s7 + $0x60] sm:$0xff] }
 0x50b   : > { %7514 = vmatpush.bf16.msra.mxu3 %v13077_v32 }
 0x50c   : > { %v5888_v7 = vpop.f32.mrf.mxu1  ;;  %v5708_v22 = vadd.f32 %v15780_v16, %v5464_v13 }
 0x50d   : > { %v5931_v1 = vadd.f32 %v5888_v7, %v5707_v33  ;;  %v15871_v7 = vpop.f32.mrf.mxu0 }
 0x511   : > { %v6112_v12 = vpop.f32.mrf.mxu2  ;;  %v5465_v17 = vpop.f32.mrf.mxu3 }
 0x512   : > { %v15858_v26 = vadd.f32 %v6112_v12, %v5931_v1  ;;  %v5466_v0 = vadd.f32 %v5465_v17, %v15736_v18 }
 0x514   : > { %v5891_v48 = vpop.f32.mrf.mxu1  ;;  %v5709_v23 = vadd.f32 %v15789_v56, %v5466_v0 }
 0x515   : > { %v5932_v51 = vadd.f32 %v5891_v48, %v5708_v22  ;;  %v13029_v22 = vld [vmem:[#allocation2 + $0xe0] sm:$0xff]  ;;  %v15883_v32 = vpop.f32.mrf.mxu0 }
 0x516   : > { %7000 = vmatmul.bf16.gmra.mxu2 %v13028_v49  ;;  %6333 = vmatmul.bf16.gmra.mxu3 %v12975_v8  ;;  %v12976_v49 = vld [vmem:[#allocation2 + $0xe0] sm:$0xff] }
 0x517   : > { %6776 = vmatmul.bf16.gmra.mxu1 %v13010_v4 }
 0x519   : > { %v6115_v24 = vpop.f32.mrf.mxu2  ;;  %v5468_v16 = vpop.f32.mrf.mxu3 }
 0x51a   : > { %v15867_v37 = vadd.f32 %v6115_v24, %v5932_v51  ;;  %v5469_v33 = vadd.f32 %v5468_v16, %v15746_v44  ;;  %v13011_v51 = vld [vmem:[#allocation2 + $0x80] sm:$0xff] }
 0x51c   : > { %v5893_v35 = vpop.f32.mrf.mxu1  ;;  %v5710_v12 = vadd.f32 %v15799_v54, %v5469_v33  ;;  %v13076_v54 = vld [vmem:[%s16589_s7 + $0x58] sm:$0xff] }
 0x51d   : > { %v5933_v31 = vadd.f32 %v5893_v35, %v5709_v23  ;;  %7515 = vmatpush.bf16.msra.mxu3 %v13076_v54 }
 0x521   : > { %v6117_v18 = vpop.f32.mrf.mxu2  ;;  %v5470_v13 = vpop.f32.mrf.mxu3 }
 0x522   : > { %v15873_v1 = vadd.f32 %v6117_v18, %v5933_v31  ;;  %v5471_v56 = vadd.f32 %v5470_v13, %v15751_v30  ;;  %v13030_v13 = vld [vmem:[#allocation2 + $0xe8] sm:$0xff] }
 0x524   : > { %v5896_v17 = vpop.f32.mrf.mxu1  ;;  %v5711_v0 = vadd.f32 %v15806_v59, %v5471_v56 }
 0x525   : > { %v5934_v48 = vadd.f32 %v5896_v17, %v5710_v12  ;;  %v12977_v12 = vld [vmem:[#allocation2 + $0xe8] sm:$0xff] }
 0x526   : > { %7005 = vmatmul.bf16.gmra.mxu2 %v13029_v22  ;;  %6338 = vmatmul.bf16.gmra.mxu3 %v12976_v49  ;;  %v13012_v17 = vld [vmem:[#allocation2 + $0x88] sm:$0xff]  ;;  %v15889_v22 = vpop.f32.mrf.mxu0 }
 0x527   : > { %6781 = vmatmul.bf16.gmra.mxu1 %v13011_v51 }
 0x529   : > { %v6120_v8 = vpop.f32.mrf.mxu2  ;;  %v5473_v4 = vpop.f32.mrf.mxu3 }
 0x52a   : > { %v15877_v44 = vadd.f32 %v6120_v8, %v5934_v48  ;;  %v5474_v23 = vadd.f32 %v5473_v4, %v15758_v60  ;;  %v13075_v4 = vld [vmem:[%s16589_s7 + $0x50] sm:$0xff] }
 0x52b   : > { %7516 = vmatpush.bf16.msra.mxu3 %v13075_v4  ;;  %v13074_v4 = vld [vmem:[%s16589_s7 + $0x48] sm:$0xff] }
 0x52c   : > { %v5898_v24 = vpop.f32.mrf.mxu1  ;;  %v5712_v33 = vadd.f32 %v15816_v40, %v5474_v23 }
 0x52d   : > { %v5935_v16 = vadd.f32 %v5898_v24, %v5711_v0 }
 0x52e   : > { %v15899_v54 = vpop.f32.mrf.mxu0 }
 0x52f   : > { %7517 = vmatpush.bf16.msra.mxu3 %v13074_v4  ;;  %v12980_v4 = vld [vmem:[#allocation2 + $0x100] sm:$0xff] }
 0x531   : > { %v6122_v30 = vpop.f32.mrf.mxu2  ;;  %v5475_v31 = vpop.f32.mrf.mxu3 }
 0x532   : > { %v15886_v35 = vadd.f32 %v6122_v30, %v5935_v16  ;;  %v5476_v48 = vadd.f32 %v5475_v31, %v15768_v27  ;;  %v13031_v31 = vld [vmem:[#allocation2 + $0xf0] sm:$0xff] }
 0x534   : > { %v5901_v18 = vpop.f32.mrf.mxu1  ;;  %v5713_v56 = vadd.f32 %v15825_v39, %v5476_v48 }
 0x535   : > { %v5936_v59 = vadd.f32 %v5901_v18, %v5712_v33  ;;  %v12978_v33 = vld [vmem:[#allocation2 + $0xf0] sm:$0xff] }
 0x536   : > { %7010 = vmatmul.bf16.gmra.mxu2 %v13030_v13  ;;  %6343 = vmatmul.bf16.gmra.mxu3 %v12977_v12  ;;  %v13013_v18 = vld [vmem:[#allocation2 + $0x90] sm:$0xff] }
 0x537   : > { %6786 = vmatmul.bf16.gmra.mxu1 %v13012_v17 }
 0x539   : > { %v6125_v49 = vpop.f32.mrf.mxu2  ;;  %v5478_v51 = vpop.f32.mrf.mxu3 }
 0x53a   : > { %v15892_v60 = vadd.f32 %v6125_v49, %v5936_v59  ;;  %v5479_v0 = vadd.f32 %v5478_v51, %v15772_v3  ;;  %v15905_v59 = vpop.f32.mrf.mxu0 }
 0x53c   : > { %v5903_v8 = vpop.f32.mrf.mxu1  ;;  %v5714_v23 = vadd.f32 %v15830_v2, %v5479_v0 }
 0x53d   : > { %v5937_v40 = vadd.f32 %v5903_v8, %v5713_v56 }
 0x541   : > { %v6127_v27 = vpop.f32.mrf.mxu2  ;;  %v5480_v16 = vpop.f32.mrf.mxu3 }
 0x542   : > { %v15901_v24 = vadd.f32 %v6127_v27, %v5937_v40  ;;  %v5481_v13 = vadd.f32 %v5480_v16, %v15782_v57  ;;  %v15917_v0 = vpop.f32.mrf.mxu0  ;;  %v13032_v16 = vld [vmem:[#allocation2 + $0xf8] sm:$0xff] }
 0x544   : > { %v5906_v30 = vpop.f32.mrf.mxu1  ;;  %v5715_v48 = vadd.f32 %v15840_v53, %v5481_v13  ;;  %v12979_v53 = vld [vmem:[#allocation2 + $0xf8] sm:$0xff] }
 0x545   : > { %v5938_v39 = vadd.f32 %v5906_v30, %v5714_v23  ;;  %v13014_v30 = vld [vmem:[#allocation2 + $0x98] sm:$0xff] }
 0x546   : > { %7015 = vmatmul.bf16.gmra.mxu2 %v13031_v31  ;;  %6348 = vmatmul.bf16.gmra.mxu3 %v12978_v33 }
 0x547   : > { %6791 = vmatmul.bf16.gmra.mxu1 %v13013_v18 }
 0x549   : > { %v6130_v3 = vpop.f32.mrf.mxu2  ;;  %v5483_v17 = vpop.f32.mrf.mxu3 }
 0x54a   : > { %v15907_v12 = vadd.f32 %v6130_v3, %v5938_v39  ;;  %v5484_v51 = vadd.f32 %v5483_v17, %v15787_v28  ;;  %v13062_v3 = vld [vmem:[%s16589_s7 + $0x38] sm:$0xff]  ;;  %v15926_v17 = vpop.f32.mrf.mxu0 }
 0x54b   : > { %7678 = vmatpush.bf16.msrb.mxu0 %v13062_v3 }
 0x54c   : > { %v5908_v49 = vpop.f32.mrf.mxu1  ;;  %v5716_v57 = vadd.f32 %v15865_v47, %v5484_v51 }
 0x54d   : > { %v5939_v2 = vadd.f32 %v5908_v49, %v5715_v48  ;;  %v13061_v49 = vld [vmem:[%s16589_s7 + $0x30] sm:$0xff] }
 0x54f   : > { %7679 = vmatpush.bf16.msrb.mxu0 %v13061_v49 }
 0x551   : > { %v6132_v56 = vpop.f32.mrf.mxu2  ;;  %v5485_v40 = vpop.f32.mrf.mxu3 }
 0x552   : > { %v15911_v8 = vadd.f32 %v6132_v56, %v5939_v2  ;;  %v5486_v28 = vadd.f32 %v5485_v40, %v15794_v29  ;;  %v13033_v40 = vld [vmem:[#allocation2 + $0x100] sm:$0xff] }
 0x554   : > { %v5911_v27 = vpop.f32.mrf.mxu1  ;;  %v5717_v33 = vadd.f32 %v15871_v7, %v5486_v28 }
 0x555   : > { %v5940_v23 = vadd.f32 %v5911_v27, %v5716_v57  ;;  %v13015_v27 = vld [vmem:[#allocation2 + $0xa0] sm:$0xff] }
 0x556   : > { %7020 = vmatmul.bf16.gmra.mxu2 %v13032_v16  ;;  %6353 = vmatmul.bf16.gmra.mxu3 %v12979_v53  ;;  %v15945_v53 = vpop.f32.mrf.mxu0 }
 0x557   : > { %6796 = vmatmul.bf16.gmra.mxu1 %v13014_v30 }
 0x559   : > { %v6135_v31 = vpop.f32.mrf.mxu2  ;;  %v5488_v47 = vpop.f32.mrf.mxu3 }
 0x55a   : > { %v15920_v39 = vadd.f32 %v6135_v31, %v5940_v23  ;;  %v5489_v48 = vadd.f32 %v5488_v47, %v15804_v41  ;;  %v13060_v41 = vld [vmem:[%s16589_s7 + $0x28] sm:$0xff]  ;;  %v13073_v23 = vld [vmem:[%s16589_s7 + $0x40] sm:$0xff] }
 0x55b   : > { %7680 = vmatpush.bf16.msrb.mxu0 %v13060_v41  ;;  %7518 = vmatpush.bf16.msra.mxu3 %v13073_v23  ;;  %v12981_v41 = vld [vmem:[#allocation2 + $0x108] sm:$0xff] }
 0x55c   : > { %v5913_v18 = vpop.f32.mrf.mxu1  ;;  %v5718_v7 = vadd.f32 %v15883_v32, %v5489_v48  ;;  %v13098_v32 = vld [vmem:[%s16589_s7 + $0xb8] sm:$0xff]  ;;  %v13056_v23 = vld [vmem:[%s16589_s7 + $0x8] sm:$0xff] }
 0x55d   : > { %v5941_v13 = vadd.f32 %v5913_v18, %v5717_v33  ;;  %7882 = vmatpush.bf16.msrb.mxu1 %v13098_v32  ;;  %v13097_v33 = vld [vmem:[%s16589_s7 + $0xb0] sm:$0xff]  ;;  %v13058_v48 = vld [vmem:[%s16589_s7 + $0x18] sm:$0xff] }
 0x561   : > { %v6137_v29 = vpop.f32.mrf.mxu2  ;;  %v5490_v51 = vpop.f32.mrf.mxu3  ;;  %7883 = vmatpush.bf16.msrb.mxu1 %v13097_v33 }
 0x562   : > { %v15932_v2 = vadd.f32 %v6137_v29, %v5941_v13  ;;  %v5491_v16 = vadd.f32 %v5490_v51, %v15808_v6  ;;  %v13059_v6 = vld [vmem:[%s16589_s7 + $0x20] sm:$0xff]  ;;  %v13000_v13 = vld [vmem:[#allocation2 + $0x58] sm:$0xff]  ;;  %v13057_v51 = vld [vmem:[%s16589_s7 + $0x10] sm:$0xff] }
 0x563   : > { %7681 = vmatpush.bf16.msrb.mxu0 %v13059_v6  ;;  %v13055_v6 = vld [vmem:[%s16589_s7] sm:$0xff] }
 0x564   : > { %v5916_v56 = vpop.f32.mrf.mxu1  ;;  %v5719_v47 = vadd.f32 %v15889_v22, %v5491_v16  ;;  %6592 = vmatmul.bf16.gmra.mxu0 %v13000_v13  ;;  %v13096_v22 = vld [vmem:[%s16589_s7 + $0xa8] sm:$0xff] }
 0x565   : > { %v5942_v57 = vadd.f32 %v5916_v56, %v5718_v7  ;;  %7884 = vmatpush.bf16.msrb.mxu1 %v13096_v22  ;;  %v15970_v7 = vpop.f32.mrf.mxu0  ;;  %v13016_v16 = vld [vmem:[#allocation2 + $0xa8] sm:$0xff] }
 0x566   : > { %7025 = vmatmul.bf16.gmra.mxu2 %v13033_v40  ;;  %6358 = vmatmul.bf16.gmra.mxu3 %v12980_v4  ;;  %v13034_v4 = vld [vmem:[#allocation2 + $0x108] sm:$0xff] }
 0x567   : > { %6801 = vmatmul.bf16.gmra.mxu1 %v13015_v27  ;;  %7682 = vmatpush.bf16.msrb.mxu0 %v13058_v48  ;;  %v13045_v48 = vld [vmem:[#allocation2] sm:$0xff]  ;;  %v13092_v22 = vld [vmem:[%s16589_s7 + $0x88] sm:$0xff] }
 0x569   : > { %v6140_v30 = vpop.f32.mrf.mxu2  ;;  %v5493_v31 = vpop.f32.mrf.mxu3 }
 0x56a   : > { %v15950_v28 = vadd.f32 %v6140_v30, %v5942_v57  ;;  %v5494_v29 = vadd.f32 %v5493_v31, %v15818_v15  ;;  %v13095_v15 = vld [vmem:[%s16589_s7 + $0xa0] sm:$0xff] }
 0x56b   : > { %7683 = vmatpush.bf16.msrb.mxu0 %v13057_v51  ;;  %7885 = vmatpush.bf16.msrb.mxu1 %v13095_v15 }
 0x56c   : > { %v5918_v18 = vpop.f32.mrf.mxu1  ;;  %v5720_v40 = vadd.f32 %v15899_v54, %v5494_v29  ;;  %v13094_v54 = vld [vmem:[%s16589_s7 + $0x98] sm:$0xff] }
 0x56d   : > { %v15956_v3 = vadd.f32 %v5918_v18, %v5719_v47  ;;  %v15992_v18 = vpop.f32.mrf.mxu0 }
 0x56f   : > { %7684 = vmatpush.bf16.msrb.mxu0 %v13056_v23  ;;  %7886 = vmatpush.bf16.msrb.mxu1 %v13094_v54  ;;  %v13134_v23 = vld [vmem:[%s16589_s7 + $0x138] sm:$0xff] }
 0x570   : > { %8330 = vmatpush.bf16.msrb.mxu3 %v13134_v23 }
 0x571   : > { %v15965_v49 = vpop.f32.mrf.mxu2  ;;  %v5495_v56 = vpop.f32.mrf.mxu3 }
 0x572   : > { %v5496_v32 = vadd.f32 %v5495_v56, %v15823_v5  ;;  %v13093_v5 = vld [vmem:[%s16589_s7 + $0x90] sm:$0xff] }
 0x573   : > { %7685 = vmatpush.bf16.msrb.mxu0 %v13055_v6  ;;  %7887 = vmatpush.bf16.msrb.mxu1 %v13093_v5 }
 0x574   : > { %v5921_v57 = vpop.f32.mrf.mxu1  ;;  %v5721_v33 = vadd.f32 %v15905_v59, %v5496_v32 }
 0x575   : > { %v5944_v27 = vadd.f32 %v5921_v57, %v5720_v40  ;;  %v13091_v40 = vld [vmem:[%s16589_s7 + $0x80] sm:$0xff]  ;;  %v13035_v57 = vld [vmem:[#allocation2 + $0x110] sm:$0xff] }
 0x576   : > { %7030 = vmatmul.bf16.gmra.mxu2 %v13034_v4  ;;  %6363 = vmatmul.bf16.gmra.mxu3 %v12981_v41  ;;  %v12982_v4 = vld [vmem:[#allocation2 + $0x110] sm:$0xff]  ;;  %v16005_v41 = vpop.f32.mrf.mxu0 }
 0x577   : > { %6806 = vmatmul.bf16.gmra.mxu1 %v13016_v16  ;;  %7686 = vmatmul.bf16.vlgmr.msrb.gmra.mxu0 %v13045_v48 }
 0x578   : > { %7888 = vmatpush.bf16.msrb.mxu1 %v13092_v22 }
 0x579   : > { %v6145_v30 = vpop.f32.mrf.mxu2  ;;  %v6324_v47 = vpop.f32.mrf.mxu3 }
 0x57a   : > { %v15986_v31 = vadd.f32 %v6145_v30, %v5944_v27  ;;  %v6374_v59 = vadd.f32 %v6324_v47, %v15828_v42  ;;  %v13017_v27 = vld [vmem:[#allocation2 + $0xb0] sm:$0xff]  ;;  %v13116_v42 = vld [vmem:[%s16589_s7 + $0xf8] sm:$0xff]  ;;  %v16017_v30 = vld [vmem:[%s16588_s6] ss:$0 sm:$0xff] }
 0x57b   : > { %8106 = vmatpush.bf16.msrb.mxu2 %v13116_v42  ;;  %v13063_v42 = vld [vmem:[#allocation2 + $0x60] sm:$0xff] }
 0x57c   : > { %v5923_v13 = vpop.f32.mrf.mxu1  ;;  %7889 = vmatpush.bf16.msrb.mxu1 %v13091_v40  ;;  %v6598_v16 = vadd.f32 %v15917_v0, %v6374_v59 }
 0x57d   : > { %v15994_v29 = vadd.f32 %v5923_v13, %v5721_v33 }
 0x57e   : > { %v16022_v48 = vpop.f32.mrf.mxu0 }
 0x581   : > { %v15999_v51 = vpop.f32.mrf.mxu2  ;;  %v6326_v56 = vpop.f32.mrf.mxu3 }
 0x582   : > { %v6375_v0 = vadd.f32 %v6326_v56, %v15837_v19 }
 0x584   : > { %v6772_v15 = vpop.f32.mrf.mxu1  ;;  %v6599_v13 = vadd.f32 %v15926_v17, %v6375_v0 }
 0x585   : > { %v6822_v32 = vadd.f32 %v6772_v15, %v6598_v16  ;;  %v13018_v16 = vld [vmem:[#allocation2 + $0xb8] sm:$0xff] }
 0x586   : > { %7035 = vmatmul.bf16.gmra.mxu2 %v13035_v57  ;;  %6368 = vmatmul.bf16.gmra.mxu3 %v12982_v4 }
 0x587   : > { %6811 = vmatmul.bf16.gmra.mxu1 %v13017_v27  ;;  %v13036_v27 = vld [vmem:[#allocation2 + $0x118] sm:$0xff] }
 0x589   : > { %v6996_v54 = vpop.f32.mrf.mxu2  ;;  %v6329_v47 = vpop.f32.mrf.mxu3 }
 0x58a   : > { %v7046_v6 = vadd.f32 %v6996_v54, %v6822_v32  ;;  %v6376_v15 = vadd.f32 %v6329_v47, %v15843_v10  ;;  %v13115_v10 = vld [vmem:[%s16589_s7 + $0xf0] sm:$0xff] }
 0x58b   : > { %v13133_v54 = vld [vmem:[%s16589_s7 + $0x130] sm:$0xff]  ;;  %8107 = vmatpush.bf16.msrb.mxu2 %v13115_v10 }
 0x58c   : > { %v6774_v33 = vpop.f32.mrf.mxu1  ;;  %v7070_v5 = vadd.f32 %v16017_v30, %v7046_v6  ;;  %v6600_v17 = vadd.f32 %v15945_v53, %v6376_v15  ;;  %8331 = vmatpush.bf16.msrb.mxu3 %v13133_v54 }
 0x58d   : > { %v6823_v22 = vadd.f32 %v6774_v33, %v6599_v13 }
 0x58e   : > { %v7090_v59 = vmax.f32 %v7070_v5, 0.0  ;;  %v16036_v5 = vpop.f32.mrf.mxu0 }
 0x590   : > { %v16026_v23 = vmul.f32 0.0, %v7090_v59 }
 0x591   : > { %v6998_v40 = vpop.f32.mrf.mxu2  ;;  %v6331_v4 = vpop.f32.mrf.mxu3 }
 0x592   : > { %v7047_v57 = vadd.f32 %v6998_v40, %v6823_v22  ;;  %v16602_v47 = vrot.slane %v16026_v23, 7  ;;  %v6377_v22 = vadd.f32 %v6331_v4, %v15847_v45  ;;  %v16603_v45 = vrot.slane %v16026_v23, 1 }
 0x594   : > { %v7071_v19 = vadd.f32 %v16017_v30, %v7047_v57  ;;  %v6777_v56 = vpop.f32.mrf.mxu1 }
 0x595   : > { %v6824_v6 = vadd.f32 %v6777_v56, %v6600_v17 }
 0x596   : > { %v7091_v32 = vmax.f32 %v7071_v19, 0.0  ;;  %7040 = vmatmul.bf16.gmra.mxu2 %v13036_v27  ;;  %7519 = vmatmul.bf16.vlgmr.msra.gmra.mxu3 %v13063_v42  ;;  %v6601_v42 = vadd.f32 %v15970_v7, %v6377_v22 }
 0x597   : > { %6816 = vmatmul.bf16.gmra.mxu1 %v13018_v16 }
 0x598   : > { %v7111_v0 = vmul.f32 0.0, %v7091_v32 }
 0x599   : > { %v7001_v33 = vpop.f32.mrf.mxu2  ;;  %v6334_v40 = vpop.f32.mrf.mxu3 }
 0x59a   : > { %v7131_v53 = vrot.slane %v7111_v0, 7  ;;  %v13710_v13 = vpack.c.bf16 %v7111_v0, %v16026_v23  ;;  %v7048_v59 = vadd.f32 %v7001_v33, %v6824_v6  ;;  %v7251_v19 = vrot.slane %v7111_v0, 1 }
 0x59b   : > { %v6378_v54 = vadd.f32 %v6334_v40, %v15854_v9 }
 0x59c   : > { %v16044_v15 = vsel %vm411_vm0, %v16602_v47, %v7131_v53  ;;  %13907 = vst [vmem:[#allocation2 + $0x68] sm:$0xff] %v13710_v13   ;;  %v7072_v57 = vadd.f32 %v16017_v30, %v7048_v59  ;;  %v6779_v27 = vpop.f32.mrf.mxu1  ;;  %v13081_v47 = vld [vmem:[#allocation2 + $0xc0] sm:$0xff]  ;;  %v16051_v59 = vpop.f32.mrf.mxu0  ;;  %v7288_v7 = vsel %vm532_vm1, %v16603_v45, %v7251_v19 }
 0x59d   : > { %v6825_v32 = vadd.f32 %v6779_v27, %v6601_v42 }
 0x59e   : > { %v7092_v16 = vmax.f32 %v7072_v57, 0.0 }
 0x5a0   : > { %v7112_v56 = vmul.f32 %v14679_v25, %v7092_v16  ;;  %v6602_v16 = vadd.f32 %v15992_v18, %v6378_v54 }
 0x5a1   : > { %v7003_v4 = vpop.f32.mrf.mxu2  ;;  %v6336_v33 = vpop.f32.mrf.mxu3 }
 0x5a2   : > { %v7132_v17 = vrot.slane %v7112_v56, 7  ;;  %v7252_v10 = vrot.slane %v7112_v56, 1  ;;  %v7049_v6 = vadd.f32 %v7003_v4, %v6825_v32  ;;  %v6379_v4 = vadd.f32 %v6336_v33, %v15858_v26 }
 0x5a3   : > { %v13064_v13 = vld [vmem:[#allocation2 + $0x68] sm:$0xff] }
 0x5a4   : > { %v7167_v0 = vsel %vm411_vm0, %v7131_v53, %v7132_v17  ;;  %v7287_v22 = vsel %vm532_vm1, %v7251_v19, %v7252_v10  ;;  %v7073_v57 = vadd.f32 %v16017_v30, %v7049_v6  ;;  %v6782_v9 = vpop.f32.mrf.mxu1  ;;  %v6603_v33 = vadd.f32 %v16005_v41, %v6379_v4 }
 0x5a5   : > { %v13760_v40 = vpack.c.bf16 %v7287_v22, %v7288_v7  ;;  %v6826_v32 = vadd.f32 %v6782_v9, %v6602_v16  ;;  %v16070_v7 = vpop.f32.mrf.mxu0 }
 0x5a6   : > { %v7093_v27 = vmax.f32 %v7073_v57, 0.0  ;;  %7524 = vmatmul.bf16.gmra.mxu3 %v13064_v13 }
 0x5a7   : > { %13917 = vst [vmem:[#allocation2 + $0xc8] sm:$0xff] %v13760_v40   ;;  %7890 = vmatmul.bf16.vlgmr.msrb.gmra.mxu1 %v13081_v47 }
 0x5a8   : > { %v7113_v42 = vmul.f32 %v14707_v52, %v7093_v27 }
 0x5a9   : > { %v7006_v45 = vpop.f32.mrf.mxu2  ;;  %v6339_v21 = vpop.f32.mrf.mxu3 }
 0x5aa   : > { %v7133_v53 = vrot.slane %v7113_v42, 7  ;;  %v13715_v20 = vpack.c.bf16 %v7113_v42, %v7112_v56  ;;  %v7253_v46 = vrot.slane %v7113_v42, 1  ;;  %v7050_v19 = vadd.f32 %v7006_v45, %v6826_v32  ;;  %v13114_v56 = vld [vmem:[%s16589_s7 + $0xe8] sm:$0xff] }
 0x5ab   : > { %v13132_v45 = vld [vmem:[%s16589_s7 + $0x128] sm:$0xff]  ;;  %8108 = vmatpush.bf16.msrb.mxu2 %v13114_v56  ;;  %v6380_v57 = vadd.f32 %v6339_v21, %v15867_v37 }
 0x5ac   : > { %v7166_v6 = vsel %vm411_vm0, %v7132_v17, %v7133_v53  ;;  %v7286_v18 = vsel %vm532_vm1, %v7252_v10, %v7253_v46  ;;  %13908 = vst [vmem:[#allocation2 + $0x70] sm:$0xff] %v13715_v20   ;;  %v7074_v47 = vadd.f32 %v16017_v30, %v7050_v19  ;;  %v6784_v54 = vpop.f32.mrf.mxu1  ;;  %8332 = vmatpush.bf16.msrb.mxu3 %v13132_v45 }
 0x5ad   : > { %v13665_v13 = vpack.c.bf16 %v7166_v6, %v7167_v0  ;;  %v6827_v17 = vadd.f32 %v6784_v54, %v6603_v33  ;;  %v16087_v21 = vpop.f32.mrf.mxu0 }
 0x5ae   : > { %v7094_v26 = vmax.f32 %v7074_v47, 0.0  ;;  %v13082_v19 = vld [vmem:[#allocation2 + $0xc8] sm:$0xff]  ;;  %v6604_v47 = vadd.f32 %v16022_v48, %v6380_v57 }
 0x5af   : > { %13898 = vst [vmem:[#allocation2 + $0x10] sm:$0xff] %v13665_v13  }
 0x5b0   : > { %v7114_v20 = vmul.f32 %v14679_v25, %v7094_v26 }
 0x5b1   : > { %v7008_v10 = vpop.f32.mrf.mxu2  ;;  %v6341_v9 = vpop.f32.mrf.mxu3 }
 0x5b2   : > { %v7134_v0 = vrot.slane %v7114_v20, 7  ;;  %v7254_v22 = vrot.slane %v7114_v20, 1  ;;  %v7051_v41 = vadd.f32 %v7008_v10, %v6827_v17 }
 0x5b3   : > { %v13065_v40 = vld [vmem:[#allocation2 + $0x70] sm:$0xff] }
 0x5b4   : > { %v7165_v27 = vsel %vm411_vm0, %v7133_v53, %v7134_v0  ;;  %v7285_v16 = vsel %vm532_vm1, %v7253_v46, %v7254_v22  ;;  %v7075_v42 = vadd.f32 %v16017_v30, %v7051_v41  ;;  %v6787_v32 = vpop.f32.mrf.mxu1  ;;  %v6381_v53 = vadd.f32 %v6341_v9, %v15873_v1 }
 0x5b5   : > { %v13765_v4 = vpack.c.bf16 %v7285_v16, %v7286_v18  ;;  %v6828_v54 = vadd.f32 %v6787_v32, %v6604_v47  ;;  %v16104_v16 = vpop.f32.mrf.mxu0 }
 0x5b6   : > { %v7095_v6 = vmax.f32 %v7075_v42, 0.0  ;;  %7529 = vmatmul.bf16.gmra.mxu3 %v13065_v40  ;;  %v6605_v1 = vadd.f32 %v16036_v5, %v6381_v53 }
 0x5b7   : > { %13918 = vst [vmem:[#allocation2 + $0xd0] sm:$0xff] %v13765_v4   ;;  %7895 = vmatmul.bf16.gmra.mxu1 %v13082_v19 }
 0x5b8   : > { %v7115_v37 = vmul.f32 %v14707_v52, %v7095_v6 }
 0x5b9   : > { %v7011_v13 = vpop.f32.mrf.mxu2  ;;  %v6344_v18 = vpop.f32.mrf.mxu3 }
 0x5ba   : > { %v7135_v46 = vrot.slane %v7115_v37, 7  ;;  %v13720_v26 = vpack.c.bf16 %v7115_v37, %v7114_v20  ;;  %v7255_v33 = vrot.slane %v7115_v37, 1  ;;  %v7052_v56 = vadd.f32 %v7011_v13, %v6828_v54  ;;  %v13113_v20 = vld [vmem:[%s16589_s7 + $0xe0] sm:$0xff] }
 0x5bb   : > { %8109 = vmatpush.bf16.msrb.mxu2 %v13113_v20  ;;  %v6382_v5 = vadd.f32 %v6344_v18, %v15877_v44 }
 0x5bc   : > { %v7164_v45 = vsel %vm411_vm0, %v7134_v0, %v7135_v46  ;;  %v7284_v48 = vsel %vm532_vm1, %v7254_v22, %v7255_v33  ;;  %13909 = vst [vmem:[#allocation2 + $0x78] sm:$0xff] %v13720_v26   ;;  %v7076_v17 = vadd.f32 %v16017_v30, %v7052_v56  ;;  %v6789_v10 = vpop.f32.mrf.mxu1  ;;  %v13131_v0 = vld [vmem:[%s16589_s7 + $0x120] sm:$0xff] }
 0x5bd   : > { %v13670_v57 = vpack.c.bf16 %v7164_v45, %v7165_v27  ;;  %v6829_v22 = vadd.f32 %v6789_v10, %v6605_v1  ;;  %8333 = vmatpush.bf16.msrb.mxu3 %v13131_v0  ;;  %v6606_v56 = vadd.f32 %v16051_v59, %v6382_v5  ;;  %v16115_v1 = vpop.f32.mrf.mxu0 }
 0x5be   : > { %v7096_v41 = vmax.f32 %v7076_v17, 0.0  ;;  %v13083_v13 = vld [vmem:[#allocation2 + $0xd0] sm:$0xff] }
 0x5bf   : > { %13899 = vst [vmem:[#allocation2 + $0x18] sm:$0xff] %v13670_v57  }
 0x5c0   : > { %v7116_v9 = vmul.f32 %v14679_v25, %v7096_v41 }
 0x5c1   : > { %v7013_v40 = vpop.f32.mrf.mxu2  ;;  %v6346_v4 = vpop.f32.mrf.mxu3 }
 0x5c2   : > { %v7136_v27 = vrot.slane %v7116_v9, 7  ;;  %v7256_v42 = vrot.slane %v7116_v9, 1  ;;  %v7053_v32 = vadd.f32 %v7013_v40, %v6829_v22  ;;  %v6383_v45 = vadd.f32 %v6346_v4, %v15886_v35 }
 0x5c3   : > { %v13066_v19 = vld [vmem:[#allocation2 + $0x78] sm:$0xff] }
 0x5c4   : > { %v7163_v6 = vsel %vm411_vm0, %v7135_v46, %v7136_v27  ;;  %v7283_v47 = vsel %vm532_vm1, %v7255_v33, %v7256_v42  ;;  %v7077_v37 = vadd.f32 %v16017_v30, %v7053_v32  ;;  %v6792_v54 = vpop.f32.mrf.mxu1  ;;  %v6607_v40 = vadd.f32 %v16070_v7, %v6383_v45  ;;  %v13130_v45 = vld [vmem:[%s16589_s7 + $0x118] sm:$0xff] }
 0x5c5   : > { %v13770_v53 = vpack.c.bf16 %v7283_v47, %v7284_v48  ;;  %v6830_v18 = vadd.f32 %v6792_v54, %v6606_v56  ;;  %v16130_v56 = vpop.f32.mrf.mxu0  ;;  %8334 = vmatpush.bf16.msrb.mxu3 %v13130_v45  ;;  %v13129_v45 = vld [vmem:[%s16589_s7 + $0x110] sm:$0xff] }
 0x5c6   : > { %v7097_v26 = vmax.f32 %v7077_v37, 0.0  ;;  %7534 = vmatmul.bf16.gmra.mxu3 %v13066_v19 }
 0x5c7   : > { %13919 = vst [vmem:[#allocation2 + $0xd8] sm:$0xff] %v13770_v53   ;;  %7900 = vmatmul.bf16.gmra.mxu1 %v13083_v13 }
 0x5c8   : > { %v7117_v44 = vmul.f32 %v14707_v52, %v7097_v26 }
 0x5c9   : > { %v7016_v46 = vpop.f32.mrf.mxu2  ;;  %v6349_v41 = vpop.f32.mrf.mxu3  ;;  %8335 = vmatpush.bf16.msrb.mxu3 %v13129_v45 }
 0x5ca   : > { %v7137_v17 = vrot.slane %v7117_v44, 7  ;;  %v13725_v10 = vpack.c.bf16 %v7117_v44, %v7116_v9  ;;  %v7257_v33 = vrot.slane %v7117_v44, 1  ;;  %v7054_v57 = vadd.f32 %v7016_v46, %v6830_v18 }
 0x5cc   : > { %v7162_v48 = vsel %vm411_vm0, %v7136_v27, %v7137_v17  ;;  %v7282_v59 = vsel %vm532_vm1, %v7256_v42, %v7257_v33  ;;  %13910 = vst [vmem:[#allocation2 + $0x80] sm:$0xff] %v13725_v10   ;;  %v7078_v20 = vadd.f32 %v16017_v30, %v7054_v57  ;;  %v6794_v0 = vpop.f32.mrf.mxu1  ;;  %v6384_v27 = vadd.f32 %v6349_v41, %v15892_v60  ;;  %v13112_v60 = vld [vmem:[%s16589_s7 + $0xd8] sm:$0xff] }
 0x5cd   : > { %v13675_v22 = vpack.c.bf16 %v7162_v48, %v7163_v6  ;;  %v6831_v5 = vadd.f32 %v6794_v0, %v6607_v40  ;;  %8110 = vmatpush.bf16.msrb.mxu2 %v13112_v60 }
 0x5ce   : > { %v7098_v35 = vmax.f32 %v7078_v20, 0.0  ;;  %v13084_v26 = vld [vmem:[#allocation2 + $0xd8] sm:$0xff]  ;;  %v6608_v18 = vadd.f32 %v16087_v21, %v6384_v27 }
 0x5cf   : > { %13900 = vst [vmem:[#allocation2 + $0x20] sm:$0xff] %v13675_v22  }
 0x5d0   : > { %v7118_v9 = vmul.f32 %v14679_v25, %v7098_v35 }
 0x5d1   : > { %v7018_v32 = vpop.f32.mrf.mxu2  ;;  %v6351_v37 = vpop.f32.mrf.mxu3 }
 0x5d2   : > { %v7138_v4 = vrot.slane %v7118_v9, 7  ;;  %v7258_v19 = vrot.slane %v7118_v9, 1  ;;  %v7055_v47 = vadd.f32 %v7018_v32, %v6831_v5  ;;  %v6385_v10 = vadd.f32 %v6351_v37, %v15901_v24  ;;  %v6583_v32 = vpop.f32.mrf.mxu0 }
 0x5d3   : > { %v13067_v42 = vld [vmem:[#allocation2 + $0x80] sm:$0xff] }
 0x5d4   : > { %v7161_v54 = vsel %vm411_vm0, %v7137_v17, %v7138_v4  ;;  %v7281_v6 = vsel %vm532_vm1, %v7257_v33, %v7258_v19  ;;  %v7079_v7 = vadd.f32 %v16017_v30, %v7055_v47  ;;  %v6797_v53 = vpop.f32.mrf.mxu1  ;;  %v6609_v5 = vadd.f32 %v16104_v16, %v6385_v10 }
 0x5d5   : > { %v13775_v13 = vpack.c.bf16 %v7281_v6, %v7282_v59  ;;  %v6832_v17 = vadd.f32 %v6797_v53, %v6608_v18 }
 0x5d6   : > { %v7099_v44 = vmax.f32 %v7079_v7, 0.0  ;;  %7539 = vmatmul.bf16.gmra.mxu3 %v13067_v42 }
 0x5d7   : > { %13920 = vst [vmem:[#allocation2 + $0xe0] sm:$0xff] %v13775_v13   ;;  %7905 = vmatmul.bf16.gmra.mxu1 %v13084_v26 }
 0x5d8   : > { %v7119_v46 = vmul.f32 %v14707_v52, %v7099_v44 }
 0x5d9   : > { %v7021_v33 = vpop.f32.mrf.mxu2  ;;  %v6354_v59 = vpop.f32.mrf.mxu3 }
 0x5da   : > { %v7139_v21 = vrot.slane %v7119_v46, 7  ;;  %v13730_v57 = vpack.c.bf16 %v7119_v46, %v7118_v9  ;;  %v7259_v41 = vrot.slane %v7119_v46, 1  ;;  %v7056_v48 = vadd.f32 %v7021_v33, %v6832_v17 }
 0x5dc   : > { %v7160_v20 = vsel %vm411_vm0, %v7138_v4, %v7139_v21  ;;  %v7280_v0 = vsel %vm532_vm1, %v7258_v19, %v7259_v41  ;;  %13911 = vst [vmem:[#allocation2 + $0x88] sm:$0xff] %v13730_v57   ;;  %v7080_v22 = vadd.f32 %v16017_v30, %v7056_v48  ;;  %v6799_v35 = vpop.f32.mrf.mxu1  ;;  %v6386_v4 = vadd.f32 %v6354_v59, %v15907_v12  ;;  %v13111_v12 = vld [vmem:[%s16589_s7 + $0xd0] sm:$0xff] }
 0x5dd   : > { %v13680_v40 = vpack.c.bf16 %v7160_v20, %v7161_v54  ;;  %v6833_v27 = vadd.f32 %v6799_v35, %v6609_v5  ;;  %8111 = vmatpush.bf16.msrb.mxu2 %v13111_v12 }
 0x5de   : > { %v7100_v24 = vmax.f32 %v7080_v22, 0.0  ;;  %v13085_v44 = vld [vmem:[#allocation2 + $0xe0] sm:$0xff]  ;;  %v6610_v60 = vadd.f32 %v16115_v1, %v6386_v4  ;;  %v6585_v1 = vpop.f32.mrf.mxu0 }
 0x5df   : > { %13901 = vst [vmem:[#allocation2 + $0x28] sm:$0xff] %v13680_v40  }
 0x5e0   : > { %v7120_v9 = vmul.f32 %v14679_v25, %v7100_v24 }
 0x5e1   : > { %v7023_v47 = vpop.f32.mrf.mxu2  ;;  %v6356_v19 = vpop.f32.mrf.mxu3 }
 0x5e2   : > { %v7140_v37 = vrot.slane %v7120_v9, 7  ;;  %v7260_v42 = vrot.slane %v7120_v9, 1  ;;  %v7057_v6 = vadd.f32 %v7023_v47, %v6833_v27  ;;  %v6387_v10 = vadd.f32 %v6356_v19, %v15911_v8 }
 0x5e3   : > { %v13068_v7 = vld [vmem:[#allocation2 + $0x88] sm:$0xff] }
 0x5e4   : > { %v7159_v53 = vsel %vm411_vm0, %v7139_v21, %v7140_v37  ;;  %v7279_v54 = vsel %vm532_vm1, %v7259_v41, %v7260_v42  ;;  %v7081_v16 = vadd.f32 %v16017_v30, %v7057_v6  ;;  %v6802_v13 = vpop.f32.mrf.mxu1  ;;  %v6611_v24 = vadd.f32 %v16130_v56, %v6387_v10 }
 0x5e5   : > { %v13780_v26 = vpack.c.bf16 %v7279_v54, %v7280_v0  ;;  %v6834_v17 = vadd.f32 %v6802_v13, %v6610_v60 }
 0x5e6   : > { %v7101_v18 = vmax.f32 %v7081_v16, 0.0  ;;  %7544 = vmatmul.bf16.gmra.mxu3 %v13068_v7  ;;  %v6588_v7 = vpop.f32.mrf.mxu0 }
 0x5e7   : > { %13921 = vst [vmem:[#allocation2 + $0xe8] sm:$0xff] %v13780_v26   ;;  %7910 = vmatmul.bf16.gmra.mxu1 %v13085_v44 }
 0x5e8   : > { %v7121_v46 = vmul.f32 %v14707_v52, %v7101_v18 }
 0x5e9   : > { %v7026_v33 = vpop.f32.mrf.mxu2  ;;  %v6359_v59 = vpop.f32.mrf.mxu3 }
 0x5ea   : > { %v7141_v21 = vrot.slane %v7121_v46, 7  ;;  %v13735_v57 = vpack.c.bf16 %v7121_v46, %v7120_v9  ;;  %v7261_v41 = vrot.slane %v7121_v46, 1  ;;  %v7058_v48 = vadd.f32 %v7026_v33, %v6834_v17 }
 0x5ec   : > { %v7158_v20 = vsel %vm411_vm0, %v7140_v37, %v7141_v21  ;;  %v7278_v0 = vsel %vm532_vm1, %v7260_v42, %v7261_v41  ;;  %13912 = vst [vmem:[#allocation2 + $0x90] sm:$0xff] %v13735_v57   ;;  %v7082_v22 = vadd.f32 %v16017_v30, %v7058_v48  ;;  %v6804_v35 = vpop.f32.mrf.mxu1  ;;  %v6388_v37 = vadd.f32 %v6359_v59, %v15920_v39 }
 0x5ed   : > { %v13685_v8 = vpack.c.bf16 %v7158_v20, %v7159_v53  ;;  %v6835_v9 = vadd.f32 %v6804_v35, %v6611_v24  ;;  %v13128_v35 = vld [vmem:[%s16589_s7 + $0x108] sm:$0xff] }
 0x5ee   : > { %v7102_v40 = vmax.f32 %v7082_v22, 0.0  ;;  %v13086_v26 = vld [vmem:[#allocation2 + $0xe8] sm:$0xff]  ;;  %v6612_v18 = vadd.f32 %v6583_v32, %v6388_v37  ;;  %v6590_v20 = vpop.f32.mrf.mxu0  ;;  %8336 = vmatpush.bf16.msrb.mxu3 %v13128_v35  ;;  %v13109_v35 = vld [vmem:[%s16589_s7 + $0xc0] sm:$0xff] }
 0x5ef   : > { %13902 = vst [vmem:[#allocation2 + $0x30] sm:$0xff] %v13685_v8   ;;  %v13110_v22 = vld [vmem:[%s16589_s7 + $0xc8] sm:$0xff] }
 0x5f0   : > { %v7122_v5 = vmul.f32 %v14679_v25, %v7102_v40  ;;  %8112 = vmatpush.bf16.msrb.mxu2 %v13110_v22 }
 0x5f1   : > { %v7028_v27 = vpop.f32.mrf.mxu2  ;;  %v6361_v19 = vpop.f32.mrf.mxu3 }
 0x5f2   : > { %v7142_v47 = vrot.slane %v7122_v5, 7  ;;  %v7262_v4 = vrot.slane %v7122_v5, 1  ;;  %v7059_v6 = vadd.f32 %v7028_v27, %v6835_v9  ;;  %v6389_v12 = vadd.f32 %v6361_v19, %v15932_v2 }
 0x5f3   : > { %v13069_v42 = vld [vmem:[#allocation2 + $0x90] sm:$0xff] }
 0x5f4   : > { %v7157_v54 = vsel %vm411_vm0, %v7141_v21, %v7142_v47  ;;  %v7277_v53 = vsel %vm532_vm1, %v7261_v41, %v7262_v4  ;;  %v7083_v56 = vadd.f32 %v16017_v30, %v7059_v6  ;;  %v6807_v16 = vpop.f32.mrf.mxu1  ;;  %v6613_v2 = vadd.f32 %v6585_v1, %v6389_v12  ;;  %8113 = vmatpush.bf16.msrb.mxu2 %v13109_v35 }
 0x5f5   : > { %v13785_v13 = vpack.c.bf16 %v7277_v53, %v7278_v0  ;;  %v6836_v60 = vadd.f32 %v6807_v16, %v6612_v18 }
 0x5f6   : > { %v7103_v44 = vmax.f32 %v7083_v56, 0.0  ;;  %7549 = vmatmul.bf16.gmra.mxu3 %v13069_v42 }
 0x5f7   : > { %13922 = vst [vmem:[#allocation2 + $0xf0] sm:$0xff] %v13785_v13   ;;  %7915 = vmatmul.bf16.gmra.mxu1 %v13086_v26  ;;  %v6593_v13 = vpop.f32.mrf.mxu0  ;;  %v13170_v26 = vld [vmem:[%s16589_s7 + $0x1b8] sm:$0xff] }
 0x5f8   : > { %v7123_v39 = vmul.f32 %v14707_v52, %v7103_v44  ;;  %8778 = vmatpush.bf16.msra.mxu1 %v13170_v26 }
 0x5f9   : > { %v7031_v45 = vpop.f32.mrf.mxu2  ;;  %v6364_v21 = vpop.f32.mrf.mxu3 }
 0x5fa   : > { %v7143_v46 = vrot.slane %v7123_v39, 7  ;;  %v13740_v17 = vpack.c.bf16 %v7123_v39, %v7122_v5  ;;  %v7263_v10 = vrot.slane %v7123_v39, 1  ;;  %v7060_v33 = vadd.f32 %v7031_v45, %v6836_v60 }
 0x5fb   : > { %v6390_v27 = vadd.f32 %v6364_v21, %v15950_v28  ;;  %v6167_v28 = vadd.f32 %v15965_v49, %v15956_v3  ;;  %v13169_v3 = vld [vmem:[%s16589_s7 + $0x1b0] sm:$0xff] }
 0x5fc   : > { %v7156_v57 = vsel %vm411_vm0, %v7142_v47, %v7143_v46  ;;  %v7276_v32 = vsel %vm532_vm1, %v7262_v4, %v7263_v10  ;;  %13913 = vst [vmem:[#allocation2 + $0x98] sm:$0xff] %v13740_v17   ;;  %v7084_v41 = vadd.f32 %v16017_v30, %v7060_v33  ;;  %v6809_v48 = vpop.f32.mrf.mxu1  ;;  %8779 = vmatpush.bf16.msra.mxu1 %v13169_v3 }
 0x5fd   : > { %v13690_v59 = vpack.c.bf16 %v7156_v57, %v7157_v54  ;;  %v6837_v40 = vadd.f32 %v6809_v48, %v6613_v2  ;;  %v6614_v16 = vadd.f32 %v6588_v7, %v6390_v27  ;;  %v13168_v48 = vld [vmem:[%s16589_s7 + $0x1a8] sm:$0xff] }
 0x5fe   : > { %v7104_v0 = vmax.f32 %v7084_v41, 0.0  ;;  %v13087_v53 = vld [vmem:[#allocation2 + $0xf0] sm:$0xff] }
 0x5ff   : > { %13903 = vst [vmem:[#allocation2 + $0x38] sm:$0xff] %v13690_v59   ;;  %v6595_v2 = vpop.f32.mrf.mxu0 }
 0x600   : > { %v7124_v8 = vmul.f32 %v14679_v25, %v7104_v0  ;;  %8780 = vmatpush.bf16.msra.mxu1 %v13168_v48 }
 0x601   : > { %v7033_v24 = vpop.f32.mrf.mxu2  ;;  %v6366_v47 = vpop.f32.mrf.mxu3 }
 0x602   : > { %v7144_v5 = vrot.slane %v7124_v8, 7  ;;  %v7264_v9 = vrot.slane %v7124_v8, 1  ;;  %v7061_v1 = vadd.f32 %v7033_v24, %v6837_v40  ;;  %v6391_v39 = vadd.f32 %v6366_v47, %v6167_v28  ;;  %v13188_v28 = vld [vmem:[%s16589_s7 + $0x1f8] sm:$0xff] }
 0x603   : > { %v13070_v4 = vld [vmem:[#allocation2 + $0x98] sm:$0xff]  ;;  %9002 = vmatpush.bf16.msra.mxu2 %v13188_v28 }
 0x604   : > { %v7155_v37 = vsel %vm411_vm0, %v7143_v46, %v7144_v5  ;;  %v7275_v6 = vsel %vm532_vm1, %v7263_v10, %v7264_v9  ;;  %v7085_v19 = vadd.f32 %v16017_v30, %v7061_v1  ;;  %v6812_v42 = vpop.f32.mrf.mxu1  ;;  %v6615_v41 = vadd.f32 %v6590_v20, %v6391_v39 }
 0x605   : > { %v13790_v54 = vpack.c.bf16 %v7275_v6, %v7276_v32  ;;  %v6838_v18 = vadd.f32 %v6812_v42, %v6614_v16 }
 0x606   : > { %v7105_v56 = vmax.f32 %v7085_v19, 0.0  ;;  %7554 = vmatmul.bf16.gmra.mxu3 %v13070_v4 }
 0x607   : > { %13923 = vst [vmem:[#allocation2 + $0xf8] sm:$0xff] %v13790_v54   ;;  %7920 = vmatmul.bf16.gmra.mxu1 %v13087_v53  ;;  %v6169_v54 = vadd.f32 %v15999_v51, %v15994_v29  ;;  %v13166_v53 = vld [vmem:[%s16589_s7 + $0x198] sm:$0xff] }
 0x608   : > { %v7125_v44 = vmul.f32 %v14707_v52, %v7105_v56 }
 0x609   : > { %v7036_v60 = vpop.f32.mrf.mxu2  ;;  %v6369_v17 = vpop.f32.mrf.mxu3 }
 0x60a   : > { %v7145_v12 = vrot.slane %v7125_v44, 7  ;;  %v13745_v45 = vpack.c.bf16 %v7125_v44, %v7124_v8  ;;  %v7265_v7 = vrot.slane %v7125_v44, 1  ;;  %v7062_v46 = vadd.f32 %v7036_v60, %v6838_v18  ;;  %v13127_v8 = vld [vmem:[%s16589_s7 + $0x100] sm:$0xff]  ;;  %v7687_v60 = vpop.f32.mrf.mxu0 }
 0x60b   : > { %v6392_v24 = vadd.f32 %v6369_v17, %v15986_v31  ;;  %8337 = vmatpush.bf16.msrb.mxu3 %v13127_v8 }
 0x60c   : > { %v7154_v49 = vsel %vm411_vm0, %v7144_v5, %v7145_v12  ;;  %v7274_v10 = vsel %vm532_vm1, %v7264_v9, %v7265_v7  ;;  %13914 = vst [vmem:[#allocation2 + $0xa0] sm:$0xff] %v13745_v45   ;;  %v7086_v33 = vadd.f32 %v16017_v30, %v7062_v46  ;;  %v6814_v21 = vpop.f32.mrf.mxu1 }
 0x60d   : > { %v13695_v57 = vpack.c.bf16 %v7154_v49, %v7155_v37  ;;  %v6839_v0 = vadd.f32 %v6814_v21, %v6615_v41  ;;  %v6616_v19 = vadd.f32 %v6593_v13, %v6392_v24 }
 0x60e   : > { %v7106_v32 = vmax.f32 %v7086_v33, 0.0  ;;  %v13088_v31 = vld [vmem:[#allocation2 + $0xf8] sm:$0xff]  ;;  %v13164_v33 = vld [vmem:[%s16589_s7 + $0x188] sm:$0xff] }
 0x60f   : > { %13904 = vst [vmem:[#allocation2 + $0x40] sm:$0xff] %v13695_v57  }
 0x610   : > { %v7126_v59 = vmul.f32 %v14679_v25, %v7106_v32  ;;  %v13167_v25 = vld [vmem:[%s16589_s7 + $0x1a0] sm:$0xff] }
 0x611   : > { %v7038_v22 = vpop.f32.mrf.mxu2  ;;  %v6371_v9 = vpop.f32.mrf.mxu3  ;;  %8781 = vmatpush.bf16.msra.mxu1 %v13167_v25 }
 0x612   : > { %v7146_v20 = vrot.slane %v7126_v59, 7  ;;  %v7266_v40 = vrot.slane %v7126_v59, 1  ;;  %v7063_v5 = vadd.f32 %v7038_v22, %v6839_v0  ;;  %v6393_v26 = vadd.f32 %v6371_v9, %v6169_v54 }
 0x613   : > { %v13071_v27 = vld [vmem:[#allocation2 + $0xa0] sm:$0xff]  ;;  %v16634_v54 = vrot.slane %v16026_v23, 7 }
 0x614   : > { %v7153_v1 = vsel %vm411_vm0, %v7145_v12, %v7146_v20  ;;  %v7273_v47 = vsel %vm532_vm1, %v7265_v7, %v7266_v40  ;;  %v7087_v4 = vadd.f32 %v16017_v30, %v7063_v5  ;;  %v6817_v37 = vpop.f32.mrf.mxu1  ;;  %v13152_v12 = vld [vmem:[%s16589_s7 + $0x178] sm:$0xff]  ;;  %v13165_v7 = vld [vmem:[%s16589_s7 + $0x190] sm:$0xff]  ;;  %v6617_v21 = vadd.f32 %v6595_v2, %v6393_v26 }
 0x615   : > { %v13795_v6 = vpack.c.bf16 %v7273_v47, %v7274_v10  ;;  %v6840_v16 = vadd.f32 %v6817_v37, %v6616_v19  ;;  %8782 = vmatpush.bf16.msra.mxu1 %v13166_v53  ;;  %8554 = vmatpush.bf16.msra.mxu0 %v13152_v12  ;;  %v13117_v12 = vld [vmem:[#allocation2 + $0x68] sm:$0xff] }
 0x616   : > { %v7107_v42 = vmax.f32 %v7087_v4, 0.0  ;;  %7559 = vmatmul.bf16.gmra.mxu3 %v13071_v27  ;;  %v7689_v4 = vpop.f32.mrf.mxu0 }
 0x617   : > { %13924 = vst [vmem:[#allocation2 + $0x100] sm:$0xff] %v13795_v6   ;;  %7925 = vmatmul.bf16.gmra.mxu1 %v13088_v31 }
 0x618   : > { %v7127_v56 = vmul.f32 %v14707_v52, %v7107_v42  ;;  %v13206_v52 = vld [vmem:[%s16589_s7 + $0x238] sm:$0xff] }
 0x619   : > { %v7041_v13 = vpop.f32.mrf.mxu2  ;;  %v7520_v39 = vpop.f32.mrf.mxu3  ;;  %9226 = vmatpush.bf16.msra.mxu3 %v13206_v52  ;;  %8783 = vmatpush.bf16.msra.mxu1 %v13165_v7  ;;  %v13186_v7 = vld [vmem:[%s16589_s7 + $0x1e8] sm:$0xff] }
 0x61a   : > { %v7147_v44 = vrot.slane %v7127_v56, 7  ;;  %v13750_v18 = vpack.c.bf16 %v7127_v56, %v7126_v59  ;;  %v7267_v29 = vrot.slane %v7127_v56, 1  ;;  %v7064_v51 = vadd.f32 %v7041_v13, %v6840_v16  ;;  %v13187_v13 = vld [vmem:[%s16589_s7 + $0x1f0] sm:$0xff] }
 0x61b   : > { %v7688_v45 = vadd.f32 %v7687_v60, %v7520_v39  ;;  %v16635_v16 = vrot.slane %v16026_v23, 1  ;;  %9003 = vmatpush.bf16.msra.mxu2 %v13187_v13  ;;  %v13147_v13 = vld [vmem:[%s16589_s7 + $0x150] sm:$0xff] }
 0x61c   : > { %v7152_v46 = vsel %vm411_vm0, %v7146_v20, %v7147_v44  ;;  %13915 = vst [vmem:[#allocation2 + $0xa8] sm:$0xff] %v13750_v18   ;;  %v7088_v17 = vadd.f32 %v16017_v30, %v7064_v51  ;;  %v7272_v3 = vsel %vm532_vm1, %v7266_v40, %v7267_v29  ;;  %v6819_v49 = vpop.f32.mrf.mxu1  ;;  %v13163_v20 = vld [vmem:[%s16589_s7 + $0x180] sm:$0xff]  ;;  %v13205_v18 = vld [vmem:[%s16589_s7 + $0x230] sm:$0xff] }
 0x61d   : > { %v13700_v10 = vpack.c.bf16 %v7152_v46, %v7153_v1  ;;  %v6841_v41 = vadd.f32 %v6819_v49, %v6617_v21  ;;  %8784 = vmatpush.bf16.msra.mxu1 %v13164_v33  ;;  %9227 = vmatpush.bf16.msra.mxu3 %v13205_v18  ;;  %v13118_v49 = vld [vmem:[#allocation2 + $0x70] sm:$0xff] }
 0x61e   : > { %v7108_v57 = vmax.f32 %v7088_v17, 0.0  ;;  %v13089_v25 = vld [vmem:[#allocation2 + $0x100] sm:$0xff]  ;;  %v13150_v17 = vld [vmem:[%s16589_s7 + $0x168] sm:$0xff]  ;;  %v13047_v33 = vld [vmem:[#allocation2 + $0x10] sm:$0xff] }
 0x61f   : > { %13905 = vst [vmem:[#allocation2 + $0x48] sm:$0xff] %v13700_v10   ;;  %9004 = vmatpush.bf16.msra.mxu2 %v13186_v7  ;;  %v13153_v10 = vld [vmem:[#allocation2 + $0x10] sm:$0xff]  ;;  %v13182_v7 = vld [vmem:[%s16589_s7 + $0x1c8] sm:$0xff] }
 0x620   : > { %v7128_v32 = vmul.f32 0.0, %v7108_v57  ;;  %v13100_v21 = vld [vmem:[#allocation2 + $0x10] sm:$0xff] }
 0x621   : > { %v7043_v48 = vpop.f32.mrf.mxu2  ;;  %v7522_v35 = vpop.f32.mrf.mxu3  ;;  %8785 = vmatpush.bf16.msra.mxu1 %v13163_v20 }
 0x622   : > { %v7148_v59 = vrot.slane %v7128_v32, 7  ;;  %v7268_v0 = vrot.slane %v7128_v32, 1  ;;  %v7065_v22 = vadd.f32 %v7043_v48, %v6841_v41  ;;  %v7690_v42 = vadd.f32 %v7689_v4, %v7522_v35  ;;  %v13185_v41 = vld [vmem:[%s16589_s7 + $0x1e0] sm:$0xff]  ;;  %v13119_v48 = vld [vmem:[#allocation2 + $0x78] sm:$0xff] }
 0x623   : > { %v13072_v8 = vld [vmem:[#allocation2 + $0xa8] sm:$0xff]  ;;  %9005 = vmatpush.bf16.msra.mxu2 %v13185_v41  ;;  %v13149_v35 = vld [vmem:[%s16589_s7 + $0x160] sm:$0xff]  ;;  %v13052_v41 = vld [vmem:[#allocation2 + $0x38] sm:$0xff] }
 0x624   : > { %v7151_v40 = vsel %vm411_vm0, %v7147_v44, %v7148_v59  ;;  %v7271_v2 = vsel %vm532_vm1, %v7267_v29, %v7268_v0  ;;  %v7089_v24 = vadd.f32 %v16017_v30, %v7065_v22  ;;  %v7891_v5 = vpop.f32.mrf.mxu1  ;;  %v13151_v44 = vld [vmem:[%s16589_s7 + $0x170] sm:$0xff]  ;;  %v13101_v22 = vld [vmem:[#allocation2 + $0x18] sm:$0xff] }
 0x625   : > { %v13800_v9 = vpack.c.bf16 %v7271_v2, %v7272_v3  ;;  %v16263_v27 = vadd.f32 %v7891_v5, %v7688_v45  ;;  %8555 = vmatpush.bf16.msra.mxu0 %v13151_v44  ;;  %v13204_v3 = vld [vmem:[%s16589_s7 + $0x228] sm:$0xff]  ;;  %v13120_v5 = vld [vmem:[#allocation2 + $0x80] sm:$0xff]  ;;  %v13201_v44 = vld [vmem:[%s16589_s7 + $0x210] sm:$0xff] }
 0x626   : > { %v7109_v1 = vmax.f32 %v7089_v24, 0.0  ;;  %7564 = vmatmul.bf16.gmra.mxu3 %v13072_v8  ;;  %v13203_v8 = vld [vmem:[%s16589_s7 + $0x220] sm:$0xff] }
 0x627   : > { %13925 = vst [vmem:[#allocation2 + $0x108] sm:$0xff] %v13800_v9   ;;  %7930 = vmatmul.bf16.gmra.mxu1 %v13089_v25  ;;  %9228 = vmatpush.bf16.msra.mxu3 %v13204_v3  ;;  %v13155_v9 = vld [vmem:[#allocation2 + $0x20] sm:$0xff]  ;;  %v13146_v3 = vld [vmem:[%s16589_s7 + $0x148] sm:$0xff] }
 0x628   : > { %v7129_v47 = vmul.f32 0.0, %v7109_v1  ;;  %v13049_v25 = vld [vmem:[#allocation2 + $0x20] sm:$0xff] }
 0x629   : > { %v16265_v19 = vpop.f32.mrf.mxu3  ;;  %8556 = vmatpush.bf16.msra.mxu0 %v13150_v17  ;;  %v13102_v1 = vld [vmem:[#allocation2 + $0x20] sm:$0xff] }
 0x62a   : > { %v7149_v37 = vrot.slane %v7129_v47, 7  ;;  %v13755_v6 = vpack.c.bf16 %v7129_v47, %v7128_v32  ;;  %v7269_v31 = vrot.slane %v7129_v47, 1  ;;  %v13184_v47 = vld [vmem:[%s16589_s7 + $0x1d8] sm:$0xff] }
 0x62b   : > { %9229 = vmatpush.bf16.msra.mxu3 %v13203_v8  ;;  %9006 = vmatpush.bf16.msra.mxu2 %v13184_v47  ;;  %v13124_v8 = vld [vmem:[#allocation2 + $0xa0] sm:$0xff] }
 0x62c   : > { %v7150_v30 = vsel %vm411_vm0, %v7148_v59, %v7149_v37  ;;  %v7169_v53 = vsel %vm411_vm0, %v7149_v37, %v16634_v54  ;;  %v7270_v56 = vsel %vm532_vm1, %v7268_v0, %v7269_v31  ;;  %v7289_v28 = vsel %vm532_vm1, %v7269_v31, %v16635_v16  ;;  %13916 = vst [vmem:[#allocation2 + $0xb0] sm:$0xff] %v13755_v6   ;;  %v7893_v26 = vpop.f32.mrf.mxu1  ;;  %v13154_v59 = vld [vmem:[#allocation2 + $0x18] sm:$0xff]  ;;  %v13156_v54 = vld [vmem:[#allocation2 + $0x28] sm:$0xff]  ;;  %v13199_v47 = vld [vmem:[%s16589_s7 + $0x200] sm:$0xff] }
 0x62d   : > { %v13660_v29 = vpack.c.bf16 %v16044_v15, %v7169_v53  ;;  %v13705_v23 = vpack.c.bf16 %v7150_v30, %v7151_v40  ;;  %v13805_v51 = vpack.c.bf16 %v7289_v28, %v7270_v56  ;;  %v16289_v14 = vadd.f32 %v7893_v26, %v7690_v42  ;;  %v13048_v0 = vld [vmem:[#allocation2 + $0x18] sm:$0xff]  ;;  %8557 = vmatpush.bf16.msra.mxu0 %v13149_v35  ;;  %v13121_v30 = vld [vmem:[#allocation2 + $0x88] sm:$0xff]  ;;  %v13183_v26 = vld [vmem:[%s16589_s7 + $0x1d0] sm:$0xff] }
 0x62e   : > { %v13090_v60 = vld [vmem:[#allocation2 + $0x108] sm:$0xff]  ;;  %v13148_v37 = vld [vmem:[%s16589_s7 + $0x158] sm:$0xff]  ;;  %v13181_v35 = vld [vmem:[%s16589_s7 + $0x1c0] sm:$0xff] }
 0x62f   : > { %13897 = vst [vmem:[#allocation2 + $0x8] sm:$0xff] %v13660_v29   ;;  %v13202_v6 = vld [vmem:[%s16589_s7 + $0x218] sm:$0xff]  ;;  %v13050_v53 = vld [vmem:[#allocation2 + $0x28] sm:$0xff]  ;;  %9007 = vmatpush.bf16.msra.mxu2 %v13183_v26 }
 0x630   : > { %13906 = vst [vmem:[#allocation2 + $0x50] sm:$0xff] %v13705_v23   ;;  %9230 = vmatpush.bf16.msra.mxu3 %v13202_v6  ;;  %v13103_v56 = vld [vmem:[#allocation2 + $0x28] sm:$0xff]  ;;  %v13122_v23 = vld [vmem:[#allocation2 + $0x90] sm:$0xff] }
 0x631   : > { %13926 = vst [vmem:[#allocation2 + $0x110] sm:$0xff] %v13805_v51   ;;  %v16291_v39 = vpop.f32.mrf.mxu3  ;;  %8558 = vmatpush.bf16.msra.mxu0 %v13148_v37  ;;  %v13157_v51 = vld [vmem:[#allocation2 + $0x30] sm:$0xff]  ;;  %v13160_v26 = vld [vmem:[#allocation2 + $0x48] sm:$0xff] }
 0x633   : > { %9008 = vmatpush.bf16.msra.mxu2 %v13182_v7 }
 0x634   : > { %v16319_v20 = vpop.f32.mrf.mxu1  ;;  %9231 = vmatpush.bf16.msra.mxu3 %v13201_v44  ;;  %v13107_v44 = vld [vmem:[#allocation2 + $0x48] sm:$0xff] }
 0x635   : > { %8559 = vmatpush.bf16.msra.mxu0 %v13147_v13  ;;  %v13054_v13 = vld [vmem:[#allocation2 + $0x48] sm:$0xff] }
 0x636   : > { %v13046_v52 = vld [vmem:[#allocation2 + $0x8] sm:$0xff]  ;;  %8338 = vmatmul.bf16.vlgmr.msrb.gmra.mxu3 %v13117_v12  ;;  %v13104_v12 = vld [vmem:[#allocation2 + $0x30] sm:$0xff] }
 0x637   : > { %v13099_v45 = vld [vmem:[#allocation2 + $0x8] sm:$0xff]  ;;  %7935 = vmatmul.bf16.gmra.mxu1 %v13090_v60  ;;  %7691 = vmatmul.bf16.gmra.mxu0 %v13046_v52  ;;  %v13051_v60 = vld [vmem:[#allocation2 + $0x30] sm:$0xff] }
 0x638   : > { %8114 = vmatmul.bf16.vlgmr.msrb.gmra.mxu2 %v13099_v45 }
 0x639   : > { %v16293_v15 = vpop.f32.mrf.mxu3  ;;  %8560 = vmatpush.bf16.msra.mxu0 %v13146_v3  ;;  %9009 = vmatpush.bf16.msra.mxu2 %v13181_v35  ;;  %v13161_v35 = vld [vmem:[#allocation2 + $0x50] sm:$0xff] }
 0x63c   : > { %v16325_v24 = vpop.f32.mrf.mxu1 }
 0x641   : > { %v16298_v46 = vpop.f32.mrf.mxu3 }
 0x644   : > { %v16338_v31 = vpop.f32.mrf.mxu1 }
 0x646   : > { %8343 = vmatmul.bf16.gmra.mxu3 %v13118_v49  ;;  %v13200_v49 = vld [vmem:[%s16589_s7 + $0x208] sm:$0xff] }
 0x647   : > { %8786 = vmatmul.bf16.vlgmr.msra.gmra.mxu1 %v13153_v10  ;;  %7696 = vmatmul.bf16.gmra.mxu0 %v13047_v33  ;;  %v13123_v33 = vld [vmem:[#allocation2 + $0x98] sm:$0xff] }
 0x648   : > { %8119 = vmatmul.bf16.gmra.mxu2 %v13100_v21  ;;  %9232 = vmatpush.bf16.msra.mxu3 %v13200_v49  ;;  %v13158_v21 = vld [vmem:[#allocation2 + $0x38] sm:$0xff] }
 0x649   : > { %v16306_v57 = vpop.f32.mrf.mxu3 }
 0x64c   : > { %v16342_v16 = vpop.f32.mrf.mxu1  ;;  %9233 = vmatpush.bf16.msra.mxu3 %v13199_v47 }
 0x651   : > { %v16308_v32 = vpop.f32.mrf.mxu3 }
 0x654   : > { %v16355_v18 = vpop.f32.mrf.mxu1 }
 0x656   : > { %8348 = vmatmul.bf16.gmra.mxu3 %v13119_v48  ;;  %v13105_v48 = vld [vmem:[#allocation2 + $0x38] sm:$0xff] }
 0x657   : > { %8791 = vmatmul.bf16.gmra.mxu1 %v13154_v59  ;;  %7701 = vmatmul.bf16.gmra.mxu0 %v13048_v0 }
 0x658   : > { %8124 = vmatmul.bf16.gmra.mxu2 %v13101_v22 }
 0x659   : > { %v16321_v40 = vpop.f32.mrf.mxu3 }
 0x65c   : > { %v16361_v45 = vpop.f32.mrf.mxu1 }
 0x661   : > { %v16323_v2 = vpop.f32.mrf.mxu3 }
 0x664   : > { %v16374_v10 = vpop.f32.mrf.mxu1 }
 0x666   : > { %8353 = vmatmul.bf16.gmra.mxu3 %v13120_v5  ;;  %v13159_v5 = vld [vmem:[#allocation2 + $0x40] sm:$0xff] }
 0x667   : > { %8796 = vmatmul.bf16.gmra.mxu1 %v13155_v9  ;;  %7706 = vmatmul.bf16.gmra.mxu0 %v13049_v25  ;;  %v13145_v9 = vld [vmem:[%s16589_s7 + $0x140] sm:$0xff] }
 0x668   : > { %8129 = vmatmul.bf16.gmra.mxu2 %v13102_v1  ;;  %v13053_v25 = vld [vmem:[#allocation2 + $0x40] sm:$0xff]  ;;  %8561 = vmatpush.bf16.msra.mxu0 %v13145_v9  ;;  %v13135_v9 = vld [vmem:[#allocation2 + $0xc8] sm:$0xff] }
 0x669   : > { %v16330_v4 = vpop.f32.mrf.mxu3  ;;  %v13106_v1 = vld [vmem:[#allocation2 + $0x40] sm:$0xff] }
 0x66c   : > { %v16378_v0 = vpop.f32.mrf.mxu1 }
 0x671   : > { %v16340_v42 = vpop.f32.mrf.mxu3 }
 0x674   : > { %v16391_v37 = vpop.f32.mrf.mxu1 }
 0x676   : > { %8358 = vmatmul.bf16.gmra.mxu3 %v13121_v30 }
 0x677   : > { %8801 = vmatmul.bf16.gmra.mxu1 %v13156_v54  ;;  %7711 = vmatmul.bf16.gmra.mxu0 %v13050_v53 }
 0x678   : > { %8134 = vmatmul.bf16.gmra.mxu2 %v13103_v56  ;;  %v13125_v56 = vld [vmem:[#allocation2 + $0xa8] sm:$0xff] }
 0x679   : > { %v16344_v28 = vpop.f32.mrf.mxu3 }
 0x67c   : > { %v16397_v54 = vpop.f32.mrf.mxu1 }
 0x681   : > { %v16357_v29 = vpop.f32.mrf.mxu3 }
 0x686   : > { %8363 = vmatmul.bf16.gmra.mxu3 %v13122_v23 }
 0x687   : > { %8806 = vmatmul.bf16.gmra.mxu1 %v13157_v51  ;;  %7716 = vmatmul.bf16.gmra.mxu0 %v13051_v60 }
 0x688   : > { %8139 = vmatmul.bf16.gmra.mxu2 %v13104_v12  ;;  %v16400_v12 = vpop.f32.mrf.mxu1 }
 0x689   : > { %v16359_v52 = vpop.f32.mrf.mxu3 }
 0x691   : > { %v16366_v17 = vpop.f32.mrf.mxu3 }
 0x696   : > { %8368 = vmatmul.bf16.gmra.mxu3 %v13123_v33 }
 0x697   : > { %8811 = vmatmul.bf16.gmra.mxu1 %v13158_v21  ;;  %7721 = vmatmul.bf16.gmra.mxu0 %v13052_v41 }
 0x698   : > { %8144 = vmatmul.bf16.gmra.mxu2 %v13105_v48  ;;  %v13126_v48 = vld [vmem:[#allocation2 + $0xb0] sm:$0xff] }
 0x699   : > { %v16376_v59 = vpop.f32.mrf.mxu3 }
 0x6a1   : > { %v16380_v22 = vpop.f32.mrf.mxu3 }
 0x6a6   : > { %8373 = vmatmul.bf16.gmra.mxu3 %v13124_v8 }
 0x6a7   : > { %8816 = vmatmul.bf16.gmra.mxu1 %v13159_v5  ;;  %7726 = vmatmul.bf16.gmra.mxu0 %v13053_v25  ;;  %v13108_v5 = vld [vmem:[#allocation2 + $0x50] sm:$0xff] }
 0x6a8   : > { %8149 = vmatmul.bf16.gmra.mxu2 %v13106_v1  ;;  %v16408_v1 = vpop.f32.mrf.mxu1 }
 0x6a9   : > { %v16393_v6 = vpop.f32.mrf.mxu3 }
 0x6b1   : > { %v16395_v30 = vpop.f32.mrf.mxu3 }
 0x6b4   : > { %v7692_v53 = vpop.f32.mrf.mxu0 }
 0x6b5   : > { %v7693_v8 = vadd.f32 %v7692_v53, %v16265_v19 }
 0x6b6   : > { %8378 = vmatmul.bf16.gmra.mxu3 %v13125_v56 }
 0x6b7   : > { %8821 = vmatmul.bf16.gmra.mxu1 %v13160_v26  ;;  %7731 = vmatmul.bf16.gmra.mxu0 %v13054_v13  ;;  %v7943_v47 = vadd.f32 %v16319_v20, %v7693_v8 }
 0x6b8   : > { %8154 = vmatmul.bf16.gmra.mxu2 %v13107_v44 }
 0x6b9   : > { %v8339_v23 = vpop.f32.mrf.mxu3 }
 0x6bb   : > { %v8115_v51 = vpop.f32.mrf.mxu2 }
 0x6bc   : > { %v8165_v60 = vadd.f32 %v8115_v51, %v16263_v27  ;;  %v7694_v7 = vpop.f32.mrf.mxu0 }
 0x6bd   : > { %v7695_v13 = vadd.f32 %v7694_v7, %v16291_v39 }
 0x6be   : > { %v16402_v3 = vadd.f32 %v8339_v23, %v8165_v60 }
 0x6bf   : > { %v7944_v53 = vadd.f32 %v16325_v24, %v7695_v13 }
 0x6c1   : > { %v8341_v49 = vpop.f32.mrf.mxu3 }
 0x6c3   : > { %v8117_v33 = vpop.f32.mrf.mxu2 }
 0x6c4   : > { %v8166_v21 = vadd.f32 %v8117_v33, %v16289_v14  ;;  %v7697_v41 = vpop.f32.mrf.mxu0 }
 0x6c5   : > { %v7698_v33 = vadd.f32 %v7697_v41, %v16293_v15 }
 0x6c6   : > { %v16406_v25 = vadd.f32 %v8341_v49, %v8166_v21  ;;  %8383 = vmatmul.bf16.gmra.mxu3 %v13126_v48  ;;  %v13189_v49 = vld [vmem:[#allocation2 + $0xd0] sm:$0xff] }
 0x6c7   : > { %8826 = vmatmul.bf16.gmra.mxu1 %v13161_v35  ;;  %8562 = vmatmul.bf16.vlgmr.msra.gmra.mxu0 %v13135_v9  ;;  %v13136_v21 = vld [vmem:[#allocation2 + $0xd0] sm:$0xff]  ;;  %v7945_v39 = vadd.f32 %v16338_v31, %v7698_v33 }
 0x6c8   : > { %8159 = vmatmul.bf16.gmra.mxu2 %v13108_v5  ;;  %v13171_v48 = vld [vmem:[#allocation2 + $0x70] sm:$0xff] }
 0x6c9   : > { %v8344_v27 = vpop.f32.mrf.mxu3 }
 0x6cb   : > { %v8120_v56 = vpop.f32.mrf.mxu2 }
 0x6cc   : > { %v8167_v14 = vadd.f32 %v8120_v56, %v7943_v47  ;;  %v7699_v26 = vpop.f32.mrf.mxu0 }
 0x6cd   : > { %v7700_v24 = vadd.f32 %v7699_v26, %v16298_v46 }
 0x6ce   : > { %v16412_v44 = vadd.f32 %v8344_v27, %v8167_v14  ;;  %v13190_v14 = vld [vmem:[#allocation2 + $0xd8] sm:$0xff] }
 0x6cf   : > { %v7946_v15 = vadd.f32 %v16342_v16, %v7700_v24  ;;  %v13173_v24 = vld [vmem:[#allocation2 + $0x80] sm:$0xff] }
 0x6d1   : > { %v8346_v19 = vpop.f32.mrf.mxu3 }
 0x6d3   : > { %v8122_v23 = vpop.f32.mrf.mxu2 }
 0x6d4   : > { %v8168_v51 = vadd.f32 %v8122_v23, %v7944_v53  ;;  %v7702_v60 = vpop.f32.mrf.mxu0  ;;  %v13172_v53 = vld [vmem:[#allocation2 + $0x78] sm:$0xff] }
 0x6d5   : > { %v7703_v13 = vadd.f32 %v7702_v60, %v16306_v57 }
 0x6d6   : > { %v16416_v35 = vadd.f32 %v8346_v19, %v8168_v51  ;;  %9234 = vmatmul.bf16.vlgmr.msra.gmra.mxu3 %v13189_v49  ;;  %v13137_v19 = vld [vmem:[#allocation2 + $0xd8] sm:$0xff] }
 0x6d7   : > { %8567 = vmatmul.bf16.gmra.mxu0 %v13136_v21  ;;  %v7947_v46 = vadd.f32 %v16355_v18, %v7703_v13  ;;  %v16434_v18 = vpop.f32.mrf.mxu1 }
 0x6d8   : > { %9010 = vmatmul.bf16.vlgmr.msra.gmra.mxu2 %v13171_v48 }
 0x6d9   : > { %v8349_v20 = vpop.f32.mrf.mxu3 }
 0x6db   : > { %v8125_v7 = vpop.f32.mrf.mxu2 }
 0x6dc   : > { %v8169_v8 = vadd.f32 %v8125_v7, %v7945_v39  ;;  %v7704_v5 = vpop.f32.mrf.mxu0  ;;  %v13191_v39 = vld [vmem:[#allocation2 + $0xe0] sm:$0xff] }
 0x6dd   : > { %v7705_v16 = vadd.f32 %v7704_v5, %v16308_v32 }
 0x6de   : > { %v16420_v9 = vadd.f32 %v8349_v20, %v8169_v8  ;;  %v13138_v8 = vld [vmem:[#allocation2 + $0xe0] sm:$0xff] }
 0x6df   : > { %v7948_v57 = vadd.f32 %v16361_v45, %v7705_v16 }
 0x6e1   : > { %v8351_v27 = vpop.f32.mrf.mxu3 }
 0x6e3   : > { %v8127_v41 = vpop.f32.mrf.mxu2 }
 0x6e4   : > { %v8170_v47 = vadd.f32 %v8127_v41, %v7946_v15  ;;  %v7707_v56 = vpop.f32.mrf.mxu0 }
 0x6e5   : > { %v7708_v7 = vadd.f32 %v7707_v56, %v16321_v40  ;;  %v16440_v40 = vpop.f32.mrf.mxu1 }
 0x6e6   : > { %v16424_v23 = vadd.f32 %v8351_v27, %v8170_v47  ;;  %9239 = vmatmul.bf16.gmra.mxu3 %v13190_v14 }
 0x6e7   : > { %8572 = vmatmul.bf16.gmra.mxu0 %v13137_v19  ;;  %v7949_v5 = vadd.f32 %v16374_v10, %v7708_v7  ;;  %v13174_v10 = vld [vmem:[#allocation2 + $0x88] sm:$0xff] }
 0x6e8   : > { %9015 = vmatmul.bf16.gmra.mxu2 %v13172_v53 }
 0x6e9   : > { %v8354_v31 = vpop.f32.mrf.mxu3 }
 0x6eb   : > { %v8130_v26 = vpop.f32.mrf.mxu2 }
 0x6ec   : > { %v8171_v51 = vadd.f32 %v8130_v26, %v7947_v46  ;;  %v7709_v49 = vpop.f32.mrf.mxu0  ;;  %v13192_v46 = vld [vmem:[#allocation2 + $0xe8] sm:$0xff] }
 0x6ed   : > { %v7710_v47 = vadd.f32 %v7709_v49, %v16323_v2 }
 0x6ee   : > { %v16428_v33 = vadd.f32 %v8354_v31, %v8171_v51  ;;  %v13139_v51 = vld [vmem:[#allocation2 + $0xe8] sm:$0xff] }
 0x6ef   : > { %v7950_v13 = vadd.f32 %v16378_v0, %v7710_v47 }
 0x6f1   : > { %v8356_v21 = vpop.f32.mrf.mxu3 }
 0x6f3   : > { %v8132_v60 = vpop.f32.mrf.mxu2 }
 0x6f4   : > { %v8172_v48 = vadd.f32 %v8132_v60, %v7948_v57  ;;  %v7712_v20 = vpop.f32.mrf.mxu0 }
 0x6f5   : > { %v7713_v26 = vadd.f32 %v7712_v20, %v16330_v4 }
 0x6f6   : > { %v16432_v27 = vadd.f32 %v8356_v21, %v8172_v48  ;;  %9244 = vmatmul.bf16.gmra.mxu3 %v13191_v39  ;;  %v16447_v21 = vpop.f32.mrf.mxu1 }
 0x6f7   : > { %8577 = vmatmul.bf16.gmra.mxu0 %v13138_v8  ;;  %v7951_v49 = vadd.f32 %v16391_v37, %v7713_v26 }
 0x6f8   : > { %9020 = vmatmul.bf16.gmra.mxu2 %v13173_v24 }
 0x6f9   : > { %v8359_v32 = vpop.f32.mrf.mxu3 }
 0x6fb   : > { %v8135_v15 = vpop.f32.mrf.mxu2 }
 0x6fc   : > { %v8173_v45 = vadd.f32 %v8135_v15, %v7949_v5  ;;  %v7714_v41 = vpop.f32.mrf.mxu0  ;;  %v13193_v5 = vld [vmem:[#allocation2 + $0xf0] sm:$0xff] }
 0x6fd   : > { %v7715_v48 = vadd.f32 %v7714_v41, %v16340_v42  ;;  %v13140_v15 = vld [vmem:[#allocation2 + $0xf0] sm:$0xff] }
 0x6fe   : > { %v16438_v14 = vadd.f32 %v8359_v32, %v8173_v45  ;;  %v16453_v24 = vpop.f32.mrf.mxu1  ;;  %v13175_v45 = vld [vmem:[#allocation2 + $0x90] sm:$0xff] }
 0x6ff   : > { %v7952_v20 = vadd.f32 %v16397_v54, %v7715_v48 }
 0x701   : > { %v8361_v56 = vpop.f32.mrf.mxu3 }
 0x703   : > { %v8137_v19 = vpop.f32.mrf.mxu2 }
 0x704   : > { %v8174_v53 = vadd.f32 %v8137_v19, %v7950_v13  ;;  %v7717_v31 = vpop.f32.mrf.mxu0 }
 0x705   : > { %v7718_v37 = vadd.f32 %v7717_v31, %v16344_v28 }
 0x706   : > { %v16444_v16 = vadd.f32 %v8361_v56, %v8174_v53  ;;  %9249 = vmatmul.bf16.gmra.mxu3 %v13192_v46  ;;  %v7936_v46 = vpop.f32.mrf.mxu1 }
 0x707   : > { %8582 = vmatmul.bf16.gmra.mxu0 %v13139_v51  ;;  %v7953_v41 = vadd.f32 %v16400_v12, %v7718_v37 }
 0x708   : > { %9025 = vmatmul.bf16.gmra.mxu2 %v13174_v10 }
 0x709   : > { %v8364_v2 = vpop.f32.mrf.mxu3 }
 0x70b   : > { %v8140_v57 = vpop.f32.mrf.mxu2 }
 0x70c   : > { %v8175_v0 = vadd.f32 %v8140_v57, %v7951_v49  ;;  %v7719_v60 = vpop.f32.mrf.mxu0  ;;  %v13141_v57 = vld [vmem:[#allocation2 + $0xf8] sm:$0xff] }
 0x70d   : > { %v7720_v19 = vadd.f32 %v7719_v60, %v16357_v29 }
 0x70e   : > { %v16450_v39 = vadd.f32 %v8364_v2, %v8175_v0  ;;  %v13194_v2 = vld [vmem:[#allocation2 + $0xf8] sm:$0xff]  ;;  %v7938_v29 = vpop.f32.mrf.mxu1 }
 0x70f   : > { %v7954_v28 = vadd.f32 %v16408_v1, %v7720_v19  ;;  %v13176_v0 = vld [vmem:[#allocation2 + $0x98] sm:$0xff] }
 0x710   : > { %v13162_v19 = vld [vmem:[#allocation2 + $0x58] sm:$0xff] }
 0x711   : > { %v8366_v4 = vpop.f32.mrf.mxu3  ;;  %8831 = vmatmul.bf16.gmra.mxu1 %v13162_v19  ;;  %v13144_v19 = vld [vmem:[#allocation2 + $0x110] sm:$0xff] }
 0x713   : > { %v8142_v7 = vpop.f32.mrf.mxu2 }
 0x714   : > { %v8176_v8 = vadd.f32 %v8142_v7, %v7952_v20  ;;  %v7722_v32 = vpop.f32.mrf.mxu0 }
 0x715   : > { %v7723_v49 = vadd.f32 %v7722_v32, %v16359_v52 }
 0x716   : > { %v16456_v47 = vadd.f32 %v8366_v4, %v8176_v8  ;;  %9254 = vmatmul.bf16.gmra.mxu3 %v13193_v5  ;;  %v8787_v32 = vpop.f32.mrf.mxu1 }
 0x717   : > { %8587 = vmatmul.bf16.gmra.mxu0 %v13140_v15  ;;  %v7955_v48 = vadd.f32 %v16434_v18, %v7723_v49 }
 0x718   : > { %9030 = vmatmul.bf16.gmra.mxu2 %v13175_v45 }
 0x719   : > { %v8369_v42 = vpop.f32.mrf.mxu3 }
 0x71b   : > { %v8145_v56 = vpop.f32.mrf.mxu2 }
 0x71c   : > { %v8177_v54 = vadd.f32 %v8145_v56, %v7953_v41  ;;  %v7724_v13 = vpop.f32.mrf.mxu0  ;;  %v13142_v56 = vld [vmem:[#allocation2 + $0x100] sm:$0xff] }
 0x71d   : > { %v7725_v7 = vadd.f32 %v7724_v13, %v16366_v17 }
 0x71e   : > { %v16460_v53 = vadd.f32 %v8369_v42, %v8177_v54  ;;  %v13195_v42 = vld [vmem:[#allocation2 + $0x100] sm:$0xff] }
 0x71f   : > { %v7956_v52 = vadd.f32 %v16440_v40, %v7725_v7  ;;  %v13177_v54 = vld [vmem:[#allocation2 + $0xa0] sm:$0xff] }
 0x721   : > { %v8371_v26 = vpop.f32.mrf.mxu3 }
 0x723   : > { %v8147_v31 = vpop.f32.mrf.mxu2 }
 0x724   : > { %v8178_v51 = vadd.f32 %v8147_v31, %v7954_v28  ;;  %v7727_v10 = vpop.f32.mrf.mxu0  ;;  %v8789_v28 = vpop.f32.mrf.mxu1 }
 0x725   : > { %v7728_v41 = vadd.f32 %v7727_v10, %v16376_v59 }
 0x726   : > { %v16464_v12 = vadd.f32 %v8371_v26, %v8178_v51  ;;  %9259 = vmatmul.bf16.gmra.mxu3 %v13194_v2 }
 0x727   : > { %8592 = vmatmul.bf16.gmra.mxu0 %v13141_v57  ;;  %v7957_v13 = vadd.f32 %v16447_v21, %v7728_v41  ;;  %v13143_v21 = vld [vmem:[#allocation2 + $0x108] sm:$0xff] }
 0x728   : > { %9035 = vmatmul.bf16.gmra.mxu2 %v13176_v0 }
 0x729   : > { %v8374_v60 = vpop.f32.mrf.mxu3 }
 0x72b   : > { %v8150_v4 = vpop.f32.mrf.mxu2 }
 0x72c   : > { %v8179_v20 = vadd.f32 %v8150_v4, %v7955_v48  ;;  %v7729_v1 = vpop.f32.mrf.mxu0  ;;  %v13178_v4 = vld [vmem:[#allocation2 + $0xa8] sm:$0xff]  ;;  %v8792_v7 = vpop.f32.mrf.mxu1 }
 0x72d   : > { %v7730_v51 = vadd.f32 %v7729_v1, %v16380_v22 }
 0x72e   : > { %v16468_v8 = vadd.f32 %v8374_v60, %v8179_v20  ;;  %v13196_v60 = vld [vmem:[#allocation2 + $0x108] sm:$0xff] }
 0x72f   : > { %v7958_v10 = vadd.f32 %v16453_v24, %v7730_v51 }
 0x731   : > { %v8376_v5 = vpop.f32.mrf.mxu3 }
 0x733   : > { %v8152_v37 = vpop.f32.mrf.mxu2 }
 0x734   : > { %v8180_v15 = vadd.f32 %v8152_v37, %v7956_v52  ;;  %v7732_v45 = vpop.f32.mrf.mxu0 }
 0x735   : > { %v7733_v48 = vadd.f32 %v7732_v45, %v16393_v6 }
 0x736   : > { %v16472_v18 = vadd.f32 %v8376_v5, %v8180_v15  ;;  %9264 = vmatmul.bf16.gmra.mxu3 %v13195_v42  ;;  %v8794_v42 = vpop.f32.mrf.mxu1 }
 0x737   : > { %8597 = vmatmul.bf16.gmra.mxu0 %v13142_v56  ;;  %v7959_v1 = vadd.f32 %v7936_v46, %v7733_v48 }
 0x738   : > { %9040 = vmatmul.bf16.gmra.mxu2 %v13177_v54 }
 0x739   : > { %v8379_v17 = vpop.f32.mrf.mxu3 }
 0x73b   : > { %v8155_v26 = vpop.f32.mrf.mxu2 }
 0x73c   : > { %v8181_v40 = vadd.f32 %v8155_v26, %v7957_v13  ;;  %v7734_v31 = vpop.f32.mrf.mxu0  ;;  %v13179_v26 = vld [vmem:[#allocation2 + $0xb0] sm:$0xff] }
 0x73d   : > { %v7735_v24 = vadd.f32 %v7734_v31, %v16395_v30 }
 0x73e   : > { %v16476_v2 = vadd.f32 %v8379_v17, %v8181_v40  ;;  %v13197_v17 = vld [vmem:[#allocation2 + $0x110] sm:$0xff]  ;;  %v8797_v31 = vpop.f32.mrf.mxu1 }
 0x73f   : > { %v7960_v6 = vadd.f32 %v7938_v29, %v7735_v24  ;;  %v16491_v29 = vld [vmem:[%s16590_s8] ss:$0 sm:$0xff] }
 0x741   : > { %v8381_v59 = vpop.f32.mrf.mxu3 }
 0x743   : > { %v8157_v49 = vpop.f32.mrf.mxu2 }
 0x744   : > { %v8182_v57 = vadd.f32 %v8157_v49, %v7958_v10  ;;  %v8563_v0 = vpop.f32.mrf.mxu0 }
 0x745   : > { %v8613_v13 = vadd.f32 %v8563_v0, %v16402_v3 }
 0x746   : > { %v16480_v20 = vadd.f32 %v8381_v59, %v8182_v57  ;;  %9269 = vmatmul.bf16.gmra.mxu3 %v13196_v60 }
 0x747   : > { %8602 = vmatmul.bf16.gmra.mxu0 %v13143_v21  ;;  %v8837_v46 = vadd.f32 %v8787_v32, %v8613_v13  ;;  %v13198_v21 = vld [vmem:[#allocation2 + $0x118] sm:$0xff] }
 0x748   : > { %9045 = vmatmul.bf16.gmra.mxu2 %v13178_v4 }
 0x749   : > { %v8384_v22 = vpop.f32.mrf.mxu3 }
 0x74b   : > { %v8160_v5 = vpop.f32.mrf.mxu2 }
 0x74c   : > { %v8183_v52 = vadd.f32 %v8160_v5, %v7959_v1  ;;  %v8565_v37 = vpop.f32.mrf.mxu0  ;;  %v13180_v1 = vld [vmem:[#allocation2 + $0xb8] sm:$0xff] }
 0x74d   : > { %v8614_v3 = vadd.f32 %v8565_v37, %v16406_v25  ;;  %v8799_v25 = vpop.f32.mrf.mxu1 }
 0x74e   : > { %v16483_v15 = vadd.f32 %v8384_v22, %v8183_v52 }
 0x74f   : > { %v8838_v48 = vadd.f32 %v8789_v28, %v8614_v3 }
 0x751   : > { %v8386_v41 = vpop.f32.mrf.mxu3 }
 0x753   : > { %v8162_v45 = vpop.f32.mrf.mxu2 }
 0x754   : > { %v8184_v56 = vadd.f32 %v8162_v45, %v7960_v6  ;;  %v8568_v54 = vpop.f32.mrf.mxu0 }
 0x755   : > { %v8615_v52 = vadd.f32 %v8568_v54, %v16412_v44  ;;  %v8802_v44 = vpop.f32.mrf.mxu1 }
 0x756   : > { %v16486_v40 = vadd.f32 %v8386_v41, %v8184_v56  ;;  %9274 = vmatmul.bf16.gmra.mxu3 %v13197_v17 }
 0x757   : > { %8607 = vmatmul.bf16.gmra.mxu0 %v13144_v19  ;;  %v8839_v41 = vadd.f32 %v8792_v7, %v8615_v52 }
 0x758   : > { %9050 = vmatmul.bf16.gmra.mxu2 %v13179_v26 }
 0x759   : > { %v9235_v30 = vpop.f32.mrf.mxu3 }
 0x75b   : > { %v9011_v51 = vpop.f32.mrf.mxu2 }
 0x75c   : > { %v9061_v59 = vadd.f32 %v9011_v51, %v8837_v46  ;;  %v8570_v10 = vpop.f32.mrf.mxu0 }
 0x75d   : > { %v8616_v13 = vadd.f32 %v8570_v10, %v16416_v35  ;;  %v8804_v10 = vpop.f32.mrf.mxu1 }
 0x75e   : > { %v9285_v49 = vadd.f32 %v9235_v30, %v9061_v59 }
 0x75f   : > { %v8840_v46 = vadd.f32 %v8794_v42, %v8616_v13 }
 0x760   : > { %v9309_v57 = vadd.f32 %v16491_v29, %v9285_v49 }
 0x761   : > { %v9237_v60 = vpop.f32.mrf.mxu3 }
 0x762   : > { %v9329_v0 = vadd.f32 %v9309_v57, %v15337_v11 }
 0x763   : > { %v9013_v32 = vpop.f32.mrf.mxu2 }
 0x764   : > { %v9349_v4 = vmax.f32 %v9329_v0, 0.0  ;;  %v9062_v22 = vadd.f32 %v9013_v32, %v8838_v48  ;;  %v8573_v5 = vpop.f32.mrf.mxu0 }
 0x765   : > { %v8617_v3 = vadd.f32 %v8573_v5, %v16420_v9  ;;  %v8807_v52 = vpop.f32.mrf.mxu1 }
 0x766   : > { %9369 = vst [vmem:[%s16501_s28] sm:$0xff] %v9349_v4  ;;  %v9286_v11 = vadd.f32 %v9237_v60, %v9062_v22  ;;  %9279 = vmatmul.bf16.gmra.mxu3 %v13198_v21 }
 0x767   : > { %v8841_v60 = vadd.f32 %v8797_v31, %v8617_v3 }
 0x768   : > { %v9310_v28 = vadd.f32 %v16491_v29, %v9286_v11  ;;  %9055 = vmatmul.bf16.gmra.mxu2 %v13180_v1 }
 0x769   : > { %v9240_v24 = vpop.f32.mrf.mxu3 }
 0x76a   : > { %v9330_v37 = vadd.f32 %v9310_v28, %v15339_v36 }
 0x76b   : > { %v9016_v6 = vpop.f32.mrf.mxu2 }
 0x76c   : > { %v9350_v45 = vmax.f32 %v9330_v37, 0.0  ;;  %v9063_v56 = vadd.f32 %v9016_v6, %v8839_v41  ;;  %v8575_v17 = vpop.f32.mrf.mxu0 }
 0x76d   : > { %v8618_v21 = vadd.f32 %v8575_v17, %v16424_v23  ;;  %v8809_v17 = vpop.f32.mrf.mxu1 }
 0x76e   : > { %9370 = vst [vmem:[%s16501_s28 + $0x8] sm:$0xff] %v9350_v45  ;;  %v9287_v19 = vadd.f32 %v9240_v24, %v9063_v56 }
 0x76f   : > { %v8842_v5 = vadd.f32 %v8799_v25, %v8618_v21 }
 0x770   : > { %v9311_v54 = vadd.f32 %v16491_v29, %v9287_v19 }
 0x771   : > { %v9242_v30 = vpop.f32.mrf.mxu3 }
 0x772   : > { %v9331_v26 = vadd.f32 %v9311_v54, %v15354_v43 }
 0x773   : > { %v9018_v51 = vpop.f32.mrf.mxu2 }
 0x774   : > { %v9351_v36 = vmax.f32 %v9331_v26, 0.0  ;;  %v9064_v7 = vadd.f32 %v9018_v51, %v8840_v46  ;;  %v8578_v59 = vpop.f32.mrf.mxu0 }
 0x775   : > { %v8619_v37 = vadd.f32 %v8578_v59, %v16428_v33  ;;  %v8812_v3 = vpop.f32.mrf.mxu1 }
 0x776   : > { %9371 = vst [vmem:[%s16501_s28 + $0x10] sm:$0xff] %v9351_v36  ;;  %v9288_v49 = vadd.f32 %v9242_v30, %v9064_v7 }
 0x777   : > { %v8843_v45 = vadd.f32 %v8802_v44, %v8619_v37 }
 0x778   : > { %v9312_v35 = vadd.f32 %v16491_v29, %v9288_v49 }
 0x779   : > { %v9245_v0 = vpop.f32.mrf.mxu3 }
 0x77a   : > { %v9332_v57 = vadd.f32 %v9312_v35, %v15372_v61 }
 0x77b   : > { %v9021_v48 = vpop.f32.mrf.mxu2 }
 0x77c   : > { %v9352_v43 = vmax.f32 %v9332_v57, 0.0  ;;  %v9065_v42 = vadd.f32 %v9021_v48, %v8841_v60  ;;  %v8580_v32 = vpop.f32.mrf.mxu0 }
 0x77d   : > { %v8620_v19 = vadd.f32 %v8580_v32, %v16432_v27 }
 0x77e   : > { %9372 = vst [vmem:[%s16501_s28 + $0x18] sm:$0xff] %v9352_v43  ;;  %v9289_v4 = vadd.f32 %v9245_v0, %v9065_v42  ;;  %v8814_v42 = vpop.f32.mrf.mxu1 }
 0x77f   : > { %v8844_v46 = vadd.f32 %v8804_v10, %v8620_v19 }
 0x780   : > { %v9313_v9 = vadd.f32 %v16491_v29, %v9289_v4 }
 0x781   : > { %v9247_v1 = vpop.f32.mrf.mxu3 }
 0x782   : > { %v9333_v22 = vadd.f32 %v9313_v9, %v15398_v58 }
 0x783   : > { %v9023_v11 = vpop.f32.mrf.mxu2 }
 0x784   : > { %v9353_v61 = vmax.f32 %v9333_v22, 0.0  ;;  %v9066_v31 = vadd.f32 %v9023_v11, %v8842_v5  ;;  %v8583_v28 = vpop.f32.mrf.mxu0 }
 0x785   : > { %v8621_v7 = vadd.f32 %v8583_v28, %v16438_v14 }
 0x786   : > { %9373 = vst [vmem:[%s16501_s28 + $0x20] sm:$0xff] %v9353_v61  ;;  %v9290_v24 = vadd.f32 %v9247_v1, %v9066_v31  ;;  %v8817_v28 = vpop.f32.mrf.mxu1 }
 0x787   : > { %v8845_v57 = vadd.f32 %v8807_v52, %v8621_v7 }
 0x788   : > { %v9314_v23 = vadd.f32 %v16491_v29, %v9290_v24 }
 0x789   : > { %v9250_v6 = vpop.f32.mrf.mxu3 }
 0x78a   : > { %v9334_v41 = vadd.f32 %v9314_v23, %v15413_v55 }
 0x78b   : > { %v9026_v56 = vpop.f32.mrf.mxu2 }
 0x78c   : > { %v9354_v58 = vmax.f32 %v9334_v41, 0.0  ;;  %v9067_v25 = vadd.f32 %v9026_v56, %v8843_v45  ;;  %v8585_v13 = vpop.f32.mrf.mxu0 }
 0x78d   : > { %v8622_v48 = vadd.f32 %v8585_v13, %v16444_v16 }
 0x78e   : > { %9374 = vst [vmem:[%s16501_s28 + $0x28] sm:$0xff] %v9354_v58  ;;  %v9291_v54 = vadd.f32 %v9250_v6, %v9067_v25  ;;  %v8819_v13 = vpop.f32.mrf.mxu1 }
 0x78f   : > { %v8846_v4 = vadd.f32 %v8809_v17, %v8622_v48 }
 0x790   : > { %v9315_v33 = vadd.f32 %v16491_v29, %v9291_v54 }
 0x791   : > { %v9252_v30 = vpop.f32.mrf.mxu3 }
 0x792   : > { %v9335_v26 = vadd.f32 %v9315_v33, %v15431_v62 }
 0x793   : > { %v9028_v51 = vpop.f32.mrf.mxu2 }
 0x794   : > { %v9355_v55 = vmax.f32 %v9335_v26, 0.0  ;;  %v9068_v44 = vadd.f32 %v9028_v51, %v8844_v46  ;;  %v8588_v36 = vpop.f32.mrf.mxu0  ;;  %v16636_v26 = vld [vmem:[#allocation3_spill] sm:$0xff] }
 0x795   : > { %v8623_v5 = vadd.f32 %v8588_v36, %v16450_v39 }
 0x796   : > { %9375 = vst [vmem:[%s16501_s28 + $0x30] sm:$0xff] %v9355_v55  ;;  %v9292_v59 = vadd.f32 %v9252_v30, %v9068_v44 }
 0x797   : > { %v8847_v31 = vadd.f32 %v8812_v3, %v8623_v5  ;;  %v16637_v3 = vld [vmem:[#allocation5_spill] sm:$0xff] }
 0x798   : > { %v9316_v27 = vadd.f32 %v16491_v29, %v9292_v59  ;;  %v8822_v59 = vpop.f32.mrf.mxu1 }
 0x799   : > { %v9255_v35 = vpop.f32.mrf.mxu3 }
 0x79a   : > { %v9336_v49 = vadd.f32 %v9316_v27, %v15449_v50 }
 0x79b   : > { %v9031_v0 = vpop.f32.mrf.mxu2 }
 0x79c   : > { %v9356_v62 = vmax.f32 %v9336_v49, 0.0  ;;  %v9069_v10 = vadd.f32 %v9031_v0, %v8845_v57  ;;  %v8590_v60 = vpop.f32.mrf.mxu0 }
 0x79d   : > { %v8624_v23 = vadd.f32 %v8590_v60, %v16456_v47 }
 0x79e   : > { %9376 = vst [vmem:[%s16501_s28 + $0x38] sm:$0xff] %v9356_v62  ;;  %v9293_v43 = vadd.f32 %v9255_v35, %v9069_v10 }
 0x79f   : > { %v8848_v58 = vadd.f32 %v8814_v42, %v8624_v23 }
 0x7a0   : > { %v9317_v14 = vadd.f32 %v16491_v29, %v9293_v43  ;;  %v8824_v43 = vpop.f32.mrf.mxu1 }
 0x7a1   : > { %v9257_v21 = vpop.f32.mrf.mxu3 }
 0x7a2   : > { %v9337_v32 = vadd.f32 %v9317_v14, %v15466_v34  ;;  %v16638_v14 = vld [vmem:[#allocation4_spill] sm:$0xff] }
 0x7a3   : > { %v9033_v9 = vpop.f32.mrf.mxu2 }
 0x7a4   : > { %v9357_v50 = vmax.f32 %v9337_v32, 0.0  ;;  %v9070_v22 = vadd.f32 %v9033_v9, %v8846_v4  ;;  %v8593_v1 = vpop.f32.mrf.mxu0 }
 0x7a5   : > { %v8625_v19 = vadd.f32 %v8593_v1, %v16460_v53 }
 0x7a6   : > { %9377 = vst [vmem:[%s16501_s28 + $0x40] sm:$0xff] %v9357_v50  ;;  %v9294_v52 = vadd.f32 %v9257_v21, %v9070_v22 }
 0x7a7   : > { %v8849_v51 = vadd.f32 %v8817_v28, %v8625_v19 }
 0x7a8   : > { %v9318_v16 = vadd.f32 %v16491_v29, %v9294_v52  ;;  %v16639_v52 = vld [vmem:[#allocation7_spill] sm:$0xff] }
 0x7a9   : > { %v9260_v61 = vpop.f32.mrf.mxu3 }
 0x7aa   : > { %v9338_v11 = vadd.f32 %v9318_v16, %v15487_v38 }
 0x7ab   : > { %v9036_v37 = vpop.f32.mrf.mxu2 }
 0x7ac   : > { %v9358_v34 = vmax.f32 %v9338_v11, 0.0  ;;  %v9071_v24 = vadd.f32 %v9036_v37, %v8847_v31  ;;  %v8595_v6 = vpop.f32.mrf.mxu0  ;;  %v8827_v31 = vpop.f32.mrf.mxu1 }
 0x7ad   : > { %v8626_v36 = vadd.f32 %v8595_v6, %v16464_v12  ;;  %v16640_v6 = vld [vmem:[#allocation6_spill] sm:$0xff] }
 0x7ae   : > { %9378 = vst [vmem:[%s16501_s28 + $0x48] sm:$0xff] %v9358_v34  ;;  %v9295_v41 = vadd.f32 %v9260_v61, %v9071_v24 }
 0x7af   : > { %v8850_v57 = vadd.f32 %v8819_v13, %v8626_v36 }
 0x7b0   : > { %v9319_v39 = vadd.f32 %v16491_v29, %v9295_v41 }
 0x7b1   : > { %v9262_v56 = vpop.f32.mrf.mxu3 }
 0x7b2   : > { %v9339_v45 = vadd.f32 %v9319_v39, %v15502_v63 }
 0x7b3   : > { %v9038_v25 = vpop.f32.mrf.mxu2 }
 0x7b4   : > { %v9359_v38 = vmax.f32 %v9339_v45, 0.0  ;;  %v9072_v17 = vadd.f32 %v9038_v25, %v8848_v58  ;;  %v8598_v33 = vpop.f32.mrf.mxu0 }
 0x7b5   : > { %v8627_v60 = vadd.f32 %v8598_v33, %v16468_v8 }
 0x7b6   : > { %9379 = vst [vmem:[%s16501_s28 + $0x50] sm:$0xff] %v9359_v38  ;;  %v9296_v54 = vadd.f32 %v9262_v56, %v9072_v17  ;;  %v8829_v17 = vpop.f32.mrf.mxu1 }
 0x7b7   : > { %v8851_v21 = vadd.f32 %v8822_v59, %v8627_v60 }
 0x7b8   : > { %v9320_v47 = vadd.f32 %v16491_v29, %v9296_v54 }
 0x7b9   : > { %v9265_v46 = vpop.f32.mrf.mxu3 }
 0x7ba   : > { %v9340_v30 = vadd.f32 %v9320_v47, %v16636_v26  ;;  %v16641_v47 = vld [vmem:[#allocation8_spill] sm:$0xff] }
 0x7bb   : > { %v9041_v55 = vpop.f32.mrf.mxu2 }
 0x7bc   : > { %v9360_v63 = vmax.f32 %v9340_v30, 0.0  ;;  %v9073_v44 = vadd.f32 %v9041_v55, %v8849_v51  ;;  %v8600_v49 = vpop.f32.mrf.mxu0 }
 0x7bd   : > { %v8628_v1 = vadd.f32 %v8600_v49, %v16472_v18 }
 0x7be   : > { %9380 = vst [vmem:[%s16501_s28 + $0x58] sm:$0xff] %v9360_v63  ;;  %v9297_v7 = vadd.f32 %v9265_v46, %v9073_v44  ;;  %v8832_v63 = vpop.f32.mrf.mxu1 }
 0x7bf   : > { %v8852_v61 = vadd.f32 %v8824_v43, %v8628_v1 }
 0x7c0   : > { %v9321_v53 = vadd.f32 %v16491_v29, %v9297_v7 }
 0x7c1   : > { %v9267_v35 = vpop.f32.mrf.mxu3 }
 0x7c2   : > { %v9341_v27 = vadd.f32 %v9321_v53, %v16637_v3  ;;  %v16642_v53 = vld [vmem:[#allocation9_spill] sm:$0xff] }
 0x7c3   : > { %v9043_v0 = vpop.f32.mrf.mxu2 }
 0x7c4   : > { %v9361_v62 = vmax.f32 %v9341_v27, 0.0  ;;  %v9074_v10 = vadd.f32 %v9043_v0, %v8850_v57  ;;  %v8603_v50 = vpop.f32.mrf.mxu0 }
 0x7c5   : > { %v8629_v24 = vadd.f32 %v8603_v50, %v16476_v2 }
 0x7c6   : > { %9381 = vst [vmem:[%s16501_s28 + $0x60] sm:$0xff] %v9361_v62  ;;  %v9298_v48 = vadd.f32 %v9267_v35, %v9074_v10  ;;  %v8834_v10 = vpop.f32.mrf.mxu1 }
 0x7c7   : > { %v8853_v56 = vadd.f32 %v8827_v31, %v8629_v24 }
 0x7c8   : > { %v9322_v12 = vadd.f32 %v16491_v29, %v9298_v48  ;;  %v16643_v48 = vld [vmem:[#allocation10_spill] sm:$0xff] }
 0x7c9   : > { %v9270_v32 = vpop.f32.mrf.mxu3 }
 0x7ca   : > { %v9342_v42 = vadd.f32 %v9322_v12, %v16638_v14 }
 0x7cb   : > { %v9046_v4 = vpop.f32.mrf.mxu2 }
 0x7cc   : > { %v9362_v9 = vmax.f32 %v9342_v42, 0.0  ;;  %v9075_v22 = vadd.f32 %v9046_v4, %v8851_v21  ;;  %v8605_v23 = vpop.f32.mrf.mxu0 }
 0x7cd   : > { %v8630_v13 = vadd.f32 %v8605_v23, %v16480_v20 }
 0x7ce   : > { %9382 = vst [vmem:[%s16501_s28 + $0x68] sm:$0xff] %v9362_v9  ;;  %v9299_v5 = vadd.f32 %v9270_v32, %v9075_v22  ;;  %v16644_v9 = vld [vmem:[#allocation11_spill] sm:$0xff] }
 0x7cf   : > { %v8854_v30 = vadd.f32 %v8829_v17, %v8630_v13 }
 0x7d0   : > { %v9323_v8 = vadd.f32 %v16491_v29, %v9299_v5 }
 0x7d1   : > { %v9272_v11 = vpop.f32.mrf.mxu3 }
 0x7d2   : > { %v9343_v16 = vadd.f32 %v9323_v8, %v16639_v52 }
 0x7d3   : > { %v9048_v28 = vpop.f32.mrf.mxu2 }
 0x7d4   : > { %v9363_v37 = vmax.f32 %v9343_v16, 0.0  ;;  %v9076_v34 = vadd.f32 %v9048_v28, %v8852_v61  ;;  %v8608_v54 = vpop.f32.mrf.mxu0 }
 0x7d5   : > { %v8631_v44 = vadd.f32 %v8608_v54, %v16483_v15 }
 0x7d6   : > { %9383 = vst [vmem:[%s16501_s28 + $0x70] sm:$0xff] %v9363_v37  ;;  %v9300_v41 = vadd.f32 %v9272_v11, %v9076_v34 }
 0x7d7   : > { %v8855_v7 = vadd.f32 %v8832_v63, %v8631_v44 }
 0x7d8   : > { %v9324_v18 = vadd.f32 %v16491_v29, %v9300_v41 }
 0x7d9   : > { %v9275_v45 = vpop.f32.mrf.mxu3 }
 0x7da   : > { %v9344_v39 = vadd.f32 %v9324_v18, %v16640_v6 }
 0x7db   : > { %v9051_v58 = vpop.f32.mrf.mxu2 }
 0x7dc   : > { %v9364_v25 = vmax.f32 %v9344_v39, 0.0  ;;  %v9077_v38 = vadd.f32 %v9051_v58, %v8853_v56  ;;  %v8610_v59 = vpop.f32.mrf.mxu0 }
 0x7dd   : > { %v8632_v0 = vadd.f32 %v8610_v59, %v16486_v40 }
 0x7de   : > { %9384 = vst [vmem:[%s16501_s28 + $0x78] sm:$0xff] %v9364_v25  ;;  %v9301_v19 = vadd.f32 %v9275_v45, %v9077_v38 }
 0x7df   : > { %v8856_v60 = vadd.f32 %v8834_v10, %v8632_v0 }
 0x7e0   : > { %v9325_v2 = vadd.f32 %v16491_v29, %v9301_v19 }
 0x7e1   : > { %v9277_v26 = vpop.f32.mrf.mxu3 }
 0x7e2   : > { %v9345_v33 = vadd.f32 %v9325_v2, %v16641_v47 }
 0x7e3   : > { %v9053_v46 = vpop.f32.mrf.mxu2 }
 0x7e4   : > { %v9365_v51 = vmax.f32 %v9345_v33, 0.0  ;;  %v9078_v55 = vadd.f32 %v9053_v46, %v8854_v30 }
 0x7e6   : > { %9385 = vst [vmem:[%s16501_s28 + $0x80] sm:$0xff] %v9365_v51  ;;  %v9302_v36 = vadd.f32 %v9277_v26, %v9078_v55 }
 0x7e8   : > { %v9326_v20 = vadd.f32 %v16491_v29, %v9302_v36 }
 0x7e9   : > { %v9280_v27 = vpop.f32.mrf.mxu3 }
 0x7ea   : > { %v9346_v3 = vadd.f32 %v9326_v20, %v16642_v53 }
 0x7eb   : > { %v9056_v49 = vpop.f32.mrf.mxu2 }
 0x7ec   : > { %v9366_v35 = vmax.f32 %v9346_v3, 0.0  ;;  %v9079_v57 = vadd.f32 %v9056_v49, %v8855_v7 }
 0x7ee   : > { %9386 = vst [vmem:[%s16501_s28 + $0x88] sm:$0xff] %v9366_v35  ;;  %v9303_v62 = vadd.f32 %v9280_v27, %v9079_v57 }
 0x7f0   : > { %v9327_v15 = vadd.f32 %v16491_v29, %v9303_v62 }
 0x7f1   : > { %v9282_v32 = vpop.f32.mrf.mxu3 }
 0x7f2   : > { %v9347_v12 = vadd.f32 %v9327_v15, %v16643_v48 }
 0x7f3   : > { %v9058_v43 = vpop.f32.mrf.mxu2 }
 0x7f4   : > { %v9367_v14 = vmax.f32 %v9347_v12, 0.0  ;;  %v9080_v42 = vadd.f32 %v9058_v43, %v8856_v60 }
 0x7f6   : > { %9387 = vst [vmem:[%s16501_s28 + $0x90] sm:$0xff] %v9367_v14  ;;  %v9304_v21 = vadd.f32 %v9282_v32, %v9080_v42 }
 0x7f8   : > { %v9328_v4 = vadd.f32 %v16491_v29, %v9304_v21 }
 0x7fa   : > { %v9348_v50 = vadd.f32 %v9328_v4, %v16644_v9 }
 0x7fc   : > { %v9368_v40 = vmax.f32 %v9348_v50, 0.0 }
 0x7fe   : > { %9388 = vst [vmem:[%s16501_s28 + $0x98] sm:$0xff] %v9368_v40 }
 0x7ff PF: > { %s19_s30 = sadd.s32 1, %s13969_s30  }
 0x800   : > { %p16_p4 = scmp.ge.s32.totalorder %s19_s30, 4  }
 0x802   :  { %18 = sbr.rel (!%p16_p4) target bundleno = 1 (0x1), region = 120 }

</bundles_post_ra>
